<compile_context>
chip_gen: v5e
topology: v5e:2x2
jax: 0.10.0
libtpu: 0.0.40
codegen_flags: <defaults>
</compile_context>

<pallas_src>
import functools
import numpy as np

import jax
import jax.numpy as jnp
from jax.experimental import pallas as pl
from jax.experimental.pallas import tpu as pltpu

# ----------------------- small, module-consistent config -----------------------
B            = 2
DIM          = 32                 # channels (divisible by 32 for GroupNorm32)
PH = PW      = 16                 # input_resolution
NUM_HEADS    = 4
WINDOW_SIZE  = 8
SHIFT_SIZE   = 4                  # SW-MSA path (exercises the attention mask)
MLP_RATIO    = 2.0
FFT_PATCH    = 8
EMB_CHANNELS = 64
NORM_GROUPS  = 32
EPS          = 1e-5
HEAD_DIM     = DIM // NUM_HEADS
QK_SCALE     = HEAD_DIM ** -0.5
N_TOK        = WINDOW_SIZE * WINDOW_SIZE
N_WIN        = (PH // WINDOW_SIZE) * (PW // WINDOW_SIZE)
HW           = PH * PW
HIDDEN       = int(DIM * MLP_RATIO)
N_FREQ       = FFT_PATCH * (FFT_PATCH // 2 + 1)


# ------------------------------- helper: erf -----------------------------------
def _erf_f32(x):
    # fp32 rational approximation of erf (|err| ~ 1e-7); mul/add/div/clamp only.
    alpha = (-2.72614225801306e-10, 2.77068142495902e-08, -2.10102402082508e-06,
             -5.69250639462346e-05, -7.34990630326855e-04, -2.954600054904e-03,
             -1.60960333262415e-02)
    beta = (-1.45660718464996e-05, -2.13374055278905e-04, -1.68282697438203e-03,
            -7.37332916720468e-03, -1.42647390514189e-02)
    x = jnp.clip(x, -4.0, 4.0)
    x2 = x * x
    p = jnp.float32(alpha[0])
    for c in alpha[1:]:
        p = p * x2 + jnp.float32(c)
    q = jnp.float32(beta[0])
    for c in beta[1:]:
        q = q * x2 + jnp.float32(c)
    return x * p / q


def _gelu_exact(x):
    # nn.GELU() default (erf formulation)
    return 0.5 * x * (1.0 + _erf_f32(x * jnp.float32(0.7071067811865476)))


# --------------------------- static setup (numpy) --------------------------------
def _relative_position_index(ws):
    coords = np.stack(np.meshgrid(np.arange(ws), np.arange(ws), indexing="ij"))
    cf = coords.reshape(2, -1)
    rel = cf[:, :, None] - cf[:, None, :]
    rel = rel.transpose(1, 2, 0).copy()
    rel[:, :, 0] += ws - 1
    rel[:, :, 1] += ws - 1
    rel[:, :, 0] *= 2 * ws - 1
    return rel.sum(-1)                                                   # (N, N)


def _calculate_mask(H, W, ws, shift):
    # Literal port of SwinTransformerBlock_AdaFM.calculate_mask (including its
    # (1,1,H,W) slicing behaviour) -> (nW, N, N) with values {0, -100}.
    img_mask = np.zeros((1, 1, H, W), np.float32)
    slices = (slice(0, -ws), slice(-ws, -shift), slice(-shift, None))
    cnt = 0
    for h in slices:
        for w in slices:
            img_mask[:, h, w, :] = cnt
            cnt += 1
    mw = img_mask.reshape(1, 1, H // ws, ws, W // ws, ws)
    mw = mw.transpose(0, 2, 4, 3, 5, 1).reshape(-1, ws, ws, 1)           # window_partition
    mw = mw.transpose(0, 2, 3, 1).reshape(-1, ws * ws)
    am = mw[:, None, :] - mw[:, :, None]
    return np.where(am != 0, np.float32(-100.0), np.float32(0.0))


def _window_perm(H, W, ws, shift):
    # Track image-flat indices through roll(-shift) + window_partition so that
    # xw = x_img @ Pm reorders (C, H*W) columns into (window, token) order.
    idx = np.arange(H * W, dtype=np.int64).reshape(1, 1, H, W)
    if shift > 0:
        idx = np.roll(idx, shift=(-shift, -shift), axis=(2, 3))
    win = idx.reshape(1, 1, H // ws, ws, W // ws, ws)
    win = win.transpose(0, 2, 4, 3, 5, 1).reshape(-1, ws * ws)           # (nW, N)
    perm = win.reshape(-1)
    Pm = np.zeros((H * W, perm.size), np.float32)
    Pm[perm, np.arange(perm.size)] = 1.0
    return Pm                     # forward: x @ Pm ; inverse (reverse+unroll): x @ Pm.T


def _adafm_basis(H, W, P):
    # Basis (N_FREQ, HW, HW) such that per channel row-vector x:
    #   irfft2(scale * rfft2(x_patches))  ==  x @ sum_f scale[f] * basis[f]
    # Built by probing numpy's rfft2/irfft2 -> identical semantics (incl. the
    # handling of the non-Hermitian DC/Nyquist bins after real scaling).
    K = P // 2 + 1
    eye = np.eye(P * P, dtype=np.float64).reshape(P * P, P, P)
    F = np.fft.rfft2(eye)                                                # (P*P, P, K)
    patch_basis = np.zeros((P * K, P * P, P * P), np.float64)
    for k1 in range(P):
        for k2 in range(K):
            Y = np.zeros((P * P, P, K), np.complex128)
            Y[:, k1, k2] = F[:, k1, k2]
            patch_basis[k1 * K + k2] = np.fft.irfft2(Y, s=(P, P)).reshape(P * P, P * P)
    out = np.zeros((P * K, H * W, H * W), np.float32)                    # block-diagonal
    for hb in range(H // P):
        for wb in range(W // P):
            rows = (hb * P + np.arange(P))[:, None] * W + (wb * P + np.arange(P))[None, :]
            idx = rows.reshape(-1)
            out[:, idx[:, None], idx[None, :]] = patch_basis
    return out


_REL_IDX = _relative_position_index(WINDOW_SIZE)                         # (N, N) int


# ------------------------- fused Pallas kernel (whole block) ---------------------
def _swin_block_kernel(x_ref, g1_ref, be1_ref, a1_ref, qkvw_ref, qkvb_ref,
                       bias_ref, projw_ref, projb_ref, pmt_ref,
                       g2_ref, be2_ref, a2_ref, w1_ref, b1_ref, w2_ref, b2_ref,
                       o_ref, *, groups, eps, num_heads, scale):
    x = x_ref[0]                                   # (C, HW) f32, channel-first
    C, hw = x.shape
    hd = C // num_heads

    def group_norm(v, g, b):
        cg = C // groups
        vg = v.reshape(groups, cg * hw)
        mu = jnp.mean(vg, axis=1, keepdims=True)
        var = jnp.mean(jnp.square(vg - mu), axis=1, keepdims=True)
        vn = ((vg - mu) * jax.lax.rsqrt(var + eps)).reshape(C, hw)
        return vn * g + b

    # ------------------------ attention branch ------------------------
    xn = group_norm(x, g1_ref[...], be1_ref[...])
    # AdaFM (rfft2 * scale -> irfft2) + roll(-shift) + window_partition, one matmul:
    xw = jnp.dot(xn, a1_ref[0], preferred_element_type=jnp.float32)      # (C, HW), cols=(win, tok)
    qkv = (jnp.dot(qkvw_ref[...], xw, preferred_element_type=jnp.float32)
           + qkvb_ref[...])                                              # (3C, HW)
    heads = []
    for h in range(num_heads):                     # sublane-aligned 8-row slices
        qh = qkv[h * hd:(h + 1) * hd] * scale                            # (hd, HW)
        kh = qkv[C + h * hd:C + (h + 1) * hd]
        vh = qkv[2 * C + h * hd:2 * C + (h + 1) * hd]
        # attention kept in (key, query) orientation -> softmax along sublanes,
        # all windows handled at once via the block mask baked into bias_ref.
        at = jnp.dot(kh.T, qh, preferred_element_type=jnp.float32)       # (HW_k, HW_q)
        at = at + bias_ref[h]
        at = at - jnp.max(at, axis=0, keepdims=True)
        e = jnp.exp(at)
        p = e / jnp.sum(e, axis=0, keepdims=True)
        heads.append(jnp.dot(vh, p, preferred_element_type=jnp.float32))  # (hd, HW_q)
    attn = jnp.concatenate(heads, axis=0)                                # (C, HW)
    proj = (jnp.dot(projw_ref[...], attn, preferred_element_type=jnp.float32)
            + projb_ref[...])
    # window_reverse + roll(+shift) = inverse permutation, then residual
    x1 = x + jnp.dot(proj, pmt_ref[...], preferred_element_type=jnp.float32)

    # --------------------------- MLP branch ----------------------------
    yn = group_norm(x1, g2_ref[...], be2_ref[...])
    ya = jnp.dot(yn, a2_ref[0], preferred_element_type=jnp.float32)      # AdaFM, image order
    hid = jnp.dot(w1_ref[...], ya, preferred_element_type=jnp.float32) + b1_ref[...]
    hid = _gelu_exact(hid)
    y2 = jnp.dot(w2_ref[...], hid, preferred_element_type=jnp.float32) + b2_ref[...]
    o_ref[0] = x1 + y2


def _swin_block_pallas(xr, g1, be1, A1, qkvw, qkvb, bias_t, projw, projb, PmT,
                       g2, be2, A2, w1, b1, w2, b2):
    Bx, C, hw = xr.shape
    nH = bias_t.shape[0]
    hidden = w1.shape[0]
    kern = functools.partial(_swin_block_kernel, groups=NORM_GROUPS, eps=EPS,
                             num_heads=NUM_HEADS, scale=QK_SCALE)
    return pl.pallas_call(
        kern,
        out_shape=jax.ShapeDtypeStruct((Bx, C, hw), jnp.float32),
        grid=(Bx,),
        in_specs=[
            pl.BlockSpec((1, C, hw), lambda b: (b, 0, 0)),      # x
            pl.BlockSpec((C, 1), lambda b: (0, 0)),             # norm1 gamma
            pl.BlockSpec((C, 1), lambda b: (0, 0)),             # norm1 beta
            pl.BlockSpec((1, hw, hw), lambda b: (b, 0, 0)),     # AdaFM+shift+partition op
            pl.BlockSpec((3 * C, C), lambda b: (0, 0)),         # qkv weight (out, in)
            pl.BlockSpec((3 * C, 1), lambda b: (0, 0)),         # qkv bias
            pl.BlockSpec((nH, hw, hw), lambda b: (0, 0, 0)),    # combined attn bias (key-major)
            pl.BlockSpec((C, C), lambda b: (0, 0)),             # proj weight
            pl.BlockSpec((C, 1), lambda b: (0, 0)),             # proj bias
            pl.BlockSpec((hw, hw), lambda b: (0, 0)),           # inverse window permutation
            pl.BlockSpec((C, 1), lambda b: (0, 0)),             # norm2 gamma
            pl.BlockSpec((C, 1), lambda b: (0, 0)),             # norm2 beta
            pl.BlockSpec((1, hw, hw), lambda b: (b, 0, 0)),     # AdaFM op (mlp branch)
            pl.BlockSpec((hidden, C), lambda b: (0, 0)),        # mlp fc1 weight
            pl.BlockSpec((hidden, 1), lambda b: (0, 0)),        # mlp fc1 bias
            pl.BlockSpec((C, hidden), lambda b: (0, 0)),        # mlp fc2 weight
            pl.BlockSpec((C, 1), lambda b: (0, 0)),             # mlp fc2 bias
        ],
        out_specs=pl.BlockSpec((1, C, hw), lambda b: (b, 0, 0)),
        compiler_params=pltpu.CompilerParams(dimension_semantics=("parallel",)),
    )(xr, g1, be1, A1, qkvw, qkvb, bias_t, projw, projb, PmT,
      g2, be2, A2, w1, b1, w2, b2)


# ------------------------------- forward (glue) ----------------------------------
@jax.jit
def swin_block_adafm(params, consts, x, t):
    Bx, C, Ph, Pw = x.shape
    hw = Ph * Pw
    N = N_TOK

    # adaLN: SiLU -> Linear (tiny (B, emb) matmul, XLA glue)
    st = jax.nn.silu(t)
    s_msa = st @ params["ada_msa_w"].T + params["ada_msa_b"]             # (B, N_FREQ)
    s_mlp = st @ params["ada_mlp_w"].T + params["ada_mlp_b"]

    # AdaFM FFT-scaling as dense per-batch (HW x HW) operators
    A_mlp = jnp.einsum("bf,fnm->bnm", s_mlp, consts["fft_basis"])
    A_msa = jnp.einsum("bf,fnm->bnm", s_msa, consts["fft_basis"])
    A_msa = jnp.einsum("bnm,mw->bnw", A_msa, consts["win_perm"])         # fold roll+partition
    PmT = consts["win_perm"].T                                           # reverse + roll back

    # relative position bias + shift mask + cross-window block mask, pre-combined
    rpb = params["rpb_table"][_REL_IDX.reshape(-1)]
    rpb = rpb.reshape(N, N, NUM_HEADS).transpose(2, 0, 1)                # (nH, Nq, Nk)
    mask = consts["shift_mask"]                                          # (nW, Nq, Nk)
    eye = jnp.eye(N_WIN, dtype=bool)
    bias = jnp.where(eye[None, :, None, :, None],
                     rpb[:, None, :, None, :] + mask[None, :, :, None, :],
                     jnp.float32(-1e9))                                  # (nH, nWq, Nq, nWk, Nk)
    bias = bias.reshape(NUM_HEADS, hw, hw)
    bias_t = jnp.swapaxes(bias, 1, 2)                                    # (nH, key, query)

    xr = x.reshape(Bx, C, hw)
    out = _swin_block_pallas(
        xr,
        params["norm1_w"].reshape(C, 1), params["norm1_b"].reshape(C, 1),
        A_msa,
        params["qkv_w"], params["qkv_b"].reshape(-1, 1),
        bias_t,
        params["proj_w"], params["proj_b"].reshape(-1, 1),
        PmT,
        params["norm2_w"].reshape(C, 1), params["norm2_b"].reshape(C, 1),
        A_mlp,
        params["mlp_w1"], params["mlp_b1"].reshape(-1, 1),
        params["mlp_w2"], params["mlp_b2"].reshape(-1, 1))
    return out.reshape(Bx, C, Ph, Pw)


# -------------------------------- parameters -------------------------------------
def init_params(key):
    ks = jax.random.split(key, 12)
    nrm = lambda k, shape, s=0.02: (s * jax.random.normal(k, shape)).astype(jnp.float32)
    table = (2 * WINDOW_SIZE - 1) ** 2
    return dict(
        norm1_w=jnp.ones((DIM,), jnp.float32), norm1_b=jnp.zeros((DIM,), jnp.float32),
        norm2_w=jnp.ones((DIM,), jnp.float32), norm2_b=jnp.zeros((DIM,), jnp.float32),
        qkv_w=nrm(ks[0], (3 * DIM, DIM)), qkv_b=nrm(ks[1], (3 * DIM,)),
        rpb_table=nrm(ks[2], (table, NUM_HEADS)),
        proj_w=nrm(ks[3], (DIM, DIM)), proj_b=nrm(ks[4], (DIM,)),
        mlp_w1=nrm(ks[5], (HIDDEN, DIM)), mlp_b1=nrm(ks[6], (HIDDEN,)),
        mlp_w2=nrm(ks[7], (DIM, HIDDEN)), mlp_b2=nrm(ks[8], (DIM,)),
        ada_msa_w=nrm(ks[9], (N_FREQ, EMB_CHANNELS)),
        ada_msa_b=jnp.ones((N_FREQ,), jnp.float32),
        ada_mlp_w=nrm(ks[10], (N_FREQ, EMB_CHANNELS)),
        ada_mlp_b=jnp.ones((N_FREQ,), jnp.float32),
    )


def init_consts():
    mask = (_calculate_mask(PH, PW, WINDOW_SIZE, SHIFT_SIZE) if SHIFT_SIZE > 0
            else np.zeros((N_WIN, N_TOK, N_TOK), np.float32))
    return dict(
        fft_basis=jnp.asarray(_adafm_basis(PH, PW, FFT_PATCH)),
        win_perm=jnp.asarray(_window_perm(PH, PW, WINDOW_SIZE, SHIFT_SIZE)),
        shift_mask=jnp.asarray(mask),
    )


# ---------------------------------- main ------------------------------------------
if __name__ == "__main__":
    key = jax.random.PRNGKey(0)
    kx, kt, kp = jax.random.split(key, 3)
    x = jax.random.normal(kx, (B, DIM, PH, PW), jnp.float32)
    t = jax.random.normal(kt, (B, EMB_CHANNELS), jnp.float32)
    params = init_params(kp)
    consts = init_consts()

    out = swin_block_adafm(params, consts, x, t)
    out = jax.block_until_ready(out)
    assert out.shape == (B, DIM, PH, PW), out.shape
    assert bool(jnp.all(jnp.isfinite(out)))
    print("KERNEL_OK")
</pallas_src>

<mosaic_0001>
module attributes {stable_mosaic.version = 11 : i64} {
  func.func @_swin_block_kernel(%arg0: i32, %arg1: memref<1x32x256xf32, #tpu.memory_space<vmem>>, %arg2: memref<32x1xf32, #tpu.memory_space<vmem>>, %arg3: memref<32x1xf32, #tpu.memory_space<vmem>>, %arg4: memref<1x256x256xf32, #tpu.memory_space<vmem>>, %arg5: memref<96x32xf32, #tpu.memory_space<vmem>>, %arg6: memref<96x1xf32, #tpu.memory_space<vmem>>, %arg7: memref<4x256x256xf32, #tpu.memory_space<vmem>>, %arg8: memref<32x32xf32, #tpu.memory_space<vmem>>, %arg9: memref<32x1xf32, #tpu.memory_space<vmem>>, %arg10: memref<256x256xf32, #tpu.memory_space<vmem>>, %arg11: memref<32x1xf32, #tpu.memory_space<vmem>>, %arg12: memref<32x1xf32, #tpu.memory_space<vmem>>, %arg13: memref<1x256x256xf32, #tpu.memory_space<vmem>>, %arg14: memref<64x32xf32, #tpu.memory_space<vmem>>, %arg15: memref<64x1xf32, #tpu.memory_space<vmem>>, %arg16: memref<32x64xf32, #tpu.memory_space<vmem>>, %arg17: memref<32x1xf32, #tpu.memory_space<vmem>>, %arg18: memref<1x32x256xf32, #tpu.memory_space<vmem>>) attributes {dimension_semantics = [#tpu.dimension_semantics<parallel>], iteration_bounds = array<i64: 2>, scalar_prefetch = 0 : i64, scratch_operands = 0 : i64, tpu.core_type = #tpu.core_type<tc>, window_params = [{transform_indices = @transform_0, window_bounds = array<i64: 1, 32, 256>}, {pipeline_mode = #tpu.pipeline_mode<synchronous>, transform_indices = @transform_1, window_bounds = array<i64: 32, 1>}, {pipeline_mode = #tpu.pipeline_mode<synchronous>, transform_indices = @transform_2, window_bounds = array<i64: 32, 1>}, {transform_indices = @transform_3, window_bounds = array<i64: 1, 256, 256>}, {pipeline_mode = #tpu.pipeline_mode<synchronous>, transform_indices = @transform_4, window_bounds = array<i64: 96, 32>}, {pipeline_mode = #tpu.pipeline_mode<synchronous>, transform_indices = @transform_5, window_bounds = array<i64: 96, 1>}, {pipeline_mode = #tpu.pipeline_mode<synchronous>, transform_indices = @transform_6, window_bounds = array<i64: 4, 256, 256>}, {pipeline_mode = #tpu.pipeline_mode<synchronous>, transform_indices = @transform_7, window_bounds = array<i64: 32, 32>}, {pipeline_mode = #tpu.pipeline_mode<synchronous>, transform_indices = @transform_8, window_bounds = array<i64: 32, 1>}, {pipeline_mode = #tpu.pipeline_mode<synchronous>, transform_indices = @transform_9, window_bounds = array<i64: 256, 256>}, {pipeline_mode = #tpu.pipeline_mode<synchronous>, transform_indices = @transform_10, window_bounds = array<i64: 32, 1>}, {pipeline_mode = #tpu.pipeline_mode<synchronous>, transform_indices = @transform_11, window_bounds = array<i64: 32, 1>}, {transform_indices = @transform_12, window_bounds = array<i64: 1, 256, 256>}, {pipeline_mode = #tpu.pipeline_mode<synchronous>, transform_indices = @transform_13, window_bounds = array<i64: 64, 32>}, {pipeline_mode = #tpu.pipeline_mode<synchronous>, transform_indices = @transform_14, window_bounds = array<i64: 64, 1>}, {pipeline_mode = #tpu.pipeline_mode<synchronous>, transform_indices = @transform_15, window_bounds = array<i64: 32, 64>}, {pipeline_mode = #tpu.pipeline_mode<synchronous>, transform_indices = @transform_16, window_bounds = array<i64: 32, 1>}, {transform_indices = @transform_17, window_bounds = array<i64: 1, 32, 256>}]} {
    %c0 = arith.constant 0 : index
    %c0_0 = arith.constant 0 : index
    %c0_1 = arith.constant 0 : index
    %0 = vector.load %arg1[%c0, %c0_0, %c0_1] : memref<1x32x256xf32, #tpu.memory_space<vmem>>, vector<1x32x256xf32>
    %1 = vector.shape_cast %0 : vector<1x32x256xf32> to vector<32x256xf32>
    %c0_2 = arith.constant 0 : index
    %c0_3 = arith.constant 0 : index
    %2 = vector.load %arg2[%c0_2, %c0_3] : memref<32x1xf32, #tpu.memory_space<vmem>>, vector<32x1xf32>
    %c0_4 = arith.constant 0 : index
    %c0_5 = arith.constant 0 : index
    %3 = vector.load %arg3[%c0_4, %c0_5] : memref<32x1xf32, #tpu.memory_space<vmem>>, vector<32x1xf32>
    %cst = arith.constant dense<0.000000e+00> : vector<32xf32>
    %4 = vector.multi_reduction <add>, %1, %cst [1] : vector<32x256xf32> to vector<32xf32>
    %5 = vector.shape_cast %4 : vector<32xf32> to vector<32x1xf32>
    %cst_6 = arith.constant 2.560000e+02 : f32
    %6 = vector.broadcast %cst_6 : f32 to vector<32x1xf32>
    %7 = arith.divf %5, %6 : vector<32x1xf32>
    %8 = vector.broadcast %7 : vector<32x1xf32> to vector<32x256xf32>
    %9 = arith.subf %1, %8 : vector<32x256xf32>
    %10 = arith.mulf %9, %9 : vector<32x256xf32>
    %cst_7 = arith.constant dense<0.000000e+00> : vector<32xf32>
    %11 = vector.multi_reduction <add>, %10, %cst_7 [1] : vector<32x256xf32> to vector<32xf32>
    %12 = vector.shape_cast %11 : vector<32xf32> to vector<32x1xf32>
    %cst_8 = arith.constant 2.560000e+02 : f32
    %13 = vector.broadcast %cst_8 : f32 to vector<32x1xf32>
    %14 = arith.divf %12, %13 : vector<32x1xf32>
    %15 = vector.broadcast %7 : vector<32x1xf32> to vector<32x256xf32>
    %16 = arith.subf %1, %15 : vector<32x256xf32>
    %cst_9 = arith.constant 9.99999974E-6 : f32
    %17 = vector.broadcast %cst_9 : f32 to vector<32x1xf32>
    %18 = arith.addf %14, %17 : vector<32x1xf32>
    %19 = math.rsqrt %18 : vector<32x1xf32>
    %20 = vector.broadcast %19 : vector<32x1xf32> to vector<32x256xf32>
    %21 = arith.mulf %16, %20 : vector<32x256xf32>
    %22 = vector.broadcast %2 : vector<32x1xf32> to vector<32x256xf32>
    %23 = arith.mulf %21, %22 : vector<32x256xf32>
    %24 = vector.broadcast %3 : vector<32x1xf32> to vector<32x256xf32>
    %25 = arith.addf %23, %24 : vector<32x256xf32>
    %c0_10 = arith.constant 0 : index
    %c0_11 = arith.constant 0 : index
    %c0_12 = arith.constant 0 : index
    %26 = vector.load %arg4[%c0_10, %c0_11, %c0_12] : memref<1x256x256xf32, #tpu.memory_space<vmem>>, vector<1x256x256xf32>
    %27 = vector.shape_cast %26 : vector<1x256x256xf32> to vector<256x256xf32>
    %cst_13 = arith.constant dense<0.000000e+00> : vector<32x256xf32>
    %28 = tpu.matmul %25, %27, %cst_13 {dimension_numbers = #tpu.dot_dimension_numbers<[1], [0], [0], [1], [0, 0, 1, 1], [], []>} : vector<32x256xf32>, vector<256x256xf32>, vector<32x256xf32> -> vector<32x256xf32>
    %c0_14 = arith.constant 0 : index
    %c0_15 = arith.constant 0 : index
    %29 = vector.load %arg5[%c0_14, %c0_15] : memref<96x32xf32, #tpu.memory_space<vmem>>, vector<96x32xf32>
    %cst_16 = arith.constant dense<0.000000e+00> : vector<96x256xf32>
    %30 = tpu.matmul %29, %28, %cst_16 {dimension_numbers = #tpu.dot_dimension_numbers<[1], [0], [0], [1], [0, 0, 1, 1], [], []>} : vector<96x32xf32>, vector<32x256xf32>, vector<96x256xf32> -> vector<96x256xf32>
    %c0_17 = arith.constant 0 : index
    %c0_18 = arith.constant 0 : index
    %31 = vector.load %arg6[%c0_17, %c0_18] : memref<96x1xf32, #tpu.memory_space<vmem>>, vector<96x1xf32>
    %32 = vector.broadcast %31 : vector<96x1xf32> to vector<96x256xf32>
    %33 = arith.addf %30, %32 : vector<96x256xf32>
    %34 = vector.extract_strided_slice %33 {offsets = [0, 0], sizes = [8, 256], strides = [1, 1]} : vector<96x256xf32> to vector<8x256xf32>
    %cst_19 = arith.constant 0.353553385 : f32
    %35 = vector.broadcast %cst_19 : f32 to vector<8x256xf32>
    %36 = arith.mulf %34, %35 : vector<8x256xf32>
    %37 = vector.extract_strided_slice %33 {offsets = [32, 0], sizes = [8, 256], strides = [1, 1]} : vector<96x256xf32> to vector<8x256xf32>
    %38 = vector.extract_strided_slice %33 {offsets = [64, 0], sizes = [8, 256], strides = [1, 1]} : vector<96x256xf32> to vector<8x256xf32>
    %39 = tpu.transpose %37, [1, 0] : vector<8x256xf32> -> vector<256x8xf32>
    %cst_20 = arith.constant dense<0.000000e+00> : vector<256x256xf32>
    %40 = tpu.matmul %39, %36, %cst_20 {dimension_numbers = #tpu.dot_dimension_numbers<[1], [0], [0], [1], [0, 0, 1, 1], [], []>} : vector<256x8xf32>, vector<8x256xf32>, vector<256x256xf32> -> vector<256x256xf32>
    %c0_21 = arith.constant 0 : index
    %c0_22 = arith.constant 0 : index
    %c0_23 = arith.constant 0 : index
    %41 = vector.load %arg7[%c0_21, %c0_22, %c0_23] : memref<4x256x256xf32, #tpu.memory_space<vmem>>, vector<1x256x256xf32>
    %42 = vector.shape_cast %41 : vector<1x256x256xf32> to vector<256x256xf32>
    %43 = arith.addf %40, %42 : vector<256x256xf32>
    %cst_24 = arith.constant dense<0xFF800000> : vector<256xf32>
    %44 = vector.multi_reduction <maximumf>, %43, %cst_24 [0] : vector<256x256xf32> to vector<256xf32>
    %45 = vector.shape_cast %44 : vector<256xf32> to vector<1x256xf32>
    %46 = vector.broadcast %45 : vector<1x256xf32> to vector<256x256xf32>
    %47 = arith.subf %43, %46 : vector<256x256xf32>
    %48 = math.exp %47 : vector<256x256xf32>
    %cst_25 = arith.constant dense<0.000000e+00> : vector<256xf32>
    %49 = vector.multi_reduction <add>, %48, %cst_25 [0] : vector<256x256xf32> to vector<256xf32>
    %50 = vector.shape_cast %49 : vector<256xf32> to vector<1x256xf32>
    %51 = vector.broadcast %50 : vector<1x256xf32> to vector<256x256xf32>
    %52 = arith.divf %48, %51 : vector<256x256xf32>
    %cst_26 = arith.constant dense<0.000000e+00> : vector<8x256xf32>
    %53 = tpu.matmul %38, %52, %cst_26 {dimension_numbers = #tpu.dot_dimension_numbers<[1], [0], [0], [1], [0, 0, 1, 1], [], []>} : vector<8x256xf32>, vector<256x256xf32>, vector<8x256xf32> -> vector<8x256xf32>
    %54 = vector.extract_strided_slice %33 {offsets = [8, 0], sizes = [8, 256], strides = [1, 1]} : vector<96x256xf32> to vector<8x256xf32>
    %cst_27 = arith.constant 0.353553385 : f32
    %55 = vector.broadcast %cst_27 : f32 to vector<8x256xf32>
    %56 = arith.mulf %54, %55 : vector<8x256xf32>
    %57 = vector.extract_strided_slice %33 {offsets = [40, 0], sizes = [8, 256], strides = [1, 1]} : vector<96x256xf32> to vector<8x256xf32>
    %58 = vector.extract_strided_slice %33 {offsets = [72, 0], sizes = [8, 256], strides = [1, 1]} : vector<96x256xf32> to vector<8x256xf32>
    %59 = tpu.transpose %57, [1, 0] : vector<8x256xf32> -> vector<256x8xf32>
    %cst_28 = arith.constant dense<0.000000e+00> : vector<256x256xf32>
    %60 = tpu.matmul %59, %56, %cst_28 {dimension_numbers = #tpu.dot_dimension_numbers<[1], [0], [0], [1], [0, 0, 1, 1], [], []>} : vector<256x8xf32>, vector<8x256xf32>, vector<256x256xf32> -> vector<256x256xf32>
    %c1 = arith.constant 1 : index
    %c0_29 = arith.constant 0 : index
    %c0_30 = arith.constant 0 : index
    %61 = vector.load %arg7[%c1, %c0_29, %c0_30] : memref<4x256x256xf32, #tpu.memory_space<vmem>>, vector<1x256x256xf32>
    %62 = vector.shape_cast %61 : vector<1x256x256xf32> to vector<256x256xf32>
    %63 = arith.addf %60, %62 : vector<256x256xf32>
    %cst_31 = arith.constant dense<0xFF800000> : vector<256xf32>
    %64 = vector.multi_reduction <maximumf>, %63, %cst_31 [0] : vector<256x256xf32> to vector<256xf32>
    %65 = vector.shape_cast %64 : vector<256xf32> to vector<1x256xf32>
    %66 = vector.broadcast %65 : vector<1x256xf32> to vector<256x256xf32>
    %67 = arith.subf %63, %66 : vector<256x256xf32>
    %68 = math.exp %67 : vector<256x256xf32>
    %cst_32 = arith.constant dense<0.000000e+00> : vector<256xf32>
    %69 = vector.multi_reduction <add>, %68, %cst_32 [0] : vector<256x256xf32> to vector<256xf32>
    %70 = vector.shape_cast %69 : vector<256xf32> to vector<1x256xf32>
    %71 = vector.broadcast %70 : vector<1x256xf32> to vector<256x256xf32>
    %72 = arith.divf %68, %71 : vector<256x256xf32>
    %cst_33 = arith.constant dense<0.000000e+00> : vector<8x256xf32>
    %73 = tpu.matmul %58, %72, %cst_33 {dimension_numbers = #tpu.dot_dimension_numbers<[1], [0], [0], [1], [0, 0, 1, 1], [], []>} : vector<8x256xf32>, vector<256x256xf32>, vector<8x256xf32> -> vector<8x256xf32>
    %74 = vector.extract_strided_slice %33 {offsets = [16, 0], sizes = [8, 256], strides = [1, 1]} : vector<96x256xf32> to vector<8x256xf32>
    %cst_34 = arith.constant 0.353553385 : f32
    %75 = vector.broadcast %cst_34 : f32 to vector<8x256xf32>
    %76 = arith.mulf %74, %75 : vector<8x256xf32>
    %77 = vector.extract_strided_slice %33 {offsets = [48, 0], sizes = [8, 256], strides = [1, 1]} : vector<96x256xf32> to vector<8x256xf32>
    %78 = vector.extract_strided_slice %33 {offsets = [80, 0], sizes = [8, 256], strides = [1, 1]} : vector<96x256xf32> to vector<8x256xf32>
    %79 = tpu.transpose %77, [1, 0] : vector<8x256xf32> -> vector<256x8xf32>
    %cst_35 = arith.constant dense<0.000000e+00> : vector<256x256xf32>
    %80 = tpu.matmul %79, %76, %cst_35 {dimension_numbers = #tpu.dot_dimension_numbers<[1], [0], [0], [1], [0, 0, 1, 1], [], []>} : vector<256x8xf32>, vector<8x256xf32>, vector<256x256xf32> -> vector<256x256xf32>
    %c2 = arith.constant 2 : index
    %c0_36 = arith.constant 0 : index
    %c0_37 = arith.constant 0 : index
    %81 = vector.load %arg7[%c2, %c0_36, %c0_37] : memref<4x256x256xf32, #tpu.memory_space<vmem>>, vector<1x256x256xf32>
    %82 = vector.shape_cast %81 : vector<1x256x256xf32> to vector<256x256xf32>
    %83 = arith.addf %80, %82 : vector<256x256xf32>
    %cst_38 = arith.constant dense<0xFF800000> : vector<256xf32>
    %84 = vector.multi_reduction <maximumf>, %83, %cst_38 [0] : vector<256x256xf32> to vector<256xf32>
    %85 = vector.shape_cast %84 : vector<256xf32> to vector<1x256xf32>
    %86 = vector.broadcast %85 : vector<1x256xf32> to vector<256x256xf32>
    %87 = arith.subf %83, %86 : vector<256x256xf32>
    %88 = math.exp %87 : vector<256x256xf32>
    %cst_39 = arith.constant dense<0.000000e+00> : vector<256xf32>
    %89 = vector.multi_reduction <add>, %88, %cst_39 [0] : vector<256x256xf32> to vector<256xf32>
    %90 = vector.shape_cast %89 : vector<256xf32> to vector<1x256xf32>
    %91 = vector.broadcast %90 : vector<1x256xf32> to vector<256x256xf32>
    %92 = arith.divf %88, %91 : vector<256x256xf32>
    %cst_40 = arith.constant dense<0.000000e+00> : vector<8x256xf32>
    %93 = tpu.matmul %78, %92, %cst_40 {dimension_numbers = #tpu.dot_dimension_numbers<[1], [0], [0], [1], [0, 0, 1, 1], [], []>} : vector<8x256xf32>, vector<256x256xf32>, vector<8x256xf32> -> vector<8x256xf32>
    %94 = vector.extract_strided_slice %33 {offsets = [24, 0], sizes = [8, 256], strides = [1, 1]} : vector<96x256xf32> to vector<8x256xf32>
    %cst_41 = arith.constant 0.353553385 : f32
    %95 = vector.broadcast %cst_41 : f32 to vector<8x256xf32>
    %96 = arith.mulf %94, %95 : vector<8x256xf32>
    %97 = vector.extract_strided_slice %33 {offsets = [56, 0], sizes = [8, 256], strides = [1, 1]} : vector<96x256xf32> to vector<8x256xf32>
    %98 = vector.extract_strided_slice %33 {offsets = [88, 0], sizes = [8, 256], strides = [1, 1]} : vector<96x256xf32> to vector<8x256xf32>
    %99 = tpu.transpose %97, [1, 0] : vector<8x256xf32> -> vector<256x8xf32>
    %cst_42 = arith.constant dense<0.000000e+00> : vector<256x256xf32>
    %100 = tpu.matmul %99, %96, %cst_42 {dimension_numbers = #tpu.dot_dimension_numbers<[1], [0], [0], [1], [0, 0, 1, 1], [], []>} : vector<256x8xf32>, vector<8x256xf32>, vector<256x256xf32> -> vector<256x256xf32>
    %c3 = arith.constant 3 : index
    %c0_43 = arith.constant 0 : index
    %c0_44 = arith.constant 0 : index
    %101 = vector.load %arg7[%c3, %c0_43, %c0_44] : memref<4x256x256xf32, #tpu.memory_space<vmem>>, vector<1x256x256xf32>
    %102 = vector.shape_cast %101 : vector<1x256x256xf32> to vector<256x256xf32>
    %103 = arith.addf %100, %102 : vector<256x256xf32>
    %cst_45 = arith.constant dense<0xFF800000> : vector<256xf32>
    %104 = vector.multi_reduction <maximumf>, %103, %cst_45 [0] : vector<256x256xf32> to vector<256xf32>
    %105 = vector.shape_cast %104 : vector<256xf32> to vector<1x256xf32>
    %106 = vector.broadcast %105 : vector<1x256xf32> to vector<256x256xf32>
    %107 = arith.subf %103, %106 : vector<256x256xf32>
    %108 = math.exp %107 : vector<256x256xf32>
    %cst_46 = arith.constant dense<0.000000e+00> : vector<256xf32>
    %109 = vector.multi_reduction <add>, %108, %cst_46 [0] : vector<256x256xf32> to vector<256xf32>
    %110 = vector.shape_cast %109 : vector<256xf32> to vector<1x256xf32>
    %111 = vector.broadcast %110 : vector<1x256xf32> to vector<256x256xf32>
    %112 = arith.divf %108, %111 : vector<256x256xf32>
    %cst_47 = arith.constant dense<0.000000e+00> : vector<8x256xf32>
    %113 = tpu.matmul %98, %112, %cst_47 {dimension_numbers = #tpu.dot_dimension_numbers<[1], [0], [0], [1], [0, 0, 1, 1], [], []>} : vector<8x256xf32>, vector<256x256xf32>, vector<8x256xf32> -> vector<8x256xf32>
    %114 = tpu.concatenate %53, %73, %93, %113 in 0 : vector<8x256xf32>, vector<8x256xf32>, vector<8x256xf32>, vector<8x256xf32> -> vector<32x256xf32>
    %c0_48 = arith.constant 0 : index
    %c0_49 = arith.constant 0 : index
    %115 = vector.load %arg8[%c0_48, %c0_49] : memref<32x32xf32, #tpu.memory_space<vmem>>, vector<32x32xf32>
    %cst_50 = arith.constant dense<0.000000e+00> : vector<32x256xf32>
    %116 = tpu.matmul %115, %114, %cst_50 {dimension_numbers = #tpu.dot_dimension_numbers<[1], [0], [0], [1], [0, 0, 1, 1], [], []>} : vector<32x32xf32>, vector<32x256xf32>, vector<32x256xf32> -> vector<32x256xf32>
    %c0_51 = arith.constant 0 : index
    %c0_52 = arith.constant 0 : index
    %117 = vector.load %arg9[%c0_51, %c0_52] : memref<32x1xf32, #tpu.memory_space<vmem>>, vector<32x1xf32>
    %118 = vector.broadcast %117 : vector<32x1xf32> to vector<32x256xf32>
    %119 = arith.addf %116, %118 : vector<32x256xf32>
    %c0_53 = arith.constant 0 : index
    %c0_54 = arith.constant 0 : index
    %120 = vector.load %arg10[%c0_53, %c0_54] : memref<256x256xf32, #tpu.memory_space<vmem>>, vector<256x256xf32>
    %cst_55 = arith.constant dense<0.000000e+00> : vector<32x256xf32>
    %121 = tpu.matmul %119, %120, %cst_55 {dimension_numbers = #tpu.dot_dimension_numbers<[1], [0], [0], [1], [0, 0, 1, 1], [], []>} : vector<32x256xf32>, vector<256x256xf32>, vector<32x256xf32> -> vector<32x256xf32>
    %122 = arith.addf %1, %121 : vector<32x256xf32>
    %c0_56 = arith.constant 0 : index
    %c0_57 = arith.constant 0 : index
    %123 = vector.load %arg11[%c0_56, %c0_57] : memref<32x1xf32, #tpu.memory_space<vmem>>, vector<32x1xf32>
    %c0_58 = arith.constant 0 : index
    %c0_59 = arith.constant 0 : index
    %124 = vector.load %arg12[%c0_58, %c0_59] : memref<32x1xf32, #tpu.memory_space<vmem>>, vector<32x1xf32>
    %cst_60 = arith.constant dense<0.000000e+00> : vector<32xf32>
    %125 = vector.multi_reduction <add>, %122, %cst_60 [1] : vector<32x256xf32> to vector<32xf32>
    %126 = vector.shape_cast %125 : vector<32xf32> to vector<32x1xf32>
    %cst_61 = arith.constant 2.560000e+02 : f32
    %127 = vector.broadcast %cst_61 : f32 to vector<32x1xf32>
    %128 = arith.divf %126, %127 : vector<32x1xf32>
    %129 = vector.broadcast %128 : vector<32x1xf32> to vector<32x256xf32>
    %130 = arith.subf %122, %129 : vector<32x256xf32>
    %131 = arith.mulf %130, %130 : vector<32x256xf32>
    %cst_62 = arith.constant dense<0.000000e+00> : vector<32xf32>
    %132 = vector.multi_reduction <add>, %131, %cst_62 [1] : vector<32x256xf32> to vector<32xf32>
    %133 = vector.shape_cast %132 : vector<32xf32> to vector<32x1xf32>
    %cst_63 = arith.constant 2.560000e+02 : f32
    %134 = vector.broadcast %cst_63 : f32 to vector<32x1xf32>
    %135 = arith.divf %133, %134 : vector<32x1xf32>
    %136 = vector.broadcast %128 : vector<32x1xf32> to vector<32x256xf32>
    %137 = arith.subf %122, %136 : vector<32x256xf32>
    %cst_64 = arith.constant 9.99999974E-6 : f32
    %138 = vector.broadcast %cst_64 : f32 to vector<32x1xf32>
    %139 = arith.addf %135, %138 : vector<32x1xf32>
    %140 = math.rsqrt %139 : vector<32x1xf32>
    %141 = vector.broadcast %140 : vector<32x1xf32> to vector<32x256xf32>
    %142 = arith.mulf %137, %141 : vector<32x256xf32>
    %143 = vector.broadcast %123 : vector<32x1xf32> to vector<32x256xf32>
    %144 = arith.mulf %142, %143 : vector<32x256xf32>
    %145 = vector.broadcast %124 : vector<32x1xf32> to vector<32x256xf32>
    %146 = arith.addf %144, %145 : vector<32x256xf32>
    %c0_65 = arith.constant 0 : index
    %c0_66 = arith.constant 0 : index
    %c0_67 = arith.constant 0 : index
    %147 = vector.load %arg13[%c0_65, %c0_66, %c0_67] : memref<1x256x256xf32, #tpu.memory_space<vmem>>, vector<1x256x256xf32>
    %148 = vector.shape_cast %147 : vector<1x256x256xf32> to vector<256x256xf32>
    %cst_68 = arith.constant dense<0.000000e+00> : vector<32x256xf32>
    %149 = tpu.matmul %146, %148, %cst_68 {dimension_numbers = #tpu.dot_dimension_numbers<[1], [0], [0], [1], [0, 0, 1, 1], [], []>} : vector<32x256xf32>, vector<256x256xf32>, vector<32x256xf32> -> vector<32x256xf32>
    %c0_69 = arith.constant 0 : index
    %c0_70 = arith.constant 0 : index
    %150 = vector.load %arg14[%c0_69, %c0_70] : memref<64x32xf32, #tpu.memory_space<vmem>>, vector<64x32xf32>
    %cst_71 = arith.constant dense<0.000000e+00> : vector<64x256xf32>
    %151 = tpu.matmul %150, %149, %cst_71 {dimension_numbers = #tpu.dot_dimension_numbers<[1], [0], [0], [1], [0, 0, 1, 1], [], []>} : vector<64x32xf32>, vector<32x256xf32>, vector<64x256xf32> -> vector<64x256xf32>
    %c0_72 = arith.constant 0 : index
    %c0_73 = arith.constant 0 : index
    %152 = vector.load %arg15[%c0_72, %c0_73] : memref<64x1xf32, #tpu.memory_space<vmem>>, vector<64x1xf32>
    %153 = vector.broadcast %152 : vector<64x1xf32> to vector<64x256xf32>
    %154 = arith.addf %151, %153 : vector<64x256xf32>
    %cst_74 = arith.constant 5.000000e-01 : f32
    %155 = vector.broadcast %cst_74 : f32 to vector<64x256xf32>
    %156 = arith.mulf %155, %154 : vector<64x256xf32>
    %cst_75 = arith.constant 0.707106769 : f32
    %157 = vector.broadcast %cst_75 : f32 to vector<64x256xf32>
    %158 = arith.mulf %154, %157 : vector<64x256xf32>
    %cst_76 = arith.constant -4.000000e+00 : f32
    %cst_77 = arith.constant 4.000000e+00 : f32
    %159 = vector.broadcast %cst_76 : f32 to vector<64x256xf32>
    %160 = arith.maximumf %159, %158 : vector<64x256xf32>
    %161 = vector.broadcast %cst_77 : f32 to vector<64x256xf32>
    %162 = arith.minimumf %161, %160 : vector<64x256xf32>
    %163 = arith.mulf %162, %162 : vector<64x256xf32>
    %cst_78 = arith.constant -2.72614237E-10 : f32
    %164 = vector.broadcast %cst_78 : f32 to vector<64x256xf32>
    %165 = arith.mulf %164, %163 : vector<64x256xf32>
    %cst_79 = arith.constant 2.77068146E-8 : f32
    %166 = vector.broadcast %cst_79 : f32 to vector<64x256xf32>
    %167 = arith.addf %165, %166 : vector<64x256xf32>
    %168 = arith.mulf %167, %163 : vector<64x256xf32>
    %cst_80 = arith.constant -2.10102394E-6 : f32
    %169 = vector.broadcast %cst_80 : f32 to vector<64x256xf32>
    %170 = arith.addf %168, %169 : vector<64x256xf32>
    %171 = arith.mulf %170, %163 : vector<64x256xf32>
    %cst_81 = arith.constant -5.69250624E-5 : f32
    %172 = vector.broadcast %cst_81 : f32 to vector<64x256xf32>
    %173 = arith.addf %171, %172 : vector<64x256xf32>
    %174 = arith.mulf %173, %163 : vector<64x256xf32>
    %cst_82 = arith.constant -7.34990637E-4 : f32
    %175 = vector.broadcast %cst_82 : f32 to vector<64x256xf32>
    %176 = arith.addf %174, %175 : vector<64x256xf32>
    %177 = arith.mulf %176, %163 : vector<64x256xf32>
    %cst_83 = arith.constant -0.00295460015 : f32
    %178 = vector.broadcast %cst_83 : f32 to vector<64x256xf32>
    %179 = arith.addf %177, %178 : vector<64x256xf32>
    %180 = arith.mulf %179, %163 : vector<64x256xf32>
    %cst_84 = arith.constant -0.0160960332 : f32
    %181 = vector.broadcast %cst_84 : f32 to vector<64x256xf32>
    %182 = arith.addf %180, %181 : vector<64x256xf32>
    %cst_85 = arith.constant -1.45660715E-5 : f32
    %183 = vector.broadcast %cst_85 : f32 to vector<64x256xf32>
    %184 = arith.mulf %183, %163 : vector<64x256xf32>
    %cst_86 = arith.constant -2.13374049E-4 : f32
    %185 = vector.broadcast %cst_86 : f32 to vector<64x256xf32>
    %186 = arith.addf %184, %185 : vector<64x256xf32>
    %187 = arith.mulf %186, %163 : vector<64x256xf32>
    %cst_87 = arith.constant -0.00168282702 : f32
    %188 = vector.broadcast %cst_87 : f32 to vector<64x256xf32>
    %189 = arith.addf %187, %188 : vector<64x256xf32>
    %190 = arith.mulf %189, %163 : vector<64x256xf32>
    %cst_88 = arith.constant -0.00737332925 : f32
    %191 = vector.broadcast %cst_88 : f32 to vector<64x256xf32>
    %192 = arith.addf %190, %191 : vector<64x256xf32>
    %193 = arith.mulf %192, %163 : vector<64x256xf32>
    %cst_89 = arith.constant -0.0142647391 : f32
    %194 = vector.broadcast %cst_89 : f32 to vector<64x256xf32>
    %195 = arith.addf %193, %194 : vector<64x256xf32>
    %196 = arith.mulf %162, %182 : vector<64x256xf32>
    %197 = arith.divf %196, %195 : vector<64x256xf32>
    %cst_90 = arith.constant 1.000000e+00 : f32
    %198 = vector.broadcast %cst_90 : f32 to vector<64x256xf32>
    %199 = arith.addf %198, %197 : vector<64x256xf32>
    %200 = arith.mulf %156, %199 : vector<64x256xf32>
    %c0_91 = arith.constant 0 : index
    %c0_92 = arith.constant 0 : index
    %201 = vector.load %arg16[%c0_91, %c0_92] : memref<32x64xf32, #tpu.memory_space<vmem>>, vector<32x64xf32>
    %cst_93 = arith.constant dense<0.000000e+00> : vector<32x256xf32>
    %202 = tpu.matmul %201, %200, %cst_93 {dimension_numbers = #tpu.dot_dimension_numbers<[1], [0], [0], [1], [0, 0, 1, 1], [], []>} : vector<32x64xf32>, vector<64x256xf32>, vector<32x256xf32> -> vector<32x256xf32>
    %c0_94 = arith.constant 0 : index
    %c0_95 = arith.constant 0 : index
    %203 = vector.load %arg17[%c0_94, %c0_95] : memref<32x1xf32, #tpu.memory_space<vmem>>, vector<32x1xf32>
    %204 = vector.broadcast %203 : vector<32x1xf32> to vector<32x256xf32>
    %205 = arith.addf %202, %204 : vector<32x256xf32>
    %206 = arith.addf %122, %205 : vector<32x256xf32>
    %c0_96 = arith.constant 0 : index
    %c0_97 = arith.constant 0 : index
    %c0_98 = arith.constant 0 : index
    %207 = vector.load %arg18[%c0_96, %c0_97, %c0_98] : memref<1x32x256xf32, #tpu.memory_space<vmem>>, vector<1x32x256xf32>
    %208 = vector.shape_cast %207 : vector<1x32x256xf32> to vector<32x256xf32>
    %209 = vector.shape_cast %206 : vector<32x256xf32> to vector<1x32x256xf32>
    tpu.vector_store %arg18[%c0_96, %c0_97, %c0_98], %209 {strides = array<i32>} : memref<1x32x256xf32, #tpu.memory_space<vmem>>, vector<1x32x256xf32>,
    return
  }
  func.func @transform_0(%arg0: i32) -> (i32, i32, i32) {
    %c0_i32 = arith.constant 0 : i32
    %c0_i32_0 = arith.constant 0 : i32
    %c0_i32_1 = arith.constant 0 : i32
    return %arg0, %c0_i32, %c0_i32_0 : i32, i32, i32
  }
  func.func @transform_1(%arg0: i32) -> (i32, i32) {
    %c0_i32 = arith.constant 0 : i32
    %c0_i32_0 = arith.constant 0 : i32
    %c0_i32_1 = arith.constant 0 : i32
    return %c0_i32, %c0_i32_0 : i32, i32
  }
  func.func @transform_2(%arg0: i32) -> (i32, i32) {
    %c0_i32 = arith.constant 0 : i32
    %c0_i32_0 = arith.constant 0 : i32
    %c0_i32_1 = arith.constant 0 : i32
    return %c0_i32, %c0_i32_0 : i32, i32
  }
  func.func @transform_3(%arg0: i32) -> (i32, i32, i32) {
    %c0_i32 = arith.constant 0 : i32
    %c0_i32_0 = arith.constant 0 : i32
    %c0_i32_1 = arith.constant 0 : i32
    return %arg0, %c0_i32, %c0_i32_0 : i32, i32, i32
  }
  func.func @transform_4(%arg0: i32) -> (i32, i32) {
    %c0_i32 = arith.constant 0 : i32
    %c0_i32_0 = arith.constant 0 : i32
    %c0_i32_1 = arith.constant 0 : i32
    return %c0_i32, %c0_i32_0 : i32, i32
  }
  func.func @transform_5(%arg0: i32) -> (i32, i32) {
    %c0_i32 = arith.constant 0 : i32
    %c0_i32_0 = arith.constant 0 : i32
    %c0_i32_1 = arith.constant 0 : i32
    return %c0_i32, %c0_i32_0 : i32, i32
  }
  func.func @transform_6(%arg0: i32) -> (i32, i32, i32) {
    %c0_i32 = arith.constant 0 : i32
    %c0_i32_0 = arith.constant 0 : i32
    %c0_i32_1 = arith.constant 0 : i32
    %c0_i32_2 = arith.constant 0 : i32
    return %c0_i32, %c0_i32_0, %c0_i32_1 : i32, i32, i32
  }
  func.func @transform_7(%arg0: i32) -> (i32, i32) {
    %c0_i32 = arith.constant 0 : i32
    %c0_i32_0 = arith.constant 0 : i32
    %c0_i32_1 = arith.constant 0 : i32
    return %c0_i32, %c0_i32_0 : i32, i32
  }
  func.func @transform_8(%arg0: i32) -> (i32, i32) {
    %c0_i32 = arith.constant 0 : i32
    %c0_i32_0 = arith.constant 0 : i32
    %c0_i32_1 = arith.constant 0 : i32
    return %c0_i32, %c0_i32_0 : i32, i32
  }
  func.func @transform_9(%arg0: i32) -> (i32, i32) {
    %c0_i32 = arith.constant 0 : i32
    %c0_i32_0 = arith.constant 0 : i32
    %c0_i32_1 = arith.constant 0 : i32
    return %c0_i32, %c0_i32_0 : i32, i32
  }
  func.func @transform_10(%arg0: i32) -> (i32, i32) {
    %c0_i32 = arith.constant 0 : i32
    %c0_i32_0 = arith.constant 0 : i32
    %c0_i32_1 = arith.constant 0 : i32
    return %c0_i32, %c0_i32_0 : i32, i32
  }
  func.func @transform_11(%arg0: i32) -> (i32, i32) {
    %c0_i32 = arith.constant 0 : i32
    %c0_i32_0 = arith.constant 0 : i32
    %c0_i32_1 = arith.constant 0 : i32
    return %c0_i32, %c0_i32_0 : i32, i32
  }
  func.func @transform_12(%arg0: i32) -> (i32, i32, i32) {
    %c0_i32 = arith.constant 0 : i32
    %c0_i32_0 = arith.constant 0 : i32
    %c0_i32_1 = arith.constant 0 : i32
    return %arg0, %c0_i32, %c0_i32_0 : i32, i32, i32
  }
  func.func @transform_13(%arg0: i32) -> (i32, i32) {
    %c0_i32 = arith.constant 0 : i32
    %c0_i32_0 = arith.constant 0 : i32
    %c0_i32_1 = arith.constant 0 : i32
    return %c0_i32, %c0_i32_0 : i32, i32
  }
  func.func @transform_14(%arg0: i32) -> (i32, i32) {
    %c0_i32 = arith.constant 0 : i32
    %c0_i32_0 = arith.constant 0 : i32
    %c0_i32_1 = arith.constant 0 : i32
    return %c0_i32, %c0_i32_0 : i32, i32
  }
  func.func @transform_15(%arg0: i32) -> (i32, i32) {
    %c0_i32 = arith.constant 0 : i32
    %c0_i32_0 = arith.constant 0 : i32
    %c0_i32_1 = arith.constant 0 : i32
    return %c0_i32, %c0_i32_0 : i32, i32
  }
  func.func @transform_16(%arg0: i32) -> (i32, i32) {
    %c0_i32 = arith.constant 0 : i32
    %c0_i32_0 = arith.constant 0 : i32
    %c0_i32_1 = arith.constant 0 : i32
    return %c0_i32, %c0_i32_0 : i32, i32
  }
  func.func @transform_17(%arg0: i32) -> (i32, i32, i32) {
    %c0_i32 = arith.constant 0 : i32
    %c0_i32_0 = arith.constant 0 : i32
    %c0_i32_1 = arith.constant 0 : i32
    return %arg0, %c0_i32, %c0_i32_0 : i32, i32, i32
  }
}

</mosaic_0001>

<bundles_post_ra>
// kernel: swin_block_adafm.1
= control target key start
LH: loop header
LB: loop body
LE: loop exit
PB: predicated region body
PF: predicated region fallthrough
CT: control target
= control target key end

     0   :  { %s7956_s24 = smov 0   ;;  %s13980_s0 = inlined_call_operand.vmem [shape: f32[2,32,256], index: 0, kind: input, shape index: {}]   ;;  %s13981_s1 = inlined_call_operand.vmem [shape: f32[32,1], index: 1, kind: input, shape index: {}]   ;;  %s13982_s2 = inlined_call_operand.vmem [shape: f32[32,1], index: 2, kind: input, shape index: {}]   ;;  %s13983_s3 = inlined_call_operand.vmem [shape: f32[2,256,256], index: 3, kind: input, shape index: {}]   ;;  %s13984_s4 = inlined_call_operand.vmem [shape: f32[96,32], index: 4, kind: input, shape index: {}]   ;;  %s13985_s5 = inlined_call_operand.vmem [shape: f32[96,1], index: 5, kind: input, shape index: {}]   ;;  %s13986_s6 = inlined_call_operand.vmem [shape: f32[4,256,256], index: 6, kind: input, shape index: {}]   ;;  %s13987_s7 = inlined_call_operand.vmem [shape: f32[32,32], index: 7, kind: input, shape index: {}]   ;;  %s13988_s8 = inlined_call_operand.vmem [shape: f32[32,1], index: 8, kind: input, shape index: {}]   ;;  %s13989_s9 = inlined_call_operand.vmem [shape: f32[256,256], index: 9, kind: input, shape index: {}]   ;;  %s13990_s10 = inlined_call_operand.vmem [shape: f32[32,1], index: 10, kind: input, shape index: {}]   ;;  %s13991_s11 = inlined_call_operand.vmem [shape: f32[32,1], index: 11, kind: input, shape index: {}]   ;;  %s13992_s12 = inlined_call_operand.vmem [shape: f32[2,256,256], index: 12, kind: input, shape index: {}]   ;;  %s13993_s13 = inlined_call_operand.vmem [shape: f32[64,32], index: 13, kind: input, shape index: {}]   ;;  %s13994_s14 = inlined_call_operand.vmem [shape: f32[64,1], index: 14, kind: input, shape index: {}]   ;;  %s13995_s15 = inlined_call_operand.vmem [shape: f32[32,64], index: 15, kind: input, shape index: {}]   ;;  %s13996_s16 = inlined_call_operand.vmem [shape: f32[32,1], index: 16, kind: input, shape index: {}]   ;;  %s13997_s17 = inlined_call_operand.vmem [shape: f32[2,32,256], index: 17, kind: output, shape index: {}]  }
   0x1   :  { %14156 = sst [smem:[#allocation50_spill]] %s13980_s0 }
   0x2   :  { %14157 = sst [smem:[#allocation51_spill]] %s13981_s1 }
   0x3 LB: > { %s6709_s25 = sadd.s32 4294967295, %s7862_s24   ;;  %p6713_p0 = scmp.ge.s32.totalorder %s7862_s24, 1  ;;  %s7862_s24 = sphi %s7956_s24, %s27_s24  }
   0x4   : > { %p507_p1 = scmp.lt.s32.totalorder %s7862_s24, 3 }
   0x6   : > { %p508_p2 = pnand %p6713_p0, %p507_p1 }
   0x8   : > { %511 = sbr.rel (%p508_p2) target bundleno = 4486 (0x1186), region = 88 }
   0xd   : > { %p569_p3 = scmp.lt.s32.totalorder %s6709_s25, 1  ;;  %v7864_v0 = vmov 0   ;;  %s14158_s29 = sld [smem:[#allocation50_spill]]  ;;  %v603_v15 = vld [vmem:[%s13982_s2 + $0x10] sm:$0xff]  ;;  %v7865_v16 = vmov 256.0   ;;  %v601_v51 = vld [vmem:[%s13982_s2] sm:$0xff] }
   0xe   : > { %7269 = vset.pattern.permute.xlu1 %v7864_v0  ;;  %7267 = vset.pattern.permute.xlu2 %v7864_v0  ;;  %s14159_s19 = sld [smem:[#allocation51_spill]]  ;;  %7270 = vrcp.f32 %v7865_v16  ;;  %v964_v52 = vld [vmem:[%s13985_s5 + $0x20] sm:$0xff]  ;;  %v602_v53 = vld [vmem:[%s13982_s2 + $0x8] sm:$0xff]  ;;  %v604_v54 = vld [vmem:[%s13982_s2 + $0x18] sm:$0xff]  ;;  %vm1032_vm13 = vcmask 261120   ;;  %vm1305_vm14 = vcmask 64512  }
   0xf   : > { %s14614_s25 = smov (!%p569_p3, %s6709_s25), 1  ;;  %7268 = vset.pattern.permute.xlu0 %v7864_v0 }
  0x10   : > { %s14012_s26 = sshll.u32 %s14614_s25, 6  ;;  %s7245_s23 = sshll.u32 %s14614_s25, 9 }
  0x13   : > { %s7972_s0 = scalar_lea.vmem %s14158_s29, %s14012_s26  ;;  %s8050_s29 = scalar_lea.vmem %s13983_s3, %s7245_s23 }
  0x14   : > { %v593_v1 = vld [vmem:[%s7972_s0 + $0x20] sm:$0xff]  ;;  %v594_v2 = vld [vmem:[%s7972_s0 + $0x28] sm:$0xff]  ;;  %v595_v7 = vld [vmem:[%s7972_s0 + $0x30] sm:$0xff]  ;;  %v7271_v17 = vpop.eup %7270  ;;  %s13112_s26 = scalar_lea.vmem %s13992_s12, %s7245_s23 }
  0x15   : > { %v589_v3 = vld [vmem:[%s7972_s0] sm:$0xff]  ;;  %v611_v4 = vadd.f32 %v594_v2, %v593_v1  ;;  %v590_v5 = vld [vmem:[%s7972_s0 + $0x8] sm:$0xff]  ;;  %v596_v8 = vld [vmem:[%s7972_s0 + $0x38] sm:$0xff]  ;;  %v618_v18 = vmul.f32 256.0, %v7271_v17  ;;  %vm622_vm0 = vweird.f32 %v7271_v17 }
  0x16   : > { %v605_v6 = vadd.f32 %v590_v5, %v589_v3  ;;  %v597_v9 = vld [vmem:[%s14159_s19] sm:$0xff]  ;;  %v591_v10 = vld [vmem:[%s7972_s0 + $0x10] sm:$0xff]  ;;  %v592_v11 = vld [vmem:[%s7972_s0 + $0x18] sm:$0xff]  ;;  %v614_v12 = vadd.f32 %v596_v8, %v595_v7 }
  0x17   : > { %612 = vadd.xlane.f32.xlu1 %v611_v4  ;;  %714 = vperm.xlu2 %7267, %v597_v9   ;;  %v608_v13 = vadd.f32 %v592_v11, %v591_v10  ;;  %v598_v14 = vld [vmem:[%s14159_s19 + $0x8] sm:$0xff]  ;;  %v619_v19 = vsub.f32 1.0, %v618_v18  ;;  %v599_v55 = vld [vmem:[%s14159_s19 + $0x10] sm:$0xff]  ;;  %v600_v56 = vld [vmem:[%s14159_s19 + $0x18] sm:$0xff] }
  0x18   : > { %606 = vadd.xlane.f32.xlu0 %v605_v6  ;;  %v798_v57 = vld [vmem:[%s8050_s29 + $0xf0] sm:$0xff]  ;;  %v799_v59 = vld [vmem:[%s8050_s29 + $0xf8] sm:$0xff]  ;;  %v796_v61 = vld [vmem:[%s8050_s29 + $0xe0] sm:$0xff] }
  0x19   : > { %v620_v20 = vmul.f32 %v7271_v17, %v619_v19  ;;  %v830_v58 = vld [vmem:[%s8050_s29 + $0x1f0] sm:$0xff]  ;;  %832 = vmatpush.msra.mxu0 %v798_v57  ;;  %v831_v60 = vld [vmem:[%s8050_s29 + $0x1f8] sm:$0xff]  ;;  %v828_v62 = vld [vmem:[%s8050_s29 + $0x1e0] sm:$0xff]  ;;  %890 = vmatpush.msra.mxu2 %v799_v59 }
  0x1a   : > { %861 = vmatpush.msra.mxu1 %v830_v58  ;;  %919 = vmatpush.msra.mxu3 %v831_v60  ;;  %v797_v63 = vld [vmem:[%s8050_s29 + $0xe8] sm:$0xff]  ;;  %v826_v6 = vld [vmem:[%s8050_s29 + $0x1d0] sm:$0xff]  ;;  %v792_v9 = vld [vmem:[%s8050_s29 + $0xc0] sm:$0xff] }
  0x1b   : > { %v621_v21 = vadd.f32 %v7271_v17, %v620_v20  ;;  %v829_v0 = vld [vmem:[%s8050_s29 + $0x1e8] sm:$0xff]  ;;  %833 = vmatpush.msra.mxu0 %v796_v61  ;;  %891 = vmatpush.msra.mxu2 %v797_v63  ;;  %v823_v16 = vld [vmem:[%s8050_s29 + $0x1b8] sm:$0xff]  ;;  %v820_v18 = vld [vmem:[%s8050_s29 + $0x1a0] sm:$0xff] }
  0x1c   : > { %862 = vmatpush.msra.mxu1 %v828_v62  ;;  %920 = vmatpush.msra.mxu3 %v829_v0  ;;  %v961_v4 = vld [vmem:[%s13985_s5 + $0x8] sm:$0xff]  ;;  %v775_v57 = vld [vmem:[%s8050_s29 + $0x38] sm:$0xff]  ;;  %v772_v59 = vld [vmem:[%s8050_s29 + $0x20] sm:$0xff] }
  0x1d   : > { %v7991_v22 = vsel %vm622_vm0, %v7271_v17, %v621_v21  ;;  %v788_v17 = vld [vmem:[%s8050_s29 + $0xa0] sm:$0xff]  ;;  %v789_v19 = vld [vmem:[%s8050_s29 + $0xa8] sm:$0xff]  ;;  %v786_v21 = vld [vmem:[%s8050_s29 + $0x90] sm:$0xff] }
  0x1e   : > { %14160 = vst [vmem:[#allocation2_spill] sm:$0xff] %v7991_v22  ;;  %863 = vmatpush.msra.mxu1 %v826_v6  ;;  %v821_v20 = vld [vmem:[%s8050_s29 + $0x1a8] sm:$0xff]  ;;  %v807_v58 = vld [vmem:[%s8050_s29 + $0x138] sm:$0xff]  ;;  %v804_v60 = vld [vmem:[%s8050_s29 + $0x120] sm:$0xff] }
  0x1f   : > { %615 = vadd.xlane.f32.xlu1 %v614_v12  ;;  %v825_v12 = vld [vmem:[%s8050_s29 + $0x1c8] sm:$0xff]  ;;  %v770_v0 = vld [vmem:[%s8050_s29 + $0x10] sm:$0xff] }
  0x20   : > { %609 = vadd.xlane.f32.xlu0 %v608_v13  ;;  %v790_v13 = vld [vmem:[%s8050_s29 + $0xb0] sm:$0xff]  ;;  %v773_v61 = vld [vmem:[%s8050_s29 + $0x28] sm:$0xff] }
  0x21   : > { %v805_v63 = vld [vmem:[%s8050_s29 + $0x128] sm:$0xff] }
  0x22   : > { %v769_v6 = vld [vmem:[%s8050_s29 + $0x8] sm:$0xff] }
  0x38   : > { %719 = vperm.xlu1 %7269, %v598_v14   ;;  %v822_v14 = vld [vmem:[%s8050_s29 + $0x1b0] sm:$0xff] }
  0x40   : > { %752 = vperm.xlu1 %7269, %v603_v15   ;;  %v791_v15 = vld [vmem:[%s8050_s29 + $0xb8] sm:$0xff] }
  0x71   : > { %v8124_v62 = vpop.permute.xlu2 %714 }
  0x8a   : > { %v613_v23 = vpop.xlane.xlu1 %612 }
  0x8b   : > { %v626_v24 = vmul.f32 %v7991_v22, %v613_v23  ;;  %v607_v25 = vpop.xlane.xlu0 %606  ;;  %v818_v23 = vld [vmem:[%s8050_s29 + $0x190] sm:$0xff] }
  0x8c   : > { %v624_v26 = vmul.f32 %v7991_v22, %v607_v25  ;;  %v819_v25 = vld [vmem:[%s8050_s29 + $0x198] sm:$0xff] }
  0x8d   : > { %v7995_v27 = vsub.f32 %v593_v1, %v626_v24  ;;  %v7997_v28 = vsub.f32 %v594_v2, %v626_v24  ;;  %v960_v1 = vld [vmem:[%s13985_s5] sm:$0xff]  ;;  %v965_v2 = vld [vmem:[%s13985_s5 + $0x28] sm:$0xff]  ;;  %v787_v24 = vld [vmem:[%s8050_s29 + $0x98] sm:$0xff] }
  0x8e   : > { %v7999_v29 = vsub.f32 %v589_v3, %v624_v26  ;;  %v8001_v30 = vsub.f32 %v590_v5, %v624_v26  ;;  %v968_v3 = vld [vmem:[%s13985_s5 + $0x40] sm:$0xff]  ;;  %v794_v5 = vld [vmem:[%s8050_s29 + $0xd0] sm:$0xff] }
  0x8f   : > { %v640_v31 = vmul.f32 %v7995_v27, %v7995_v27  ;;  %v641_v32 = vmul.f32 %v7997_v28, %v7997_v28  ;;  %834 = vmatpush.msra.mxu0 %v794_v5  ;;  %v784_v26 = vld [vmem:[%s8050_s29 + $0x80] sm:$0xff] }
  0x90   : > { %v636_v33 = vmul.f32 %v7999_v29, %v7999_v29  ;;  %v637_v34 = vmul.f32 %v8001_v30, %v8001_v30  ;;  %v800_v5 = vld [vmem:[%s8050_s29 + $0x100] sm:$0xff] }
  0x91   : > { %v650_v35 = vadd.f32 %v641_v32, %v640_v31  ;;  %835 = vmatpush.msra.mxu0 %v792_v9  ;;  %v816_v31 = vld [vmem:[%s8050_s29 + $0x180] sm:$0xff]  ;;  %v785_v32 = vld [vmem:[%s8050_s29 + $0x88] sm:$0xff] }
  0x92   : > { %v616_v36 = vpop.xlane.xlu1 %615  ;;  %v644_v37 = vadd.f32 %v637_v34, %v636_v33  ;;  %v817_v33 = vld [vmem:[%s8050_s29 + $0x188] sm:$0xff]  ;;  %v782_v34 = vld [vmem:[%s8050_s29 + $0x70] sm:$0xff] }
  0x93   : > { %v627_v38 = vmul.f32 %v7991_v22, %v616_v36  ;;  %v610_v39 = vpop.xlane.xlu0 %609  ;;  %651 = vadd.xlane.f32.xlu0 %v650_v35  ;;  %836 = vmatpush.msra.mxu0 %v790_v13  ;;  %v814_v35 = vld [vmem:[%s8050_s29 + $0x170] sm:$0xff]  ;;  %v783_v36 = vld [vmem:[%s8050_s29 + $0x78] sm:$0xff] }
  0x94   : > { %v625_v40 = vmul.f32 %v7991_v22, %v610_v39  ;;  %645 = vadd.xlane.f32.xlu2 %v644_v37  ;;  %v815_v37 = vld [vmem:[%s8050_s29 + $0x178] sm:$0xff]  ;;  %v812_v39 = vld [vmem:[%s8050_s29 + $0x160] sm:$0xff] }
  0x95   : > { %v8013_v41 = vsub.f32 %v595_v7, %v627_v38  ;;  %v8015_v42 = vsub.f32 %v596_v8, %v627_v38  ;;  %v795_v7 = vld [vmem:[%s8050_s29 + $0xd8] sm:$0xff]  ;;  %837 = vmatpush.msra.mxu0 %v788_v17  ;;  %v780_v38 = vld [vmem:[%s8050_s29 + $0x60] sm:$0xff] }
  0x96   : > { %v8017_v43 = vsub.f32 %v591_v10, %v625_v40  ;;  %v8019_v44 = vsub.f32 %v592_v11, %v625_v40  ;;  %v827_v8 = vld [vmem:[%s8050_s29 + $0x1d8] sm:$0xff]  ;;  %892 = vmatpush.msra.mxu2 %v795_v7  ;;  %v824_v10 = vld [vmem:[%s8050_s29 + $0x1c0] sm:$0xff]  ;;  %v793_v11 = vld [vmem:[%s8050_s29 + $0xc8] sm:$0xff] }
  0x97   : > { %v642_v45 = vmul.f32 %v8013_v41, %v8013_v41  ;;  %v643_v46 = vmul.f32 %v8015_v42, %v8015_v42  ;;  %921 = vmatpush.msra.mxu3 %v827_v8  ;;  %864 = vmatpush.msra.mxu1 %v824_v10  ;;  %v781_v40 = vld [vmem:[%s8050_s29 + $0x68] sm:$0xff] }
  0x98   : > { %v638_v47 = vmul.f32 %v8017_v43, %v8017_v43  ;;  %v639_v48 = vmul.f32 %v8019_v44, %v8019_v44  ;;  %893 = vmatpush.msra.mxu2 %v793_v11  ;;  %838 = vmatpush.msra.mxu0 %v786_v21  ;;  %v801_v7 = vld [vmem:[%s8050_s29 + $0x108] sm:$0xff] }
  0x99   : > { %v653_v49 = vadd.f32 %v643_v46, %v642_v45  ;;  %922 = vmatpush.msra.mxu3 %v825_v12  ;;  %865 = vmatpush.msra.mxu1 %v822_v14  ;;  %v813_v45 = vld [vmem:[%s8050_s29 + $0x168] sm:$0xff]  ;;  %v778_v46 = vld [vmem:[%s8050_s29 + $0x50] sm:$0xff] }
  0x9a   : > { %v647_v50 = vadd.f32 %v639_v48, %v638_v47  ;;  %894 = vmatpush.msra.mxu2 %v791_v15  ;;  %839 = vmatpush.msra.mxu0 %v784_v26  ;;  %v810_v47 = vld [vmem:[%s8050_s29 + $0x150] sm:$0xff]  ;;  %v779_v48 = vld [vmem:[%s8050_s29 + $0x58] sm:$0xff] }
  0x9b   : > { %654 = vadd.xlane.f32.xlu1 %v653_v49  ;;  %923 = vmatpush.msra.mxu3 %v823_v16  ;;  %v811_v49 = vld [vmem:[%s8050_s29 + $0x158] sm:$0xff] }
  0x9c   : > { %648 = vadd.xlane.f32.xlu2 %v647_v50  ;;  %866 = vmatpush.msra.mxu1 %v820_v18  ;;  %v776_v50 = vld [vmem:[%s8050_s29 + $0x40] sm:$0xff] }
  0x9d   : > { %895 = vmatpush.msra.mxu2 %v789_v19  ;;  %924 = vmatpush.msra.mxu3 %v821_v20 }
  0x9e   : > { %867 = vmatpush.msra.mxu1 %v818_v23  ;;  %840 = vmatpush.msra.mxu0 %v782_v34 }
  0x9f   : > { %896 = vmatpush.msra.mxu2 %v787_v24  ;;  %925 = vmatpush.msra.mxu3 %v819_v25 }
  0xa0   : > { %868 = vmatpush.msra.mxu1 %v816_v31  ;;  %841 = vmatpush.msra.mxu0 %v780_v38 }
  0xa1   : > { %897 = vmatpush.msra.mxu2 %v785_v32  ;;  %926 = vmatpush.msra.mxu3 %v817_v33 }
  0xa2   : > { %869 = vmatpush.msra.mxu1 %v814_v35  ;;  %842 = vmatpush.msra.mxu0 %v778_v46 }
  0xa3   : > { %898 = vmatpush.msra.mxu2 %v783_v36  ;;  %927 = vmatpush.msra.mxu3 %v815_v37 }
  0xa4   : > { %870 = vmatpush.msra.mxu1 %v812_v39  ;;  %843 = vmatpush.msra.mxu0 %v776_v50 }
  0xa5   : > { %899 = vmatpush.msra.mxu2 %v781_v40  ;;  %928 = vmatpush.msra.mxu3 %v813_v45 }
  0xa6   : > { %871 = vmatpush.msra.mxu1 %v810_v47 }
  0xa7   : > { %742 = vperm.xlu0 %7268, %v601_v51   ;;  %900 = vmatpush.msra.mxu2 %v779_v48  ;;  %v808_v51 = vld [vmem:[%s8050_s29 + $0x140] sm:$0xff] }
  0xa8   : > { %929 = vmatpush.msra.mxu3 %v811_v49  ;;  %872 = vmatpush.msra.mxu1 %v808_v51 }
  0xaf   : > { %994 = vperm.xlu0 %7268, %v964_v52   ;;  %v777_v52 = vld [vmem:[%s8050_s29 + $0x48] sm:$0xff] }
  0xb0   : > { %901 = vmatpush.msra.mxu2 %v777_v52 }
  0xb2   : > { %902 = vmatpush.msra.mxu2 %v775_v57 }
  0xb4   : > { %747 = vperm.xlu2 %7267, %v602_v53   ;;  %757 = vperm.xlu1 %7269, %v604_v54   ;;  %v809_v53 = vld [vmem:[%s8050_s29 + $0x148] sm:$0xff]  ;;  %v8115_v54 = vpop.permute.xlu1 %719 }
  0xb5   : > { %930 = vmatpush.msra.mxu3 %v809_v53  ;;  %903 = vmatpush.msra.mxu2 %v773_v61 }
  0xb7   : > { %931 = vmatpush.msra.mxu3 %v807_v58 }
  0xb9   : > { %932 = vmatpush.msra.mxu3 %v805_v63 }
  0xbc   : > { %724 = vperm.xlu2 %7267, %v599_v55   ;;  %v774_v55 = vld [vmem:[%s8050_s29 + $0x30] sm:$0xff]  ;;  %v8135_v8 = vpop.permute.xlu1 %752 }
  0xbd   : > { %844 = vmatpush.msra.mxu0 %v774_v55 }
  0xbf   : > { %845 = vmatpush.msra.mxu0 %v772_v59 }
  0xc1   : > { %846 = vmatpush.msra.mxu0 %v770_v0 }
  0xc4   : > { %729 = vperm.xlu2 %7267, %v600_v56   ;;  %v806_v56 = vld [vmem:[%s8050_s29 + $0x130] sm:$0xff] }
  0xc5   : > { %873 = vmatpush.msra.mxu1 %v806_v56 }
  0xc7   : > { %874 = vmatpush.msra.mxu1 %v804_v60 }
  0xcc   : > { %974 = vperm.xlu2 %7267, %v960_v1   ;;  %v802_v1 = vld [vmem:[%s8050_s29 + $0x110] sm:$0xff] }
  0xcd   : > { %875 = vmatpush.msra.mxu1 %v802_v1 }
  0xcf   : > { %876 = vmatpush.msra.mxu1 %v800_v5 }
  0xd4   : > { %999 = vperm.xlu2 %7267, %v965_v2   ;;  %v771_v2 = vld [vmem:[%s8050_s29 + $0x18] sm:$0xff] }
  0xd5   : > { %904 = vmatpush.msra.mxu2 %v771_v2 }
  0xd7   : > { %905 = vmatpush.msra.mxu2 %v769_v6 }
  0xdc   : > { %1014 = vperm.xlu2 %7267, %v968_v3   ;;  %v803_v3 = vld [vmem:[%s8050_s29 + $0x118] sm:$0xff] }
  0xdd   : > { %933 = vmatpush.msra.mxu3 %v803_v3 }
  0xdf   : > { %934 = vmatpush.msra.mxu3 %v801_v7 }
  0xe4   : > { %979 = vperm.xlu2 %7267, %v961_v4   ;;  %v768_v4 = vld [vmem:[%s8050_s29] sm:$0xff]  ;;  %s14604_s29 = sshll.u32 %s14614_s25, 6 }
  0xe5   : > { %847 = vmatpush.msra.mxu0 %v768_v4  ;;  %s13959_s21 = scalar_lea.vmem %s13997_s17, %s14604_s29 }
 0x106   : > { %v652_v9 = vpop.xlane.xlu0 %651 }
 0x107   : > { %v646_v10 = vpop.xlane.xlu2 %645  ;;  %v658_v11 = vmul.f32 %v652_v9, %v7991_v22 }
 0x108   : > { %v656_v12 = vmul.f32 %v646_v10, %v7991_v22 }
 0x109   : > { %v662_v13 = vadd.f32 1e-05, %v658_v11 }
 0x10a   : > { %v660_v14 = vadd.f32 1e-05, %v656_v12 }
 0x10b   : > { %7272 = vrsqrt.f32 %v662_v13  ;;  %vm690_vm5 = vweird.f32 %v662_v13 }
 0x10c   : > { %7274 = vrsqrt.f32 %v660_v14  ;;  %vm670_vm2 = vweird.f32 %v660_v14 }
 0x10e   : > { %v655_v15 = vpop.xlane.xlu1 %654 }
 0x10f   : > { %v659_v16 = vmul.f32 %v655_v15, %v7991_v22  ;;  %v649_v17 = vpop.xlane.xlu2 %648 }
 0x110   : > { %v657_v18 = vmul.f32 %v649_v17, %v7991_v22 }
 0x111   : > { %v7273_v19 = vpop.eup %7272  ;;  %v663_v20 = vadd.f32 1e-05, %v659_v16 }
 0x112   : > { %v7275_v21 = vpop.eup %7274  ;;  %v661_v23 = vadd.f32 1e-05, %v657_v18  ;;  %v685_v25 = vmul.f32 %v7273_v19, %v662_v13  ;;  %vm691_vm6 = vweird.f32 %v7273_v19 }
 0x113   : > { %v665_v24 = vmul.f32 %v7275_v21, %v660_v14  ;;  %7276 = vrsqrt.f32 %v663_v20  ;;  %vm671_vm1 = vweird.f32 %v7275_v21  ;;  %vm692_vm9 = vmor %vm690_vm5, %vm691_vm6  ;;  %vm700_vm10 = vweird.f32 %v663_v20 }
 0x114   : > { %7278 = vrsqrt.f32 %v661_v23  ;;  %v686_v32 = vmul.f32 %v7273_v19, %v685_v25  ;;  %vm672_vm3 = vmor %vm670_vm2, %vm671_vm1  ;;  %vm680_vm7 = vweird.f32 %v661_v23 }
 0x115   : > { %v666_v26 = vmul.f32 %v7275_v21, %v665_v24 }
 0x116   : > { %v687_v36 = vmul.f32 0.5, %v686_v32 }
 0x117   : > { %v667_v31 = vmul.f32 0.5, %v666_v26  ;;  %v748_v51 = vpop.permute.xlu2 %747 }
 0x118   : > { %v688_v48 = vsub.f32 1.5, %v687_v36 }
 0x119   : > { %v7277_v33 = vpop.eup %7276  ;;  %v668_v34 = vsub.f32 1.5, %v667_v31  ;;  %v743_v56 = vpop.permute.xlu0 %742 }
 0x11a   : > { %v7279_v35 = vpop.eup %7278  ;;  %v695_v37 = vmul.f32 %v7277_v33, %v663_v20  ;;  %v689_v59 = vmul.f32 %v7273_v19, %v688_v48  ;;  %vm701_vm11 = vweird.f32 %v7277_v33 }
 0x11b   : > { %v675_v38 = vmul.f32 %v7279_v35, %v661_v23  ;;  %v669_v39 = vmul.f32 %v7275_v21, %v668_v34  ;;  %vm681_vm4 = vweird.f32 %v7279_v35  ;;  %vm702_vm12 = vmor %vm700_vm10, %vm701_vm11 }
 0x11c   : > { %v696_v49 = vmul.f32 %v7277_v33, %v695_v37  ;;  %vm682_vm8 = vmor %vm680_vm7, %vm681_vm4  ;;  %v693_v0 = vsel %vm692_vm9, %v7273_v19, %v689_v59 }
 0x11d   : > { %v676_v40 = vmul.f32 %v7279_v35, %v675_v38  ;;  %v673_v45 = vsel %vm672_vm3, %v7275_v21, %v669_v39  ;;  %v708_v6 = vmul.f32 %v693_v0, %v7995_v27  ;;  %v709_v7 = vmul.f32 %v693_v0, %v7997_v28 }
 0x11e   : > { %v704_v46 = vmul.f32 %v673_v45, %v7999_v29  ;;  %v705_v47 = vmul.f32 %v673_v45, %v8001_v30  ;;  %v697_v60 = vmul.f32 0.5, %v696_v49  ;;  %v948_v45 = vld [vmem:[%s13984_s4] sm:$0xff]  ;;  %v949_v49 = vld [vmem:[%s13984_s4 + $0x8] sm:$0xff] }
 0x11f   : > { %v677_v50 = vmul.f32 0.5, %v676_v40  ;;  %v725_v3 = vpop.permute.xlu2 %724 }
 0x120   : > { %v732_v52 = vmul.f32 %v8124_v62, %v704_v46  ;;  %v733_v53 = vmul.f32 %v8124_v62, %v705_v47  ;;  %v698_v63 = vsub.f32 1.5, %v697_v60 }
 0x121   : > { %v678_v55 = vsub.f32 1.5, %v677_v50  ;;  %v950_v50 = vld [vmem:[%s13984_s4 + $0x10] sm:$0xff] }
 0x122   : > { %v760_v57 = vadd.f32 %v743_v56, %v732_v52  ;;  %v761_v58 = vadd.f32 %v743_v56, %v733_v53  ;;  %v699_v9 = vmul.f32 %v7277_v33, %v698_v63  ;;  %v952_v52 = vld [vmem:[%s13984_s4 + $0x20] sm:$0xff]  ;;  %v953_v53 = vld [vmem:[%s13984_s4 + $0x28] sm:$0xff]  ;;  %v955_v56 = vld [vmem:[%s13984_s4 + $0x38] sm:$0xff] }
 0x123   : > { %v679_v29 = vmul.f32 %v7279_v35, %v678_v55  ;;  %v954_v55 = vld [vmem:[%s13984_s4 + $0x30] sm:$0xff] }
 0x124   : > { %848 = vmatmul.f32.vlgmr.msra.gmra.mxu0 %v760_v57  ;;  %877 = vmatmul.f32.vlgmr.msra.gmra.mxu1 %v761_v58  ;;  %v703_v10 = vsel %vm702_vm12, %v7277_v33, %v699_v9 }
 0x125   : > { %906 = vmatmul.f32.vlgmr.msra.gmra.mxu2 %v760_v57  ;;  %935 = vmatmul.f32.vlgmr.msra.gmra.mxu3 %v761_v58  ;;  %v683_v30 = vsel %vm682_vm8, %v7279_v35, %v679_v29  ;;  %v710_v12 = vmul.f32 %v703_v10, %v8013_v41  ;;  %v711_v13 = vmul.f32 %v703_v10, %v8015_v42  ;;  %v956_v57 = vld [vmem:[%s13984_s4 + $0x40] sm:$0xff] }
 0x126   : > { %v706_v61 = vmul.f32 %v683_v30, %v8017_v43  ;;  %v707_v62 = vmul.f32 %v683_v30, %v8019_v44  ;;  %v736_v43 = vmul.f32 %v725_v3, %v708_v6  ;;  %v737_v44 = vmul.f32 %v725_v3, %v709_v7  ;;  %v758_v15 = vpop.permute.xlu1 %757 }
 0x127   : > { %v730_v27 = vpop.permute.xlu2 %729 }
 0x128   : > { %v734_v1 = vmul.f32 %v8115_v54, %v706_v61  ;;  %v735_v2 = vmul.f32 %v8115_v54, %v707_v62  ;;  %v764_v54 = vadd.f32 %v8135_v8, %v736_v43  ;;  %v765_v11 = vadd.f32 %v8135_v8, %v737_v44 }
 0x129   : > { %v738_v28 = vmul.f32 %v730_v27, %v710_v12  ;;  %v739_v14 = vmul.f32 %v730_v27, %v711_v13  ;;  %v959_v12 = vld [vmem:[%s13984_s4 + $0x58] sm:$0xff] }
 0x12a   : > { %v762_v4 = vadd.f32 %v748_v51, %v734_v1  ;;  %v763_v5 = vadd.f32 %v748_v51, %v735_v2  ;;  %v951_v51 = vld [vmem:[%s13984_s4 + $0x18] sm:$0xff] }
 0x12b   : > { %v766_v16 = vadd.f32 %v758_v15, %v738_v28  ;;  %v767_v17 = vadd.f32 %v758_v15, %v739_v14  ;;  %v957_v14 = vld [vmem:[%s13984_s4 + $0x48] sm:$0xff] }
 0x12c   : > { %851 = vmatmul.f32.gmra.mxu0 %v762_v4  ;;  %880 = vmatmul.f32.gmra.mxu1 %v763_v5 }
 0x12d   : > { %909 = vmatmul.f32.gmra.mxu2 %v762_v4  ;;  %938 = vmatmul.f32.gmra.mxu3 %v763_v5  ;;  %v995_v5 = vpop.permute.xlu0 %994 }
 0x12f   : > { %v975_v58 = vpop.permute.xlu2 %974 }
 0x134   : > { %854 = vmatmul.f32.gmra.mxu0 %v764_v54  ;;  %883 = vmatmul.f32.gmra.mxu1 %v765_v11 }
 0x135   : > { %912 = vmatmul.f32.gmra.mxu2 %v764_v54  ;;  %941 = vmatmul.f32.gmra.mxu3 %v765_v11  ;;  %v958_v11 = vld [vmem:[%s13984_s4 + $0x50] sm:$0xff] }
 0x137   : > { %v1000_v44 = vpop.permute.xlu2 %999 }
 0x13c   : > { %857 = vmatmul.f32.gmra.mxu0 %v766_v16  ;;  %886 = vmatmul.f32.gmra.mxu1 %v767_v17 }
 0x13d   : > { %915 = vmatmul.f32.gmra.mxu2 %v766_v16  ;;  %944 = vmatmul.f32.gmra.mxu3 %v767_v17 }
 0x1a1   : > { %v849_v18 = vpop.f32.mrf.mxu0  ;;  %v878_v8 = vpop.f32.mrf.mxu1 }
 0x1a2   : > { %v879_v39 = vadd.f32 %v878_v8, %v849_v18 }
 0x1a8   : > { %v907_v19 = vpop.f32.mrf.mxu2  ;;  %v936_v41 = vpop.f32.mrf.mxu3 }
 0x1a9   : > { %v852_v20 = vpop.f32.mrf.mxu0  ;;  %v881_v42 = vpop.f32.mrf.mxu1  ;;  %v937_v48 = vadd.f32 %v936_v41, %v907_v19  ;;  %v966_v19 = vld [vmem:[%s13985_s5 + $0x30] sm:$0xff] }
 0x1aa   : > { %v882_v36 = vadd.f32 %v881_v42, %v852_v20 }
 0x1b0   : > { %v910_v21 = vpop.f32.mrf.mxu2  ;;  %v939_v23 = vpop.f32.mrf.mxu3 }
 0x1b1   : > { %v855_v24 = vpop.f32.mrf.mxu0  ;;  %v884_v25 = vpop.f32.mrf.mxu1  ;;  %v940_v47 = vadd.f32 %v939_v23, %v910_v21  ;;  %v969_v21 = vld [vmem:[%s13985_s5 + $0x48] sm:$0xff] }
 0x1b2   : > { %v885_v35 = vadd.f32 %v884_v25, %v855_v24 }
 0x1b8   : > { %v913_v26 = vpop.f32.mrf.mxu2  ;;  %v942_v31 = vpop.f32.mrf.mxu3 }
 0x1b9   : > { %v858_v32 = vpop.f32.mrf.mxu0  ;;  %v887_v33 = vpop.f32.mrf.mxu1  ;;  %v943_v46 = vadd.f32 %v942_v31, %v913_v26 }
 0x1ba   : > { %v888_v34 = vadd.f32 %v887_v33, %v858_v32 }
 0x1bc   : > { %1081 = vmatpush.msrb.mxu0 %v888_v34  ;;  %7248 = vmatpush.msrb.mxu2 %v888_v34 }
 0x1be   : > { %1082 = vmatpush.msrb.mxu0 %v885_v35  ;;  %7249 = vmatpush.msrb.mxu2 %v885_v35 }
 0x1c0   : > { %v916_v37 = vpop.f32.mrf.mxu2  ;;  %v945_v38 = vpop.f32.mrf.mxu3  ;;  %1083 = vmatpush.msrb.mxu0 %v882_v36  ;;  %7250 = vmatpush.msrb.mxu2 %v882_v36 }
 0x1c1   : > { %v946_v40 = vadd.f32 %v945_v38, %v916_v37 }
 0x1c2   : > { %1084 = vmatpush.msrb.mxu0 %v879_v39  ;;  %7251 = vmatpush.msrb.mxu2 %v879_v39 }
 0x1c3   : > { %1134 = vmatpush.msrb.mxu1 %v946_v40  ;;  %7252 = vmatpush.msrb.mxu3 %v946_v40 }
 0x1c4   : > { %6722 = vmatmul.msk.f32.vlgmr.msrb.gmra.mxu0 %vm1032_vm13, %v948_v45  ;;  %6732 = vmatmul.msk.f32.vlgmr.msrb.gmra.mxu2 %vm1032_vm13, %v958_v11 }
 0x1c5   : > { %1135 = vmatpush.msrb.mxu1 %v943_v46  ;;  %7253 = vmatpush.msrb.mxu3 %v943_v46 }
 0x1c7   : > { %1136 = vmatpush.msrb.mxu1 %v940_v47  ;;  %7254 = vmatpush.msrb.mxu3 %v940_v47 }
 0x1c9   : > { %1137 = vmatpush.msrb.mxu1 %v937_v48  ;;  %7255 = vmatpush.msrb.mxu3 %v937_v48 }
 0x1ca   : > { %6734 = vmatmul.msk.f32.vlgmr.msrb.gmra.mxu1 %vm1032_vm13, %v948_v45  ;;  %6744 = vmatmul.msk.f32.vlgmr.msrb.gmra.mxu3 %vm1032_vm13, %v958_v11 }
 0x1cc   : > { %6723 = vmatmul.msk.f32.gmra.mxu0 %vm1032_vm13, %v949_v49  ;;  %6733 = vmatmul.msk.f32.gmra.mxu2 %vm1032_vm13, %v959_v12 }
 0x1d2   : > { %6735 = vmatmul.msk.f32.gmra.mxu1 %vm1032_vm13, %v949_v49  ;;  %6745 = vmatmul.msk.f32.gmra.mxu3 %vm1032_vm13, %v959_v12 }
 0x1d4   : > { %6724 = vmatmul.msk.f32.gmra.mxu0 %vm1032_vm13, %v950_v50 }
 0x1da   : > { %6736 = vmatmul.msk.f32.gmra.mxu1 %vm1032_vm13, %v950_v50 }
 0x1dc   : > { %6725 = vmatmul.msk.f32.gmra.mxu0 %vm1032_vm13, %v951_v51 }
 0x1e2   : > { %6737 = vmatmul.msk.f32.gmra.mxu1 %vm1032_vm13, %v951_v51  ;;  %v1241_v51 = vld [vmem:[%s13986_s6] sm:$0xff] }
 0x1e4   : > { %6726 = vmatmul.msk.f32.gmra.mxu0 %vm1032_vm13, %v952_v52 }
 0x1ea   : > { %6738 = vmatmul.msk.f32.gmra.mxu1 %vm1032_vm13, %v952_v52  ;;  %v1242_v52 = vld [vmem:[%s13986_s6 + $0x8] sm:$0xff] }
 0x1ec   : > { %6727 = vmatmul.msk.f32.gmra.mxu0 %vm1032_vm13, %v953_v53 }
 0x1f2   : > { %6739 = vmatmul.msk.f32.gmra.mxu1 %vm1032_vm13, %v953_v53  ;;  %v1245_v53 = vld [vmem:[%s13986_s6 + $0x20] sm:$0xff] }
 0x1f4   : > { %6728 = vmatmul.msk.f32.gmra.mxu0 %vm1032_vm13, %v954_v55 }
 0x1fa   : > { %6740 = vmatmul.msk.f32.gmra.mxu1 %vm1032_vm13, %v954_v55  ;;  %v1246_v55 = vld [vmem:[%s13986_s6 + $0x28] sm:$0xff] }
 0x1fc   : > { %6729 = vmatmul.msk.f32.gmra.mxu0 %vm1032_vm13, %v955_v56 }
 0x202   : > { %6741 = vmatmul.msk.f32.gmra.mxu1 %vm1032_vm13, %v955_v56 }
 0x204   : > { %6730 = vmatmul.msk.f32.gmra.mxu0 %vm1032_vm13, %v956_v57 }
 0x20a   : > { %6742 = vmatmul.msk.f32.gmra.mxu1 %vm1032_vm13, %v956_v57 }
 0x20c   : > { %6731 = vmatmul.msk.f32.gmra.mxu0 %vm1032_vm13, %v957_v14 }
 0x212   : > { %6743 = vmatmul.msk.f32.gmra.mxu1 %vm1032_vm13, %v957_v14 }
 0x241   : > { %v1086_v59 = vpop.f32.mrf.mxu0 }
 0x242   : > { %v1087_v60 = vadd.f32 %v1086_v59, %v975_v58 }
 0x244   : > { %v1175_v29 = vmul.f32 0.35355338, %v1087_v60 }
 0x246   : > { %1417 = vmatpush.msra.mxu2 %v1175_v29 }
 0x247   : > { %v1139_v30 = vpop.f32.mrf.mxu1  ;;  %v8261_v34 = vpop.f32.mrf.mxu2 }
 0x248   : > { %v1140_v61 = vadd.f32 %v1139_v30, %v975_v58  ;;  %14167 = vst [vmem:[#allocation9_spill] sm:$0xff] %v8261_v34 }
 0x249   : > { %v8200_v62 = vpop.f32.mrf.mxu0 }
 0x24a   : > { %14161 = vst [vmem:[#allocation3_spill] sm:$0xff] %v8200_v62  ;;  %v1176_v63 = vmul.f32 0.35355338, %v1140_v61  ;;  %v1263_v62 = vld [vmem:[%s13986_s6 + $0xb0] sm:$0xff] }
 0x24c   : > { %1530 = vmatpush.msra.mxu3 %v1176_v63 }
 0x24d   : > { %v8263_v36 = vpop.f32.mrf.mxu3 }
 0x24e   : > { %14168 = vst [vmem:[#allocation10_spill] sm:$0xff] %v8263_v36 }
 0x24f   : > { %v8202_v0 = vpop.f32.mrf.mxu1  ;;  %v8269_v39 = vpop.f32.mrf.mxu2 }
 0x250   : > { %14162 = vst [vmem:[#allocation4_spill] sm:$0xff] %v8202_v0  ;;  %v1261_v0 = vld [vmem:[%s13986_s6 + $0xa0] sm:$0xff] }
 0x251   : > { %v8204_v1 = vpop.f32.mrf.mxu0  ;;  %14169 = vst [vmem:[#allocation11_spill] sm:$0xff] %v8269_v39 }
 0x252   : > { %14163 = vst [vmem:[#allocation5_spill] sm:$0xff] %v8204_v1  ;;  %v1259_v1 = vld [vmem:[%s13986_s6 + $0x90] sm:$0xff] }
 0x255   : > { %v8271_v40 = vpop.f32.mrf.mxu3 }
 0x256   : > { %14170 = vst [vmem:[#allocation12_spill] sm:$0xff] %v8271_v40 }
 0x257   : > { %v8206_v2 = vpop.f32.mrf.mxu1 }
 0x258   : > { %14164 = vst [vmem:[#allocation6_spill] sm:$0xff] %v8206_v2  ;;  %v1257_v2 = vld [vmem:[%s13986_s6 + $0x80] sm:$0xff] }
 0x259   : > { %v8208_v3 = vpop.f32.mrf.mxu0 }
 0x25a   : > { %14165 = vst [vmem:[#allocation7_spill] sm:$0xff] %v8208_v3 }
 0x25f   : > { %v8210_v4 = vpop.f32.mrf.mxu1 }
 0x260   : > { %14166 = vst [vmem:[#allocation8_spill] sm:$0xff] %v8210_v4 }
 0x261   : > { %v1098_v6 = vpop.f32.mrf.mxu0 }
 0x262   : > { %v1099_v7 = vadd.f32 %v1098_v6, %v995_v5  ;;  %v1244_v6 = vld [vmem:[%s13986_s6 + $0x18] sm:$0xff] }
 0x264   : > { %1177 = vxpose.xlu1.b32.start.end [1/1] (short) %v1099_v7, 128  ;;  %v1247_v7 = vld [vmem:[%s13986_s6 + $0x30] sm:$0xff] }
 0x267   : > { %v1151_v9 = vpop.f32.mrf.mxu1 }
 0x268   : > { %v1152_v43 = vadd.f32 %v1151_v9, %v995_v5  ;;  %v1243_v5 = vld [vmem:[%s13986_s6 + $0x10] sm:$0xff]  ;;  %v1248_v9 = vld [vmem:[%s13986_s6 + $0x38] sm:$0xff] }
 0x269   : > { %v1101_v10 = vpop.f32.mrf.mxu0 }
 0x26a   : > { %v1102_v54 = vadd.f32 %v1101_v10, %v1000_v44  ;;  %1209 = vxpose.xlu0.b32.start.end [1/1] (short) %v1152_v43, 128 }
 0x26c   : > { %2142 = vxpose.xlu2.b32.start.end [1/1] (short) %v1102_v54, 128 }
 0x26f   : > { %v1154_v13 = vpop.f32.mrf.mxu1 }
 0x270   : > { %v1155_v27 = vadd.f32 %v1154_v13, %v1000_v44 }
 0x2ea   : > { %2174 = vxpose.xlu0.b32.start.end [1/1] (short) %v1155_v27, 128  ;;  %v1104_v27 = vpop.f32.mrf.mxu0 }
 0x308   : > { %v1193_v28 = vpop.trf.xlu1 }
 0x309   : > { %6746 = vmatmul.msk.f32.vlgmr.msra.gmra.mxu2 %vm1305_vm14, %v1193_v28  ;;  %6778 = vmatmul.msk.f32.vlgmr.msra.gmra.mxu3 %vm1305_vm14, %v1193_v28 }
 0x30e   : > { %v1225_v31 = vpop.trf.xlu0 }
 0x310   : > { %v1194_v15 = vpop.trf.xlu1 }
 0x311   : > { %6747 = vmatmul.msk.f32.gmra.mxu2 %vm1305_vm14, %v1194_v15  ;;  %6779 = vmatmul.msk.f32.gmra.mxu3 %vm1305_vm14, %v1194_v15  ;;  %v1157_v15 = vpop.f32.mrf.mxu1 }
 0x316   : > { %v1226_v33 = vpop.trf.xlu0 }
 0x318   : > { %v1195_v16 = vpop.trf.xlu1 }
 0x319   : > { %6748 = vmatmul.msk.f32.gmra.mxu2 %vm1305_vm14, %v1195_v16  ;;  %6780 = vmatmul.msk.f32.gmra.mxu3 %vm1305_vm14, %v1195_v16 }
 0x31e   : > { %v1227_v37 = vpop.trf.xlu0 }
 0x320   : > { %v1196_v17 = vpop.trf.xlu1 }
 0x321   : > { %6749 = vmatmul.msk.f32.gmra.mxu2 %vm1305_vm14, %v1196_v17  ;;  %6781 = vmatmul.msk.f32.gmra.mxu3 %vm1305_vm14, %v1196_v17 }
 0x326   : > { %v1228_v45 = vpop.trf.xlu0 }
 0x328   : > { %v1197_v18 = vpop.trf.xlu1 }
 0x329   : > { %6750 = vmatmul.msk.f32.gmra.mxu2 %vm1305_vm14, %v1197_v18  ;;  %6782 = vmatmul.msk.f32.gmra.mxu3 %vm1305_vm14, %v1197_v18 }
 0x32e   : > { %v1229_v48 = vpop.trf.xlu0 }
 0x330   : > { %v1198_v8 = vpop.trf.xlu1 }
 0x331   : > { %6751 = vmatmul.msk.f32.gmra.mxu2 %vm1305_vm14, %v1198_v8  ;;  %6783 = vmatmul.msk.f32.gmra.mxu3 %vm1305_vm14, %v1198_v8  ;;  %v1249_v8 = vld [vmem:[%s13986_s6 + $0x40] sm:$0xff] }
 0x336   : > { %1004 = vperm.xlu1 %7269, %v966_v19   ;;  %v1230_v56 = vpop.trf.xlu0  ;;  %v1250_v19 = vld [vmem:[%s13986_s6 + $0x48] sm:$0xff] }
 0x338   : > { %v1199_v41 = vpop.trf.xlu1 }
 0x339   : > { %6752 = vmatmul.msk.f32.gmra.mxu2 %vm1305_vm14, %v1199_v41  ;;  %6784 = vmatmul.msk.f32.gmra.mxu3 %vm1305_vm14, %v1199_v41 }
 0x33e   : > { %v1231_v10 = vpop.trf.xlu0 }
 0x340   : > { %v1200_v20 = vpop.trf.xlu1 }
 0x341   : > { %6753 = vmatmul.msk.f32.gmra.mxu2 %vm1305_vm14, %v1200_v20  ;;  %6785 = vmatmul.msk.f32.gmra.mxu3 %vm1305_vm14, %v1200_v20 }
 0x348   : > { %v1201_v42 = vpop.trf.xlu1 }
 0x349   : > { %6754 = vmatmul.msk.f32.gmra.mxu2 %vm1305_vm14, %v1201_v42  ;;  %6786 = vmatmul.msk.f32.gmra.mxu3 %vm1305_vm14, %v1201_v42 }
 0x34d   : > { %1019 = vperm.xlu2 %7267, %v969_v21  }
 0x350   : > { %v1202_v23 = vpop.trf.xlu1 }
 0x351   : > { %6755 = vmatmul.msk.f32.gmra.mxu2 %vm1305_vm14, %v1202_v23  ;;  %6787 = vmatmul.msk.f32.gmra.mxu3 %vm1305_vm14, %v1202_v23  ;;  %v1232_v23 = vpop.trf.xlu0 }
 0x358   : > { %v1203_v24 = vpop.trf.xlu1 }
 0x359   : > { %6756 = vmatmul.msk.f32.gmra.mxu2 %vm1305_vm14, %v1203_v24  ;;  %6788 = vmatmul.msk.f32.gmra.mxu3 %vm1305_vm14, %v1203_v24 }
 0x360   : > { %v1204_v25 = vpop.trf.xlu1 }
 0x361   : > { %6757 = vmatmul.msk.f32.gmra.mxu2 %vm1305_vm14, %v1204_v25  ;;  %6789 = vmatmul.msk.f32.gmra.mxu3 %vm1305_vm14, %v1204_v25 }
 0x368   : > { %v1205_v26 = vpop.trf.xlu1 }
 0x369   : > { %6758 = vmatmul.msk.f32.gmra.mxu2 %vm1305_vm14, %v1205_v26  ;;  %6790 = vmatmul.msk.f32.gmra.mxu3 %vm1305_vm14, %v1205_v26  ;;  %v1251_v26 = vld [vmem:[%s13986_s6 + $0x50] sm:$0xff] }
 0x370   : > { %v1206_v32 = vpop.trf.xlu1 }
 0x371   : > { %6759 = vmatmul.msk.f32.gmra.mxu2 %vm1305_vm14, %v1206_v32  ;;  %6791 = vmatmul.msk.f32.gmra.mxu3 %vm1305_vm14, %v1206_v32 }
 0x378   : > { %v1207_v35 = vpop.trf.xlu1 }
 0x379   : > { %6760 = vmatmul.msk.f32.gmra.mxu2 %vm1305_vm14, %v1207_v35  ;;  %6792 = vmatmul.msk.f32.gmra.mxu3 %vm1305_vm14, %v1207_v35 }
 0x380   : > { %v1208_v38 = vpop.trf.xlu1 }
 0x381   : > { %6761 = vmatmul.msk.f32.gmra.mxu2 %vm1305_vm14, %v1208_v38  ;;  %6793 = vmatmul.msk.f32.gmra.mxu3 %vm1305_vm14, %v1208_v38 }
 0x389   : > { %6762 = vmatmul.msk.f32.gmra.mxu2 %vm1305_vm14, %v1225_v31  ;;  %6794 = vmatmul.msk.f32.gmra.mxu3 %vm1305_vm14, %v1225_v31  ;;  %v1252_v31 = vld [vmem:[%s13986_s6 + $0x58] sm:$0xff] }
 0x38c   : > { %v1419_v46 = vpop.f32.mrf.mxu2  ;;  %v1532_v47 = vpop.f32.mrf.mxu3 }
 0x38d   : > { %v8291_v59 = vadd.f32 %v1419_v46, %v1241_v51  ;;  %v8293_v60 = vadd.f32 %v1532_v47, %v1242_v52  ;;  %v1233_v46 = vpop.trf.xlu0  ;;  %v1253_v47 = vld [vmem:[%s13986_s6 + $0x60] sm:$0xff] }
 0x38f   : > { %14171 = vst [vmem:[#allocation13_spill] sm:$0xff] %v8291_v59 }
 0x390   : > { %14172 = vst [vmem:[#allocation14_spill] sm:$0xff] %v8293_v60 }
 0x391   : > { %6763 = vmatmul.msk.f32.gmra.mxu2 %vm1305_vm14, %v1226_v33  ;;  %6795 = vmatmul.msk.f32.gmra.mxu3 %vm1305_vm14, %v1226_v33 }
 0x394   : > { %v1422_v49 = vpop.f32.mrf.mxu2  ;;  %v1535_v50 = vpop.f32.mrf.mxu3 }
 0x395   : > { %v8317_v54 = vadd.f32 %v1422_v49, %v1243_v5  ;;  %v8319_v11 = vadd.f32 %v1535_v50, %v1244_v6 }
 0x397   : > { %14175 = vst [vmem:[#allocation17_spill] sm:$0xff] %v8317_v54 }
 0x398   : > { %14176 = vst [vmem:[#allocation18_spill] sm:$0xff] %v8319_v11 }
 0x399   : > { %6764 = vmatmul.msk.f32.gmra.mxu2 %vm1305_vm14, %v1227_v37  ;;  %6796 = vmatmul.msk.f32.gmra.mxu3 %vm1305_vm14, %v1227_v37 }
 0x39c   : > { %v1425_v57 = vpop.f32.mrf.mxu2  ;;  %v1538_v58 = vpop.f32.mrf.mxu3 }
 0x39d   : > { %v8295_v29 = vadd.f32 %v1425_v57, %v1245_v53  ;;  %v8297_v30 = vadd.f32 %v1538_v58, %v1246_v55  ;;  %v1256_v57 = vld [vmem:[%s13986_s6 + $0x78] sm:$0xff]  ;;  %v1234_v58 = vpop.trf.xlu0 }
 0x39f   : > { %14173 = vst [vmem:[#allocation15_spill] sm:$0xff] %v8295_v29  ;;  %v1628_v61 = vmax.f32 %v8291_v59, %v8295_v29  ;;  %v1665_v63 = vmax.f32 %v8293_v60, %v8297_v30  ;;  %v1267_v60 = vld [vmem:[%s13986_s6 + $0xd0] sm:$0xff] }
 0x3a0   : > { %14174 = vst [vmem:[#allocation16_spill] sm:$0xff] %v8297_v30 }
 0x3a1   : > { %6765 = vmatmul.msk.f32.gmra.mxu2 %vm1305_vm14, %v1228_v45  ;;  %6797 = vmatmul.msk.f32.gmra.mxu3 %vm1305_vm14, %v1228_v45 }
 0x3a4   : > { %v1428_v43 = vpop.f32.mrf.mxu2  ;;  %v1541_v44 = vpop.f32.mrf.mxu3 }
 0x3a5   : > { %v8321_v12 = vadd.f32 %v1428_v43, %v1247_v7  ;;  %v8323_v13 = vadd.f32 %v1541_v44, %v1248_v9 }
 0x3a7   : > { %14177 = vst [vmem:[#allocation19_spill] sm:$0xff] %v8321_v12  ;;  %v1629_v28 = vmax.f32 %v8317_v54, %v8321_v12  ;;  %v1666_v14 = vmax.f32 %v8319_v11, %v8323_v13  ;;  %v1265_v11 = vld [vmem:[%s13986_s6 + $0xc0] sm:$0xff] }
 0x3a8   : > { %14178 = vst [vmem:[#allocation20_spill] sm:$0xff] %v8323_v13  ;;  %v1005_v16 = vpop.permute.xlu1 %1004 }
 0x3a9   : > { %v1105_v17 = vadd.f32 %v1104_v27, %v1005_v16  ;;  %v1158_v18 = vadd.f32 %v1157_v15, %v1005_v16  ;;  %6766 = vmatmul.msk.f32.gmra.mxu2 %vm1305_vm14, %v1229_v48  ;;  %6798 = vmatmul.msk.f32.gmra.mxu3 %vm1305_vm14, %v1229_v48  ;;  %v1254_v48 = vld [vmem:[%s13986_s6 + $0x68] sm:$0xff]  ;;  %v962_v27 = vld [vmem:[%s13985_s5 + $0x10] sm:$0xff]  ;;  %v963_v15 = vld [vmem:[%s13985_s5 + $0x18] sm:$0xff] }
 0x3ab   : > { %3139 = vxpose.xlu2.b32.start.end [1/1] (short) %v1158_v18, 128  ;;  %3107 = vxpose.xlu1.b32.start.end [1/1] (short) %v1105_v17, 128 }
 0x3ac   : > { %v1431_v41 = vpop.f32.mrf.mxu2  ;;  %v1544_v20 = vpop.f32.mrf.mxu3 }
 0x3ad   : > { %v8337_v42 = vadd.f32 %v1431_v41, %v1249_v8  ;;  %v8339_v21 = vadd.f32 %v1544_v20, %v1250_v19 }
 0x3af   : > { %14179 = vst [vmem:[#allocation21_spill] sm:$0xff] %v8337_v42  ;;  %v8342_v24 = vmax.f32 %v1628_v61, %v8337_v42  ;;  %v8345_v25 = vmax.f32 %v1665_v63, %v8339_v21  ;;  %v1271_v42 = vld [vmem:[%s13986_s6 + $0xf0] sm:$0xff] }
 0x3b0   : > { %14180 = vst [vmem:[#allocation22_spill] sm:$0xff] %v8339_v21 }
 0x3b1   : > { %6767 = vmatmul.msk.f32.gmra.mxu2 %vm1305_vm14, %v1230_v56  ;;  %6799 = vmatmul.msk.f32.gmra.mxu3 %vm1305_vm14, %v1230_v56  ;;  %v1255_v56 = vld [vmem:[%s13986_s6 + $0x70] sm:$0xff] }
 0x3b4   : > { %v1434_v32 = vpop.f32.mrf.mxu2  ;;  %v1547_v33 = vpop.f32.mrf.mxu3 }
 0x3b5   : > { %v8355_v35 = vadd.f32 %v1434_v32, %v1251_v26  ;;  %v8357_v37 = vadd.f32 %v1547_v33, %v1252_v31 }
 0x3b7   : > { %14181 = vst [vmem:[#allocation23_spill] sm:$0xff] %v8355_v35  ;;  %v8360_v38 = vmax.f32 %v1629_v28, %v8355_v35  ;;  %v8363_v45 = vmax.f32 %v1666_v14, %v8357_v37  ;;  %v1258_v35 = vld [vmem:[%s13986_s6 + $0x88] sm:$0xff] }
 0x3b8   : > { %14182 = vst [vmem:[#allocation24_spill] sm:$0xff] %v8357_v37 }
 0x3b9   : > { %6768 = vmatmul.msk.f32.gmra.mxu2 %vm1305_vm14, %v1231_v10  ;;  %6800 = vmatmul.msk.f32.gmra.mxu3 %vm1305_vm14, %v1231_v10  ;;  %v1235_v10 = vpop.trf.xlu0 }
 0x3bc   : > { %v1437_v49 = vpop.f32.mrf.mxu2  ;;  %v1550_v50 = vpop.f32.mrf.mxu3 }
 0x3bd   : > { %v8373_v51 = vadd.f32 %v1437_v49, %v1253_v47  ;;  %v8375_v52 = vadd.f32 %v1550_v50, %v1254_v48 }
 0x3bf   : > { %v14184_v12 = vmax.f32 %v8342_v24, %v8373_v51 }
 0x3c1   : > { %6769 = vmatmul.msk.f32.gmra.mxu2 %vm1305_vm14, %v1232_v23  ;;  %6801 = vmatmul.msk.f32.gmra.mxu3 %vm1305_vm14, %v1232_v23  ;;  %v1236_v16 = vpop.trf.xlu0 }
 0x3c4   : > { %v1440_v61 = vpop.f32.mrf.mxu2  ;;  %v1553_v63 = vpop.f32.mrf.mxu3 }
 0x3c5   : > { %v8389_v5 = vadd.f32 %v1440_v61, %v1255_v56  ;;  %v8391_v6 = vadd.f32 %v1553_v63, %v1256_v57 }
 0x3c9   : > { %6770 = vmatmul.msk.f32.gmra.mxu2 %vm1305_vm14, %v1233_v46  ;;  %6802 = vmatmul.msk.f32.gmra.mxu3 %vm1305_vm14, %v1233_v46  ;;  %v1237_v8 = vpop.trf.xlu0 }
 0x3cc   : > { %v8399_v43 = vpop.f32.mrf.mxu2  ;;  %v8401_v44 = vpop.f32.mrf.mxu3 }
 0x3cd   : > { %v8504_v13 = vadd.f32 %v8399_v43, %v1257_v2  ;;  %v1260_v2 = vld [vmem:[%s13986_s6 + $0x98] sm:$0xff]  ;;  %v8550_v24 = vadd.f32 %v8401_v44, %v1258_v35 }
 0x3ce   : > { %v1268_v35 = vld [vmem:[%s13986_s6 + $0xd8] sm:$0xff] }
 0x3cf   : > { %v1634_v29 = vmax.f32 %v14184_v12, %v8504_v13 }
 0x3d0   : > { %984 = vperm.xlu0 %7268, %v962_v27  }
 0x3d1   : > { %6771 = vmatmul.msk.f32.gmra.mxu2 %vm1305_vm14, %v1234_v58  ;;  %6803 = vmatmul.msk.f32.gmra.mxu3 %vm1305_vm14, %v1234_v58  ;;  %v1238_v20 = vpop.trf.xlu0 }
 0x3d4   : > { %v8408_v28 = vpop.f32.mrf.mxu2  ;;  %v8410_v14 = vpop.f32.mrf.mxu3 }
 0x3d5   : > { %v8507_v30 = vadd.f32 %v8408_v28, %v1259_v1  ;;  %v1269_v28 = vld [vmem:[%s13986_s6 + $0xe0] sm:$0xff]  ;;  %v8553_v12 = vadd.f32 %v8410_v14, %v1260_v2  ;;  %v1279_v2 = vld [vmem:[%s13986_s6 + $0x130] sm:$0xff] }
 0x3d7   : > { %14183 = vst [vmem:[#allocation25_spill] sm:$0xff] %v8507_v30 }
 0x3d8   : > { %989 = vperm.xlu0 %7268, %v963_v15  }
 0x3d9   : > { %6772 = vmatmul.msk.f32.gmra.mxu2 %vm1305_vm14, %v1235_v10  ;;  %6804 = vmatmul.msk.f32.gmra.mxu3 %vm1305_vm14, %v1235_v10  ;;  %v1239_v33 = vpop.trf.xlu0 }
 0x3dc   : > { %v1449_v17 = vpop.f32.mrf.mxu2  ;;  %v8417_v18 = vpop.f32.mrf.mxu3 }
 0x3dd   : > { %v8521_v43 = vadd.f32 %v1449_v17, %v1261_v0  ;;  %v14185_v0 = vmax.f32 %v8360_v38, %v8389_v5  ;;  %v1273_v38 = vld [vmem:[%s13986_s6 + $0x100] sm:$0xff] }
 0x3df   : > { %v1635_v17 = vmax.f32 %v14185_v0, %v8507_v30  ;;  %v1275_v0 = vld [vmem:[%s13986_s6 + $0x110] sm:$0xff]  ;;  %v1636_v30 = vmax.f32 %v1634_v29, %v8521_v43  ;;  %v1277_v29 = vld [vmem:[%s13986_s6 + $0x120] sm:$0xff] }
 0x3e1   : > { %6773 = vmatmul.msk.f32.gmra.mxu2 %vm1305_vm14, %v1236_v16  ;;  %6805 = vmatmul.msk.f32.gmra.mxu3 %vm1305_vm14, %v1236_v16  ;;  %v1240_v48 = vpop.trf.xlu0 }
 0x3e4   : > { %v1452_v19 = vpop.f32.mrf.mxu2  ;;  %v8421_v41 = vpop.f32.mrf.mxu3 }
 0x3e5   : > { %v8523_v1 = vadd.f32 %v1452_v19, %v1263_v62  ;;  %v1262_v62 = vld [vmem:[%s13986_s6 + $0xa8] sm:$0xff]  ;;  %v1264_v19 = vld [vmem:[%s13986_s6 + $0xb8] sm:$0xff] }
 0x3e9   : > { %6774 = vmatmul.msk.f32.gmra.mxu2 %vm1305_vm14, %v1237_v8  ;;  %6806 = vmatmul.msk.f32.gmra.mxu3 %vm1305_vm14, %v1237_v8 }
 0x3ec   : > { %v1455_v23 = vpop.f32.mrf.mxu2  ;;  %v8425_v26 = vpop.f32.mrf.mxu3 }
 0x3ed   : > { %v8545_v54 = vadd.f32 %v1455_v23, %v1265_v11  ;;  %v1637_v11 = vmax.f32 %v1635_v17, %v8523_v1  ;;  %v8574_v23 = vadd.f32 %v8417_v18, %v1262_v62  ;;  %v1270_v18 = vld [vmem:[%s13986_s6 + $0xe8] sm:$0xff] }
 0x3ef   : > { %14186 = vst [vmem:[#allocation26_spill] sm:$0xff] %v8545_v54 }
 0x3f1   : > { %6775 = vmatmul.msk.f32.gmra.mxu2 %vm1305_vm14, %v1238_v20  ;;  %6807 = vmatmul.msk.f32.gmra.mxu3 %vm1305_vm14, %v1238_v20 }
 0x3f4   : > { %v1458_v31 = vpop.f32.mrf.mxu2  ;;  %v8429_v32 = vpop.f32.mrf.mxu3 }
 0x3f5   : > { %v8547_v59 = vadd.f32 %v1458_v31, %v1267_v60  ;;  %v1266_v60 = vld [vmem:[%s13986_s6 + $0xc8] sm:$0xff]  ;;  %v8577_v31 = vadd.f32 %v8421_v41, %v1264_v19  ;;  %v1272_v41 = vld [vmem:[%s13986_s6 + $0xf8] sm:$0xff] }
 0x3f7   : > { %14187 = vst [vmem:[#allocation27_spill] sm:$0xff] %v8547_v59 }
 0x3f9   : > { %6776 = vmatmul.msk.f32.gmra.mxu2 %vm1305_vm14, %v1239_v33  ;;  %6808 = vmatmul.msk.f32.gmra.mxu3 %vm1305_vm14, %v1239_v33 }
 0x3fc   : > { %v1461_v46 = vpop.f32.mrf.mxu2  ;;  %v8433_v47 = vpop.f32.mrf.mxu3 }
 0x3fd   : > { %v8569_v44 = vadd.f32 %v1461_v46, %v1269_v28  ;;  %v1638_v46 = vmax.f32 %v1636_v30, %v8545_v54  ;;  %v14188_v30 = vmax.f32 %v8345_v25, %v8375_v52  ;;  %v8612_v54 = vadd.f32 %v8425_v26, %v1266_v60  ;;  %v1283_v25 = vld [vmem:[%s13986_s6 + $0x150] sm:$0xff]  ;;  %v1276_v26 = vld [vmem:[%s13986_s6 + $0x118] sm:$0xff] }
 0x3ff   : > { %v1671_v19 = vmax.f32 %v14188_v30, %v8550_v24 }
 0x401   : > { %6777 = vmatmul.msk.f32.gmra.mxu2 %vm1305_vm14, %v1240_v48  ;;  %6809 = vmatmul.msk.f32.gmra.mxu3 %vm1305_vm14, %v1240_v48 }
 0x404   : > { %v1464_v49 = vpop.f32.mrf.mxu2  ;;  %v8437_v50 = vpop.f32.mrf.mxu3 }
 0x405   : > { %v8571_v14 = vadd.f32 %v1464_v49, %v1271_v42  ;;  %v1639_v42 = vmax.f32 %v1637_v11, %v8547_v59  ;;  %v14189_v11 = vmax.f32 %v8363_v45, %v8391_v6  ;;  %v1274_v45 = vld [vmem:[%s13986_s6 + $0x108] sm:$0xff]  ;;  %v8643_v30 = vadd.f32 %v8437_v50, %v1272_v41 }
 0x407   : > { %v1672_v59 = vmax.f32 %v14189_v11, %v8553_v12  ;;  %14191 = vst [vmem:[#allocation29_spill] sm:$0xff] %v8643_v30  ;;  %v1285_v11 = vld [vmem:[%s13986_s6 + $0x160] sm:$0xff] }
 0x40c   : > { %v8439_v56 = vpop.f32.mrf.mxu2  ;;  %v8441_v57 = vpop.f32.mrf.mxu3 }
 0x40d   : > { %v8596_v49 = vadd.f32 %v8439_v56, %v1273_v38  ;;  %v8615_v56 = vadd.f32 %v8429_v32, %v1268_v35  ;;  %v1640_v38 = vmax.f32 %v1638_v46, %v8569_v44  ;;  %v1673_v35 = vmax.f32 %v1671_v19, %v8574_v23 }
 0x40e   : > { %v1674_v46 = vmax.f32 %v1672_v59, %v8577_v31  ;;  %v1278_v59 = vld [vmem:[%s13986_s6 + $0x128] sm:$0xff]  ;;  %v8668_v19 = vadd.f32 %v8441_v57, %v1274_v45 }
 0x40f   : > { %14190 = vst [vmem:[#allocation28_spill] sm:$0xff] %v8615_v56 }
 0x410   : > { %v1676_v41 = vmax.f32 %v1674_v46, %v8615_v56  ;;  %v1293_v56 = vld [vmem:[%s13986_s6 + $0x1a0] sm:$0xff] }
 0x412   : > { %v1678_v46 = vmax.f32 %v1676_v41, %v8643_v30  ;;  %v1297_v30 = vld [vmem:[%s13986_s6 + $0x1c0] sm:$0xff] }
 0x414   : > { %v8443_v58 = vpop.f32.mrf.mxu2  ;;  %v8445_v61 = vpop.f32.mrf.mxu3 }
 0x415   : > { %v8599_v28 = vadd.f32 %v8443_v58, %v1275_v0  ;;  %v1281_v58 = vld [vmem:[%s13986_s6 + $0x140] sm:$0xff]  ;;  %v1641_v0 = vmax.f32 %v1639_v42, %v8571_v14  ;;  %v8640_v42 = vadd.f32 %v8433_v47, %v1270_v18  ;;  %v1280_v47 = vld [vmem:[%s13986_s6 + $0x138] sm:$0xff]  ;;  %v1675_v18 = vmax.f32 %v1673_v35, %v8612_v54 }
 0x417   : > { %v1677_v35 = vmax.f32 %v1675_v18, %v8640_v42 }
 0x419   : > { %v1679_v18 = vmax.f32 %v1677_v35, %v8668_v19 }
 0x41c   : > { %v8447_v63 = vpop.f32.mrf.mxu2  ;;  %v8449_v10 = vpop.f32.mrf.mxu3 }
 0x41d   : > { %v8632_v32 = vadd.f32 %v8447_v63, %v1277_v29  ;;  %v1287_v63 = vld [vmem:[%s13986_s6 + $0x170] sm:$0xff]  ;;  %v1643_v29 = vmax.f32 %v1641_v0, %v8599_v28  ;;  %v1289_v0 = vld [vmem:[%s13986_s6 + $0x180] sm:$0xff] }
 0x424   : > { %v8451_v27 = vpop.f32.mrf.mxu2  ;;  %v8453_v15 = vpop.f32.mrf.mxu3 }
 0x425   : > { %v8635_v60 = vadd.f32 %v8451_v27, %v1279_v2  ;;  %v1642_v27 = vmax.f32 %v1640_v38, %v8596_v49  ;;  %v8671_v38 = vadd.f32 %v8445_v61, %v1276_v26  ;;  %v1282_v61 = vld [vmem:[%s13986_s6 + $0x148] sm:$0xff] }
 0x427   : > { %v1645_v57 = vmax.f32 %v1643_v29, %v8635_v60  ;;  %v8702_v29 = vadd.f32 %v8453_v15, %v1280_v47  ;;  %v1288_v15 = vld [vmem:[%s13986_s6 + $0x178] sm:$0xff]  ;;  %v1680_v41 = vmax.f32 %v1678_v46, %v8671_v38 }
 0x429   : > { %v1682_v35 = vmax.f32 %v1680_v41, %v8702_v29 }
 0x42c   : > { %v8455_v16 = vpop.f32.mrf.mxu2  ;;  %v8457_v8 = vpop.f32.mrf.mxu3 }
 0x42d   : > { %v8660_v50 = vadd.f32 %v8455_v16, %v1281_v58  ;;  %v1291_v16 = vld [vmem:[%s13986_s6 + $0x190] sm:$0xff]  ;;  %v1644_v58 = vmax.f32 %v1642_v27, %v8632_v32  ;;  %v8699_v27 = vadd.f32 %v8449_v10, %v1278_v59  ;;  %v1286_v10 = vld [vmem:[%s13986_s6 + $0x168] sm:$0xff] }
 0x434   : > { %v8459_v20 = vpop.f32.mrf.mxu2  ;;  %v8461_v33 = vpop.f32.mrf.mxu3 }
 0x435   : > { %v8663_v2 = vadd.f32 %v8459_v20, %v1283_v25  ;;  %v967_v20 = vld [vmem:[%s13985_s5 + $0x38] sm:$0xff] }
 0x436   : > { %v1284_v25 = vld [vmem:[%s13986_s6 + $0x158] sm:$0xff] }
 0x43c   : > { %v8463_v48 = vpop.f32.mrf.mxu2  ;;  %v8465_v9 = vpop.f32.mrf.mxu3 }
 0x43d   : > { %v8691_v45 = vadd.f32 %v8463_v48, %v1285_v11  ;;  %v1295_v48 = vld [vmem:[%s13986_s6 + $0x1b0] sm:$0xff]  ;;  %v1646_v11 = vmax.f32 %v1644_v58, %v8660_v50  ;;  %v8727_v58 = vadd.f32 %v8457_v8, %v1282_v61  ;;  %v1290_v8 = vld [vmem:[%s13986_s6 + $0x188] sm:$0xff]  ;;  %v8755_v46 = vadd.f32 %v8465_v9, %v1286_v10  ;;  %v1296_v9 = vld [vmem:[%s13986_s6 + $0x1b8] sm:$0xff] }
 0x444   : > { %v8467_v55 = vpop.f32.mrf.mxu2  ;;  %v8469_v7 = vpop.f32.mrf.mxu3 }
 0x445   : > { %v8694_v26 = vadd.f32 %v8467_v55, %v1287_v63  ;;  %v1647_v63 = vmax.f32 %v1645_v57, %v8663_v2  ;;  %v8730_v57 = vadd.f32 %v8461_v33, %v1284_v25  ;;  %v1292_v33 = vld [vmem:[%s13986_s6 + $0x198] sm:$0xff]  ;;  %v1681_v25 = vmax.f32 %v1679_v18, %v8699_v27 }
 0x447   : > { %v1683_v10 = vmax.f32 %v1681_v25, %v8727_v58 }
 0x44c   : > { %v8471_v53 = vpop.f32.mrf.mxu2  ;;  %v8473_v22 = vpop.f32.mrf.mxu3 }
 0x44d   : > { %v8719_v59 = vadd.f32 %v8471_v53, %v1289_v0  ;;  %v1648_v53 = vmax.f32 %v1646_v11, %v8691_v45  ;;  %v1649_v0 = vmax.f32 %v1647_v63, %v8694_v26  ;;  %v8758_v11 = vadd.f32 %v8469_v7, %v1288_v15  ;;  %v1301_v63 = vld [vmem:[%s13986_s6 + $0x1e0] sm:$0xff] }
 0x44e   : > { %v1684_v15 = vmax.f32 %v1682_v35, %v8730_v57  ;;  %v8780_v18 = vadd.f32 %v8473_v22, %v1290_v8  ;;  %v1300_v22 = vld [vmem:[%s13986_s6 + $0x1d8] sm:$0xff] }
 0x454   : > { %v8475_v40 = vpop.f32.mrf.mxu2  ;;  %v8477_v39 = vpop.f32.mrf.mxu3 }
 0x455   : > { %v8722_v47 = vadd.f32 %v8475_v40, %v1291_v16  ;;  %v1299_v40 = vld [vmem:[%s13986_s6 + $0x1d0] sm:$0xff]  ;;  %v8783_v41 = vadd.f32 %v8477_v39, %v1292_v33  ;;  %v1685_v39 = vmax.f32 %v1683_v10, %v8755_v46 }
 0x45c   : > { %v8479_v4 = vpop.f32.mrf.mxu2  ;;  %v8481_v3 = vpop.f32.mrf.mxu3 }
 0x45d   : > { %v8747_v16 = vadd.f32 %v8479_v4, %v1293_v56  ;;  %v1650_v4 = vmax.f32 %v1648_v53, %v8719_v59  ;;  %v1294_v56 = vld [vmem:[%s13986_s6 + $0x1a8] sm:$0xff]  ;;  %v1303_v53 = vld [vmem:[%s13986_s6 + $0x1f0] sm:$0xff] }
 0x45e   : > { %v8801_v8 = vadd.f32 %v8481_v3, %v1294_v56 }
 0x464   : > { %v8483_v36 = vpop.f32.mrf.mxu2  ;;  %v8485_v34 = vpop.f32.mrf.mxu3 }
 0x465   : > { %v8804_v33 = vadd.f32 %v8485_v34, %v1296_v9 }
 0x467   : > { %14192 = vst [vmem:[#allocation30_spill] sm:$0xff] %v8804_v33 }
 0x46c   : > { %v8499_v37 = vpop.f32.mrf.mxu2  ;;  %v8501_v21 = vpop.f32.mrf.mxu3 }
 0x474   : > { %v8585_v17 = vpop.f32.mrf.mxu2  ;;  %v8601_v62 = vpop.f32.mrf.mxu3 }
 0x475   : > { %v8775_v7 = vadd.f32 %v8585_v17, %v1299_v40  ;;  %v1298_v17 = vld [vmem:[%s13986_s6 + $0x1c8] sm:$0xff]  ;;  %v8819_v34 = vadd.f32 %v8601_v62, %v1300_v22 }
 0x476   : > { %v8816_v3 = vadd.f32 %v8501_v21, %v1298_v17 }
 0x477   : > { %14194 = vst [vmem:[#allocation32_spill] sm:$0xff] %v8819_v34 }
 0x478   : > { %14193 = vst [vmem:[#allocation31_spill] sm:$0xff] %v8816_v3 }
 0x47c   : > { %v1509_v55 = vpop.f32.mrf.mxu2  ;;  %v1622_v61 = vpop.f32.mrf.mxu3 }
 0x47d   : > { %1009 = vperm.xlu1 %7269, %v967_v20   ;;  %v8750_v20 = vadd.f32 %v8483_v36, %v1295_v48  ;;  %v1651_v36 = vmax.f32 %v1649_v0, %v8722_v47  ;;  %v8772_v48 = vadd.f32 %v8499_v37, %v1297_v30  ;;  %v1652_v37 = vmax.f32 %v1650_v4, %v8747_v16 }
 0x47e   : > { %v8796_v40 = vadd.f32 %v1509_v55, %v1301_v63  ;;  %v1686_v0 = vmax.f32 %v1684_v15, %v8758_v11  ;;  %v1302_v55 = vld [vmem:[%s13986_s6 + $0x1e8] sm:$0xff] }
 0x47f   : > { %v1653_v30 = vmax.f32 %v1651_v36, %v8750_v20  ;;  %v1654_v35 = vmax.f32 %v1652_v37, %v8772_v48  ;;  %v1687_v36 = vmax.f32 %v1685_v39, %v8780_v18  ;;  %v1304_v39 = vld [vmem:[%s13986_s6 + $0x1f8] sm:$0xff] }
 0x480   : > { %v1688_v10 = vmax.f32 %v1686_v0, %v8783_v41 }
 0x481   : > { %v1655_v4 = vmax.f32 %v1653_v30, %v8775_v7  ;;  %v1656_v56 = vmax.f32 %v1654_v35, %v8796_v40  ;;  %v1689_v15 = vmax.f32 %v1687_v36, %v8801_v8 }
 0x482   : > { %v1690_v37 = vmax.f32 %v1688_v10, %v8804_v33 }
 0x483   : > { %v1691_v17 = vmax.f32 %v1689_v15, %v8816_v3  ;;  %v14196_v15 = vld [vmem:[#allocation13_spill] sm:$0xff] }
 0x484   : > { %v1512_v25 = vpop.f32.mrf.mxu2  ;;  %v1625_v21 = vpop.f32.mrf.mxu3  ;;  %v1692_v62 = vmax.f32 %v1690_v37, %v8819_v34  ;;  %v14197_v37 = vld [vmem:[#allocation17_spill] sm:$0xff] }
 0x485   : > { %v8811_v63 = vadd.f32 %v1512_v25, %v1303_v53  ;;  %v8825_v53 = vadd.f32 %v1622_v61, %v1302_v55  ;;  %v8832_v22 = vadd.f32 %v1625_v21, %v1304_v39  ;;  %v8836_v61 = vpop.trf.xlu1  ;;  %v14198_v21 = vld [vmem:[#allocation15_spill] sm:$0xff] }
 0x486   : > { %14195 = vst [vmem:[#allocation33_spill] sm:$0xff] %v8836_v61 }
 0x487   : > { %v1657_v9 = vmax.f32 %v1655_v4, %v8811_v63  ;;  %v1693_v25 = vmax.f32 %v1691_v17, %v8825_v53  ;;  %v1694_v35 = vmax.f32 %v1692_v62, %v8832_v22  ;;  %v14199_v62 = vld [vmem:[#allocation19_spill] sm:$0xff] }
 0x489   : > { %v1658_v30 = vmax.f32 %v1656_v56, %v1657_v9  ;;  %v1695_v55 = vmax.f32 %v1693_v25, %v1694_v35  ;;  %v14201_v25 = vld [vmem:[#allocation21_spill] sm:$0xff] }
 0x48b   : > { %v1659_v0 = vrot.slane %v1658_v30, 4 }
 0x48d   : > { %v1660_v4 = vmax.f32 %v1658_v30, %v1659_v0  ;;  %v8848_v0 = vpop.trf.xlu1 }
 0x48e   : > { %14200 = vst [vmem:[#allocation13_spill] sm:$0xff] %v8848_v0 }
 0x48f   : > { %v1661_v36 = vrot.slane %v1660_v4, 2 }
 0x491   : > { %v1662_v10 = vmax.f32 %v1660_v4, %v1661_v36  ;;  %v14202_v4 = vld [vmem:[#allocation23_spill] sm:$0xff] }
 0x493   : > { %v1663_v56 = vrot.slane %v1662_v10, 1 }
 0x495   : > { %v8838_v9 = vmax.f32 %v1662_v10, %v1663_v56 }
 0x497   : > { %v1702_v3 = vsub.f32 %v14196_v15, %v8838_v9  ;;  %v1704_v39 = vsub.f32 %v14197_v37, %v8838_v9  ;;  %v1706_v17 = vsub.f32 %v14198_v21, %v8838_v9  ;;  %v1708_v30 = vsub.f32 %v14199_v62, %v8838_v9  ;;  %v8874_v62 = vpop.trf.xlu1 }
 0x498   : > { %v1710_v35 = vsub.f32 %v14201_v25, %v8838_v9  ;;  %v1712_v36 = vsub.f32 %v14202_v4, %v8838_v9  ;;  %v1714_v10 = vsub.f32 %v8373_v51, %v8838_v9  ;;  %v1716_v56 = vsub.f32 %v8389_v5, %v8838_v9  ;;  %14203 = vst [vmem:[#allocation17_spill] sm:$0xff] %v8874_v62 }
 0x499   : > { %v1696_v15 = vrot.slane %v1695_v55, 4  ;;  %v1766_v21 = vmul.f32 1.442695, %v1702_v3  ;;  %v1770_v61 = vmul.f32 1.442695, %v1704_v39  ;;  %v1718_v3 = vsub.f32 %v8504_v13, %v8838_v9 }
 0x49a   : > { %v1774_v34 = vmul.f32 1.442695, %v1706_v17  ;;  %v1782_v51 = vmul.f32 1.442695, %v1710_v35  ;;  %v1786_v25 = vmul.f32 1.442695, %v1712_v36  ;;  %v1722_v13 = vsub.f32 %v8521_v43, %v8838_v9 }
 0x49b   : > { %v1697_v4 = vmax.f32 %v1695_v55, %v1696_v15  ;;  %7280 = vpow2.f32 %v1766_v21  ;;  %v1778_v55 = vmul.f32 1.442695, %v1708_v30  ;;  %v1790_v39 = vmul.f32 1.442695, %v1714_v10  ;;  %v14206_v17 = vld [vmem:[#allocation25_spill] sm:$0xff] }
 0x49c   : > { %7282 = vpow2.f32 %v1770_v61  ;;  %v1720_v21 = vsub.f32 %v14206_v17, %v8838_v9  ;;  %v1794_v35 = vmul.f32 1.442695, %v1716_v56  ;;  %v1724_v17 = vsub.f32 %v8523_v1, %v8838_v9  ;;  %v14210_v56 = vld [vmem:[#allocation26_spill] sm:$0xff] }
 0x49d   : > { %v1698_v15 = vrot.slane %v1697_v4, 2  ;;  %7284 = vpow2.f32 %v1774_v34  ;;  %v971_v34 = vld [vmem:[%s13985_s5 + $0x58] sm:$0xff]  ;;  %v1806_v62 = vmul.f32 1.442695, %v1722_v13 }
 0x49e   : > { %7286 = vpow2.f32 %v1778_v55  ;;  %1029 = vperm.xlu1 %7269, %v971_v34   ;;  %v1802_v34 = vmul.f32 1.442695, %v1720_v21 }
 0x49f   : > { %v1699_v5 = vmax.f32 %v1697_v4, %v1698_v15  ;;  %7288 = vpow2.f32 %v1782_v51  ;;  %v1798_v51 = vmul.f32 1.442695, %v1718_v3  ;;  %v8898_v15 = vpop.trf.xlu1 }
 0x4a0   : > { %7290 = vpow2.f32 %v1786_v25  ;;  %14209 = vst [vmem:[#allocation25_spill] sm:$0xff] %v8898_v15  ;;  %v1726_v25 = vsub.f32 %v14210_v56, %v8838_v9  ;;  %v14215_v56 = vld [vmem:[#allocation20_spill] sm:$0xff] }
 0x4a1   : > { %v8876_v33 = vpop.eup %7280  ;;  %v1700_v36 = vrot.slane %v1699_v5, 1  ;;  %7292 = vpow2.f32 %v1790_v39 }
 0x4a2   : > { %14204 = vst [vmem:[#allocation15_spill] sm:$0xff] %v8876_v33  ;;  %v8878_v0 = vpop.eup %7282  ;;  %7294 = vpow2.f32 %v1794_v35  ;;  %v14218_v35 = vld [vmem:[#allocation24_spill] sm:$0xff] }
 0x4a3   : > { %14205 = vst [vmem:[#allocation19_spill] sm:$0xff] %v8878_v0  ;;  %v1894_v61 = vadd.f32 %v8878_v0, %v8876_v33  ;;  %v8889_v30 = vpop.eup %7284  ;;  %v8896_v55 = vmax.f32 %v1699_v5, %v1700_v36  ;;  %v14213_v5 = vld [vmem:[#allocation18_spill] sm:$0xff]  ;;  %v14214_v36 = vld [vmem:[#allocation16_spill] sm:$0xff]  ;;  %7296 = vpow2.f32 %v1798_v51 }
 0x4a4   : > { %14207 = vst [vmem:[#allocation21_spill] sm:$0xff] %v8889_v30  ;;  %v8894_v4 = vpop.eup %7286  ;;  %v5039_v51 = vld [vmem:[%s13988_s8] sm:$0xff]  ;;  %7298 = vpow2.f32 %v1802_v34 }
 0x4a5   : > { %v1895_v10 = vadd.f32 %v8889_v30, %v1894_v61  ;;  %14208 = vst [vmem:[#allocation23_spill] sm:$0xff] %v8894_v4  ;;  %v8905_v43 = vpop.eup %7288  ;;  %v14212_v61 = vld [vmem:[#allocation14_spill] sm:$0xff]  ;;  %v1705_v3 = vsub.f32 %v14213_v5, %v8896_v55  ;;  %v1810_v5 = vmul.f32 1.442695, %v1724_v17  ;;  %7300 = vpow2.f32 %v1806_v62 }
 0x4a6   : > { %14211 = vst [vmem:[#allocation26_spill] sm:$0xff] %v8905_v43  ;;  %v1703_v39 = vsub.f32 %v14212_v61, %v8896_v55  ;;  %v8918_v0 = vpop.eup %7290  ;;  %v14219_v61 = vld [vmem:[#allocation27_spill] sm:$0xff]  ;;  %5045 = vperm.xlu1 %7269, %v5039_v51   ;;  %v1732_v17 = vsub.f32 %v8571_v14, %v8838_v9  ;;  %v5042_v14 = vld [vmem:[%s13988_s8 + $0x18] sm:$0xff] }
 0x4a7   : > { %v1896_v37 = vadd.f32 %v8894_v4, %v1895_v10  ;;  %v14216_v10 = vld [vmem:[#allocation22_spill] sm:$0xff]  ;;  %14217 = vst [vmem:[#allocation14_spill] sm:$0xff] %v8918_v0  ;;  %v8933_v33 = vpop.eup %7292  ;;  %v1728_v15 = vsub.f32 %v14219_v61, %v8838_v9  ;;  %v8942_v4 = vpop.trf.xlu1  ;;  %7302 = vpow2.f32 %v1810_v5 }
 0x4a8   : > { %v8938_v30 = vpop.eup %7294  ;;  %14220 = vst [vmem:[#allocation18_spill] sm:$0xff] %v8942_v4 }
 0x4a9   : > { %v1897_v1 = vadd.f32 %v8905_v43, %v1896_v37  ;;  %v970_v37 = vld [vmem:[%s13985_s5 + $0x50] sm:$0xff]  ;;  %v8947_v61 = vpop.eup %7296  ;;  %v1818_v34 = vmul.f32 1.442695, %v1728_v15 }
 0x4aa   : > { %1024 = vperm.xlu2 %7267, %v970_v37   ;;  %v1814_v37 = vmul.f32 1.442695, %v1726_v25  ;;  %v8956_v25 = vpop.eup %7298 }
 0x4ab   : > { %v1898_v21 = vadd.f32 %v8918_v0, %v1897_v1  ;;  %v1730_v1 = vsub.f32 %v8569_v44, %v8838_v9  ;;  %v1734_v44 = vsub.f32 %v8596_v49, %v8838_v9  ;;  %v5040_v49 = vld [vmem:[%s13988_s8 + $0x8] sm:$0xff]  ;;  %v8967_v5 = vpop.eup %7300 }
 0x4ac   : > { %7304 = vpow2.f32 %v1814_v37  ;;  %v1738_v37 = vsub.f32 %v8632_v32, %v8838_v9 }
 0x4ad   : > { %v1899_v13 = vadd.f32 %v8933_v33, %v1898_v21  ;;  %v1822_v51 = vmul.f32 1.442695, %v1730_v1  ;;  %7306 = vpow2.f32 %v1818_v34  ;;  %v8976_v21 = vpop.eup %7302  ;;  %v1768_v34 = vmul.f32 1.442695, %v1703_v39 }
 0x4ae   : > { %5050 = vperm.xlu1 %7269, %v5040_v49   ;;  %v1772_v1 = vmul.f32 1.442695, %v1705_v3  ;;  %v1838_v49 = vmul.f32 1.442695, %v1738_v37  ;;  %v14223_v39 = vsub.f32 %v8635_v60, %v8838_v9  ;;  %v14225_v60 = vsub.f32 %v8660_v50, %v8838_v9 }
 0x4af   : > { %v1900_v43 = vadd.f32 %v8938_v30, %v1899_v13  ;;  %v1736_v13 = vsub.f32 %v8599_v28, %v8838_v9  ;;  %7308 = vpow2.f32 %v1822_v51  ;;  %v8978_v4 = vpop.trf.xlu1  ;;  %v14222_v51 = vsub.f32 %v14214_v36, %v8896_v55 }
 0x4b0   : > { %14221 = vst [vmem:[#allocation16_spill] sm:$0xff] %v8978_v4 }
 0x4b1   : > { %v1901_v62 = vadd.f32 %v8947_v61, %v1900_v43  ;;  %v1826_v43 = vmul.f32 1.442695, %v1732_v17  ;;  %v1834_v0 = vmul.f32 1.442695, %v1736_v13  ;;  %v1776_v13 = vmul.f32 1.442695, %v14222_v51 }
 0x4b2   : > { %5060 = vperm.xlu2 %7267, %v5042_v14   ;;  %v8981_v28 = vpop.eup %7304 }
 0x4b3   : > { %v1902_v15 = vadd.f32 %v8956_v25, %v1901_v62  ;;  %v1830_v62 = vmul.f32 1.442695, %v1734_v44  ;;  %7310 = vpow2.f32 %v1826_v43  ;;  %v8984_v44 = vpop.eup %7306  ;;  %v5041_v43 = vld [vmem:[%s13988_s8 + $0x10] sm:$0xff] }
 0x4b5   : > { %v1903_v14 = vadd.f32 %v8967_v5, %v1902_v15  ;;  %7312 = vpow2.f32 %v1830_v62  ;;  %v1744_v15 = vsub.f32 %v8663_v2, %v8838_v9  ;;  %v8998_v37 = vpop.eup %7308  ;;  %v1746_v2 = vsub.f32 %v8691_v45, %v8838_v9 }
 0x4b6   : > { %7314 = vpow2.f32 %v1834_v0  ;;  %v14224_v0 = vsub.f32 %v14215_v56, %v8896_v55  ;;  %5055 = vperm.xlu1 %7269, %v5041_v43   ;;  %v1846_v62 = vmul.f32 1.442695, %v14225_v60  ;;  %v1748_v45 = vsub.f32 %v8694_v26, %v8838_v9 }
 0x4b7   : > { %v1904_v17 = vadd.f32 %v8976_v21, %v1903_v14  ;;  %v1842_v14 = vmul.f32 1.442695, %v14223_v39  ;;  %7316 = vpow2.f32 %v1768_v34  ;;  %v9014_v56 = vpop.trf.xlu1  ;;  %v1750_v43 = vsub.f32 %v8719_v59, %v8838_v9 }
 0x4b8   : > { %7318 = vpow2.f32 %v1772_v1  ;;  %v1780_v36 = vmul.f32 1.442695, %v14224_v0  ;;  %v14226_v1 = vsub.f32 %v14216_v10, %v8896_v55  ;;  %14227 = vst [vmem:[#allocation20_spill] sm:$0xff] %v9014_v56  ;;  %v1854_v0 = vmul.f32 1.442695, %v1746_v2  ;;  %v14243_v56 = vld [vmem:[#allocation29_spill] sm:$0xff] }
 0x4b9   : > { %v1905_v32 = vadd.f32 %v8981_v28, %v1904_v17  ;;  %7320 = vpow2.f32 %v1838_v49  ;;  %v9009_v34 = vpop.eup %7310  ;;  %v1850_v49 = vmul.f32 1.442695, %v1744_v15  ;;  %v1752_v15 = vsub.f32 %v8722_v47, %v8838_v9 }
 0x4ba   : > { %7322 = vpow2.f32 %v1776_v13  ;;  %v14228_v13 = vsub.f32 %v14218_v35, %v8896_v55  ;;  %v14231_v35 = vsub.f32 %v8375_v52, %v8896_v55  ;;  %v1858_v59 = vmul.f32 1.442695, %v1748_v45 }
 0x4bb   : > { %v1906_v3 = vadd.f32 %v8984_v44, %v1905_v32  ;;  %v1784_v32 = vmul.f32 1.442695, %v14226_v1  ;;  %v9016_v51 = vpop.eup %7312  ;;  %7324 = vpow2.f32 %v1842_v14  ;;  %v1721_v47 = vsub.f32 %v8553_v12, %v8896_v55 }
 0x4bc   : > { %v9021_v39 = vpop.eup %7314  ;;  %7326 = vpow2.f32 %v1780_v36  ;;  %v1719_v36 = vsub.f32 %v8550_v24, %v8896_v55  ;;  %v1792_v60 = vmul.f32 1.442695, %v14231_v35  ;;  %v14233_v24 = vsub.f32 %v8391_v6, %v8896_v55 }
 0x4bd   : > { %v1907_v17 = vadd.f32 %v8998_v37, %v1906_v3  ;;  %v1788_v3 = vmul.f32 1.442695, %v14228_v13  ;;  %v9026_v10 = vpop.eup %7316  ;;  %7328 = vpow2.f32 %v1846_v62  ;;  %v1866_v6 = vmul.f32 1.442695, %v1752_v15 }
 0x4be   : > { %14229 = vst [vmem:[#allocation22_spill] sm:$0xff] %v9026_v10  ;;  %v9031_v14 = vpop.eup %7318  ;;  %7330 = vpow2.f32 %v1784_v32  ;;  %v1796_v52 = vmul.f32 1.442695, %v14233_v24  ;;  %v1800_v12 = vmul.f32 1.442695, %v1719_v36  ;;  %v14237_v36 = vsub.f32 %v8747_v16, %v8838_v9 }
 0x4bf   : > { %v1908_v50 = vadd.f32 %v9009_v34, %v1907_v17  ;;  %14230 = vst [vmem:[#allocation24_spill] sm:$0xff] %v9031_v14  ;;  %v9040_v17 = vpop.eup %7320  ;;  %7332 = vpow2.f32 %v1850_v49  ;;  %v1931_v62 = vadd.f32 %v9031_v14, %v9026_v10  ;;  %v1862_v49 = vmul.f32 1.442695, %v1750_v43 }
 0x4c0   : > { %v9045_v1 = vpop.eup %7322  ;;  %7334 = vpow2.f32 %v1788_v3  ;;  %v9060_v3 = vpop.trf.xlu1  ;;  %v1804_v24 = vmul.f32 1.442695, %v1721_v47  ;;  %v14238_v47 = vsub.f32 %v8750_v20, %v8838_v9 }
 0x4c1   : > { %v1909_v26 = vadd.f32 %v9016_v51, %v1908_v50  ;;  %14232 = vst [vmem:[#allocation27_spill] sm:$0xff] %v9045_v1  ;;  %v9052_v32 = vpop.eup %7324  ;;  %7336 = vpow2.f32 %v1854_v0  ;;  %v1932_v50 = vadd.f32 %v9045_v1, %v1931_v62  ;;  %v1725_v62 = vsub.f32 %v8577_v31, %v8896_v55 }
 0x4c2   : > { %v9056_v13 = vpop.eup %7326  ;;  %7338 = vpow2.f32 %v1792_v60  ;;  %14235 = vst [vmem:[#allocation35_spill] sm:$0xff] %v9060_v3  ;;  %v1870_v60 = vmul.f32 1.442695, %v14237_v36 }
 0x4c3   : > { %v1910_v2 = vadd.f32 %v9021_v39, %v1909_v26  ;;  %14234 = vst [vmem:[#allocation34_spill] sm:$0xff] %v9056_v13  ;;  %v1723_v26 = vsub.f32 %v8574_v23, %v8896_v55  ;;  %v9062_v35 = vpop.eup %7328  ;;  %7340 = vpow2.f32 %v1858_v59  ;;  %v1933_v43 = vadd.f32 %v9056_v13, %v1932_v50 }
 0x4c4   : > { %7342 = vpow2.f32 %v1796_v52  ;;  %v1727_v50 = vsub.f32 %v8612_v54, %v8896_v55  ;;  %v1812_v54 = vmul.f32 1.442695, %v1725_v62 }
 0x4c5   : > { %v1911_v45 = vadd.f32 %v9040_v17, %v1910_v2  ;;  %v9066_v2 = vpop.eup %7330  ;;  %7344 = vpow2.f32 %v1862_v49  ;;  %v1808_v31 = vmul.f32 1.442695, %v1723_v26  ;;  %v1874_v49 = vmul.f32 1.442695, %v14238_v47 }
 0x4c6   : > { %14236 = vst [vmem:[#allocation36_spill] sm:$0xff] %v9066_v2  ;;  %v9070_v23 = vpop.eup %7332  ;;  %v1934_v59 = vadd.f32 %v9066_v2, %v1933_v43  ;;  %7346 = vpow2.f32 %v1800_v12  ;;  %v14239_v43 = vld [vmem:[#allocation28_spill] sm:$0xff]  ;;  %v14240_v26 = vsub.f32 %v8772_v48, %v8838_v9  ;;  %v14242_v48 = vsub.f32 %v8775_v7, %v8838_v9 }
 0x4c7   : > { %v1912_v0 = vadd.f32 %v9052_v32, %v1911_v45  ;;  %v9077_v45 = vpop.eup %7334  ;;  %7348 = vpow2.f32 %v1866_v6  ;;  %v1729_v3 = vsub.f32 %v14239_v43, %v8896_v55  ;;  %v1816_v43 = vmul.f32 1.442695, %v1727_v50 }
 0x4c8   : > { %v9081_v52 = vpop.eup %7336  ;;  %7350 = vpow2.f32 %v1804_v24  ;;  %v1878_v6 = vmul.f32 1.442695, %v14240_v26  ;;  %v9103_v24 = vpop.trf.xlu1 }
 0x4c9   : > { %v1913_v15 = vadd.f32 %v9062_v35, %v1912_v0  ;;  %v1935_v0 = vadd.f32 %v9077_v45, %v1934_v59  ;;  %v9088_v36 = vpop.eup %7338  ;;  %7352 = vpow2.f32 %v1870_v60  ;;  %v1731_v59 = vsub.f32 %v8640_v42, %v8896_v55  ;;  %14241 = vst [vmem:[#allocation28_spill] sm:$0xff] %v9103_v24 }
 0x4ca   : > { %v9092_v12 = vpop.eup %7340  ;;  %7354 = vpow2.f32 %v1808_v31  ;;  %v1882_v60 = vmul.f32 1.442695, %v14242_v48  ;;  %v1733_v42 = vsub.f32 %v14243_v56, %v8896_v55  ;;  %v1820_v50 = vmul.f32 1.442695, %v1729_v3 }
 0x4cb   : > { %v1914_v16 = vadd.f32 %v9070_v23, %v1913_v15  ;;  %v1936_v15 = vadd.f32 %v9088_v36, %v1935_v0  ;;  %v9099_v47 = vpop.eup %7342  ;;  %7356 = vpow2.f32 %v1874_v49  ;;  %v14244_v49 = vsub.f32 %v8796_v40, %v8838_v9 }
 0x4cc   : > { %v9105_v62 = vpop.eup %7344  ;;  %7358 = vpow2.f32 %v1812_v54  ;;  %v1824_v56 = vmul.f32 1.442695, %v1731_v59  ;;  %v14245_v3 = vsub.f32 %v8811_v63, %v8838_v9  ;;  %v1739_v9 = vsub.f32 %v8699_v27, %v8896_v55 }
 0x4cd   : > { %v1915_v20 = vadd.f32 %v9081_v52, %v1914_v16  ;;  %v1937_v0 = vadd.f32 %v9099_v47, %v1936_v15  ;;  %v9112_v26 = vpop.eup %7346  ;;  %7360 = vpow2.f32 %v1878_v6  ;;  %v1886_v24 = vmul.f32 1.442695, %v14244_v49 }
 0x4ce   : > { %v9116_v31 = vpop.eup %7348  ;;  %v1735_v15 = vsub.f32 %v8668_v19, %v8896_v55  ;;  %7362 = vpow2.f32 %v1816_v43  ;;  %v1890_v6 = vmul.f32 1.442695, %v14245_v3  ;;  %v1828_v19 = vmul.f32 1.442695, %v1733_v42 }
 0x4cf   : > { %v1916_v16 = vadd.f32 %v9092_v12, %v1915_v20  ;;  %v1938_v20 = vadd.f32 %v9112_v26, %v1937_v0  ;;  %v9123_v48 = vpop.eup %7350  ;;  %7364 = vpow2.f32 %v1882_v60  ;;  %v1737_v0 = vsub.f32 %v8671_v38, %v8896_v55 }
 0x4d0   : > { %v9127_v54 = vpop.eup %7352  ;;  %7366 = vpow2.f32 %v1820_v50 }
 0x4d1   : > { %v1917_v7 = vadd.f32 %v9105_v62, %v1916_v16  ;;  %v1939_v16 = vadd.f32 %v9123_v48, %v1938_v20  ;;  %v9134_v49 = vpop.eup %7354  ;;  %7368 = vpow2.f32 %v1886_v24  ;;  %v9146_v20 = vpop.trf.xlu1  ;;  %v1836_v50 = vmul.f32 1.442695, %v1737_v0 }
 0x4d2   : > { %v9138_v43 = vpop.eup %7356  ;;  %7370 = vpow2.f32 %v1824_v56  ;;  %14246 = vst [vmem:[#allocation29_spill] sm:$0xff] %v9146_v20  ;;  %v1840_v56 = vmul.f32 1.442695, %v1739_v9  ;;  %v1745_v0 = vsub.f32 %v8730_v57, %v8896_v55 }
 0x4d3   : > { %v1918_v40 = vadd.f32 %v9116_v31, %v1917_v7  ;;  %v1940_v60 = vadd.f32 %v9134_v49, %v1939_v16  ;;  %v9142_v63 = vpop.eup %7358  ;;  %v1832_v7 = vmul.f32 1.442695, %v1735_v15  ;;  %7372 = vpow2.f32 %v1890_v6 }
 0x4d4   : > { %v9148_v3 = vpop.eup %7360  ;;  %7374 = vpow2.f32 %v1828_v19  ;;  %v14247_v19 = vsub.f32 %v8702_v29, %v8896_v55  ;;  %v1747_v29 = vsub.f32 %v8755_v46, %v8896_v55 }
 0x4d5   : > { %v1919_v59 = vadd.f32 %v9127_v54, %v1918_v40  ;;  %v1941_v24 = vadd.f32 %v9142_v63, %v1940_v60  ;;  %v9152_v42 = vpop.eup %7362  ;;  %7376 = vpow2.f32 %v1832_v7 }
 0x4d6   : > { %v9154_v40 = vpop.eup %7364  ;;  %7378 = vpow2.f32 %v1836_v50  ;;  %v1856_v46 = vmul.f32 1.442695, %v1747_v29 }
 0x4d7   : > { %v1920_v38 = vadd.f32 %v9138_v43, %v1919_v59  ;;  %v1942_v27 = vadd.f32 %v9152_v42, %v1941_v24  ;;  %v9158_v15 = vpop.eup %7366  ;;  %7380 = vpow2.f32 %v1840_v56  ;;  %v1749_v56 = vsub.f32 %v8758_v11, %v8896_v55 }
 0x4d8   : > { %v9160_v20 = vpop.eup %7368 }
 0x4d9   : > { %v1921_v16 = vadd.f32 %v9148_v3, %v1920_v38  ;;  %v1943_v59 = vadd.f32 %v9158_v15, %v1942_v27  ;;  %v9164_v60 = vpop.eup %7370  ;;  %v1844_v38 = vmul.f32 1.442695, %v14247_v19  ;;  %v9180_v10 = vpop.trf.xlu1  ;;  %v1860_v11 = vmul.f32 1.442695, %v1749_v56  ;;  %v14254_v56 = vld [vmem:[#allocation30_spill] sm:$0xff] }
 0x4da   : > { %v9171_v24 = vpop.eup %7372  ;;  %14249 = vst [vmem:[#allocation37_spill] sm:$0xff] %v9180_v10 }
 0x4db   : > { %v1922_v6 = vadd.f32 %v9154_v40, %v1921_v16  ;;  %v1944_v7 = vadd.f32 %v9164_v60, %v1943_v59  ;;  %v9175_v4 = vpop.eup %7374  ;;  %v14248_v16 = vsub.f32 %v8727_v58, %v8896_v55  ;;  %7382 = vpow2.f32 %v1844_v38 }
 0x4dc   : > { %v9186_v19 = vpop.eup %7376 }
 0x4dd   : > { %v1923_v9 = vadd.f32 %v9160_v20, %v1922_v6  ;;  %v1848_v27 = vmul.f32 1.442695, %v14248_v16  ;;  %v1945_v50 = vadd.f32 %v9175_v4, %v1944_v7  ;;  %14250 = vst [vmem:[#allocation38_spill] sm:$0xff] %v9186_v19  ;;  %v1852_v6 = vmul.f32 1.442695, %v1745_v0  ;;  %v9191_v16 = vpop.eup %7378 }
 0x4de   : > { %14251 = vst [vmem:[#allocation39_spill] sm:$0xff] %v9191_v16  ;;  %v9196_v14 = vpop.eup %7380  ;;  %v1753_v0 = vsub.f32 %v8783_v41, %v8896_v55 }
 0x4df   : > { %v1924_v57 = vadd.f32 %v9171_v24, %v1923_v9  ;;  %v1946_v58 = vadd.f32 %v9186_v19, %v1945_v50  ;;  %7384 = vpow2.f32 %v1848_v27  ;;  %v1751_v9 = vsub.f32 %v8780_v18, %v8896_v55  ;;  %14252 = vst [vmem:[#allocation40_spill] sm:$0xff] %v9196_v14 }
 0x4e0   : > { %7386 = vpow2.f32 %v1852_v6  ;;  %v1755_v27 = vsub.f32 %v8801_v8, %v8896_v55  ;;  %v1868_v41 = vmul.f32 1.442695, %v1753_v0  ;;  %v14255_v8 = vld [vmem:[#allocation31_spill] sm:$0xff]  ;;  %v14256_v0 = vld [vmem:[#allocation32_spill] sm:$0xff] }
 0x4e1   : > { %v1925_v59 = vrot.slane %v1924_v57, 4  ;;  %v1947_v7 = vadd.f32 %v9191_v16, %v1946_v58  ;;  %v9201_v19 = vpop.eup %7382  ;;  %7388 = vpow2.f32 %v1856_v46  ;;  %v1864_v29 = vmul.f32 1.442695, %v1751_v9 }
 0x4e2   : > { %v1757_v16 = vsub.f32 %v14254_v56, %v8896_v55  ;;  %7390 = vpow2.f32 %v1860_v11  ;;  %v1872_v9 = vmul.f32 1.442695, %v1755_v27 }
 0x4e3   : > { %v1926_v10 = vadd.f32 %v1925_v59, %v1924_v57  ;;  %v1948_v50 = vadd.f32 %v9196_v14, %v1947_v7  ;;  %v9205_v57 = vpop.trf.xlu1  ;;  %7392 = vpow2.f32 %v1864_v29 }
 0x4e4   : > { %14253 = vst [vmem:[#allocation41_spill] sm:$0xff] %v9205_v57  ;;  %v1759_v57 = vsub.f32 %v14255_v8, %v8896_v55  ;;  %7394 = vpow2.f32 %v1868_v41  ;;  %v1876_v11 = vmul.f32 1.442695, %v1757_v16  ;;  %v14258_v16 = vsub.f32 %v8825_v53, %v8896_v55 }
 0x4e5   : > { %v1927_v38 = vrot.slane %v1926_v10, 2  ;;  %v1949_v59 = vadd.f32 %v9201_v19, %v1948_v50  ;;  %v9208_v58 = vpop.eup %7384  ;;  %v1761_v50 = vsub.f32 %v14256_v0, %v8896_v55 }
 0x4e6   : > { %v9213_v14 = vpop.eup %7386 }
 0x4e7   : > { %v1928_v18 = vadd.f32 %v1927_v38, %v1926_v10  ;;  %v1950_v7 = vadd.f32 %v9208_v58, %v1949_v59  ;;  %v9218_v38 = vpop.eup %7388  ;;  %v1884_v41 = vmul.f32 1.442695, %v1761_v50 }
 0x4e8   : > { %v9225_v1 = vpop.eup %7390 }
 0x4e9   : > { %v1929_v6 = vrot.slane %v1928_v18, 1  ;;  %v1951_v46 = vadd.f32 %v9213_v14, %v1950_v7  ;;  %v9228_v29 = vpop.eup %7392 }
 0x4eb   : > { %v1930_v10 = vadd.f32 %v1929_v6, %v1928_v18  ;;  %v1952_v59 = vadd.f32 %v9218_v38, %v1951_v46  ;;  %v9223_v56 = vpop.trf.xlu1  ;;  %v1880_v18 = vmul.f32 1.442695, %v1759_v57  ;;  %v9230_v6 = vpop.eup %7394  ;;  %v1888_v46 = vmul.f32 1.442695, %v14258_v16 }
 0x4ec   : > { %14257 = vst [vmem:[#allocation30_spill] sm:$0xff] %v9223_v56 }
 0x4ed   : > { %7396 = vrcp.f32 %v1930_v10  ;;  %v1953_v27 = vadd.f32 %v9225_v1, %v1952_v59  ;;  %v1979_v13 = vand.u32 2147483648, %v1930_v10  ;;  %v1977_v16 = vand.u32 2147483647, %v1930_v10 }
 0x4ee   : > { %7398 = vpow2.f32 %v1872_v9  ;;  %vm1973_vm0 = vweird.f32 %v1930_v10 }
 0x4ef   : > { %7400 = vpow2.f32 %v1876_v11  ;;  %v1954_v7 = vadd.f32 %v9228_v29, %v1953_v27  ;;  %v14259_v11 = vsub.f32 %v8832_v22, %v8896_v55  ;;  %vm1978_vm2 = vcmp.eq.f32.partialorder %v1977_v16, 8.507059e+37 }
 0x4f0   : > { %7402 = vpow2.f32 %v1880_v18 }
 0x4f1   : > { %v1955_v9 = vadd.f32 %v9230_v6, %v1954_v7  ;;  %7404 = vpow2.f32 %v1884_v41  ;;  %v1892_v50 = vmul.f32 1.442695, %v14259_v11 }
 0x4f2   : > { %7406 = vpow2.f32 %v1888_v46 }
 0x4f3   : > { %v7397_v8 = vpop.eup %7396  ;;  %v9243_v27 = vpop.trf.xlu1  ;;  %7408 = vpow2.f32 %v1892_v50 }
 0x4f4   : > { %v1969_v0 = vmul.f32 %v7397_v8, %v1930_v10  ;;  %v9237_v57 = vpop.eup %7398  ;;  %14260 = vst [vmem:[#allocation31_spill] sm:$0xff] %v9243_v27  ;;  %vm1974_vm15 = vweird.f32 %v7397_v8 }
 0x4f5   : > { %v1956_v56 = vadd.f32 %v9237_v57, %v1955_v9  ;;  %v9245_v18 = vpop.eup %7400  ;;  %vm1975_vm1 = vmor %vm1973_vm0, %vm1974_vm15 }
 0x4f6   : > { %v1970_v59 = vsub.f32 1.0, %v1969_v0  ;;  %v9248_v2 = vpop.eup %7402  ;;  %v1980_v0 = vor.u32 1.1754944e-38, %v1979_v13 }
 0x4f7   : > { %v1957_v7 = vadd.f32 %v9245_v18, %v1956_v56  ;;  %v9251_v55 = vpop.eup %7404 }
 0x4f8   : > { %v1971_v53 = vmul.f32 %v7397_v8, %v1970_v59  ;;  %v9254_v11 = vpop.eup %7406 }
 0x4f9   : > { %v1958_v22 = vadd.f32 %v9248_v2, %v1957_v7 }
 0x4fa   : > { %v1972_v41 = vadd.f32 %v7397_v8, %v1971_v53  ;;  %v9265_v53 = vpop.eup %7408 }
 0x4fb   : > { %v1959_v46 = vadd.f32 %v9251_v55, %v1958_v22  ;;  %v9259_v27 = vpop.trf.xlu1 }
 0x4fc   : > { %v1976_v9 = vsel %vm1975_vm1, %v7397_v8, %v1972_v41  ;;  %14261 = vst [vmem:[#allocation32_spill] sm:$0xff] %v9259_v27  ;;  %v6822_v27 = vld [vmem:[%s13986_s6 + $0x260] sm:$0xff] }
 0x4fd   : > { %v9256_v59 = vsel %vm1978_vm2, %v1980_v0, %v1976_v9  ;;  %v1960_v56 = vadd.f32 %v9254_v11, %v1959_v46 }
 0x4fe   : > { %v2026_v10 = vmul.f32 %v9009_v34, %v9256_v59  ;;  %v2058_v50 = vmul.f32 %v9171_v24, %v9256_v59  ;;  %v2056_v13 = vmul.f32 %v9160_v20, %v9256_v59  ;;  %v2054_v8 = vmul.f32 %v9154_v40, %v9256_v59 }
 0x4ff   : > { %v1961_v16 = vadd.f32 %v9265_v53, %v1960_v56  ;;  %v2024_v7 = vmul.f32 %v8998_v37, %v9256_v59  ;;  %v2052_v34 = vmul.f32 %v9148_v3, %v9256_v59  ;;  %v2050_v24 = vmul.f32 %v9138_v43, %v9256_v59 }
 0x500   : > { %2060 = vmatpush.msra.mxu0 %v2026_v10  ;;  %2080 = vmatpush.msra.mxu1 %v2058_v50  ;;  %v2022_v20 = vmul.f32 %v8984_v44, %v9256_v59  ;;  %v2020_v22 = vmul.f32 %v8981_v28, %v9256_v59  ;;  %v2018_v43 = vmul.f32 %v8976_v21, %v9256_v59  ;;  %v1107_v50 = vpop.f32.mrf.mxu0 }
 0x501   : > { %v1962_v41 = vrot.slane %v1961_v16, 4  ;;  %v2048_v3 = vmul.f32 %v9127_v54, %v9256_v59  ;;  %v2046_v44 = vmul.f32 %v9116_v31, %v9256_v59  ;;  %v2016_v28 = vmul.f32 %v8967_v5, %v9256_v59 }
 0x502   : > { %2061 = vmatpush.msra.mxu0 %v2024_v7  ;;  %2081 = vmatpush.msra.mxu1 %v2056_v13  ;;  %v2044_v46 = vmul.f32 %v9105_v62, %v9256_v59  ;;  %v2042_v56 = vmul.f32 %v9092_v12, %v9256_v59  ;;  %v2014_v21 = vmul.f32 %v8956_v25, %v9256_v59  ;;  %v9305_v13 = vpop.f32.mrf.mxu1 }
 0x503   : > { %v1963_v40 = vadd.f32 %v1962_v41, %v1961_v16  ;;  %v9282_v37 = vpop.trf.xlu1  ;;  %v2012_v31 = vmul.f32 %v8947_v61, %v9256_v59  ;;  %v2010_v12 = vmul.f32 %v8938_v30, %v9256_v59  ;;  %v2008_v25 = vmul.f32 %v8933_v33, %v9256_v59 }
 0x504   : > { %2062 = vmatpush.msra.mxu0 %v2022_v20  ;;  %2082 = vmatpush.msra.mxu1 %v2054_v8  ;;  %14262 = vst [vmem:[#allocation42_spill] sm:$0xff] %v9282_v37  ;;  %v2040_v61 = vmul.f32 %v9081_v52, %v9256_v59  ;;  %v14263_v8 = vld [vmem:[#allocation14_spill] sm:$0xff]  ;;  %v2038_v30 = vmul.f32 %v9070_v23, %v9256_v59  ;;  %v1015_v52 = vpop.permute.xlu2 %1014  ;;  %v14265_v20 = vld [vmem:[#allocation23_spill] sm:$0xff] }
 0x505   : > { %v1964_v0 = vrot.slane %v1963_v40, 2  ;;  %v2006_v16 = vmul.f32 %v14263_v8, %v9256_v59  ;;  %v2036_v33 = vmul.f32 %v9062_v35, %v9256_v59  ;;  %v2032_v35 = vmul.f32 %v9040_v17, %v9256_v59  ;;  %v14268_v17 = vld [vmem:[#allocation15_spill] sm:$0xff] }
 0x506   : > { %2063 = vmatpush.msra.mxu0 %v2020_v22  ;;  %2083 = vmatpush.msra.mxu1 %v2052_v34  ;;  %v14264_v34 = vld [vmem:[#allocation26_spill] sm:$0xff]  ;;  %v2034_v22 = vmul.f32 %v9052_v32, %v9256_v59 }
 0x507   : > { %v1965_v9 = vadd.f32 %v1964_v0, %v1963_v40  ;;  %v2002_v40 = vmul.f32 %v14265_v20, %v9256_v59  ;;  %v14273_v20 = vld [vmem:[#allocation3_spill] sm:$0xff] }
 0x508   : > { %2064 = vmatpush.msra.mxu0 %v2018_v43  ;;  %2084 = vmatpush.msra.mxu1 %v2050_v24  ;;  %v2004_v24 = vmul.f32 %v14264_v34, %v9256_v59  ;;  %v14266_v43 = vld [vmem:[#allocation21_spill] sm:$0xff] }
 0x509   : > { %v1966_v10 = vrot.slane %v1965_v9, 1 }
 0x50a   : > { %2065 = vmatpush.msra.mxu0 %v2016_v28  ;;  %2085 = vmatpush.msra.mxu1 %v2048_v3  ;;  %v2000_v3 = vmul.f32 %v14266_v43, %v9256_v59  ;;  %v1110_v28 = vpop.f32.mrf.mxu0  ;;  %v14276_v43 = vld [vmem:[#allocation39_spill] sm:$0xff] }
 0x50b   : > { %v1967_v54 = vadd.f32 %v1966_v10, %v1965_v9  ;;  %v9300_v5 = vpop.permute.xlu1 %1009  ;;  %v2030_v10 = vmul.f32 %v9021_v39, %v9256_v59 }
 0x50c   : > { %2066 = vmatpush.msra.mxu0 %v2014_v21  ;;  %2086 = vmatpush.msra.mxu1 %v2046_v44  ;;  %v1108_v62 = vadd.f32 %v1107_v50, %v9300_v5  ;;  %v1982_v50 = vmul.f32 %v14268_v17, %v9256_v59 }
 0x50d   : > { %7410 = vrcp.f32 %v1967_v54  ;;  %v1994_v0 = vand.u32 2147483648, %v1967_v54  ;;  %v1992_v9 = vand.u32 2147483647, %v1967_v54  ;;  %vm1988_vm4 = vweird.f32 %v1967_v54 }
 0x50e   : > { %2067 = vmatpush.msra.mxu0 %v2012_v31  ;;  %2087 = vmatpush.msra.mxu1 %v2044_v46  ;;  %v1163_v46 = vpop.f32.mrf.mxu1 }
 0x50f   : > { %4072 = vxpose.xlu0.b32.start.end [1/1] (short) %v1108_v62, 128  ;;  %v1995_v31 = vor.u32 1.1754944e-38, %v1994_v0  ;;  %v9335_v62 = vadd.f32 %v1110_v28, %v1015_v52  ;;  %vm1993_vm6 = vcmp.eq.f32.partialorder %v1992_v9, 8.507059e+37  ;;  %v14278_v28 = vld [vmem:[#allocation38_spill] sm:$0xff] }
 0x510   : > { %2068 = vmatpush.msra.mxu0 %v2010_v12  ;;  %2088 = vmatpush.msra.mxu1 %v2042_v56  ;;  %v14267_v56 = vld [vmem:[#allocation19_spill] sm:$0xff]  ;;  %v2028_v12 = vmul.f32 %v9016_v51, %v9256_v59 }
 0x511   : > { %v1998_v32 = vmul.f32 %v14267_v56, %v9256_v59  ;;  %v980_v59 = vpop.permute.xlu2 %979 }
 0x512   : > { %2069 = vmatpush.msra.mxu0 %v2008_v25  ;;  %2089 = vmatpush.msra.mxu1 %v2040_v61  ;;  %v9337_v25 = vadd.f32 %v1163_v46, %v1015_v52 }
 0x513   : > { %v7411_v7 = vpop.eup %7410 }
 0x514   : > { %2070 = vmatpush.msra.mxu0 %v2006_v16  ;;  %2090 = vmatpush.msra.mxu1 %v2038_v30  ;;  %v1984_v41 = vmul.f32 %v7411_v7, %v1967_v54  ;;  %vm1989_vm3 = vweird.f32 %v7411_v7 }
 0x515   : > { %vm1990_vm5 = vmor %vm1988_vm4, %vm1989_vm3 }
 0x516   : > { %2071 = vmatpush.msra.mxu0 %v2004_v24  ;;  %2091 = vmatpush.msra.mxu1 %v2036_v33  ;;  %v1985_v23 = vsub.f32 1.0, %v1984_v41  ;;  %v14272_v41 = vld [vmem:[#allocation40_spill] sm:$0xff] }
 0x518   : > { %2072 = vmatpush.msra.mxu0 %v2002_v40  ;;  %2092 = vmatpush.msra.mxu1 %v2034_v22  ;;  %v1986_v44 = vmul.f32 %v7411_v7, %v1985_v23  ;;  %v14274_v40 = vld [vmem:[#allocation4_spill] sm:$0xff] }
 0x519   : > { %v1143_v22 = vadd.f32 %v14274_v40, %v980_v59  ;;  %v14275_v23 = vld [vmem:[#allocation24_spill] sm:$0xff] }
 0x51a   : > { %2073 = vmatpush.msra.mxu0 %v2000_v3  ;;  %2093 = vmatpush.msra.mxu1 %v2032_v35  ;;  %v1987_v21 = vadd.f32 %v7411_v7, %v1986_v44  ;;  %v14277_v44 = vld [vmem:[#allocation22_spill] sm:$0xff] }
 0x51c   : > { %2074 = vmatpush.msra.mxu0 %v1998_v32  ;;  %2094 = vmatpush.msra.mxu1 %v2030_v10  ;;  %v1991_v61 = vsel %vm1990_vm5, %v7411_v7, %v1987_v21  ;;  %v2141_v32 = vmul.f32 0.35355338, %v1143_v22 }
 0x51d   : > { %v9339_v8 = vsel %vm1993_vm6, %v1995_v31, %v1991_v61  ;;  %v1161_v61 = vadd.f32 %v9305_v13, %v9300_v5  ;;  %v9439_v13 = vpop.f32.mrf.mxu0 }
 0x51e   : > { %2075 = vmatpush.msra.mxu0 %v1982_v50  ;;  %2095 = vmatpush.msra.mxu1 %v2028_v12  ;;  %v2027_v39 = vmul.f32 %v9175_v4, %v9339_v8  ;;  %v2059_v51 = vmul.f32 %v9265_v53, %v9339_v8  ;;  %v2057_v54 = vmul.f32 %v9254_v11, %v9339_v8 }
 0x51f   : > { %2076 = vmatmul.f32.vlgmr.msra.gmra.mxu0 %v9335_v62  ;;  %2096 = vmatmul.f32.vlgmr.msra.gmra.mxu1 %v9337_v25  ;;  %v2055_v16 = vmul.f32 %v9251_v55, %v9339_v8  ;;  %v2025_v30 = vmul.f32 %v9164_v60, %v9339_v8  ;;  %v2053_v7 = vmul.f32 %v9248_v2, %v9339_v8 }
 0x520   : > { %2100 = vmatpush.msrb.mxu0 %v2027_v39  ;;  %2120 = vmatpush.msrb.mxu1 %v2059_v51  ;;  %v2051_v4 = vmul.f32 %v9245_v18, %v9339_v8  ;;  %v2049_v53 = vmul.f32 %v9237_v57, %v9339_v8  ;;  %v2047_v11 = vmul.f32 %v9230_v6, %v9339_v8 }
 0x521   : > { %v2023_v55 = vmul.f32 %v9158_v15, %v9339_v8  ;;  %v2045_v60 = vmul.f32 %v9228_v29, %v9339_v8  ;;  %v2043_v2 = vmul.f32 %v9225_v1, %v9339_v8  ;;  %v2041_v18 = vmul.f32 %v9218_v38, %v9339_v8  ;;  %v2158_v38 = vpop.trf.xlu2  ;;  %14279 = vst [vmem:[#allocation14_spill] sm:$0xff] %v9439_v13 }
 0x522   : > { %2101 = vmatpush.msrb.mxu0 %v2025_v30  ;;  %2121 = vmatpush.msrb.mxu1 %v2057_v54  ;;  %v2021_v57 = vmul.f32 %v9152_v42, %v9339_v8  ;;  %v2039_v6 = vmul.f32 %v9213_v14, %v9339_v8  ;;  %v2037_v15 = vmul.f32 %v9208_v58, %v9339_v8 }
 0x523   : > { %v2035_v29 = vmul.f32 %v9201_v19, %v9339_v8  ;;  %v2019_v1 = vmul.f32 %v9142_v63, %v9339_v8  ;;  %v2017_v42 = vmul.f32 %v9134_v49, %v9339_v8  ;;  %v2015_v14 = vmul.f32 %v9123_v48, %v9339_v8 }
 0x524   : > { %2102 = vmatpush.msrb.mxu0 %v2023_v55  ;;  %2122 = vmatpush.msrb.mxu1 %v2055_v16  ;;  %v2013_v19 = vmul.f32 %v9112_v26, %v9339_v8  ;;  %v2011_v63 = vmul.f32 %v9099_v47, %v9339_v8  ;;  %v2009_v49 = vmul.f32 %v9088_v36, %v9339_v8  ;;  %v14269_v26 = vld [vmem:[#allocation36_spill] sm:$0xff]  ;;  %v14270_v47 = vld [vmem:[#allocation34_spill] sm:$0xff]  ;;  %v14271_v36 = vld [vmem:[#allocation27_spill] sm:$0xff] }
 0x525   : > { %v2007_v48 = vmul.f32 %v9077_v45, %v9339_v8  ;;  %v2005_v34 = vmul.f32 %v14269_v26, %v9339_v8  ;;  %v2003_v24 = vmul.f32 %v14270_v47, %v9339_v8  ;;  %v2001_v33 = vmul.f32 %v14271_v36, %v9339_v8 }
 0x526   : > { %2103 = vmatpush.msrb.mxu0 %v2021_v57  ;;  %2123 = vmatpush.msrb.mxu1 %v2053_v7  ;;  %v2033_v52 = vmul.f32 %v14272_v41, %v9339_v8  ;;  %v1090_v45 = vadd.f32 %v14273_v20, %v980_v59  ;;  %v1999_v0 = vmul.f32 %v14275_v23, %v9339_v8  ;;  %v9441_v59 = vpop.f32.mrf.mxu1 }
 0x527   : > { %v2031_v3 = vmul.f32 %v14276_v43, %v9339_v8  ;;  %v1997_v9 = vmul.f32 %v14277_v44, %v9339_v8  ;;  %v2029_v46 = vmul.f32 %v14278_v28, %v9339_v8  ;;  %v2190_v8 = vpop.trf.xlu0  ;;  %14280 = vst [vmem:[#allocation26_spill] sm:$0xff] %v9441_v59  ;;  %v6824_v59 = vld [vmem:[%s13986_s6 + $0x270] sm:$0xff] }
 0x528   : > { %2104 = vmatpush.msrb.mxu0 %v2019_v1  ;;  %2124 = vmatpush.msrb.mxu1 %v2051_v4  ;;  %v2140_v56 = vmul.f32 0.35355338, %v1090_v45 }
 0x529   : > { %v2159_v58 = vpop.trf.xlu2 }
 0x52a   : > { %2105 = vmatpush.msrb.mxu0 %v2017_v42  ;;  %2125 = vmatpush.msrb.mxu1 %v2049_v53 }
 0x52c   : > { %2106 = vmatpush.msrb.mxu0 %v2015_v14  ;;  %2126 = vmatpush.msrb.mxu1 %v2047_v11 }
 0x52e   : > { %2107 = vmatpush.msrb.mxu0 %v2013_v19  ;;  %2127 = vmatpush.msrb.mxu1 %v2045_v60 }
 0x52f   : > { %v2191_v54 = vpop.trf.xlu0 }
 0x530   : > { %2108 = vmatpush.msrb.mxu0 %v2011_v63  ;;  %2128 = vmatpush.msrb.mxu1 %v2043_v2 }
 0x531   : > { %v2160_v35 = vpop.trf.xlu2 }
 0x532   : > { %2109 = vmatpush.msrb.mxu0 %v2009_v49  ;;  %2129 = vmatpush.msrb.mxu1 %v2041_v18 }
 0x534   : > { %2110 = vmatpush.msrb.mxu0 %v2007_v48  ;;  %2130 = vmatpush.msrb.mxu1 %v2039_v6 }
 0x536   : > { %2111 = vmatpush.msrb.mxu0 %v2005_v34  ;;  %2131 = vmatpush.msrb.mxu1 %v2037_v15 }
 0x537   : > { %v2192_v4 = vpop.trf.xlu0 }
 0x538   : > { %2112 = vmatpush.msrb.mxu0 %v2003_v24  ;;  %2132 = vmatpush.msrb.mxu1 %v2035_v29 }
 0x539   : > { %v2161_v10 = vpop.trf.xlu2 }
 0x53a   : > { %2113 = vmatpush.msrb.mxu0 %v2001_v33  ;;  %2133 = vmatpush.msrb.mxu1 %v2033_v52 }
 0x53c   : > { %2114 = vmatpush.msrb.mxu0 %v1999_v0  ;;  %2134 = vmatpush.msrb.mxu1 %v2031_v3 }
 0x53e   : > { %2115 = vmatpush.msrb.mxu0 %v1997_v9  ;;  %2135 = vmatpush.msrb.mxu1 %v2029_v46 }
 0x53f   : > { %2116 = vmatmul.f32.vlgmr.msrb.gmra.mxu0 %v9335_v62  ;;  %2136 = vmatmul.f32.vlgmr.msrb.gmra.mxu1 %v9337_v25  ;;  %v2193_v18 = vpop.trf.xlu0 }
 0x540   : > { %2382 = vmatpush.msra.mxu0 %v2140_v56  ;;  %2495 = vmatpush.msra.mxu1 %v2141_v32 }
 0x541   : > { %v2162_v21 = vpop.trf.xlu2 }
 0x547   : > { %6874 = vmatmul.msk.f32.vlgmr.msra.gmra.mxu0 %vm1305_vm14, %v2158_v38  ;;  %6906 = vmatmul.msk.f32.vlgmr.msra.gmra.mxu1 %vm1305_vm14, %v2158_v38  ;;  %v2194_v15 = vpop.trf.xlu0 }
 0x549   : > { %v2163_v31 = vpop.trf.xlu2 }
 0x54f   : > { %6875 = vmatmul.msk.f32.gmra.mxu0 %vm1305_vm14, %v2159_v58  ;;  %6907 = vmatmul.msk.f32.gmra.mxu1 %vm1305_vm14, %v2159_v58  ;;  %v2195_v38 = vpop.trf.xlu0 }
 0x551   : > { %v2164_v17 = vpop.trf.xlu2 }
 0x557   : > { %6876 = vmatmul.msk.f32.gmra.mxu0 %vm1305_vm14, %v2160_v35  ;;  %6908 = vmatmul.msk.f32.gmra.mxu1 %vm1305_vm14, %v2160_v35  ;;  %v2196_v19 = vpop.trf.xlu0 }
 0x559   : > { %v2165_v50 = vpop.trf.xlu2 }
 0x55f   : > { %6877 = vmatmul.msk.f32.gmra.mxu0 %vm1305_vm14, %v2161_v10  ;;  %6909 = vmatmul.msk.f32.gmra.mxu1 %vm1305_vm14, %v2161_v10  ;;  %v2197_v26 = vpop.trf.xlu0 }
 0x561   : > { %v2166_v12 = vpop.trf.xlu2 }
 0x567   : > { %6878 = vmatmul.msk.f32.gmra.mxu0 %vm1305_vm14, %v2162_v21  ;;  %6910 = vmatmul.msk.f32.gmra.mxu1 %vm1305_vm14, %v2162_v21  ;;  %v2198_v24 = vpop.trf.xlu0 }
 0x569   : > { %v2167_v62 = vpop.trf.xlu2 }
 0x56f   : > { %6879 = vmatmul.msk.f32.gmra.mxu0 %vm1305_vm14, %v2163_v31  ;;  %6911 = vmatmul.msk.f32.gmra.mxu1 %vm1305_vm14, %v2163_v31  ;;  %v2199_v41 = vpop.trf.xlu0 }
 0x571   : > { %v2168_v25 = vpop.trf.xlu2 }
 0x577   : > { %6880 = vmatmul.msk.f32.gmra.mxu0 %vm1305_vm14, %v2164_v17  ;;  %6912 = vmatmul.msk.f32.gmra.mxu1 %vm1305_vm14, %v2164_v17  ;;  %v2200_v45 = vpop.trf.xlu0 }
 0x579   : > { %v2169_v39 = vpop.trf.xlu2 }
 0x57f   : > { %6881 = vmatmul.msk.f32.gmra.mxu0 %vm1305_vm14, %v2165_v50  ;;  %6913 = vmatmul.msk.f32.gmra.mxu1 %vm1305_vm14, %v2165_v50  ;;  %v2201_v43 = vpop.trf.xlu0 }
 0x581   : > { %v2170_v51 = vpop.trf.xlu2 }
 0x587   : > { %6882 = vmatmul.msk.f32.gmra.mxu0 %vm1305_vm14, %v2166_v12  ;;  %6914 = vmatmul.msk.f32.gmra.mxu1 %vm1305_vm14, %v2166_v12  ;;  %v2202_v44 = vpop.trf.xlu0 }
 0x589   : > { %v2171_v5 = vpop.trf.xlu2 }
 0x58f   : > { %6883 = vmatmul.msk.f32.gmra.mxu0 %vm1305_vm14, %v2167_v62  ;;  %6915 = vmatmul.msk.f32.gmra.mxu1 %vm1305_vm14, %v2167_v62  ;;  %v2203_v46 = vpop.trf.xlu0 }
 0x590   : > { %4104 = vxpose.xlu0.b32.start.end [1/1] (short) %v1161_v61, 128 }
 0x591   : > { %v2172_v16 = vpop.trf.xlu2 }
 0x597   : > { %6884 = vmatmul.msk.f32.gmra.mxu0 %vm1305_vm14, %v2168_v25  ;;  %6916 = vmatmul.msk.f32.gmra.mxu1 %vm1305_vm14, %v2168_v25  ;;  %v2204_v10 = vpop.trf.xlu0 }
 0x599   : > { %v2173_v55 = vpop.trf.xlu2 }
 0x59c   : > { %v9445_v30 = vpop.f32.mrf.mxu0  ;;  %v9447_v7 = vpop.f32.mrf.mxu1 }
 0x59d   : > { %14281 = vst [vmem:[#allocation23_spill] sm:$0xff] %v9445_v30 }
 0x59e   : > { %14282 = vst [vmem:[#allocation21_spill] sm:$0xff] %v9447_v7  ;;  %v6820_v7 = vld [vmem:[%s13986_s6 + $0x250] sm:$0xff] }
 0x59f   : > { %6885 = vmatmul.msk.f32.gmra.mxu0 %vm1305_vm14, %v2169_v39  ;;  %6917 = vmatmul.msk.f32.gmra.mxu1 %vm1305_vm14, %v2169_v39  ;;  %v2205_v50 = vpop.trf.xlu0 }
 0x5a7   : > { %6886 = vmatmul.msk.f32.gmra.mxu0 %vm1305_vm14, %v2170_v51  ;;  %6918 = vmatmul.msk.f32.gmra.mxu1 %vm1305_vm14, %v2170_v51 }
 0x5af   : > { %6887 = vmatmul.msk.f32.gmra.mxu0 %vm1305_vm14, %v2171_v5  ;;  %6919 = vmatmul.msk.f32.gmra.mxu1 %vm1305_vm14, %v2171_v5 }
 0x5b7   : > { %6888 = vmatmul.msk.f32.gmra.mxu0 %vm1305_vm14, %v2172_v16  ;;  %6920 = vmatmul.msk.f32.gmra.mxu1 %vm1305_vm14, %v2172_v16 }
 0x5bc   : > { %v9451_v53 = vpop.f32.mrf.mxu0  ;;  %v9453_v11 = vpop.f32.mrf.mxu1 }
 0x5bd   : > { %14283 = vst [vmem:[#allocation19_spill] sm:$0xff] %v9451_v53  ;;  %v6818_v53 = vld [vmem:[%s13986_s6 + $0x240] sm:$0xff] }
 0x5be   : > { %14284 = vst [vmem:[#allocation15_spill] sm:$0xff] %v9453_v11  ;;  %v6812_v11 = vld [vmem:[%s13986_s6 + $0x210] sm:$0xff] }
 0x5bf   : > { %6889 = vmatmul.msk.f32.gmra.mxu0 %vm1305_vm14, %v2173_v55  ;;  %6921 = vmatmul.msk.f32.gmra.mxu1 %vm1305_vm14, %v2173_v55 }
 0x5c4   : > { %v9457_v60 = vpop.f32.mrf.mxu0  ;;  %v9459_v2 = vpop.f32.mrf.mxu1 }
 0x5c7   : > { %6890 = vmatmul.msk.f32.gmra.mxu0 %vm1305_vm14, %v2190_v8  ;;  %6922 = vmatmul.msk.f32.gmra.mxu1 %vm1305_vm14, %v2190_v8 }
 0x5cc   : > { %v9463_v57 = vpop.f32.mrf.mxu0  ;;  %v9465_v6 = vpop.f32.mrf.mxu1 }
 0x5cf   : > { %6891 = vmatmul.msk.f32.gmra.mxu0 %vm1305_vm14, %v2191_v54  ;;  %6923 = vmatmul.msk.f32.gmra.mxu1 %vm1305_vm14, %v2191_v54 }
 0x5d4   : > { %v9469_v29 = vpop.f32.mrf.mxu0  ;;  %v9471_v1 = vpop.f32.mrf.mxu1 }
 0x5d7   : > { %6892 = vmatmul.msk.f32.gmra.mxu0 %vm1305_vm14, %v2192_v4  ;;  %6924 = vmatmul.msk.f32.gmra.mxu1 %vm1305_vm14, %v2192_v4 }
 0x5dc   : > { %v9475_v42 = vpop.f32.mrf.mxu0  ;;  %v9477_v14 = vpop.f32.mrf.mxu1 }
 0x5df   : > { %6893 = vmatmul.msk.f32.gmra.mxu0 %vm1305_vm14, %v2193_v18  ;;  %6925 = vmatmul.msk.f32.gmra.mxu1 %vm1305_vm14, %v2193_v18 }
 0x5e4   : > { %v9481_v63 = vpop.f32.mrf.mxu0  ;;  %v9483_v49 = vpop.f32.mrf.mxu1 }
 0x5e7   : > { %6894 = vmatmul.msk.f32.gmra.mxu0 %vm1305_vm14, %v2194_v15  ;;  %6926 = vmatmul.msk.f32.gmra.mxu1 %vm1305_vm14, %v2194_v15 }
 0x5ec   : > { %v9487_v58 = vpop.f32.mrf.mxu0  ;;  %v9489_v48 = vpop.f32.mrf.mxu1 }
 0x5ef   : > { %6895 = vmatmul.msk.f32.gmra.mxu0 %vm1305_vm14, %v2195_v38  ;;  %6927 = vmatmul.msk.f32.gmra.mxu1 %vm1305_vm14, %v2195_v38 }
 0x5f4   : > { %v9493_v34 = vpop.f32.mrf.mxu0  ;;  %v9495_v47 = vpop.f32.mrf.mxu1 }
 0x5f7   : > { %6896 = vmatmul.msk.f32.gmra.mxu0 %vm1305_vm14, %v2196_v19  ;;  %6928 = vmatmul.msk.f32.gmra.mxu1 %vm1305_vm14, %v2196_v19 }
 0x5fc   : > { %v9499_v36 = vpop.f32.mrf.mxu0  ;;  %v9501_v33 = vpop.f32.mrf.mxu1 }
 0x5ff   : > { %6897 = vmatmul.msk.f32.gmra.mxu0 %vm1305_vm14, %v2197_v26  ;;  %6929 = vmatmul.msk.f32.gmra.mxu1 %vm1305_vm14, %v2197_v26 }
 0x604   : > { %v9505_v52 = vpop.f32.mrf.mxu0  ;;  %v9507_v20 = vpop.f32.mrf.mxu1 }
 0x607   : > { %6898 = vmatmul.msk.f32.gmra.mxu0 %vm1305_vm14, %v2198_v24  ;;  %6930 = vmatmul.msk.f32.gmra.mxu1 %vm1305_vm14, %v2198_v24 }
 0x60c   : > { %v9511_v40 = vpop.f32.mrf.mxu0  ;;  %v9513_v22 = vpop.f32.mrf.mxu1 }
 0x60f   : > { %6899 = vmatmul.msk.f32.gmra.mxu0 %vm1305_vm14, %v2199_v41  ;;  %6931 = vmatmul.msk.f32.gmra.mxu1 %vm1305_vm14, %v2199_v41 }
 0x614   : > { %v9517_v23 = vpop.f32.mrf.mxu0  ;;  %v9519_v0 = vpop.f32.mrf.mxu1 }
 0x617   : > { %6900 = vmatmul.msk.f32.gmra.mxu0 %vm1305_vm14, %v2200_v45  ;;  %6932 = vmatmul.msk.f32.gmra.mxu1 %vm1305_vm14, %v2200_v45 }
 0x61c   : > { %v9523_v3 = vpop.f32.mrf.mxu0  ;;  %v9525_v35 = vpop.f32.mrf.mxu1 }
 0x61f   : > { %6901 = vmatmul.msk.f32.gmra.mxu0 %vm1305_vm14, %v2201_v43  ;;  %6933 = vmatmul.msk.f32.gmra.mxu1 %vm1305_vm14, %v2201_v43 }
 0x624   : > { %v9529_v9 = vpop.f32.mrf.mxu0  ;;  %v9531_v28 = vpop.f32.mrf.mxu1 }
 0x627   : > { %6902 = vmatmul.msk.f32.gmra.mxu0 %vm1305_vm14, %v2202_v44  ;;  %6934 = vmatmul.msk.f32.gmra.mxu1 %vm1305_vm14, %v2202_v44  ;;  %v6814_v44 = vld [vmem:[%s13986_s6 + $0x220] sm:$0xff] }
 0x628   : > { %v9614_v30 = vadd.f32 %v6814_v44, %v9469_v29  ;;  %v9632_v29 = vadd.f32 %v6818_v53, %v9481_v63  ;;  %v6826_v44 = vld [vmem:[%s13986_s6 + $0x280] sm:$0xff]  ;;  %v9648_v53 = vadd.f32 %v6822_v27, %v9493_v34 }
 0x629   : > { %v6830_v63 = vld [vmem:[%s13986_s6 + $0x2a0] sm:$0xff]  ;;  %v9666_v34 = vadd.f32 %v6826_v44, %v9505_v52  ;;  %v6840_v44 = vld [vmem:[%s13986_s6 + $0x2f0] sm:$0xff] }
 0x62c   : > { %v9535_v56 = vpop.f32.mrf.mxu0  ;;  %v9537_v32 = vpop.f32.mrf.mxu1 }
 0x62f   : > { %6903 = vmatmul.msk.f32.gmra.mxu0 %vm1305_vm14, %v2203_v46  ;;  %6935 = vmatmul.msk.f32.gmra.mxu1 %vm1305_vm14, %v2203_v46  ;;  %v6816_v46 = vld [vmem:[%s13986_s6 + $0x230] sm:$0xff] }
 0x630   : > { %v9617_v37 = vadd.f32 %v6816_v46, %v9475_v42  ;;  %v9635_v42 = vadd.f32 %v6820_v7, %v9487_v58  ;;  %v6828_v46 = vld [vmem:[%s13986_s6 + $0x290] sm:$0xff]  ;;  %v9651_v7 = vadd.f32 %v6824_v59, %v9499_v36  ;;  %v6834_v36 = vld [vmem:[%s13986_s6 + $0x2c0] sm:$0xff] }
 0x631   : > { %v6832_v58 = vld [vmem:[%s13986_s6 + $0x2b0] sm:$0xff]  ;;  %v9669_v59 = vadd.f32 %v6828_v46, %v9511_v40  ;;  %v6838_v40 = vld [vmem:[%s13986_s6 + $0x2e0] sm:$0xff] }
 0x632   : > { %v9683_v52 = vadd.f32 %v6832_v58, %v9523_v3  ;;  %v6842_v3 = vld [vmem:[%s13986_s6 + $0x300] sm:$0xff] }
 0x633   : > { %14289 = vst [vmem:[#allocation3_spill] sm:$0xff] %v9669_v59 }
 0x634   : > { %v9541_v21 = vpop.f32.mrf.mxu0  ;;  %v9543_v31 = vpop.f32.mrf.mxu1 }
 0x637   : > { %6904 = vmatmul.msk.f32.gmra.mxu0 %vm1305_vm14, %v2204_v10  ;;  %6936 = vmatmul.msk.f32.gmra.mxu1 %vm1305_vm14, %v2204_v10 }
 0x63c   : > { %v9547_v17 = vpop.f32.mrf.mxu0  ;;  %v9549_v12 = vpop.f32.mrf.mxu1 }
 0x63f   : > { %6905 = vmatmul.msk.f32.gmra.mxu0 %vm1305_vm14, %v2205_v50  ;;  %6937 = vmatmul.msk.f32.gmra.mxu1 %vm1305_vm14, %v2205_v50  ;;  %v6810_v50 = vld [vmem:[%s13986_s6 + $0x200] sm:$0xff] }
 0x640   : > { %v9626_v13 = vadd.f32 %v6810_v50, %v9457_v60 }
 0x642   : > { %v2593_v60 = vmax.f32 %v9626_v13, %v9614_v30 }
 0x644   : > { %v9553_v62 = vpop.f32.mrf.mxu0  ;;  %v9555_v25 = vpop.f32.mrf.mxu1 }
 0x64c   : > { %v9557_v61 = vpop.f32.mrf.mxu0  ;;  %v9559_v8 = vpop.f32.mrf.mxu1 }
 0x654   : > { %v9561_v39 = vpop.f32.mrf.mxu0  ;;  %v9565_v5 = vpop.f32.mrf.mxu1 }
 0x65c   : > { %v9563_v51 = vpop.f32.mrf.mxu0  ;;  %v9569_v16 = vpop.f32.mrf.mxu1 }
 0x664   : > { %v9567_v54 = vpop.f32.mrf.mxu0  ;;  %v9573_v55 = vpop.f32.mrf.mxu1 }
 0x66c   : > { %v9571_v4 = vpop.f32.mrf.mxu0  ;;  %v9577_v15 = vpop.f32.mrf.mxu1 }
 0x674   : > { %v9575_v18 = vpop.f32.mrf.mxu0  ;;  %v9583_v26 = vpop.f32.mrf.mxu1 }
 0x675   : > { %14285 = vst [vmem:[#allocation36_spill] sm:$0xff] %v9583_v26 }
 0x67c   : > { %v9579_v38 = vpop.f32.mrf.mxu0  ;;  %v9587_v41 = vpop.f32.mrf.mxu1 }
 0x67d   : > { %14286 = vst [vmem:[#allocation34_spill] sm:$0xff] %v9587_v41  ;;  %v2595_v41 = vmax.f32 %v2593_v60, %v9632_v29 }
 0x67f   : > { %v2597_v26 = vmax.f32 %v2595_v41, %v9648_v53 }
 0x681   : > { %v2599_v46 = vmax.f32 %v2597_v26, %v9666_v34 }
 0x684   : > { %v9581_v19 = vpop.f32.mrf.mxu0  ;;  %v9591_v43 = vpop.f32.mrf.mxu1 }
 0x685   : > { %14287 = vst [vmem:[#allocation27_spill] sm:$0xff] %v9591_v43  ;;  %v9629_v43 = vadd.f32 %v6812_v11, %v9463_v57 }
 0x687   : > { %v2594_v11 = vmax.f32 %v9629_v43, %v9617_v37 }
 0x689   : > { %v2596_v27 = vmax.f32 %v2594_v11, %v9635_v42  ;;  %v9680_v11 = vadd.f32 %v6830_v63, %v9517_v23  ;;  %v6844_v63 = vld [vmem:[%s13986_s6 + $0x310] sm:$0xff] }
 0x68b   : > { %v2598_v60 = vmax.f32 %v2596_v27, %v9651_v7  ;;  %v9694_v27 = vadd.f32 %v6834_v36, %v9529_v9  ;;  %v2601_v58 = vmax.f32 %v2599_v46, %v9680_v11  ;;  %v9711_v9 = vadd.f32 %v6840_v44, %v9547_v17  ;;  %v6852_v44 = vld [vmem:[%s13986_s6 + $0x350] sm:$0xff] }
 0x68c   : > { %v9585_v24 = vpop.f32.mrf.mxu0  ;;  %v9653_v57 = vpop.f32.mrf.mxu1 }
 0x68d   : > { %14288 = vst [vmem:[#allocation40_spill] sm:$0xff] %v9653_v57  ;;  %v6836_v57 = vld [vmem:[%s13986_s6 + $0x2d0] sm:$0xff]  ;;  %v2600_v41 = vmax.f32 %v2598_v60, %v9669_v59  ;;  %v9708_v60 = vadd.f32 %v6838_v40, %v9541_v21  ;;  %v2603_v59 = vmax.f32 %v2601_v58, %v9694_v27  ;;  %v9725_v21 = vadd.f32 %v6844_v63, %v9557_v61  ;;  %v6850_v40 = vld [vmem:[%s13986_s6 + $0x340] sm:$0xff] }
 0x68e   : > { %v9697_v23 = vadd.f32 %v6836_v57, %v9535_v56  ;;  %v6846_v56 = vld [vmem:[%s13986_s6 + $0x320] sm:$0xff]  ;;  %v6848_v57 = vld [vmem:[%s13986_s6 + $0x330] sm:$0xff] }
 0x68f   : > { %v2602_v26 = vmax.f32 %v2600_v41, %v9683_v52  ;;  %v9722_v41 = vadd.f32 %v6842_v3, %v9553_v62  ;;  %14291 = vst [vmem:[#allocation24_spill] sm:$0xff] %v9725_v21  ;;  %v2605_v58 = vmax.f32 %v2603_v59, %v9708_v60  ;;  %v9738_v62 = vadd.f32 %v6846_v56, %v9561_v39  ;;  %v6854_v3 = vld [vmem:[%s13986_s6 + $0x360] sm:$0xff]  ;;  %v6856_v63 = vld [vmem:[%s13986_s6 + $0x370] sm:$0xff] }
 0x690   : > { %14290 = vst [vmem:[#allocation4_spill] sm:$0xff] %v9697_v23  ;;  %v9741_v61 = vadd.f32 %v6848_v57, %v9563_v51  ;;  %v9755_v39 = vadd.f32 %v6852_v44, %v9571_v4  ;;  %v6858_v51 = vld [vmem:[%s13986_s6 + $0x380] sm:$0xff]  ;;  %v6860_v56 = vld [vmem:[%s13986_s6 + $0x390] sm:$0xff] }
 0x691   : > { %v2604_v46 = vmax.f32 %v2602_v26, %v9697_v23  ;;  %v2607_v23 = vmax.f32 %v2605_v58, %v9722_v41  ;;  %v6862_v4 = vld [vmem:[%s13986_s6 + $0x3a0] sm:$0xff] }
 0x692   : > { %14292 = vst [vmem:[#allocation39_spill] sm:$0xff] %v9755_v39 }
 0x693   : > { %v2606_v26 = vmax.f32 %v2604_v46, %v9711_v9  ;;  %v9752_v46 = vadd.f32 %v6850_v40, %v9567_v54  ;;  %v2609_v57 = vmax.f32 %v2607_v23, %v9738_v62  ;;  %v9769_v54 = vadd.f32 %v6856_v63, %v9579_v38  ;;  %v6864_v40 = vld [vmem:[%s13986_s6 + $0x3b0] sm:$0xff]  ;;  %v6866_v38 = vld [vmem:[%s13986_s6 + $0x3c0] sm:$0xff] }
 0x694   : > { %v9589_v45 = vpop.f32.mrf.mxu0  ;;  %v9727_v17 = vpop.f32.mrf.mxu1 }
 0x695   : > { %v2608_v59 = vmax.f32 %v2606_v26, %v9725_v21  ;;  %v9766_v26 = vadd.f32 %v6854_v3, %v9575_v18  ;;  %14293 = vst [vmem:[#allocation22_spill] sm:$0xff] %v9769_v54  ;;  %v2611_v21 = vmax.f32 %v2609_v57, %v9752_v46  ;;  %v9783_v18 = vadd.f32 %v6860_v56, %v9585_v24  ;;  %v6868_v3 = vld [vmem:[%s13986_s6 + $0x3d0] sm:$0xff] }
 0x697   : > { %v2610_v58 = vmax.f32 %v2608_v59, %v9741_v61  ;;  %v9780_v59 = vadd.f32 %v6858_v51, %v9581_v19  ;;  %14294 = vst [vmem:[#allocation38_spill] sm:$0xff] %v9783_v18  ;;  %v2613_v63 = vmax.f32 %v2611_v21, %v9766_v26  ;;  %v6870_v51 = vld [vmem:[%s13986_s6 + $0x3e0] sm:$0xff] }
 0x699   : > { %v2612_v23 = vmax.f32 %v2610_v58, %v9755_v39  ;;  %v9794_v58 = vadd.f32 %v6862_v4, %v9589_v45  ;;  %v2615_v56 = vmax.f32 %v2613_v63, %v9780_v59  ;;  %v6872_v45 = vld [vmem:[%s13986_s6 + $0x3f0] sm:$0xff] }
 0x69b   : > { %v2614_v57 = vmax.f32 %v2612_v23, %v9769_v54 }
 0x69c   : > { %v9599_v10 = vpop.f32.mrf.mxu0  ;;  %v9799_v24 = vpop.f32.mrf.mxu1 }
 0x69d   : > { %v9797_v19 = vadd.f32 %v6864_v40, %v9599_v10  ;;  %v2616_v39 = vmax.f32 %v2614_v57, %v9783_v18  ;;  %v2617_v10 = vmax.f32 %v2615_v56, %v9794_v58 }
 0x69f   : > { %v2618_v4 = vmax.f32 %v2616_v39, %v9797_v19 }
 0x6a4   : > { %v9661_v50 = vpop.f32.mrf.mxu0  ;;  %v9842_v56 = vpop.f32.mrf.mxu1 }
 0x6a5   : > { %v9807_v21 = vadd.f32 %v6866_v38, %v9661_v50  ;;  %v6815_v50 = vld [vmem:[%s13986_s6 + $0x228] sm:$0xff] }
 0x6a7   : > { %v2619_v63 = vmax.f32 %v2617_v10, %v9807_v21  ;;  %v9845_v10 = vadd.f32 %v6815_v50, %v9471_v1  ;;  %v6827_v50 = vld [vmem:[%s13986_s6 + $0x288] sm:$0xff] }
 0x6ac   : > { %v2471_v36 = vpop.f32.mrf.mxu0 }
 0x6ad   : > { %v9809_v23 = vadd.f32 %v6868_v3, %v2471_v36  ;;  %v6817_v36 = vld [vmem:[%s13986_s6 + $0x238] sm:$0xff]  ;;  %v6819_v3 = vld [vmem:[%s13986_s6 + $0x248] sm:$0xff] }
 0x6ae   : > { %v9863_v1 = vadd.f32 %v6819_v3, %v9483_v49 }
 0x6af   : > { %14295 = vst [vmem:[#allocation43_spill] sm:$0xff] %v9809_v23  ;;  %v2620_v57 = vmax.f32 %v2618_v4, %v9809_v23  ;;  %v9848_v4 = vadd.f32 %v6817_v36, %v9477_v14  ;;  %v6829_v36 = vld [vmem:[%s13986_s6 + $0x298] sm:$0xff] }
 0x6b4   : > { %v2474_v44 = vpop.f32.mrf.mxu0 }
 0x6b5   : > { %v9816_v40 = vadd.f32 %v6870_v51, %v2474_v44  ;;  %v6811_v44 = vld [vmem:[%s13986_s6 + $0x208] sm:$0xff]  ;;  %v6821_v51 = vld [vmem:[%s13986_s6 + $0x258] sm:$0xff] }
 0x6b6   : > { %v9866_v14 = vadd.f32 %v6821_v51, %v9489_v48 }
 0x6b7   : > { %14296 = vst [vmem:[#allocation44_spill] sm:$0xff] %v9816_v40  ;;  %v2621_v38 = vmax.f32 %v2619_v63, %v9816_v40  ;;  %v6823_v63 = vld [vmem:[%s13986_s6 + $0x268] sm:$0xff]  ;;  %v9857_v40 = vadd.f32 %v6811_v44, %v9459_v2 }
 0x6b8   : > { %v9879_v49 = vadd.f32 %v6823_v63, %v9495_v47  ;;  %v6831_v44 = vld [vmem:[%s13986_s6 + $0x2a8] sm:$0xff]  ;;  %v9896_v47 = vadd.f32 %v6829_v36, %v9513_v22  ;;  %v6837_v63 = vld [vmem:[%s13986_s6 + $0x2d8] sm:$0xff]  ;;  %v9918_v36 = vpop.f32.mrf.mxu1 }
 0x6b9   : > { %v2630_v2 = vmax.f32 %v9857_v40, %v9845_v10  ;;  %v6839_v22 = vld [vmem:[%s13986_s6 + $0x2e8] sm:$0xff] }
 0x6bb   : > { %v2632_v3 = vmax.f32 %v2630_v2, %v9863_v1 }
 0x6bc   : > { %v2477_v54 = vpop.f32.mrf.mxu0 }
 0x6bd   : > { %v9820_v18 = vadd.f32 %v6872_v45, %v2477_v54  ;;  %v6813_v54 = vld [vmem:[%s13986_s6 + $0x218] sm:$0xff]  ;;  %v2634_v23 = vmax.f32 %v2632_v3, %v9879_v49 }
 0x6bf   : > { %14297 = vst [vmem:[#allocation45_spill] sm:$0xff] %v9820_v18  ;;  %v2622_v39 = vmax.f32 %v2620_v57, %v9820_v18  ;;  %v6825_v57 = vld [vmem:[%s13986_s6 + $0x278] sm:$0xff] }
 0x6c0   : > { %v9882_v48 = vadd.f32 %v6825_v57, %v9501_v33  ;;  %v6835_v33 = vld [vmem:[%s13986_s6 + $0x2c8] sm:$0xff] }
 0x6c1   : > { %v2623_v45 = vmax.f32 %v2621_v38, %v2622_v39  ;;  %v9860_v38 = vadd.f32 %v6813_v54, %v9465_v6 }
 0x6c3   : > { %v2624_v18 = vrot.slane %v2623_v45, 4  ;;  %v2631_v6 = vmax.f32 %v9860_v38, %v9848_v4 }
 0x6c5   : > { %v2625_v39 = vmax.f32 %v2623_v45, %v2624_v18  ;;  %v6833_v18 = vld [vmem:[%s13986_s6 + $0x2b8] sm:$0xff]  ;;  %v2633_v51 = vmax.f32 %v2631_v6, %v9866_v14  ;;  %v9893_v45 = vadd.f32 %v6827_v50, %v9507_v20  ;;  %v9907_v6 = vadd.f32 %v6831_v44, %v9519_v0  ;;  %v6843_v44 = vld [vmem:[%s13986_s6 + $0x308] sm:$0xff] }
 0x6c6   : > { %v9910_v20 = vadd.f32 %v6833_v18, %v9525_v35  ;;  %v6841_v50 = vld [vmem:[%s13986_s6 + $0x2f8] sm:$0xff]  ;;  %v9923_v0 = vadd.f32 %v6835_v33, %v9531_v28  ;;  %v9926_v35 = vadd.f32 %v6837_v63, %v9537_v32  ;;  %v6847_v32 = vld [vmem:[%s13986_s6 + $0x328] sm:$0xff] }
 0x6c7   : > { %v2626_v54 = vrot.slane %v2625_v39, 2  ;;  %v2635_v2 = vmax.f32 %v2633_v51, %v9882_v48  ;;  %v6845_v18 = vld [vmem:[%s13986_s6 + $0x318] sm:$0xff]  ;;  %v9940_v28 = vadd.f32 %v6841_v50, %v9549_v12 }
 0x6c8   : > { %14298 = vst [vmem:[#allocation46_spill] sm:$0xff] %v9910_v20  ;;  %v6849_v33 = vld [vmem:[%s13986_s6 + $0x338] sm:$0xff]  ;;  %v9956_v12 = vadd.f32 %v6845_v18, %v9559_v8 }
 0x6c9   : > { %v2627_v57 = vmax.f32 %v2625_v39, %v2626_v54  ;;  %v2636_v54 = vmax.f32 %v2634_v23, %v9893_v45  ;;  %v2637_v3 = vmax.f32 %v2635_v2, %v9896_v47  ;;  %v9937_v2 = vadd.f32 %v6839_v22, %v9543_v31  ;;  %v6851_v22 = vld [vmem:[%s13986_s6 + $0x348] sm:$0xff] }
 0x6ca   : > { %v9953_v31 = vadd.f32 %v6843_v44, %v9555_v25  ;;  %v6853_v25 = vld [vmem:[%s13986_s6 + $0x358] sm:$0xff] }
 0x6cb   : > { %v2628_v39 = vrot.slane %v2627_v57, 1  ;;  %v2638_v51 = vmax.f32 %v2636_v54, %v9907_v6  ;;  %v2639_v23 = vmax.f32 %v2637_v3, %v9910_v20 }
 0x6cd   : > { %v9948_v63 = vmax.f32 %v2627_v57, %v2628_v39  ;;  %v2640_v54 = vmax.f32 %v2638_v51, %v9923_v0  ;;  %v2641_v3 = vmax.f32 %v2639_v23, %v9926_v35  ;;  %v9964_v57 = vadd.f32 %v6847_v32, %v9565_v5  ;;  %v6857_v23 = vld [vmem:[%s13986_s6 + $0x378] sm:$0xff]  ;;  %v2587_v32 = vpop.f32.mrf.mxu1 }
 0x6ce   : > { %v9967_v39 = vadd.f32 %v6849_v33, %v9569_v16  ;;  %v9979_v5 = vadd.f32 %v6851_v22, %v9573_v55  ;;  %v6855_v16 = vld [vmem:[%s13986_s6 + $0x368] sm:$0xff] }
 0x6cf   : > { %v2642_v50 = vmax.f32 %v2640_v54, %v9937_v2  ;;  %v2643_v20 = vmax.f32 %v2641_v3, %v9940_v28  ;;  %14299 = vst [vmem:[#allocation47_spill] sm:$0xff] %v9964_v57  ;;  %v2667_v8 = vsub.f32 %v9626_v13, %v9948_v63  ;;  %v2669_v44 = vsub.f32 %v9629_v43, %v9948_v63  ;;  %v6859_v33 = vld [vmem:[%s13986_s6 + $0x388] sm:$0xff]  ;;  %v6861_v54 = vld [vmem:[%s13986_s6 + $0x398] sm:$0xff] }
 0x6d0   : > { %14300 = vst [vmem:[#allocation48_spill] sm:$0xff] %v9967_v39  ;;  %v2671_v13 = vsub.f32 %v9614_v30, %v9948_v63  ;;  %v9990_v43 = vadd.f32 %v6853_v25, %v9577_v15  ;;  %v2673_v3 = vsub.f32 %v9617_v37, %v9948_v63  ;;  %v14302_v30 = vld [vmem:[#allocation36_spill] sm:$0xff]  ;;  %v14303_v15 = vld [vmem:[#allocation34_spill] sm:$0xff]  ;;  %v2675_v37 = vsub.f32 %v9632_v29, %v9948_v63 }
 0x6d1   : > { %v2644_v18 = vmax.f32 %v2642_v50, %v9953_v31  ;;  %v2645_v51 = vmax.f32 %v2643_v20, %v9956_v12  ;;  %14301 = vst [vmem:[#allocation49_spill] sm:$0xff] %v9979_v5  ;;  %v10003_v22 = vadd.f32 %v6855_v16, %v14302_v30  ;;  %v10006_v50 = vadd.f32 %v6857_v23, %v14303_v15  ;;  %v14304_v23 = vld [vmem:[#allocation27_spill] sm:$0xff] }
 0x6d2   : > { %v2731_v25 = vmul.f32 1.442695, %v2667_v8  ;;  %v2739_v16 = vmul.f32 1.442695, %v2671_v13  ;;  %v10019_v15 = vadd.f32 %v6859_v33, %v14304_v23  ;;  %v14305_v8 = vld [vmem:[#allocation40_spill] sm:$0xff]  ;;  %v2677_v29 = vsub.f32 %v9635_v42, %v9948_v63  ;;  %v6871_v23 = vld [vmem:[%s13986_s6 + $0x3e8] sm:$0xff] }
 0x6d3   : > { %v2646_v20 = vmax.f32 %v2644_v18, %v9964_v57  ;;  %v2647_v55 = vmax.f32 %v2645_v51, %v9967_v39  ;;  %v2735_v18 = vmul.f32 1.442695, %v2669_v44  ;;  %v6863_v39 = vld [vmem:[%s13986_s6 + $0x3a8] sm:$0xff]  ;;  %v6865_v57 = vld [vmem:[%s13986_s6 + $0x3b8] sm:$0xff]  ;;  %v10022_v44 = vadd.f32 %v6861_v54, %v14305_v8 }
 0x6d4   : > { %7412 = vpow2.f32 %v2731_v25  ;;  %v2743_v13 = vmul.f32 1.442695, %v2673_v3  ;;  %v10035_v54 = vadd.f32 %v6863_v39, %v9727_v17  ;;  %v10038_v25 = vadd.f32 %v6865_v57, %v9799_v24 }
 0x6d5   : > { %v2648_v51 = vmax.f32 %v2646_v20, %v9979_v5  ;;  %v2649_v30 = vmax.f32 %v2647_v55, %v9990_v43  ;;  %v6867_v20 = vld [vmem:[%s13986_s6 + $0x3c8] sm:$0xff]  ;;  %v6869_v5 = vld [vmem:[%s13986_s6 + $0x3d8] sm:$0xff]  ;;  %7414 = vpow2.f32 %v2735_v18  ;;  %v2679_v8 = vsub.f32 %v9648_v53, %v9948_v63 }
 0x6d6   : > { %7416 = vpow2.f32 %v2739_v16  ;;  %v2747_v42 = vmul.f32 1.442695, %v2675_v37  ;;  %v10051_v17 = vadd.f32 %v6869_v5, %v9918_v36  ;;  %v2681_v24 = vsub.f32 %v9651_v7, %v9948_v63 }
 0x6d7   : > { %v2650_v55 = vmax.f32 %v2648_v51, %v10003_v22  ;;  %v2651_v33 = vmax.f32 %v2649_v30, %v10006_v50  ;;  %v10048_v51 = vadd.f32 %v6867_v20, %v9842_v56  ;;  %7418 = vpow2.f32 %v2743_v13  ;;  %v2590_v30 = vpop.f32.mrf.mxu1  ;;  %v14309_v13 = vld [vmem:[#allocation3_spill] sm:$0xff] }
 0x6d8   : > { %v2751_v57 = vmul.f32 1.442695, %v2677_v29  ;;  %v10059_v16 = vadd.f32 %v6871_v23, %v2587_v32  ;;  %v2683_v56 = vsub.f32 %v9666_v34, %v9948_v63  ;;  %7420 = vpow2.f32 %v2747_v42  ;;  %v6873_v32 = vld [vmem:[%s13986_s6 + $0x3f8] sm:$0xff] }
 0x6d9   : > { %v2652_v3 = vmax.f32 %v2650_v55, %v10019_v15  ;;  %v2653_v18 = vmax.f32 %v2651_v33, %v10022_v44  ;;  %v2755_v36 = vmul.f32 1.442695, %v2679_v8  ;;  %v2685_v33 = vsub.f32 %v14309_v13, %v9948_v63 }
 0x6da   : > { %v10055_v39 = vpop.eup %7412  ;;  %7422 = vpow2.f32 %v2751_v57  ;;  %v2759_v34 = vmul.f32 1.442695, %v2681_v24  ;;  %v10076_v23 = vadd.f32 %v6873_v32, %v2590_v30  ;;  %v2689_v24 = vsub.f32 %v9683_v52, %v9948_v63 }
 0x6db   : > { %14306 = vst [vmem:[#allocation36_spill] sm:$0xff] %v10055_v39  ;;  %v2654_v53 = vmax.f32 %v2652_v3, %v10035_v54  ;;  %v2655_v37 = vmax.f32 %v2653_v18, %v10038_v25  ;;  %v10061_v55 = vpop.eup %7414  ;;  %v2687_v18 = vsub.f32 %v9680_v11, %v9948_v63  ;;  %7424 = vpow2.f32 %v2755_v36 }
 0x6dc   : > { %14307 = vst [vmem:[#allocation34_spill] sm:$0xff] %v10061_v55  ;;  %v2859_v20 = vadd.f32 %v10061_v55, %v10055_v39  ;;  %v10072_v29 = vpop.eup %7416  ;;  %7426 = vpow2.f32 %v2759_v34  ;;  %v2767_v57 = vmul.f32 1.442695, %v2685_v33  ;;  %v2691_v11 = vsub.f32 %v9694_v27, %v9948_v63 }
 0x6dd   : > { %v2656_v7 = vmax.f32 %v2654_v53, %v10048_v51  ;;  %v2657_v5 = vmax.f32 %v2655_v37, %v10051_v17  ;;  %14308 = vst [vmem:[#allocation27_spill] sm:$0xff] %v10072_v29  ;;  %v10080_v3 = vpop.eup %7418  ;;  %v2763_v53 = vmul.f32 1.442695, %v2683_v56  ;;  %v2771_v56 = vmul.f32 1.442695, %v2687_v18 }
 0x6de   : > { %v2860_v42 = vadd.f32 %v10072_v29, %v2859_v20  ;;  %v10086_v13 = vpop.eup %7420  ;;  %v2775_v33 = vmul.f32 1.442695, %v2689_v24  ;;  %v2695_v27 = vsub.f32 %v9708_v60, %v9948_v63  ;;  %v2779_v18 = vmul.f32 1.442695, %v2691_v11 }
 0x6df   : > { %v2658_v8 = vmax.f32 %v2656_v7, %v10059_v16  ;;  %v2659_v37 = vmax.f32 %v2657_v5, %v10076_v23  ;;  %7428 = vpow2.f32 %v2763_v53  ;;  %v2699_v60 = vsub.f32 %v9722_v41, %v9948_v63 }
 0x6e0   : > { %v2861_v39 = vadd.f32 %v10080_v3, %v2860_v42  ;;  %v10091_v20 = vpop.eup %7422  ;;  %v14310_v42 = vld [vmem:[#allocation4_spill] sm:$0xff]  ;;  %7430 = vpow2.f32 %v2767_v57  ;;  %v2787_v11 = vmul.f32 1.442695, %v2695_v27 }
 0x6e1   : > { %v2660_v30 = vmax.f32 %v2658_v8, %v2659_v37  ;;  %v10096_v32 = vpop.eup %7424  ;;  %v2693_v52 = vsub.f32 %v14310_v42, %v9948_v63  ;;  %7432 = vpow2.f32 %v2771_v56  ;;  %v2697_v42 = vsub.f32 %v9711_v9, %v9948_v63 }
 0x6e2   : > { %v2862_v7 = vadd.f32 %v10086_v13, %v2861_v39  ;;  %v10101_v8 = vpop.eup %7426  ;;  %7434 = vpow2.f32 %v2775_v33  ;;  %v2795_v41 = vmul.f32 1.442695, %v2699_v60  ;;  %v14312_v60 = vld [vmem:[#allocation39_spill] sm:$0xff] }
 0x6e3   : > { %v2661_v36 = vrot.slane %v2660_v30, 4  ;;  %v2783_v24 = vmul.f32 1.442695, %v2693_v52  ;;  %7436 = vpow2.f32 %v2779_v18  ;;  %v2791_v9 = vmul.f32 1.442695, %v2697_v42 }
 0x6e4   : > { %v2863_v5 = vadd.f32 %v10091_v20, %v2862_v7 }
 0x6e5   : > { %v2662_v34 = vmax.f32 %v2660_v30, %v2661_v36  ;;  %v10106_v7 = vpop.eup %7428  ;;  %7438 = vpow2.f32 %v2783_v24 }
 0x6e6   : > { %v2864_v39 = vadd.f32 %v10096_v32, %v2863_v5  ;;  %v10111_v36 = vpop.eup %7430  ;;  %7440 = vpow2.f32 %v2787_v11  ;;  %v2709_v11 = vsub.f32 %v14312_v60, %v9948_v63 }
 0x6e7   : > { %v2663_v53 = vrot.slane %v2662_v34, 2  ;;  %v10116_v5 = vpop.eup %7432  ;;  %7442 = vpow2.f32 %v2791_v9 }
 0x6e8   : > { %v2865_v37 = vadd.f32 %v10101_v8, %v2864_v39  ;;  %v14311_v39 = vld [vmem:[#allocation24_spill] sm:$0xff]  ;;  %7444 = vpow2.f32 %v2795_v41  ;;  %v14313_v41 = vld [vmem:[#allocation22_spill] sm:$0xff] }
 0x6e9   : > { %v2664_v57 = vmax.f32 %v2662_v34, %v2663_v53  ;;  %v2701_v55 = vsub.f32 %v14311_v39, %v9948_v63  ;;  %v10121_v34 = vpop.eup %7434  ;;  %v2703_v53 = vsub.f32 %v9738_v62, %v9948_v63 }
 0x6ea   : > { %v2866_v30 = vadd.f32 %v10106_v7, %v2865_v37  ;;  %v10126_v18 = vpop.eup %7436  ;;  %v2705_v37 = vsub.f32 %v9741_v61, %v9948_v63 }
 0x6eb   : > { %v2665_v52 = vrot.slane %v2664_v57, 1  ;;  %v2799_v24 = vmul.f32 1.442695, %v2701_v55  ;;  %v10135_v39 = vpop.eup %7438  ;;  %v2803_v62 = vmul.f32 1.442695, %v2703_v53  ;;  %v2711_v53 = vsub.f32 %v9766_v26, %v9948_v63 }
 0x6ec   : > { %v2867_v56 = vadd.f32 %v10111_v36, %v2866_v30  ;;  %v2707_v30 = vsub.f32 %v9752_v46, %v9948_v63  ;;  %v10140_v29 = vpop.eup %7440  ;;  %v2807_v61 = vmul.f32 1.442695, %v2705_v37 }
 0x6ed   : > { %v10130_v42 = vmax.f32 %v2664_v57, %v2665_v52  ;;  %7446 = vpow2.f32 %v2799_v24  ;;  %v10147_v52 = vpop.eup %7442 }
 0x6ee   : > { %v2868_v33 = vadd.f32 %v10116_v5, %v2867_v56  ;;  %v2811_v57 = vmul.f32 1.442695, %v2707_v30  ;;  %7448 = vpow2.f32 %v2803_v62  ;;  %v10156_v24 = vpop.eup %7444 }
 0x6ef   : > { %v2668_v55 = vsub.f32 %v9857_v40, %v10130_v42  ;;  %v2670_v46 = vsub.f32 %v9860_v38, %v10130_v42  ;;  %v2672_v40 = vsub.f32 %v9845_v10, %v10130_v42  ;;  %7450 = vpow2.f32 %v2807_v61 }
 0x6f0   : > { %v2869_v27 = vadd.f32 %v10121_v34, %v2868_v33  ;;  %v2815_v38 = vmul.f32 1.442695, %v2709_v11  ;;  %7452 = vpow2.f32 %v2811_v57  ;;  %v2674_v26 = vsub.f32 %v9848_v4, %v10130_v42 }
 0x6f1   : > { %v2733_v30 = vmul.f32 1.442695, %v2668_v55  ;;  %v2676_v11 = vsub.f32 %v9863_v1, %v10130_v42  ;;  %v2741_v61 = vmul.f32 1.442695, %v2672_v40  ;;  %v2719_v1 = vsub.f32 %v9794_v58, %v9948_v63 }
 0x6f2   : > { %v2870_v56 = vadd.f32 %v10126_v18, %v2869_v27  ;;  %v2713_v27 = vsub.f32 %v14313_v41, %v9948_v63 }
 0x6f3   : > { %v10161_v62 = vpop.eup %7446  ;;  %7454 = vpow2.f32 %v2733_v30 }
 0x6f4   : > { %v2871_v33 = vadd.f32 %v10135_v39, %v2870_v56  ;;  %v2737_v56 = vmul.f32 1.442695, %v2670_v46  ;;  %v10168_v55 = vpop.eup %7448  ;;  %v14314_v46 = vld [vmem:[#allocation38_spill] sm:$0xff]  ;;  %v2823_v4 = vmul.f32 1.442695, %v2713_v27  ;;  %v2680_v27 = vsub.f32 %v9879_v49, %v10130_v42 }
 0x6f5   : > { %v2717_v57 = vsub.f32 %v14314_v46, %v9948_v63  ;;  %v2723_v49 = vsub.f32 %v9807_v21, %v9948_v63 }
 0x6f6   : > { %v2872_v9 = vadd.f32 %v10140_v29, %v2871_v33  ;;  %v2715_v33 = vsub.f32 %v9780_v59, %v9948_v63  ;;  %7456 = vpow2.f32 %v2737_v56  ;;  %v2678_v59 = vsub.f32 %v9866_v14, %v10130_v42 }
 0x6f7   : > { %7458 = vpow2.f32 %v2815_v38  ;;  %v2749_v38 = vmul.f32 1.442695, %v2676_v11  ;;  %v2721_v14 = vsub.f32 %v9797_v19, %v9948_v63  ;;  %v2835_v11 = vmul.f32 1.442695, %v2719_v1 }
 0x6f8   : > { %v2873_v37 = vadd.f32 %v10147_v52, %v2872_v9  ;;  %v2819_v9 = vmul.f32 1.442695, %v2711_v53  ;;  %v2745_v53 = vmul.f32 1.442695, %v2674_v26  ;;  %v2827_v40 = vmul.f32 1.442695, %v2715_v33 }
 0x6f9   : > { %v2831_v26 = vmul.f32 1.442695, %v2717_v57  ;;  %v2682_v33 = vsub.f32 %v9882_v48, %v10130_v42  ;;  %v2757_v57 = vmul.f32 1.442695, %v2680_v27  ;;  %v14317_v48 = vld [vmem:[#allocation43_spill] sm:$0xff]  ;;  %v14319_v27 = vld [vmem:[#allocation44_spill] sm:$0xff] }
 0x6fa   : > { %v2874_v60 = vadd.f32 %v10156_v24, %v2873_v37  ;;  %v10175_v37 = vpop.eup %7450  ;;  %7460 = vpow2.f32 %v2819_v9  ;;  %v2753_v9 = vmul.f32 1.442695, %v2678_v59  ;;  %v2839_v59 = vmul.f32 1.442695, %v2721_v14 }
 0x6fb   : > { %v10179_v30 = vpop.eup %7452  ;;  %7462 = vpow2.f32 %v2741_v61  ;;  %v2684_v61 = vsub.f32 %v9893_v45, %v10130_v42  ;;  %v2761_v45 = vmul.f32 1.442695, %v2682_v33  ;;  %v14321_v33 = vld [vmem:[#allocation45_spill] sm:$0xff] }
 0x6fc   : > { %v2875_v10 = vadd.f32 %v10161_v62, %v2874_v60  ;;  %v10184_v60 = vpop.eup %7454  ;;  %7464 = vpow2.f32 %v2823_v4 }
 0x6fd   : > { %14315 = vst [vmem:[#allocation40_spill] sm:$0xff] %v10184_v60  ;;  %7466 = vpow2.f32 %v2745_v53 }
 0x6fe   : > { %v2876_v41 = vadd.f32 %v10168_v55, %v2875_v10  ;;  %v10188_v10 = vpop.eup %7456  ;;  %7468 = vpow2.f32 %v2827_v40  ;;  %v2686_v40 = vsub.f32 %v9896_v47, %v10130_v42  ;;  %v2765_v47 = vmul.f32 1.442695, %v2684_v61 }
 0x6ff   : > { %14316 = vst [vmem:[#allocation3_spill] sm:$0xff] %v10188_v10  ;;  %v10193_v46 = vpop.eup %7458  ;;  %7470 = vpow2.f32 %v2749_v38  ;;  %v2896_v53 = vadd.f32 %v10188_v10, %v10184_v60  ;;  %v2727_v38 = vsub.f32 %v14319_v27, %v9948_v63  ;;  %v2729_v60 = vsub.f32 %v14321_v33, %v9948_v63 }
 0x700   : > { %v2877_v56 = vadd.f32 %v10175_v37, %v2876_v41  ;;  %v10200_v4 = vpop.eup %7460  ;;  %v2725_v41 = vsub.f32 %v14317_v48, %v9948_v63  ;;  %7472 = vpow2.f32 %v2831_v26  ;;  %v2843_v26 = vmul.f32 1.442695, %v2723_v49 }
 0x701   : > { %v10206_v21 = vpop.eup %7462  ;;  %7474 = vpow2.f32 %v2753_v9  ;;  %v2851_v61 = vmul.f32 1.442695, %v2727_v38 }
 0x702   : > { %v2878_v58 = vadd.f32 %v10179_v30, %v2877_v56  ;;  %14318 = vst [vmem:[#allocation4_spill] sm:$0xff] %v10206_v21  ;;  %v10211_v56 = vpop.eup %7464  ;;  %7476 = vpow2.f32 %v2835_v11  ;;  %v2897_v14 = vadd.f32 %v10206_v21, %v2896_v53  ;;  %v2847_v27 = vmul.f32 1.442695, %v2725_v41 }
 0x703   : > { %7478 = vpow2.f32 %v2757_v57 }
 0x704   : > { %v2879_v19 = vadd.f32 %v10193_v46, %v2878_v58  ;;  %v10216_v58 = vpop.eup %7466  ;;  %7480 = vpow2.f32 %v2839_v59  ;;  %v2692_v59 = vsub.f32 %v9923_v0, %v10130_v42 }
 0x705   : > { %14320 = vst [vmem:[#allocation24_spill] sm:$0xff] %v10216_v58  ;;  %v10221_v9 = vpop.eup %7468  ;;  %v2898_v49 = vadd.f32 %v10216_v58, %v2897_v14  ;;  %7482 = vpow2.f32 %v2761_v45  ;;  %v2855_v45 = vmul.f32 1.442695, %v2729_v60 }
 0x706   : > { %v2880_v1 = vadd.f32 %v10200_v4, %v2879_v19  ;;  %v2688_v19 = vsub.f32 %v9907_v6, %v10130_v42  ;;  %v10226_v11 = vpop.eup %7470  ;;  %v2769_v6 = vmul.f32 1.442695, %v2686_v40  ;;  %7484 = vpow2.f32 %v2843_v26 }
 0x707   : > { %14322 = vst [vmem:[#allocation39_spill] sm:$0xff] %v10226_v11  ;;  %v10231_v57 = vpop.eup %7472  ;;  %v2899_v21 = vadd.f32 %v10226_v11, %v2898_v49  ;;  %7486 = vpow2.f32 %v2765_v47  ;;  %v2694_v26 = vsub.f32 %v9926_v35, %v10130_v42  ;;  %v2781_v47 = vmul.f32 1.442695, %v2692_v59 }
 0x708   : > { %v2881_v48 = vadd.f32 %v10211_v56, %v2880_v1  ;;  %v14323_v1 = vld [vmem:[#allocation46_spill] sm:$0xff]  ;;  %v10234_v63 = vpop.eup %7474  ;;  %v2773_v14 = vmul.f32 1.442695, %v2688_v19  ;;  %7488 = vpow2.f32 %v2847_v27 }
 0x709   : > { %v2690_v10 = vsub.f32 %v14323_v1, %v10130_v42  ;;  %14324 = vst [vmem:[#allocation22_spill] sm:$0xff] %v10234_v63  ;;  %v2900_v40 = vadd.f32 %v10234_v63, %v2899_v21  ;;  %7490 = vpow2.f32 %v2769_v6  ;;  %v2696_v21 = vsub.f32 %v9937_v2, %v10130_v42 }
 0x70a   : > { %v2882_v53 = vadd.f32 %v10221_v9, %v2881_v48  ;;  %v10239_v48 = vpop.eup %7476  ;;  %7492 = vpow2.f32 %v2851_v61  ;;  %v2698_v6 = vsub.f32 %v9940_v28, %v10130_v42  ;;  %v2785_v61 = vmul.f32 1.442695, %v2694_v26 }
 0x70b   : > { %v10242_v33 = vpop.eup %7478  ;;  %v2777_v49 = vmul.f32 1.442695, %v2690_v10  ;;  %7494 = vpow2.f32 %v2773_v14 }
 0x70c   : > { %v2883_v41 = vadd.f32 %v10231_v57, %v2882_v53  ;;  %14325 = vst [vmem:[#allocation38_spill] sm:$0xff] %v10242_v33  ;;  %v10247_v53 = vpop.eup %7480  ;;  %v2901_v0 = vadd.f32 %v10242_v33, %v2900_v40  ;;  %7496 = vpow2.f32 %v2855_v45  ;;  %v2700_v45 = vsub.f32 %v9953_v31, %v10130_v42 }
 0x70d   : > { %v10250_v19 = vpop.eup %7482  ;;  %7498 = vpow2.f32 %v2777_v49  ;;  %v2789_v40 = vmul.f32 1.442695, %v2696_v21  ;;  %v2702_v49 = vsub.f32 %v9956_v12, %v10130_v42 }
 0x70e   : > { %v2884_v38 = vadd.f32 %v10239_v48, %v2883_v41  ;;  %14326 = vst [vmem:[#allocation43_spill] sm:$0xff] %v10250_v19  ;;  %v10255_v27 = vpop.eup %7484  ;;  %v2902_v35 = vadd.f32 %v10250_v19, %v2901_v0  ;;  %7500 = vpow2.f32 %v2781_v47  ;;  %v14328_v47 = vld [vmem:[#allocation47_spill] sm:$0xff]  ;;  %v2797_v58 = vmul.f32 1.442695, %v2700_v45  ;;  %v14330_v19 = vld [vmem:[#allocation49_spill] sm:$0xff] }
 0x70f   : > { %v10258_v10 = vpop.eup %7486  ;;  %7502 = vpow2.f32 %v2785_v61  ;;  %v2801_v63 = vmul.f32 1.442695, %v2702_v49 }
 0x710   : > { %v2885_v60 = vadd.f32 %v10247_v53, %v2884_v38  ;;  %14327 = vst [vmem:[#allocation44_spill] sm:$0xff] %v10258_v10  ;;  %v10263_v41 = vpop.eup %7488  ;;  %v2903_v2 = vadd.f32 %v10258_v10, %v2902_v35  ;;  %7504 = vpow2.f32 %v2789_v40  ;;  %v2710_v40 = vsub.f32 %v9990_v43, %v10130_v42 }
 0x711   : > { %v10266_v14 = vpop.eup %7490 }
 0x712   : > { %v2886_v1 = vadd.f32 %v10255_v27, %v2885_v60  ;;  %v10271_v38 = vpop.eup %7492  ;;  %v2904_v0 = vadd.f32 %v10266_v14, %v2903_v2  ;;  %v2793_v60 = vmul.f32 1.442695, %v2698_v6  ;;  %v2704_v2 = vsub.f32 %v14328_v47, %v10130_v42  ;;  %v14329_v6 = vld [vmem:[#allocation48_spill] sm:$0xff] }
 0x713   : > { %v10274_v28 = vpop.eup %7494  ;;  %v2706_v61 = vsub.f32 %v14329_v6, %v10130_v42  ;;  %v2708_v47 = vsub.f32 %v14330_v19, %v10130_v42  ;;  %v2712_v19 = vsub.f32 %v10003_v22, %v10130_v42  ;;  %v2716_v22 = vsub.f32 %v10019_v15, %v10130_v42 }
 0x714   : > { %v2887_v59 = vadd.f32 %v10263_v41, %v2886_v1  ;;  %v10279_v35 = vpop.eup %7496  ;;  %v2905_v1 = vadd.f32 %v10274_v28, %v2904_v0  ;;  %7506 = vpow2.f32 %v2793_v60  ;;  %v2805_v45 = vmul.f32 1.442695, %v2704_v2 }
 0x715   : > { %v10282_v31 = vpop.eup %7498  ;;  %7508 = vpow2.f32 %v2797_v58  ;;  %v2809_v49 = vmul.f32 1.442695, %v2706_v61  ;;  %v2813_v58 = vmul.f32 1.442695, %v2708_v47  ;;  %v2817_v2 = vmul.f32 1.442695, %v2710_v40 }
 0x716   : > { %v2888_v26 = vadd.f32 %v10271_v38, %v2887_v59  ;;  %v2906_v59 = vadd.f32 %v10282_v31, %v2905_v1  ;;  %v10288_v11 = vpop.eup %7500  ;;  %7510 = vpow2.f32 %v2801_v63  ;;  %v2714_v63 = vsub.f32 %v10006_v50, %v10130_v42 }
 0x717   : > { %v10293_v33 = vpop.eup %7502  ;;  %7512 = vpow2.f32 %v2805_v45  ;;  %v2821_v47 = vmul.f32 1.442695, %v2712_v19  ;;  %v2718_v50 = vsub.f32 %v10022_v44, %v10130_v42  ;;  %v2720_v15 = vsub.f32 %v10035_v54, %v10130_v42 }
 0x718   : > { %v2889_v21 = vadd.f32 %v10279_v35, %v2888_v26  ;;  %v2907_v0 = vadd.f32 %v10288_v11, %v2906_v59  ;;  %v10300_v10 = vpop.eup %7504  ;;  %7514 = vpow2.f32 %v2809_v49 }
 0x719   : > { %7516 = vpow2.f32 %v2813_v58  ;;  %v2837_v54 = vmul.f32 1.442695, %v2720_v15 }
 0x71a   : > { %v2890_v12 = vrot.slane %v2889_v21, 4  ;;  %v2908_v1 = vadd.f32 %v10293_v33, %v2907_v0  ;;  %v10303_v59 = vpop.eup %7506  ;;  %7518 = vpow2.f32 %v2817_v2  ;;  %v2722_v2 = vsub.f32 %v10038_v25, %v10130_v42 }
 0x71b   : > { %v2726_v25 = vsub.f32 %v10051_v17, %v10130_v42  ;;  %v2730_v17 = vsub.f32 %v10076_v23, %v10130_v42 }
 0x71c   : > { %v2891_v26 = vadd.f32 %v2890_v12, %v2889_v21  ;;  %v2909_v60 = vadd.f32 %v10300_v10, %v2908_v1  ;;  %v10308_v12 = vpop.eup %7508 }
 0x71d   : > { %14331 = vst [vmem:[#allocation45_spill] sm:$0xff] %v10308_v12  ;;  %v10313_v1 = vpop.eup %7510 }
 0x71e   : > { %v2892_v6 = vrot.slane %v2891_v26, 2  ;;  %v2910_v43 = vadd.f32 %v10303_v59, %v2909_v60  ;;  %14332 = vst [vmem:[#allocation46_spill] sm:$0xff] %v10313_v1  ;;  %v10320_v40 = vpop.eup %7512 }
 0x71f   : > { %v10326_v60 = vpop.eup %7514 }
 0x720   : > { %v2893_v21 = vadd.f32 %v2892_v6, %v2891_v26  ;;  %v2911_v61 = vadd.f32 %v10308_v12, %v2910_v43  ;;  %v2825_v6 = vmul.f32 1.442695, %v2714_v63  ;;  %v10331_v58 = vpop.eup %7516  ;;  %v2833_v43 = vmul.f32 1.442695, %v2718_v50 }
 0x721   : > { %v10335_v44 = vpop.eup %7518  ;;  %v2841_v50 = vmul.f32 1.442695, %v2722_v2  ;;  %v2849_v2 = vmul.f32 1.442695, %v2726_v25 }
 0x722   : > { %v2894_v0 = vrot.slane %v2893_v21, 1  ;;  %v2912_v45 = vadd.f32 %v10313_v1, %v2911_v61  ;;  %v2724_v61 = vsub.f32 %v10048_v51, %v10130_v42  ;;  %v2728_v51 = vsub.f32 %v10059_v16, %v10130_v42 }
 0x724   : > { %v10315_v26 = vadd.f32 %v2894_v0, %v2893_v21  ;;  %v2913_v49 = vadd.f32 %v10320_v40, %v2912_v45  ;;  %v2829_v21 = vmul.f32 1.442695, %v2716_v22  ;;  %v2845_v15 = vmul.f32 1.442695, %v2724_v61 }
 0x726   : > { %7520 = vrcp.f32 %v10315_v26  ;;  %v2914_v19 = vadd.f32 %v10326_v60, %v2913_v49  ;;  %vm2938_vm8 = vweird.f32 %v10315_v26  ;;  %v2942_v23 = vand.u32 2147483647, %v10315_v26 }
 0x727   : > { %7522 = vpow2.f32 %v2821_v47 }
 0x728   : > { %7524 = vpow2.f32 %v2825_v6  ;;  %v2915_v0 = vadd.f32 %v10331_v58, %v2914_v19  ;;  %vm2943_vm10 = vcmp.eq.f32.partialorder %v2942_v23, 8.507059e+37 }
 0x729   : > { %7526 = vpow2.f32 %v2829_v21 }
 0x72a   : > { %v2916_v47 = vadd.f32 %v10335_v44, %v2915_v0  ;;  %7528 = vpow2.f32 %v2833_v43 }
 0x72b   : > { %7530 = vpow2.f32 %v2837_v54  ;;  %v2944_v54 = vand.u32 2147483648, %v10315_v26 }
 0x72c   : > { %v7521_v63 = vpop.eup %7520  ;;  %7532 = vpow2.f32 %v2841_v50 }
 0x72d   : > { %v2934_v22 = vmul.f32 %v7521_v63, %v10315_v26  ;;  %v10342_v45 = vpop.eup %7522  ;;  %7534 = vpow2.f32 %v2845_v15  ;;  %vm2939_vm7 = vweird.f32 %v7521_v63  ;;  %v2945_v15 = vor.u32 1.1754944e-38, %v2944_v54 }
 0x72e   : > { %v2917_v49 = vadd.f32 %v10342_v45, %v2916_v47  ;;  %v10347_v19 = vpop.eup %7524  ;;  %v2853_v47 = vmul.f32 1.442695, %v2728_v51  ;;  %7536 = vpow2.f32 %v2849_v2  ;;  %vm2940_vm9 = vmor %vm2938_vm8, %vm2939_vm7 }
 0x72f   : > { %v2935_v6 = vsub.f32 1.0, %v2934_v22  ;;  %v10352_v12 = vpop.eup %7526 }
 0x730   : > { %v2918_v0 = vadd.f32 %v10347_v19, %v2917_v49  ;;  %v10357_v22 = vpop.eup %7528  ;;  %7538 = vpow2.f32 %v2853_v47 }
 0x731   : > { %v2936_v21 = vmul.f32 %v7521_v63, %v2935_v6  ;;  %v10360_v61 = vpop.eup %7530  ;;  %v2857_v6 = vmul.f32 1.442695, %v2730_v17 }
 0x732   : > { %v2919_v43 = vadd.f32 %v10352_v12, %v2918_v0  ;;  %v10366_v25 = vpop.eup %7532 }
 0x733   : > { %v2937_v1 = vadd.f32 %v7521_v63, %v2936_v21  ;;  %v10369_v51 = vpop.eup %7534  ;;  %7540 = vpow2.f32 %v2857_v6 }
 0x734   : > { %v2920_v16 = vadd.f32 %v10357_v22, %v2919_v43  ;;  %v10372_v0 = vpop.eup %7536 }
 0x735   : > { %v2941_v50 = vsel %vm2940_vm9, %v7521_v63, %v2937_v1 }
 0x736   : > { %v2921_v42 = vadd.f32 %v10360_v61, %v2920_v16  ;;  %v10374_v17 = vsel %vm2943_vm10, %v2945_v15, %v2941_v50  ;;  %v10377_v2 = vpop.eup %7538 }
 0x737   : > { %v2991_v1 = vmul.f32 %v10147_v52, %v10374_v17  ;;  %v3023_v63 = vmul.f32 %v10279_v35, %v10374_v17  ;;  %v3021_v16 = vmul.f32 %v10271_v38, %v10374_v17  ;;  %v3019_v54 = vmul.f32 %v10263_v41, %v10374_v17 }
 0x738   : > { %v2922_v49 = vadd.f32 %v10366_v25, %v2921_v42  ;;  %v2989_v23 = vmul.f32 %v10140_v29, %v10374_v17  ;;  %v3017_v52 = vmul.f32 %v10255_v27, %v10374_v17  ;;  %v3015_v35 = vmul.f32 %v10247_v53, %v10374_v17 }
 0x739   : > { %v10384_v47 = vpop.eup %7540  ;;  %3025 = vmatpush.msrb.mxu2 %v2991_v1  ;;  %3045 = vmatpush.msrb.mxu3 %v3023_v63  ;;  %v3013_v42 = vmul.f32 %v10239_v48, %v10374_v17  ;;  %v2987_v41 = vmul.f32 %v10135_v39, %v10374_v17  ;;  %v3009_v50 = vmul.f32 %v10221_v9, %v10374_v17 }
 0x73a   : > { %v2923_v21 = vadd.f32 %v10369_v51, %v2922_v49  ;;  %v3007_v29 = vmul.f32 %v10211_v56, %v10374_v17  ;;  %v3005_v27 = vmul.f32 %v10200_v4, %v10374_v17  ;;  %v2985_v48 = vmul.f32 %v10126_v18, %v10374_v17 }
 0x73b   : > { %3026 = vmatpush.msrb.mxu2 %v2989_v23  ;;  %3046 = vmatpush.msrb.mxu3 %v3021_v16  ;;  %v2983_v39 = vmul.f32 %v10121_v34, %v10374_v17  ;;  %v2981_v56 = vmul.f32 %v10116_v5, %v10374_v17  ;;  %v2979_v4 = vmul.f32 %v10111_v36, %v10374_v17  ;;  %v14333_v16 = vld [vmem:[#allocation27_spill] sm:$0xff]  ;;  %v1020_v23 = vpop.permute.xlu2 %1019 }
 0x73c   : > { %v2924_v26 = vadd.f32 %v10372_v0, %v2923_v21  ;;  %v3011_v18 = vmul.f32 %v10231_v57, %v10374_v17  ;;  %v2977_v34 = vmul.f32 %v10106_v7, %v10374_v17  ;;  %v2975_v5 = vmul.f32 %v10101_v8, %v10374_v17 }
 0x73d   : > { %3027 = vmatpush.msrb.mxu2 %v2987_v41  ;;  %3047 = vmatpush.msrb.mxu3 %v3019_v54  ;;  %v2973_v36 = vmul.f32 %v10096_v32, %v10374_v17  ;;  %v2971_v57 = vmul.f32 %v10091_v20, %v10374_v17  ;;  %v3001_v8 = vmul.f32 %v10179_v30, %v10374_v17 }
 0x73e   : > { %v2925_v43 = vadd.f32 %v10377_v2, %v2924_v26  ;;  %v3003_v26 = vmul.f32 %v10193_v46, %v10374_v17  ;;  %v2967_v32 = vmul.f32 %v10080_v3, %v10374_v17  ;;  %v2999_v20 = vmul.f32 %v10175_v37, %v10374_v17  ;;  %v14334_v3 = vld [vmem:[#allocation34_spill] sm:$0xff] }
 0x73f   : > { %3028 = vmatpush.msrb.mxu2 %v2985_v48  ;;  %3048 = vmatpush.msrb.mxu3 %v3017_v52  ;;  %v2965_v54 = vmul.f32 %v14333_v16, %v10374_v17  ;;  %v2963_v52 = vmul.f32 %v14334_v3, %v10374_v17  ;;  %v2995_v37 = vmul.f32 %v10161_v62, %v10374_v17  ;;  %v14349_v16 = vld [vmem:[#allocation40_spill] sm:$0xff]  ;;  %v14351_v3 = vld [vmem:[#allocation33_spill] sm:$0xff] }
 0x740   : > { %v2926_v6 = vadd.f32 %v10384_v47, %v2925_v43  ;;  %v2969_v43 = vmul.f32 %v10086_v13, %v10374_v17  ;;  %v2997_v13 = vmul.f32 %v10168_v55, %v10374_v17  ;;  %v14335_v55 = vld [vmem:[#allocation36_spill] sm:$0xff]  ;;  %v2993_v41 = vmul.f32 %v10156_v24, %v10374_v17 }
 0x741   : > { %3029 = vmatpush.msrb.mxu2 %v2983_v39  ;;  %3049 = vmatpush.msrb.mxu3 %v3015_v35 }
 0x742   : > { %v2927_v38 = vrot.slane %v2926_v6, 4 }
 0x743   : > { %3030 = vmatpush.msrb.mxu2 %v2981_v56  ;;  %3050 = vmatpush.msrb.mxu3 %v3013_v42 }
 0x744   : > { %v2928_v49 = vadd.f32 %v2927_v38, %v2926_v6  ;;  %v2947_v38 = vmul.f32 %v14335_v55, %v10374_v17  ;;  %v14356_v55 = vld [vmem:[#allocation16_spill] sm:$0xff] }
 0x745   : > { %3031 = vmatpush.msrb.mxu2 %v2979_v4  ;;  %3051 = vmatpush.msrb.mxu3 %v3011_v18  ;;  %v14342_v18 = vld [vmem:[#allocation39_spill] sm:$0xff] }
 0x746   : > { %v2929_v53 = vrot.slane %v2928_v49, 2 }
 0x747   : > { %3032 = vmatpush.msrb.mxu2 %v2977_v34  ;;  %3052 = vmatpush.msrb.mxu3 %v3009_v50  ;;  %v14336_v50 = vld [vmem:[#allocation14_spill] sm:$0xff]  ;;  %v985_v34 = vpop.permute.xlu0 %984 }
 0x748   : > { %v2930_v15 = vadd.f32 %v2929_v53, %v2928_v49 }
 0x749   : > { %3033 = vmatpush.msrb.mxu2 %v2975_v5  ;;  %3053 = vmatpush.msrb.mxu3 %v3007_v29  ;;  %v10448_v29 = vadd.f32 %v14336_v50, %v1020_v23  ;;  %v14343_v5 = vld [vmem:[#allocation24_spill] sm:$0xff] }
 0x74a   : > { %v2931_v9 = vrot.slane %v2930_v15, 1  ;;  %v14359_v50 = vld [vmem:[#allocation28_spill] sm:$0xff] }
 0x74b   : > { %3034 = vmatpush.msrb.mxu2 %v2973_v36  ;;  %3054 = vmatpush.msrb.mxu3 %v3005_v27  ;;  %v14337_v27 = vld [vmem:[#allocation26_spill] sm:$0xff] }
 0x74c   : > { %v2932_v21 = vadd.f32 %v2931_v9, %v2930_v15  ;;  %v10451_v49 = vadd.f32 %v14337_v27, %v1020_v23  ;;  %v14361_v27 = vld [vmem:[#allocation37_spill] sm:$0xff] }
 0x74d   : > { %3035 = vmatpush.msrb.mxu2 %v2971_v57  ;;  %3055 = vmatpush.msrb.mxu3 %v3003_v26  ;;  %v14344_v57 = vld [vmem:[#allocation4_spill] sm:$0xff] }
 0x74e   : > { %7542 = vrcp.f32 %v2932_v21  ;;  %v2959_v46 = vand.u32 2147483648, %v2932_v21  ;;  %v2957_v6 = vand.u32 2147483647, %v2932_v21  ;;  %vm2953_vm12 = vweird.f32 %v2932_v21 }
 0x74f   : > { %3036 = vmatpush.msrb.mxu2 %v2969_v43  ;;  %3056 = vmatpush.msrb.mxu3 %v3001_v8  ;;  %v14346_v8 = vld [vmem:[#allocation6_spill] sm:$0xff] }
 0x750   : > { %v2960_v42 = vor.u32 1.1754944e-38, %v2959_v46  ;;  %vm2958_vm0 = vcmp.eq.f32.partialorder %v2957_v6, 8.507059e+37 }
 0x751   : > { %3037 = vmatpush.msrb.mxu2 %v2967_v32  ;;  %3057 = vmatpush.msrb.mxu3 %v2999_v20  ;;  %v14347_v32 = vld [vmem:[#allocation3_spill] sm:$0xff] }
 0x753   : > { %3038 = vmatpush.msrb.mxu2 %v2965_v54  ;;  %3058 = vmatpush.msrb.mxu3 %v2997_v13  ;;  %v14350_v13 = vld [vmem:[#allocation45_spill] sm:$0xff] }
 0x754   : > { %v7543_v7 = vpop.eup %7542 }
 0x755   : > { %v2949_v1 = vmul.f32 %v7543_v7, %v2932_v21  ;;  %vm2954_vm11 = vweird.f32 %v7543_v7  ;;  %3039 = vmatpush.msrb.mxu2 %v2963_v52  ;;  %3059 = vmatpush.msrb.mxu3 %v2995_v37  ;;  %v14352_v52 = vld [vmem:[#allocation13_spill] sm:$0xff] }
 0x756   : > { %vm2955_vm15 = vmor %vm2953_vm12, %vm2954_vm11  ;;  %v14353_v37 = vld [vmem:[#allocation17_spill] sm:$0xff] }
 0x757   : > { %v2950_v63 = vsub.f32 1.0, %v2949_v1  ;;  %3040 = vmatpush.msrb.mxu2 %v2947_v38  ;;  %3060 = vmatpush.msrb.mxu3 %v2993_v41  ;;  %v1146_v1 = vadd.f32 %v14346_v8, %v985_v34  ;;  %v14357_v38 = vld [vmem:[#allocation20_spill] sm:$0xff]  ;;  %v14358_v41 = vld [vmem:[#allocation35_spill] sm:$0xff] }
 0x758   : > { %3041 = vmatmul.f32.vlgmr.msrb.gmra.mxu2 %v10448_v29  ;;  %3061 = vmatmul.f32.vlgmr.msrb.gmra.mxu3 %v10451_v49 }
 0x759   : > { %v2951_v30 = vmul.f32 %v7543_v7, %v2950_v63  ;;  %v14348_v63 = vld [vmem:[#allocation46_spill] sm:$0xff]  ;;  %v3106_v23 = vmul.f32 0.35355338, %v1146_v1 }
 0x75b   : > { %v2952_v35 = vadd.f32 %v7543_v7, %v2951_v30 }
 0x75d   : > { %v2956_v48 = vsel %vm2955_vm15, %v7543_v7, %v2952_v35  ;;  %v14345_v7 = vld [vmem:[#allocation5_spill] sm:$0xff] }
 0x75e   : > { %v10453_v62 = vsel %vm2958_vm0, %v2960_v42, %v2956_v48  ;;  %v1093_v43 = vadd.f32 %v14345_v7, %v985_v34  ;;  %v14354_v35 = vld [vmem:[#allocation25_spill] sm:$0xff]  ;;  %v14355_v42 = vld [vmem:[#allocation18_spill] sm:$0xff]  ;;  %v3155_v48 = vpop.trf.xlu2  ;;  %v6944_v34 = vld [vmem:[%s13986_s6 + $0x430] sm:$0xff] }
 0x75f   : > { %v2992_v53 = vmul.f32 %v10303_v59, %v10453_v62  ;;  %v3024_v24 = vmul.f32 %v10384_v47, %v10453_v62  ;;  %v2990_v17 = vmul.f32 %v10300_v10, %v10453_v62  ;;  %v3022_v39 = vmul.f32 %v10377_v2, %v10453_v62 }
 0x760   : > { %v2988_v15 = vmul.f32 %v10293_v33, %v10453_v62  ;;  %v3020_v56 = vmul.f32 %v10372_v0, %v10453_v62  ;;  %v3010_v59 = vmul.f32 %v10352_v12, %v10453_v62  ;;  %v2986_v47 = vmul.f32 %v10288_v11, %v10453_v62 }
 0x761   : > { %3065 = vmatpush.msra.mxu2 %v2992_v53  ;;  %3085 = vmatpush.msra.mxu3 %v3024_v24  ;;  %v3008_v10 = vmul.f32 %v10347_v19, %v10453_v62  ;;  %v3006_v2 = vmul.f32 %v10342_v45, %v10453_v62  ;;  %v3018_v33 = vmul.f32 %v10369_v51, %v10453_v62  ;;  %v3105_v6 = vmul.f32 0.35355338, %v1093_v43  ;;  %v14364_v53 = vld [vmem:[#allocation31_spill] sm:$0xff] }
 0x762   : > { %v3004_v0 = vmul.f32 %v10335_v44, %v10453_v62  ;;  %v3002_v12 = vmul.f32 %v10331_v58, %v10453_v62  ;;  %v3000_v11 = vmul.f32 %v10326_v60, %v10453_v62  ;;  %v2998_v19 = vmul.f32 %v10320_v40, %v10453_v62 }
 0x763   : > { %3066 = vmatpush.msra.mxu2 %v2990_v17  ;;  %3086 = vmatpush.msra.mxu3 %v3022_v39  ;;  %v2984_v45 = vmul.f32 %v10282_v31, %v10453_v62  ;;  %v3016_v51 = vmul.f32 %v10366_v25, %v10453_v62  ;;  %v2982_v44 = vmul.f32 %v10274_v28, %v10453_v62  ;;  %v14338_v31 = vld [vmem:[#allocation44_spill] sm:$0xff]  ;;  %v14339_v28 = vld [vmem:[#allocation43_spill] sm:$0xff] }
 0x764   : > { %v3014_v58 = vmul.f32 %v10360_v61, %v10453_v62  ;;  %v2980_v40 = vmul.f32 %v10266_v14, %v10453_v62  ;;  %v3012_v60 = vmul.f32 %v10357_v22, %v10453_v62  ;;  %v2978_v25 = vmul.f32 %v14338_v31, %v10453_v62  ;;  %v14340_v61 = vld [vmem:[#allocation38_spill] sm:$0xff]  ;;  %v14365_v17 = vld [vmem:[#allocation32_spill] sm:$0xff] }
 0x765   : > { %3067 = vmatpush.msra.mxu2 %v2988_v15  ;;  %3087 = vmatpush.msra.mxu3 %v3020_v56  ;;  %v2976_v9 = vmul.f32 %v14339_v28, %v10453_v62  ;;  %v2974_v4 = vmul.f32 %v14340_v61, %v10453_v62  ;;  %v14341_v14 = vld [vmem:[#allocation22_spill] sm:$0xff]  ;;  %v2970_v21 = vmul.f32 %v14342_v18, %v10453_v62  ;;  %v6940_v18 = vld [vmem:[%s13986_s6 + $0x410] sm:$0xff] }
 0x766   : > { %v2972_v22 = vmul.f32 %v14341_v14, %v10453_v62  ;;  %v2968_v36 = vmul.f32 %v14343_v5, %v10453_v62  ;;  %v2966_v26 = vmul.f32 %v14344_v57, %v10453_v62  ;;  %v2964_v20 = vmul.f32 %v14347_v32, %v10453_v62  ;;  %v3156_v24 = vpop.trf.xlu2  ;;  %v6945_v5 = vld [vmem:[%s13986_s6 + $0x438] sm:$0xff] }
 0x767   : > { %3068 = vmatpush.msra.mxu2 %v2986_v47  ;;  %3088 = vmatpush.msra.mxu3 %v3018_v33  ;;  %v2996_v46 = vmul.f32 %v14348_v63, %v10453_v62  ;;  %v2962_v54 = vmul.f32 %v14349_v16, %v10453_v62  ;;  %v2994_v30 = vmul.f32 %v14350_v13, %v10453_v62  ;;  %v14363_v62 = vld [vmem:[#allocation30_spill] sm:$0xff] }
 0x768   : > { %v6946_v63 = vld [vmem:[%s13986_s6 + $0x440] sm:$0xff] }
 0x769   : > { %3069 = vmatpush.msra.mxu2 %v2984_v45  ;;  %3089 = vmatpush.msra.mxu3 %v3016_v51  ;;  %v6938_v51 = vld [vmem:[%s13986_s6 + $0x400] sm:$0xff] }
 0x76b   : > { %3070 = vmatpush.msra.mxu2 %v2982_v44  ;;  %3090 = vmatpush.msra.mxu3 %v3014_v58  ;;  %v6939_v44 = vld [vmem:[%s13986_s6 + $0x408] sm:$0xff]  ;;  %v6942_v58 = vld [vmem:[%s13986_s6 + $0x420] sm:$0xff] }
 0x76d   : > { %3071 = vmatpush.msra.mxu2 %v2980_v40  ;;  %3091 = vmatpush.msra.mxu3 %v3012_v60  ;;  %v6943_v40 = vld [vmem:[%s13986_s6 + $0x428] sm:$0xff] }
 0x76e   : > { %v3157_v56 = vpop.trf.xlu2 }
 0x76f   : > { %3072 = vmatpush.msra.mxu2 %v2978_v25  ;;  %3092 = vmatpush.msra.mxu3 %v3010_v59  ;;  %v14368_v59 = vld [vmem:[#allocation42_spill] sm:$0xff] }
 0x771   : > { %3073 = vmatpush.msra.mxu2 %v2976_v9  ;;  %3093 = vmatpush.msra.mxu3 %v3008_v10 }
 0x773   : > { %3074 = vmatpush.msra.mxu2 %v2974_v4  ;;  %3094 = vmatpush.msra.mxu3 %v3006_v2 }
 0x775   : > { %3075 = vmatpush.msra.mxu2 %v2972_v22  ;;  %3095 = vmatpush.msra.mxu3 %v3004_v0 }
 0x776   : > { %v3158_v33 = vpop.trf.xlu2 }
 0x777   : > { %3076 = vmatpush.msra.mxu2 %v2970_v21  ;;  %3096 = vmatpush.msra.mxu3 %v3002_v12  ;;  %v6941_v21 = vld [vmem:[%s13986_s6 + $0x418] sm:$0xff] }
 0x779   : > { %3077 = vmatpush.msra.mxu2 %v2968_v36  ;;  %3097 = vmatpush.msra.mxu3 %v3000_v11 }
 0x77b   : > { %3078 = vmatpush.msra.mxu2 %v2966_v26  ;;  %3098 = vmatpush.msra.mxu3 %v2998_v19 }
 0x77d   : > { %3079 = vmatpush.msra.mxu2 %v2964_v20  ;;  %3099 = vmatpush.msra.mxu3 %v2996_v46  ;;  %v6947_v46 = vld [vmem:[%s13986_s6 + $0x448] sm:$0xff] }
 0x77e   : > { %v3159_v11 = vpop.trf.xlu2 }
 0x77f   : > { %3080 = vmatpush.msra.mxu2 %v2962_v54  ;;  %3100 = vmatpush.msra.mxu3 %v2994_v30 }
 0x780   : > { %3081 = vmatmul.f32.vlgmr.msra.gmra.mxu2 %v10448_v29  ;;  %3101 = vmatmul.f32.vlgmr.msra.gmra.mxu3 %v10451_v49  ;;  %v14360_v29 = vld [vmem:[#allocation29_spill] sm:$0xff] }
 0x781   : > { %3347 = vmatpush.msrb.mxu2 %v3105_v6  ;;  %3460 = vmatpush.msrb.mxu3 %v3106_v23  ;;  %v14362_v49 = vld [vmem:[#allocation41_spill] sm:$0xff] }
 0x786   : > { %v3160_v60 = vpop.trf.xlu2 }
 0x788   : > { %7002 = vmatmul.msk.f32.vlgmr.msrb.gmra.mxu2 %vm1305_vm14, %v14351_v3  ;;  %7034 = vmatmul.msk.f32.vlgmr.msrb.gmra.mxu3 %vm1305_vm14, %v14351_v3 }
 0x78e   : > { %v3161_v26 = vpop.trf.xlu2 }
 0x790   : > { %7003 = vmatmul.msk.f32.gmra.mxu2 %vm1305_vm14, %v14352_v52  ;;  %7035 = vmatmul.msk.f32.gmra.mxu3 %vm1305_vm14, %v14352_v52  ;;  %v6948_v52 = vld [vmem:[%s13986_s6 + $0x450] sm:$0xff] }
 0x796   : > { %v3162_v6 = vpop.trf.xlu2 }
 0x798   : > { %7004 = vmatmul.msk.f32.gmra.mxu2 %vm1305_vm14, %v14353_v37  ;;  %7036 = vmatmul.msk.f32.gmra.mxu3 %vm1305_vm14, %v14353_v37  ;;  %v6949_v37 = vld [vmem:[%s13986_s6 + $0x458] sm:$0xff] }
 0x7a0   : > { %7005 = vmatmul.msk.f32.gmra.mxu2 %vm1305_vm14, %v14354_v35  ;;  %7037 = vmatmul.msk.f32.gmra.mxu3 %vm1305_vm14, %v14354_v35 }
 0x7a8   : > { %7006 = vmatmul.msk.f32.gmra.mxu2 %vm1305_vm14, %v14355_v42  ;;  %7038 = vmatmul.msk.f32.gmra.mxu3 %vm1305_vm14, %v14355_v42 }
 0x7b0   : > { %7007 = vmatmul.msk.f32.gmra.mxu2 %vm1305_vm14, %v14356_v55  ;;  %7039 = vmatmul.msk.f32.gmra.mxu3 %vm1305_vm14, %v14356_v55 }
 0x7b8   : > { %7008 = vmatmul.msk.f32.gmra.mxu2 %vm1305_vm14, %v14357_v38  ;;  %7040 = vmatmul.msk.f32.gmra.mxu3 %vm1305_vm14, %v14357_v38 }
 0x7c0   : > { %7009 = vmatmul.msk.f32.gmra.mxu2 %vm1305_vm14, %v14358_v41  ;;  %7041 = vmatmul.msk.f32.gmra.mxu3 %vm1305_vm14, %v14358_v41 }
 0x7c8   : > { %7010 = vmatmul.msk.f32.gmra.mxu2 %vm1305_vm14, %v14359_v50  ;;  %7042 = vmatmul.msk.f32.gmra.mxu3 %vm1305_vm14, %v14359_v50 }
 0x7d0   : > { %7011 = vmatmul.msk.f32.gmra.mxu2 %vm1305_vm14, %v14360_v29  ;;  %7043 = vmatmul.msk.f32.gmra.mxu3 %vm1305_vm14, %v14360_v29  ;;  %v3163_v29 = vpop.trf.xlu2 }
 0x7d8   : > { %7012 = vmatmul.msk.f32.gmra.mxu2 %vm1305_vm14, %v14361_v27  ;;  %7044 = vmatmul.msk.f32.gmra.mxu3 %vm1305_vm14, %v14361_v27  ;;  %v6950_v27 = vld [vmem:[%s13986_s6 + $0x460] sm:$0xff] }
 0x7db   : > { %v10585_v39 = vpop.f32.mrf.mxu2  ;;  %v10587_v15 = vpop.f32.mrf.mxu3 }
 0x7dc   : > { %14366 = vst [vmem:[#allocation47_spill] sm:$0xff] %v10585_v39 }
 0x7dd   : > { %14367 = vst [vmem:[#allocation48_spill] sm:$0xff] %v10587_v15 }
 0x7e0   : > { %7013 = vmatmul.msk.f32.gmra.mxu2 %vm1305_vm14, %v14362_v49  ;;  %7045 = vmatmul.msk.f32.gmra.mxu3 %vm1305_vm14, %v14362_v49  ;;  %v6951_v49 = vld [vmem:[%s13986_s6 + $0x468] sm:$0xff] }
 0x7e8   : > { %7014 = vmatmul.msk.f32.gmra.mxu2 %vm1305_vm14, %v14363_v62  ;;  %7046 = vmatmul.msk.f32.gmra.mxu3 %vm1305_vm14, %v14363_v62 }
 0x7f0   : > { %7015 = vmatmul.msk.f32.gmra.mxu2 %vm1305_vm14, %v14364_v53  ;;  %7047 = vmatmul.msk.f32.gmra.mxu3 %vm1305_vm14, %v14364_v53 }
 0x7f8   : > { %7016 = vmatmul.msk.f32.gmra.mxu2 %vm1305_vm14, %v14365_v17  ;;  %7048 = vmatmul.msk.f32.gmra.mxu3 %vm1305_vm14, %v14365_v17  ;;  %v6958_v17 = vld [vmem:[%s13986_s6 + $0x4a0] sm:$0xff] }
 0x800   : > { %7017 = vmatmul.msk.f32.gmra.mxu2 %vm1305_vm14, %v14368_v59  ;;  %7049 = vmatmul.msk.f32.gmra.mxu3 %vm1305_vm14, %v14368_v59  ;;  %v6952_v59 = vld [vmem:[%s13986_s6 + $0x470] sm:$0xff] }
 0x803   : > { %v3082_v47 = vpop.f32.mrf.mxu2  ;;  %v3102_v10 = vpop.f32.mrf.mxu3 }
 0x804   : > { %v10593_v2 = vadd.f32 %v3102_v10, %v3082_v47  ;;  %v6953_v47 = vld [vmem:[%s13986_s6 + $0x478] sm:$0xff]  ;;  %v3164_v10 = vpop.trf.xlu2 }
 0x806   : > { %14369 = vst [vmem:[#allocation49_spill] sm:$0xff] %v10593_v2  ;;  %v6960_v2 = vld [vmem:[%s13986_s6 + $0x4b0] sm:$0xff] }
 0x808   : > { %7018 = vmatmul.msk.f32.gmra.mxu2 %vm1305_vm14, %v3155_v48  ;;  %7050 = vmatmul.msk.f32.gmra.mxu3 %vm1305_vm14, %v3155_v48 }
 0x80b   : > { %v3349_v0 = vpop.f32.mrf.mxu2  ;;  %v3462_v12 = vpop.f32.mrf.mxu3 }
 0x80c   : > { %v10613_v28 = vadd.f32 %v6938_v51, %v3349_v0  ;;  %v10615_v9 = vadd.f32 %v6939_v44, %v3462_v12 }
 0x80e   : > { %14370 = vst [vmem:[#allocation27_spill] sm:$0xff] %v10615_v9 }
 0x810   : > { %7019 = vmatmul.msk.f32.gmra.mxu2 %vm1305_vm14, %v3156_v24  ;;  %7051 = vmatmul.msk.f32.gmra.mxu3 %vm1305_vm14, %v3156_v24 }
 0x813   : > { %v3352_v19 = vpop.f32.mrf.mxu2  ;;  %v3465_v45 = vpop.f32.mrf.mxu3 }
 0x814   : > { %v10639_v7 = vadd.f32 %v6940_v18, %v3352_v19  ;;  %v10641_v43 = vadd.f32 %v6941_v21, %v3465_v45  ;;  %v6954_v45 = vld [vmem:[%s13986_s6 + $0x480] sm:$0xff] }
 0x816   : > { %14372 = vst [vmem:[#allocation36_spill] sm:$0xff] %v10641_v43 }
 0x818   : > { %7020 = vmatmul.msk.f32.gmra.mxu2 %vm1305_vm14, %v3157_v56  ;;  %7052 = vmatmul.msk.f32.gmra.mxu3 %vm1305_vm14, %v3157_v56  ;;  %v6956_v56 = vld [vmem:[%s13986_s6 + $0x490] sm:$0xff] }
 0x81b   : > { %v3355_v31 = vpop.f32.mrf.mxu2  ;;  %v3468_v25 = vpop.f32.mrf.mxu3 }
 0x81c   : > { %v10617_v61 = vadd.f32 %v6942_v58, %v3355_v31  ;;  %v10619_v4 = vadd.f32 %v6943_v40, %v3468_v25  ;;  %v3165_v58 = vpop.trf.xlu2 }
 0x81e   : > { %14371 = vst [vmem:[#allocation34_spill] sm:$0xff] %v10619_v4  ;;  %v3558_v14 = vmax.f32 %v10613_v28, %v10617_v61  ;;  %v3595_v22 = vmax.f32 %v10615_v9, %v10619_v4  ;;  %v6966_v9 = vld [vmem:[%s13986_s6 + $0x4e0] sm:$0xff] }
 0x820   : > { %7021 = vmatmul.msk.f32.gmra.mxu2 %vm1305_vm14, %v3158_v33  ;;  %7053 = vmatmul.msk.f32.gmra.mxu3 %vm1305_vm14, %v3158_v33 }
 0x823   : > { %v3358_v36 = vpop.f32.mrf.mxu2  ;;  %v3471_v57 = vpop.f32.mrf.mxu3 }
 0x824   : > { %v10643_v8 = vadd.f32 %v6944_v34, %v3358_v36  ;;  %v10645_v1 = vadd.f32 %v6945_v5, %v3471_v57  ;;  %v3166_v31 = vpop.trf.xlu2 }
 0x826   : > { %14373 = vst [vmem:[#allocation14_spill] sm:$0xff] %v10645_v1  ;;  %v3559_v32 = vmax.f32 %v10639_v7, %v10643_v8  ;;  %v3596_v20 = vmax.f32 %v10641_v43, %v10645_v1  ;;  %v6964_v1 = vld [vmem:[%s13986_s6 + $0x4d0] sm:$0xff] }
 0x828   : > { %7022 = vmatmul.msk.f32.gmra.mxu2 %vm1305_vm14, %v3159_v11  ;;  %7054 = vmatmul.msk.f32.gmra.mxu3 %vm1305_vm14, %v3159_v11 }
 0x82b   : > { %v3361_v16 = vpop.f32.mrf.mxu2  ;;  %v3474_v54 = vpop.f32.mrf.mxu3 }
 0x82c   : > { %v10659_v13 = vadd.f32 %v6946_v63, %v3361_v16  ;;  %v10661_v30 = vadd.f32 %v6947_v46, %v3474_v54 }
 0x82e   : > { %14374 = vst [vmem:[#allocation26_spill] sm:$0xff] %v10661_v30  ;;  %v10664_v23 = vmax.f32 %v3558_v14, %v10659_v13  ;;  %v10667_v3 = vmax.f32 %v3595_v22, %v10661_v30  ;;  %v3167_v22 = vpop.trf.xlu2  ;;  %v6962_v30 = vld [vmem:[%s13986_s6 + $0x4c0] sm:$0xff] }
 0x830   : > { %7023 = vmatmul.msk.f32.gmra.mxu2 %vm1305_vm14, %v3160_v60  ;;  %7055 = vmatmul.msk.f32.gmra.mxu3 %vm1305_vm14, %v3160_v60 }
 0x833   : > { %v3364_v35 = vpop.f32.mrf.mxu2  ;;  %v3477_v42 = vpop.f32.mrf.mxu3 }
 0x834   : > { %v10677_v55 = vadd.f32 %v6948_v52, %v3364_v35  ;;  %v10679_v38 = vadd.f32 %v6949_v37, %v3477_v42 }
 0x836   : > { %14375 = vst [vmem:[#allocation44_spill] sm:$0xff] %v10679_v38  ;;  %v10682_v41 = vmax.f32 %v3559_v32, %v10677_v55  ;;  %v10685_v50 = vmax.f32 %v3596_v20, %v10679_v38  ;;  %v3168_v34 = vpop.trf.xlu2 }
 0x838   : > { %7024 = vmatmul.msk.f32.gmra.mxu2 %vm1305_vm14, %v3161_v26  ;;  %7056 = vmatmul.msk.f32.gmra.mxu3 %vm1305_vm14, %v3161_v26 }
 0x83b   : > { %v3367_v48 = vpop.f32.mrf.mxu2  ;;  %v3480_v62 = vpop.f32.mrf.mxu3 }
 0x83c   : > { %v10695_v53 = vadd.f32 %v6950_v27, %v3367_v48  ;;  %v10697_v24 = vadd.f32 %v6951_v49, %v3480_v62 }
 0x83e   : > { %v3169_v32 = vpop.trf.xlu2 }
 0x840   : > { %7025 = vmatmul.msk.f32.gmra.mxu2 %vm1305_vm14, %v3162_v6  ;;  %7057 = vmatmul.msk.f32.gmra.mxu3 %vm1305_vm14, %v3162_v6 }
 0x843   : > { %v3370_v33 = vpop.f32.mrf.mxu2  ;;  %v3483_v0 = vpop.f32.mrf.mxu3 }
 0x844   : > { %v10711_v12 = vadd.f32 %v6952_v59, %v3370_v33  ;;  %v10713_v11 = vadd.f32 %v6953_v47, %v3483_v0 }
 0x846   : > { %v3170_v46 = vpop.trf.xlu2 }
 0x848   : > { %7026 = vmatmul.msk.f32.gmra.mxu2 %vm1305_vm14, %v3163_v29  ;;  %7058 = vmatmul.msk.f32.gmra.mxu3 %vm1305_vm14, %v3163_v29 }
 0x84b   : > { %v10721_v51 = vpop.f32.mrf.mxu2  ;;  %v10723_v44 = vpop.f32.mrf.mxu3 }
 0x84c   : > { %v10790_v39 = vadd.f32 %v6954_v45, %v10721_v51  ;;  %v14378_v45 = vmax.f32 %v10664_v23, %v10695_v53 }
 0x84e   : > { %14377 = vst [vmem:[#allocation38_spill] sm:$0xff] %v10790_v39  ;;  %v3564_v51 = vmax.f32 %v14378_v45, %v10790_v39 }
 0x850   : > { %7027 = vmatmul.msk.f32.gmra.mxu2 %vm1305_vm14, %v3164_v10  ;;  %7059 = vmatmul.msk.f32.gmra.mxu3 %vm1305_vm14, %v3164_v10 }
 0x853   : > { %v3376_v40 = vpop.f32.mrf.mxu2  ;;  %v10727_v60 = vpop.f32.mrf.mxu3 }
 0x854   : > { %v10792_v38 = vadd.f32 %v6956_v56, %v3376_v40  ;;  %v6968_v56 = vld [vmem:[%s13986_s6 + $0x4f0] sm:$0xff] }
 0x858   : > { %7028 = vmatmul.msk.f32.gmra.mxu2 %vm1305_vm14, %v3165_v58  ;;  %7060 = vmatmul.msk.f32.gmra.mxu3 %vm1305_vm14, %v3165_v58 }
 0x85b   : > { %v3379_v25 = vpop.f32.mrf.mxu2  ;;  %v10731_v14 = vpop.f32.mrf.mxu3 }
 0x85c   : > { %v10800_v4 = vadd.f32 %v6958_v17, %v3379_v25  ;;  %v14379_v17 = vmax.f32 %v10682_v41, %v10711_v12 }
 0x85e   : > { %v3565_v40 = vmax.f32 %v14379_v17, %v10792_v38  ;;  %v3566_v23 = vmax.f32 %v3564_v51, %v10800_v4 }
 0x860   : > { %7029 = vmatmul.msk.f32.gmra.mxu2 %vm1305_vm14, %v3166_v31  ;;  %7061 = vmatmul.msk.f32.gmra.mxu3 %vm1305_vm14, %v3166_v31 }
 0x863   : > { %v3382_v18 = vpop.f32.mrf.mxu2  ;;  %v10735_v21 = vpop.f32.mrf.mxu3 }
 0x864   : > { %v10802_v43 = vadd.f32 %v6960_v2, %v3382_v18  ;;  %v6970_v18 = vld [vmem:[%s13986_s6 + $0x500] sm:$0xff] }
 0x866   : > { %v3567_v45 = vmax.f32 %v3565_v40, %v10802_v43 }
 0x868   : > { %7030 = vmatmul.msk.f32.gmra.mxu2 %vm1305_vm14, %v3167_v22  ;;  %7062 = vmatmul.msk.f32.gmra.mxu3 %vm1305_vm14, %v3167_v22 }
 0x86b   : > { %v3385_v5 = vpop.f32.mrf.mxu2  ;;  %v10739_v36 = vpop.f32.mrf.mxu3 }
 0x86c   : > { %v10818_v2 = vadd.f32 %v6962_v30, %v3385_v5  ;;  %v6976_v30 = vld [vmem:[%s13986_s6 + $0x530] sm:$0xff] }
 0x86e   : > { %14380 = vst [vmem:[#allocation22_spill] sm:$0xff] %v10818_v2 }
 0x870   : > { %7031 = vmatmul.msk.f32.gmra.mxu2 %vm1305_vm14, %v3168_v34  ;;  %7063 = vmatmul.msk.f32.gmra.mxu3 %vm1305_vm14, %v3168_v34 }
 0x873   : > { %v3388_v57 = vpop.f32.mrf.mxu2  ;;  %v10743_v26 = vpop.f32.mrf.mxu3 }
 0x874   : > { %v10820_v25 = vadd.f32 %v6964_v1, %v3388_v57  ;;  %v6974_v1 = vld [vmem:[%s13986_s6 + $0x520] sm:$0xff]  ;;  %v3568_v57 = vmax.f32 %v3566_v23, %v10818_v2 }
 0x876   : > { %14381 = vst [vmem:[#allocation39_spill] sm:$0xff] %v10820_v25  ;;  %v3569_v17 = vmax.f32 %v3567_v45, %v10820_v25 }
 0x878   : > { %7032 = vmatmul.msk.f32.gmra.mxu2 %vm1305_vm14, %v3169_v32  ;;  %7064 = vmatmul.msk.f32.gmra.mxu3 %vm1305_vm14, %v3169_v32 }
 0x87b   : > { %v3391_v20 = vpop.f32.mrf.mxu2  ;;  %v10747_v63 = vpop.f32.mrf.mxu3 }
 0x87c   : > { %v10830_v39 = vadd.f32 %v6966_v9, %v3391_v20  ;;  %v6978_v20 = vld [vmem:[%s13986_s6 + $0x540] sm:$0xff] }
 0x880   : > { %7033 = vmatmul.msk.f32.gmra.mxu2 %vm1305_vm14, %v3170_v46  ;;  %7065 = vmatmul.msk.f32.gmra.mxu3 %vm1305_vm14, %v3170_v46 }
 0x883   : > { %v3394_v16 = vpop.f32.mrf.mxu2  ;;  %v10751_v54 = vpop.f32.mrf.mxu3 }
 0x884   : > { %v10832_v41 = vadd.f32 %v6968_v56, %v3394_v16  ;;  %v6980_v16 = vld [vmem:[%s13986_s6 + $0x550] sm:$0xff]  ;;  %v3570_v56 = vmax.f32 %v3568_v57, %v10830_v39 }
 0x886   : > { %v3571_v23 = vmax.f32 %v3569_v17, %v10832_v41 }
 0x88b   : > { %v3397_v6 = vpop.f32.mrf.mxu2  ;;  %v10753_v52 = vpop.f32.mrf.mxu3 }
 0x88c   : > { %v10842_v51 = vadd.f32 %v6970_v18, %v3397_v6 }
 0x88e   : > { %v3572_v18 = vmax.f32 %v3570_v56, %v10842_v51 }
 0x893   : > { %v3400_v37 = vpop.f32.mrf.mxu2  ;;  %v10755_v35 = vpop.f32.mrf.mxu3 }
 0x89b   : > { %v3403_v42 = vpop.f32.mrf.mxu2  ;;  %v10757_v27 = vpop.f32.mrf.mxu3 }
 0x89c   : > { %v10856_v2 = vadd.f32 %v6974_v1, %v3403_v42  ;;  %v6986_v42 = vld [vmem:[%s13986_s6 + $0x580] sm:$0xff] }
 0x89e   : > { %v3574_v1 = vmax.f32 %v3572_v18, %v10856_v2 }
 0x8a3   : > { %v3406_v29 = vpop.f32.mrf.mxu2  ;;  %v10759_v48 = vpop.f32.mrf.mxu3 }
 0x8a4   : > { %v10858_v6 = vadd.f32 %v6976_v30, %v3406_v29  ;;  %v6988_v29 = vld [vmem:[%s13986_s6 + $0x590] sm:$0xff] }
 0x8ab   : > { %v3409_v49 = vpop.f32.mrf.mxu2  ;;  %v10761_v59 = vpop.f32.mrf.mxu3 }
 0x8ac   : > { %v10868_v25 = vadd.f32 %v6978_v20, %v3409_v49  ;;  %v6990_v49 = vld [vmem:[%s13986_s6 + $0x5a0] sm:$0xff] }
 0x8b3   : > { %v3412_v62 = vpop.f32.mrf.mxu2  ;;  %v10763_v10 = vpop.f32.mrf.mxu3 }
 0x8b4   : > { %v10870_v57 = vadd.f32 %v6980_v16, %v3412_v62  ;;  %v6992_v62 = vld [vmem:[%s13986_s6 + $0x5b0] sm:$0xff]  ;;  %v3576_v16 = vmax.f32 %v3574_v1, %v10868_v25 }
 0x8b6   : > { %14382 = vst [vmem:[#allocation24_spill] sm:$0xff] %v10870_v57 }
 0x8bb   : > { %v3415_v47 = vpop.f32.mrf.mxu2  ;;  %v10765_v58 = vpop.f32.mrf.mxu3 }
 0x8c3   : > { %v3418_v33 = vpop.f32.mrf.mxu2  ;;  %v10767_v22 = vpop.f32.mrf.mxu3 }
 0x8cb   : > { %v3421_v0 = vpop.f32.mrf.mxu2  ;;  %v10771_v32 = vpop.f32.mrf.mxu3 }
 0x8cc   : > { %v10892_v18 = vadd.f32 %v6986_v42, %v3421_v0  ;;  %v6998_v42 = vld [vmem:[%s13986_s6 + $0x5e0] sm:$0xff] }
 0x8d3   : > { %v3424_v31 = vpop.f32.mrf.mxu2  ;;  %v10781_v19 = vpop.f32.mrf.mxu3 }
 0x8d4   : > { %14376 = vst [vmem:[#allocation43_spill] sm:$0xff] %v10781_v19  ;;  %v6972_v19 = vld [vmem:[%s13986_s6 + $0x510] sm:$0xff] }
 0x8d5   : > { %v10844_v40 = vadd.f32 %v6972_v19, %v3400_v37  ;;  %v6982_v19 = vld [vmem:[%s13986_s6 + $0x560] sm:$0xff]  ;;  %v6984_v37 = vld [vmem:[%s13986_s6 + $0x570] sm:$0xff] }
 0x8d6   : > { %v10880_v17 = vadd.f32 %v6982_v19, %v3415_v47  ;;  %v10882_v56 = vadd.f32 %v6984_v37, %v3418_v33  ;;  %v6994_v47 = vld [vmem:[%s13986_s6 + $0x5c0] sm:$0xff]  ;;  %v6996_v33 = vld [vmem:[%s13986_s6 + $0x5d0] sm:$0xff] }
 0x8d7   : > { %v3573_v45 = vmax.f32 %v3571_v23, %v10844_v40 }
 0x8d8   : > { %14383 = vst [vmem:[#allocation4_spill] sm:$0xff] %v10882_v56  ;;  %v3578_v19 = vmax.f32 %v3576_v16, %v10880_v17 }
 0x8d9   : > { %v3575_v30 = vmax.f32 %v3573_v45, %v10858_v6  ;;  %v10894_v45 = vadd.f32 %v6988_v29, %v3424_v31 }
 0x8da   : > { %v3580_v29 = vmax.f32 %v3578_v19, %v10892_v18 }
 0x8db   : > { %v10769_v34 = vpop.f32.mrf.mxu2  ;;  %v10846_v9 = vpop.f32.mrf.mxu3  ;;  %v3577_v23 = vmax.f32 %v3575_v30, %v10870_v57  ;;  %14384 = vst [vmem:[#allocation5_spill] sm:$0xff] %v10894_v45 }
 0x8dc   : > { %v10905_v1 = vadd.f32 %v6990_v49, %v10769_v34  ;;  %v7000_v34 = vld [vmem:[%s13986_s6 + $0x5f0] sm:$0xff] }
 0x8dd   : > { %v3579_v37 = vmax.f32 %v3577_v23, %v10882_v56 }
 0x8df   : > { %v3581_v30 = vmax.f32 %v3579_v37, %v10894_v45 }
 0x8e3   : > { %v10773_v46 = vpop.f32.mrf.mxu2  ;;  %v10910_v31 = vpop.f32.mrf.mxu3 }
 0x8e4   : > { %v10908_v0 = vadd.f32 %v6992_v62, %v10773_v46  ;;  %v3582_v46 = vmax.f32 %v3580_v29, %v10905_v1 }
 0x8e6   : > { %v3583_v49 = vmax.f32 %v3581_v30, %v10908_v0 }
 0x8eb   : > { %v3433_v15 = vpop.f32.mrf.mxu2 }
 0x8ec   : > { %v10917_v57 = vadd.f32 %v6994_v47, %v3433_v15  ;;  %v6955_v47 = vld [vmem:[%s13986_s6 + $0x488] sm:$0xff] }
 0x8ee   : > { %v3584_v56 = vmax.f32 %v3582_v46, %v10917_v57 }
 0x8f3   : > { %v3436_v5 = vpop.f32.mrf.mxu2 }
 0x8f4   : > { %v10919_v16 = vadd.f32 %v6996_v33, %v3436_v5  ;;  %v10937_v33 = vpop.f32.mrf.mxu3 }
 0x8f6   : > { %v3585_v19 = vmax.f32 %v3583_v49, %v10919_v16  ;;  %v6963_v49 = vld [vmem:[%s13986_s6 + $0x4c8] sm:$0xff] }
 0x8fb   : > { %v3439_v20 = vpop.f32.mrf.mxu2 }
 0x8fc   : > { %v10926_v62 = vadd.f32 %v6998_v42, %v3439_v20  ;;  %v6957_v20 = vld [vmem:[%s13986_s6 + $0x498] sm:$0xff]  ;;  %v6959_v42 = vld [vmem:[%s13986_s6 + $0x4a8] sm:$0xff] }
 0x8fd   : > { %v10952_v46 = vadd.f32 %v6957_v20, %v10727_v60  ;;  %v6967_v60 = vld [vmem:[%s13986_s6 + $0x4e8] sm:$0xff]  ;;  %v14387_v20 = vmax.f32 %v10685_v50, %v10713_v11 }
 0x8fe   : > { %v3586_v15 = vmax.f32 %v3584_v56, %v10926_v62  ;;  %v10946_v56 = vadd.f32 %v6955_v47, %v10723_v44  ;;  %v6965_v44 = vld [vmem:[%s13986_s6 + $0x4d8] sm:$0xff]  ;;  %v14386_v47 = vmax.f32 %v10667_v3, %v10697_v24  ;;  %v10985_v45 = vadd.f32 %v6967_v60, %v10747_v63  ;;  %v6971_v50 = vld [vmem:[%s13986_s6 + $0x508] sm:$0xff]  ;;  %v11000_v63 = vpop.f32.mrf.mxu3 }
 0x8ff   : > { %v6969_v3 = vld [vmem:[%s13986_s6 + $0x4f8] sm:$0xff] }
 0x903   : > { %v3442_v23 = vpop.f32.mrf.mxu2 }
 0x904   : > { %v10930_v37 = vadd.f32 %v7000_v34, %v3442_v23  ;;  %v6961_v34 = vld [vmem:[%s13986_s6 + $0x4b8] sm:$0xff] }
 0x906   : > { %v3587_v5 = vmax.f32 %v3585_v19, %v10930_v37  ;;  %v10958_v19 = vadd.f32 %v6959_v42, %v10731_v14  ;;  %v10974_v14 = vadd.f32 %v6963_v49, %v10739_v36  ;;  %v3602_v42 = vmax.f32 %v14387_v20, %v10952_v46  ;;  %v6975_v49 = vld [vmem:[%s13986_s6 + $0x528] sm:$0xff] }
 0x907   : > { %v11011_v20 = vadd.f32 %v6971_v50, %v10753_v52 }
 0x908   : > { %v3588_v29 = vmax.f32 %v3586_v15, %v3587_v5  ;;  %v10964_v15 = vadd.f32 %v6961_v34, %v10735_v21  ;;  %v10981_v21 = vadd.f32 %v6965_v44, %v10743_v26  ;;  %v6973_v26 = vld [vmem:[%s13986_s6 + $0x518] sm:$0xff] }
 0x90a   : > { %v3589_v30 = vrot.slane %v3588_v29, 4  ;;  %14385 = vst [vmem:[#allocation6_spill] sm:$0xff] %v10964_v15  ;;  %v3604_v36 = vmax.f32 %v3602_v42, %v10964_v15  ;;  %v11014_v42 = vadd.f32 %v6973_v26, %v10755_v35  ;;  %v11017_v15 = vadd.f32 %v6975_v49, %v10757_v27  ;;  %v6983_v49 = vld [vmem:[%s13986_s6 + $0x568] sm:$0xff] }
 0x90c   : > { %v3590_v23 = vmax.f32 %v3588_v29, %v3589_v30  ;;  %v3601_v29 = vmax.f32 %v14386_v47, %v10946_v56  ;;  %v3606_v60 = vmax.f32 %v3604_v36, %v10981_v21  ;;  %14388 = vst [vmem:[#allocation3_spill] sm:$0xff] %v11017_v15 }
 0x90e   : > { %v3591_v5 = vrot.slane %v3590_v23, 2  ;;  %v3603_v34 = vmax.f32 %v3601_v29, %v10958_v19 }
 0x910   : > { %v3592_v30 = vmax.f32 %v3590_v23, %v3591_v5  ;;  %v3605_v44 = vmax.f32 %v3603_v34, %v10974_v14  ;;  %v11005_v5 = vadd.f32 %v6969_v3, %v10751_v54  ;;  %v6977_v34 = vld [vmem:[%s13986_s6 + $0x538] sm:$0xff] }
 0x911   : > { %v11040_v50 = vadd.f32 %v6977_v34, %v10759_v48  ;;  %v3552_v34 = vpop.f32.mrf.mxu3 }
 0x912   : > { %v3593_v23 = vrot.slane %v3592_v30, 1  ;;  %v3607_v29 = vmax.f32 %v3605_v44, %v10985_v45 }
 0x914   : > { %v11007_v47 = vmax.f32 %v3592_v30, %v3593_v23  ;;  %v6985_v23 = vld [vmem:[%s13986_s6 + $0x578] sm:$0xff] }
 0x915   : > { %v11090_v44 = vadd.f32 %v6985_v23, %v10767_v22  ;;  %v14389_v22 = vld [vmem:[#allocation43_spill] sm:$0xff] }
 0x916   : > { %v3632_v54 = vsub.f32 %v10613_v28, %v11007_v47  ;;  %v3634_v30 = vsub.f32 %v10639_v7, %v11007_v47  ;;  %v3636_v52 = vsub.f32 %v10617_v61, %v11007_v47  ;;  %v3638_v35 = vsub.f32 %v10643_v8, %v11007_v47  ;;  %v6979_v61 = vld [vmem:[%s13986_s6 + $0x548] sm:$0xff] }
 0x917   : > { %v3640_v27 = vsub.f32 %v10659_v13, %v11007_v47  ;;  %v3642_v3 = vsub.f32 %v10677_v55, %v11007_v47  ;;  %v3644_v36 = vsub.f32 %v10695_v53, %v11007_v47  ;;  %v3608_v7 = vmax.f32 %v3606_v60, %v11005_v5  ;;  %v6981_v13 = vld [vmem:[%s13986_s6 + $0x558] sm:$0xff] }
 0x918   : > { %v3609_v8 = vmax.f32 %v3607_v29, %v11011_v20  ;;  %v11054_v48 = vadd.f32 %v6979_v61, %v10761_v59  ;;  %v11066_v29 = vadd.f32 %v6981_v13, %v10763_v10  ;;  %v6987_v61 = vld [vmem:[%s13986_s6 + $0x588] sm:$0xff]  ;;  %v11087_v59 = vadd.f32 %v6983_v49, %v10765_v58  ;;  %v6993_v13 = vld [vmem:[%s13986_s6 + $0x5b8] sm:$0xff] }
 0x919   : > { %v3610_v55 = vmax.f32 %v3608_v7, %v11014_v42  ;;  %v3696_v53 = vmul.f32 1.442695, %v3632_v54  ;;  %v3700_v28 = vmul.f32 1.442695, %v3634_v30  ;;  %v6991_v10 = vld [vmem:[%s13986_s6 + $0x5a8] sm:$0xff]  ;;  %v11101_v58 = vadd.f32 %v6987_v61, %v10771_v32  ;;  %v6997_v30 = vld [vmem:[%s13986_s6 + $0x5d8] sm:$0xff] }
 0x91a   : > { %v3611_v26 = vmax.f32 %v3609_v8, %v11017_v15  ;;  %v6989_v8 = vld [vmem:[%s13986_s6 + $0x598] sm:$0xff]  ;;  %v6995_v54 = vld [vmem:[%s13986_s6 + $0x5c8] sm:$0xff]  ;;  %v11115_v32 = vadd.f32 %v6991_v10, %v10846_v9  ;;  %v3712_v61 = vmul.f32 1.442695, %v3640_v27  ;;  %v3716_v9 = vmul.f32 1.442695, %v3642_v3  ;;  %v3555_v27 = vpop.f32.mrf.mxu3 }
 0x91b   : > { %v3612_v60 = vmax.f32 %v3610_v55, %v11040_v50  ;;  %v3704_v55 = vmul.f32 1.442695, %v3636_v52  ;;  %v11104_v49 = vadd.f32 %v6989_v8, %v14389_v22  ;;  %7544 = vpow2.f32 %v3696_v53  ;;  %v6999_v53 = vld [vmem:[%s13986_s6 + $0x5e8] sm:$0xff]  ;;  %v14392_v22 = vld [vmem:[#allocation38_spill] sm:$0xff] }
 0x91c   : > { %v3613_v15 = vmax.f32 %v3611_v26, %v11054_v48  ;;  %7546 = vpow2.f32 %v3700_v28  ;;  %v3708_v26 = vmul.f32 1.442695, %v3638_v35  ;;  %v11129_v28 = vadd.f32 %v6997_v30, %v11000_v63 }
 0x91d   : > { %v3614_v7 = vmax.f32 %v3612_v60, %v11066_v29  ;;  %v11118_v60 = vadd.f32 %v6993_v13, %v10910_v31  ;;  %7548 = vpow2.f32 %v3704_v55  ;;  %v11135_v55 = vadd.f32 %v6999_v53, %v3552_v34  ;;  %v7001_v34 = vld [vmem:[%s13986_s6 + $0x5f8] sm:$0xff] }
 0x91e   : > { %v3615_v52 = vmax.f32 %v3613_v15, %v11087_v59  ;;  %v11126_v15 = vadd.f32 %v6995_v54, %v10937_v33  ;;  %7550 = vpow2.f32 %v3708_v26  ;;  %v3648_v33 = vsub.f32 %v14392_v22, %v11007_v47 }
 0x91f   : > { %v3616_v23 = vmax.f32 %v3614_v7, %v11090_v44  ;;  %7552 = vpow2.f32 %v3712_v61  ;;  %v3720_v54 = vmul.f32 1.442695, %v3644_v36  ;;  %v14394_v36 = vsub.f32 %v10711_v12, %v11007_v47 }
 0x920   : > { %v3617_v8 = vmax.f32 %v3615_v52, %v11101_v58  ;;  %v3650_v52 = vsub.f32 %v10792_v38, %v11007_v47  ;;  %7554 = vpow2.f32 %v3716_v9  ;;  %v11155_v53 = vadd.f32 %v7001_v34, %v3555_v27 }
 0x921   : > { %v3618_v35 = vmax.f32 %v3616_v23, %v11104_v49  ;;  %v11131_v31 = vpop.eup %7544  ;;  %v3724_v23 = vmul.f32 1.442695, %v14394_v36  ;;  %7556 = vpow2.f32 %v3720_v54  ;;  %v3654_v12 = vsub.f32 %v10802_v43, %v11007_v47 }
 0x922   : > { %14390 = vst [vmem:[#allocation46_spill] sm:$0xff] %v11131_v31  ;;  %v3619_v7 = vmax.f32 %v3617_v8, %v11115_v32  ;;  %v11137_v13 = vpop.eup %7546  ;;  %v3732_v27 = vmul.f32 1.442695, %v3650_v52 }
 0x923   : > { %v3620_v10 = vmax.f32 %v3618_v35, %v11118_v60  ;;  %14391 = vst [vmem:[#allocation40_spill] sm:$0xff] %v11137_v13  ;;  %v3824_v30 = vadd.f32 %v11137_v13, %v11131_v31  ;;  %v11148_v26 = vpop.eup %7548  ;;  %7558 = vpow2.f32 %v3724_v23  ;;  %v14400_v31 = vld [vmem:[#allocation39_spill] sm:$0xff]  ;;  %v3740_v52 = vmul.f32 1.442695, %v3654_v12 }
 0x924   : > { %v3621_v63 = vmax.f32 %v3619_v7, %v11126_v15  ;;  %14393 = vst [vmem:[#allocation45_spill] sm:$0xff] %v11148_v26  ;;  %v11159_v35 = vpop.eup %7550  ;;  %v3652_v7 = vsub.f32 %v10800_v4, %v11007_v47  ;;  %v14398_v4 = vld [vmem:[#allocation22_spill] sm:$0xff]  ;;  %v3658_v43 = vsub.f32 %v14400_v31, %v11007_v47  ;;  %v3662_v31 = vsub.f32 %v10832_v41, %v11007_v47 }
 0x925   : > { %v3622_v3 = vmax.f32 %v3620_v10, %v11129_v28  ;;  %v3825_v8 = vadd.f32 %v11148_v26, %v3824_v30  ;;  %14395 = vst [vmem:[#allocation33_spill] sm:$0xff] %v11159_v35  ;;  %v3728_v10 = vmul.f32 1.442695, %v3648_v33  ;;  %v11165_v22 = vpop.eup %7552  ;;  %v3656_v54 = vsub.f32 %v14398_v4, %v11007_v47 }
 0x926   : > { %v3623_v61 = vmax.f32 %v3621_v63, %v11135_v55  ;;  %14396 = vst [vmem:[#allocation13_spill] sm:$0xff] %v11165_v22  ;;  %v11170_v34 = vpop.eup %7554  ;;  %v3736_v33 = vmul.f32 1.442695, %v3652_v7  ;;  %v3748_v12 = vmul.f32 1.442695, %v3658_v43 }
 0x927   : > { %v3624_v38 = vmax.f32 %v3622_v3, %v11155_v53  ;;  %v3826_v9 = vadd.f32 %v11159_v35, %v3825_v8  ;;  %14397 = vst [vmem:[#allocation17_spill] sm:$0xff] %v11170_v34  ;;  %7560 = vpow2.f32 %v3728_v10  ;;  %v11175_v8 = vpop.eup %7556  ;;  %v3744_v7 = vmul.f32 1.442695, %v3656_v54 }
 0x928   : > { %14399 = vst [vmem:[#allocation25_spill] sm:$0xff] %v11175_v8  ;;  %7562 = vpow2.f32 %v3732_v27  ;;  %v3756_v41 = vmul.f32 1.442695, %v3662_v31 }
 0x929   : > { %v3625_v63 = vmax.f32 %v3623_v61, %v3624_v38  ;;  %v3827_v30 = vadd.f32 %v11165_v22, %v3826_v9  ;;  %v11180_v38 = vpop.eup %7558  ;;  %v3660_v9 = vsub.f32 %v10830_v39, %v11007_v47  ;;  %7564 = vpow2.f32 %v3736_v33 }
 0x92a   : > { %14401 = vst [vmem:[#allocation18_spill] sm:$0xff] %v11180_v38  ;;  %7566 = vpow2.f32 %v3740_v52  ;;  %v3666_v33 = vsub.f32 %v10844_v40, %v11007_v47 }
 0x92b   : > { %v3626_v3 = vrot.slane %v3625_v63, 4  ;;  %v3828_v36 = vadd.f32 %v11170_v34, %v3827_v30  ;;  %7568 = vpow2.f32 %v3744_v7  ;;  %v3752_v39 = vmul.f32 1.442695, %v3660_v9  ;;  %v14402_v9 = vld [vmem:[#allocation27_spill] sm:$0xff] }
 0x92c   : > { %7570 = vpow2.f32 %v3748_v12  ;;  %v14404_v12 = vld [vmem:[#allocation34_spill] sm:$0xff] }
 0x92d   : > { %v3627_v23 = vmax.f32 %v3625_v63, %v3626_v3  ;;  %v3829_v61 = vadd.f32 %v11175_v8, %v3828_v36  ;;  %v11185_v4 = vpop.eup %7560  ;;  %v3664_v63 = vsub.f32 %v10842_v51, %v11007_v47  ;;  %v3668_v51 = vsub.f32 %v10856_v2, %v11007_v47  ;;  %v14405_v2 = vld [vmem:[#allocation14_spill] sm:$0xff] }
 0x92e   : > { %v11192_v36 = vpop.eup %7562  ;;  %7572 = vpow2.f32 %v3752_v39  ;;  %v14407_v39 = vld [vmem:[#allocation44_spill] sm:$0xff] }
 0x92f   : > { %v3628_v10 = vrot.slane %v3627_v23, 2  ;;  %v3830_v30 = vadd.f32 %v11180_v38, %v3829_v61  ;;  %v11197_v13 = vpop.eup %7564  ;;  %v3760_v52 = vmul.f32 1.442695, %v3664_v63  ;;  %7574 = vpow2.f32 %v3756_v41 }
 0x930   : > { %v11204_v7 = vpop.eup %7566 }
 0x931   : > { %v3629_v27 = vmax.f32 %v3627_v23, %v3628_v10  ;;  %v3831_v3 = vadd.f32 %v11185_v4, %v3830_v30  ;;  %v14403_v10 = vld [vmem:[#allocation36_spill] sm:$0xff]  ;;  %v11217_v26 = vpop.eup %7568  ;;  %7576 = vpow2.f32 %v3760_v52 }
 0x933   : > { %v3630_v54 = vrot.slane %v3629_v27, 1  ;;  %v3832_v61 = vadd.f32 %v11192_v36, %v3831_v3 }
 0x935   : > { %v11199_v43 = vmax.f32 %v3629_v27, %v3630_v54  ;;  %v3833_v23 = vadd.f32 %v11197_v13, %v3832_v61  ;;  %v3764_v27 = vmul.f32 1.442695, %v3666_v33  ;;  %v14406_v54 = vld [vmem:[#allocation26_spill] sm:$0xff] }
 0x937   : > { %v3633_v40 = vsub.f32 %v14402_v9, %v11199_v43  ;;  %v3635_v30 = vsub.f32 %v14403_v10, %v11199_v43  ;;  %v3637_v31 = vsub.f32 %v14404_v12, %v11199_v43  ;;  %v3834_v3 = vadd.f32 %v11204_v7, %v3833_v23  ;;  %v11226_v12 = vpop.eup %7570 }
 0x938   : > { %v3639_v63 = vsub.f32 %v14405_v2, %v11199_v43  ;;  %v3641_v61 = vsub.f32 %v14406_v54, %v11199_v43  ;;  %v3643_v9 = vsub.f32 %v14407_v39, %v11199_v43  ;;  %v3645_v10 = vsub.f32 %v10697_v24, %v11199_v43  ;;  %v14408_v54 = vld [vmem:[#allocation24_spill] sm:$0xff]  ;;  %v11231_v22 = vpop.eup %7572 }
 0x939   : > { %v3835_v23 = vadd.f32 %v11217_v26, %v3834_v3  ;;  %v3768_v2 = vmul.f32 1.442695, %v3668_v51  ;;  %v3674_v35 = vsub.f32 %v14408_v54, %v11007_v47  ;;  %7578 = vpow2.f32 %v3764_v27 }
 0x93a   : > { %v14409_v24 = vsub.f32 %v10858_v6, %v11007_v47  ;;  %v14410_v3 = vsub.f32 %v10868_v25, %v11007_v47  ;;  %v3676_v27 = vsub.f32 %v10880_v17, %v11007_v47  ;;  %v14411_v6 = vld [vmem:[#allocation4_spill] sm:$0xff]  ;;  %v3680_v17 = vsub.f32 %v10892_v18, %v11007_v47 }
 0x93b   : > { %v3836_v41 = vadd.f32 %v11226_v12, %v3835_v23  ;;  %v11244_v23 = vpop.eup %7574  ;;  %7580 = vpow2.f32 %v3768_v2  ;;  %v3780_v34 = vmul.f32 1.442695, %v3674_v35 }
 0x93c   : > { %v3772_v39 = vmul.f32 1.442695, %v14409_v24  ;;  %v3776_v52 = vmul.f32 1.442695, %v14410_v3  ;;  %v3678_v24 = vsub.f32 %v14411_v6, %v11007_v47  ;;  %v11251_v8 = vpop.eup %7576  ;;  %v3702_v3 = vmul.f32 1.442695, %v3635_v30 }
 0x93d   : > { %v3837_v51 = vadd.f32 %v11231_v22, %v3836_v41  ;;  %v3698_v41 = vmul.f32 1.442695, %v3633_v40  ;;  %v3784_v2 = vmul.f32 1.442695, %v3676_v27  ;;  %v14412_v6 = vld [vmem:[#allocation5_spill] sm:$0xff] }
 0x93e   : > { %7582 = vpow2.f32 %v3772_v39  ;;  %v3682_v40 = vsub.f32 %v14412_v6, %v11007_v47  ;;  %v3788_v30 = vmul.f32 1.442695, %v3678_v24  ;;  %v3792_v18 = vmul.f32 1.442695, %v3680_v17 }
 0x93f   : > { %v3838_v33 = vadd.f32 %v11244_v23, %v3837_v51  ;;  %7584 = vpow2.f32 %v3776_v52  ;;  %v11256_v38 = vpop.eup %7578  ;;  %v3706_v51 = vmul.f32 1.442695, %v3637_v31  ;;  %v3710_v52 = vmul.f32 1.442695, %v3639_v63 }
 0x940   : > { %7586 = vpow2.f32 %v3698_v41  ;;  %v3714_v31 = vmul.f32 1.442695, %v3641_v61  ;;  %v3718_v63 = vmul.f32 1.442695, %v3643_v9  ;;  %v14415_v17 = vsub.f32 %v10905_v1, %v11007_v47 }
 0x941   : > { %v3839_v54 = vadd.f32 %v11251_v8, %v3838_v33  ;;  %7588 = vpow2.f32 %v3702_v3  ;;  %v11261_v39 = vpop.eup %7580  ;;  %v3796_v3 = vmul.f32 1.442695, %v3682_v40  ;;  %v3649_v61 = vsub.f32 %v10946_v56, %v11199_v43 }
 0x942   : > { %7590 = vpow2.f32 %v3780_v34  ;;  %v14416_v9 = vsub.f32 %v10908_v0, %v11007_v47  ;;  %v14418_v56 = vsub.f32 %v10713_v11, %v11199_v43  ;;  %v14419_v0 = vsub.f32 %v10917_v57, %v11007_v47 }
 0x943   : > { %v3840_v35 = vadd.f32 %v11256_v38, %v3839_v54  ;;  %7592 = vpow2.f32 %v3784_v2  ;;  %v3800_v2 = vmul.f32 1.442695, %v14415_v17 }
 0x944   : > { %v11266_v25 = vpop.eup %7582  ;;  %7594 = vpow2.f32 %v3706_v51  ;;  %v3722_v51 = vmul.f32 1.442695, %v3645_v10  ;;  %v3726_v10 = vmul.f32 1.442695, %v14418_v56 }
 0x945   : > { %v3841_v33 = vadd.f32 %v11261_v39, %v3840_v35  ;;  %v11268_v27 = vpop.eup %7584  ;;  %7596 = vpow2.f32 %v3788_v30  ;;  %v3804_v30 = vmul.f32 1.442695, %v14416_v9 }
 0x946   : > { %v11271_v41 = vpop.eup %7586  ;;  %7598 = vpow2.f32 %v3710_v52 }
 0x947   : > { %v3842_v54 = vadd.f32 %v11266_v25, %v3841_v33  ;;  %14413 = vst [vmem:[#allocation16_spill] sm:$0xff] %v11271_v41  ;;  %v11273_v6 = vpop.eup %7588  ;;  %7600 = vpow2.f32 %v3792_v18  ;;  %v3651_v18 = vsub.f32 %v10952_v46, %v11199_v43  ;;  %v3653_v46 = vsub.f32 %v10958_v19, %v11199_v43 }
 0x948   : > { %14414 = vst [vmem:[#allocation20_spill] sm:$0xff] %v11273_v6  ;;  %v11276_v24 = vpop.eup %7590  ;;  %7602 = vpow2.f32 %v3714_v31  ;;  %v3861_v33 = vadd.f32 %v11273_v6, %v11271_v41  ;;  %v3808_v31 = vmul.f32 1.442695, %v14419_v0 }
 0x949   : > { %v3843_v34 = vadd.f32 %v11268_v27, %v3842_v54  ;;  %v11284_v40 = vpop.eup %7592  ;;  %7604 = vpow2.f32 %v3796_v3  ;;  %v3734_v19 = vmul.f32 1.442695, %v3651_v18  ;;  %v14424_v18 = vsub.f32 %v10930_v37, %v11007_v47 }
 0x94a   : > { %v11291_v52 = vpop.eup %7594  ;;  %7606 = vpow2.f32 %v3718_v63  ;;  %v3730_v63 = vmul.f32 1.442695, %v3649_v61  ;;  %v14423_v61 = vsub.f32 %v10926_v62, %v11007_v47 }
 0x94b   : > { %v3844_v35 = vadd.f32 %v11276_v24, %v3843_v34  ;;  %14417 = vst [vmem:[#allocation35_spill] sm:$0xff] %v11291_v52  ;;  %v11299_v54 = vpop.eup %7596  ;;  %7608 = vpow2.f32 %v3800_v2  ;;  %v3862_v3 = vadd.f32 %v11291_v52, %v3861_v33  ;;  %v14421_v2 = vsub.f32 %v10919_v16, %v11007_v47 }
 0x94c   : > { %v11305_v34 = vpop.eup %7598  ;;  %7610 = vpow2.f32 %v3722_v51  ;;  %v3661_v47 = vsub.f32 %v10985_v45, %v11199_v43 }
 0x94d   : > { %v3845_v1 = vadd.f32 %v11284_v40, %v3844_v35  ;;  %14420 = vst [vmem:[#allocation28_spill] sm:$0xff] %v11305_v34  ;;  %v11310_v11 = vpop.eup %7600  ;;  %7612 = vpow2.f32 %v3804_v30  ;;  %v3812_v35 = vmul.f32 1.442695, %v14421_v2  ;;  %v3863_v57 = vadd.f32 %v11305_v34, %v3862_v3 }
 0x94e   : > { %v11316_v9 = vpop.eup %7602  ;;  %7614 = vpow2.f32 %v3726_v10  ;;  %v3816_v30 = vmul.f32 1.442695, %v14423_v61  ;;  %v3738_v2 = vmul.f32 1.442695, %v3653_v46 }
 0x94f   : > { %v3846_v17 = vadd.f32 %v11299_v54, %v3845_v1  ;;  %v14422_v1 = vld [vmem:[#allocation6_spill] sm:$0xff]  ;;  %v11321_v51 = vpop.eup %7604  ;;  %7616 = vpow2.f32 %v3808_v31  ;;  %v3864_v16 = vadd.f32 %v11316_v9, %v3863_v57  ;;  %v3820_v31 = vmul.f32 1.442695, %v14424_v18 }
 0x950   : > { %v3655_v56 = vsub.f32 %v14422_v1, %v11199_v43  ;;  %v11327_v0 = vpop.eup %7606  ;;  %7618 = vpow2.f32 %v3730_v63 }
 0x951   : > { %v3847_v33 = vadd.f32 %v11310_v11, %v3846_v17  ;;  %v3657_v17 = vsub.f32 %v10974_v14, %v11199_v43  ;;  %v11332_v10 = vpop.eup %7608  ;;  %7620 = vpow2.f32 %v3812_v35  ;;  %v3865_v62 = vadd.f32 %v11327_v0, %v3864_v16 }
 0x952   : > { %v11338_v1 = vpop.eup %7610  ;;  %7622 = vpow2.f32 %v3734_v19  ;;  %v3742_v14 = vmul.f32 1.442695, %v3655_v56 }
 0x953   : > { %v3848_v3 = vadd.f32 %v11321_v51, %v3847_v33  ;;  %v3659_v33 = vsub.f32 %v10981_v21, %v11199_v43  ;;  %v11343_v63 = vpop.eup %7612  ;;  %7624 = vpow2.f32 %v3816_v30  ;;  %v3866_v46 = vadd.f32 %v11338_v1, %v3865_v62 }
 0x954   : > { %v11346_v35 = vpop.eup %7614  ;;  %7626 = vpow2.f32 %v3738_v2  ;;  %v3746_v61 = vmul.f32 1.442695, %v3657_v17  ;;  %v3663_v30 = vsub.f32 %v11005_v5, %v11199_v43  ;;  %v3754_v62 = vmul.f32 1.442695, %v3661_v47 }
 0x955   : > { %v3849_v57 = vadd.f32 %v11332_v10, %v3848_v3  ;;  %v11351_v16 = vpop.eup %7616  ;;  %7628 = vpow2.f32 %v3820_v31  ;;  %v3867_v21 = vadd.f32 %v11346_v35, %v3866_v46  ;;  %v3750_v3 = vmul.f32 1.442695, %v3659_v33 }
 0x956   : > { %v11354_v56 = vpop.eup %7618  ;;  %7630 = vpow2.f32 %v3742_v14  ;;  %v3665_v31 = vsub.f32 %v11011_v20, %v11199_v43  ;;  %v3667_v14 = vsub.f32 %v11014_v42, %v11199_v43 }
 0x957   : > { %v3850_v37 = vadd.f32 %v11343_v63, %v3849_v57  ;;  %v11359_v18 = vpop.eup %7620  ;;  %v3868_v45 = vadd.f32 %v11354_v56, %v3867_v21  ;;  %7632 = vpow2.f32 %v3746_v61  ;;  %v14425_v61 = vld [vmem:[#allocation3_spill] sm:$0xff] }
 0x958   : > { %v11362_v2 = vpop.eup %7622  ;;  %7634 = vpow2.f32 %v3750_v3  ;;  %v3762_v41 = vmul.f32 1.442695, %v3665_v31 }
 0x959   : > { %v3851_v19 = vadd.f32 %v11351_v16, %v3850_v37  ;;  %v11367_v57 = vpop.eup %7624  ;;  %v3869_v46 = vadd.f32 %v11362_v2, %v3868_v45  ;;  %v3758_v37 = vmul.f32 1.442695, %v3663_v30  ;;  %v3669_v45 = vsub.f32 %v14425_v61, %v11199_v43 }
 0x95a   : > { %v11370_v5 = vpop.eup %7626  ;;  %7636 = vpow2.f32 %v3754_v62  ;;  %v3766_v30 = vmul.f32 1.442695, %v3667_v14 }
 0x95b   : > { %v3852_v17 = vadd.f32 %v11359_v18, %v3851_v19  ;;  %v11375_v21 = vpop.eup %7628  ;;  %v3870_v19 = vadd.f32 %v11370_v5, %v3869_v46  ;;  %7638 = vpow2.f32 %v3758_v37  ;;  %v3770_v34 = vmul.f32 1.442695, %v3669_v45 }
 0x95c   : > { %v11378_v20 = vpop.eup %7630  ;;  %7640 = vpow2.f32 %v3762_v41  ;;  %v14426_v37 = vsub.f32 %v11040_v50, %v11199_v43  ;;  %v3677_v41 = vsub.f32 %v11087_v59, %v11199_v43 }
 0x95d   : > { %v3853_v33 = vadd.f32 %v11367_v57, %v3852_v17  ;;  %v3871_v17 = vadd.f32 %v11378_v20, %v3870_v19  ;;  %v11384_v6 = vpop.eup %7632  ;;  %7642 = vpow2.f32 %v3766_v30 }
 0x95e   : > { %v11387_v52 = vpop.eup %7634  ;;  %v3774_v14 = vmul.f32 1.442695, %v14426_v37  ;;  %7644 = vpow2.f32 %v3770_v34  ;;  %v3786_v34 = vmul.f32 1.442695, %v3677_v41 }
 0x95f   : > { %v3854_v47 = vadd.f32 %v11375_v21, %v3853_v33  ;;  %v3872_v3 = vadd.f32 %v11384_v6, %v3871_v17  ;;  %v3675_v33 = vsub.f32 %v11066_v29, %v11199_v43  ;;  %v14427_v29 = vsub.f32 %v11054_v48, %v11199_v43 }
 0x960   : > { %v11392_v31 = vpop.eup %7636  ;;  %7646 = vpow2.f32 %v3774_v14  ;;  %v3681_v48 = vsub.f32 %v11101_v58, %v11199_v43  ;;  %v3685_v58 = vsub.f32 %v11115_v32, %v11199_v43 }
 0x961   : > { %v3855_v42 = vrot.slane %v3854_v47, 4  ;;  %v3873_v62 = vadd.f32 %v11387_v52, %v3872_v3  ;;  %v11398_v17 = vpop.eup %7638  ;;  %v3778_v45 = vmul.f32 1.442695, %v14427_v29 }
 0x962   : > { %v11406_v3 = vpop.eup %7640  ;;  %v3794_v41 = vmul.f32 1.442695, %v3681_v48  ;;  %v3802_v32 = vmul.f32 1.442695, %v3685_v58 }
 0x963   : > { %v3856_v46 = vadd.f32 %v3855_v42, %v3854_v47  ;;  %v3874_v61 = vadd.f32 %v11392_v31, %v3873_v62  ;;  %v3782_v42 = vmul.f32 1.442695, %v3675_v33  ;;  %14428 = vst [vmem:[#allocation29_spill] sm:$0xff] %v11406_v3  ;;  %v3679_v62 = vsub.f32 %v11090_v44, %v11199_v43 }
 0x964   : > { %7648 = vpow2.f32 %v3778_v45  ;;  %v3683_v44 = vsub.f32 %v11104_v49, %v11199_v43 }
 0x965   : > { %v3857_v19 = vrot.slane %v3856_v46, 2  ;;  %v3875_v30 = vadd.f32 %v11398_v17, %v3874_v61  ;;  %7650 = vpow2.f32 %v3782_v42  ;;  %v3790_v14 = vmul.f32 1.442695, %v3679_v62 }
 0x966   : > { %v3687_v42 = vsub.f32 %v11118_v60, %v11199_v43  ;;  %v3691_v60 = vsub.f32 %v11129_v28, %v11199_v43 }
 0x967   : > { %v3858_v47 = vadd.f32 %v3857_v19, %v3856_v46  ;;  %v3876_v46 = vadd.f32 %v11406_v3, %v3875_v30  ;;  %v11411_v19 = vpop.eup %7642  ;;  %v3798_v30 = vmul.f32 1.442695, %v3683_v44 }
 0x968   : > { %14429 = vst [vmem:[#allocation37_spill] sm:$0xff] %v11411_v19  ;;  %v11418_v37 = vpop.eup %7644  ;;  %v3806_v44 = vmul.f32 1.442695, %v3687_v42 }
 0x969   : > { %v3859_v50 = vrot.slane %v3858_v47, 1  ;;  %v3877_v33 = vadd.f32 %v11411_v19, %v3876_v46  ;;  %v3689_v46 = vsub.f32 %v11126_v15, %v11199_v43  ;;  %v3693_v15 = vsub.f32 %v11135_v55, %v11199_v43 }
 0x96a   : > { %v3814_v19 = vmul.f32 1.442695, %v3691_v60 }
 0x96b   : > { %v11413_v59 = vadd.f32 %v3859_v50, %v3858_v47  ;;  %v3878_v61 = vadd.f32 %v11418_v37, %v3877_v33  ;;  %v11424_v47 = vpop.eup %7646  ;;  %v3810_v58 = vmul.f32 1.442695, %v3689_v46 }
 0x96c   : > { %v11429_v45 = vpop.eup %7648 }
 0x96d   : > { %7652 = vrcp.f32 %v11413_v59  ;;  %v3879_v29 = vadd.f32 %v11424_v47, %v3878_v61  ;;  %v11433_v49 = vpop.eup %7650  ;;  %v3909_v46 = vand.u32 2147483648, %v11413_v59  ;;  %vm3903_vm2 = vweird.f32 %v11413_v59 }
 0x96e   : > { %7654 = vpow2.f32 %v3786_v34  ;;  %v3907_v60 = vand.u32 2147483647, %v11413_v59 }
 0x96f   : > { %7656 = vpow2.f32 %v3790_v14  ;;  %v3880_v50 = vadd.f32 %v11429_v45, %v3879_v29 }
 0x970   : > { %7658 = vpow2.f32 %v3794_v41  ;;  %vm3908_vm4 = vcmp.eq.f32.partialorder %v3907_v60, 8.507059e+37 }
 0x971   : > { %v3881_v34 = vadd.f32 %v11433_v49, %v3880_v50  ;;  %7660 = vpow2.f32 %v3798_v30  ;;  %v3818_v30 = vmul.f32 1.442695, %v3693_v15 }
 0x972   : > { %7662 = vpow2.f32 %v3802_v32  ;;  %v14430_v32 = vsub.f32 %v11155_v53, %v11199_v43 }
 0x973   : > { %v7653_v62 = vpop.eup %7652  ;;  %7664 = vpow2.f32 %v3806_v44 }
 0x974   : > { %v3899_v48 = vmul.f32 %v7653_v62, %v11413_v59  ;;  %v11440_v33 = vpop.eup %7654  ;;  %7666 = vpow2.f32 %v3810_v58  ;;  %vm3904_vm1 = vweird.f32 %v7653_v62  ;;  %v3822_v44 = vmul.f32 1.442695, %v14430_v32 }
 0x975   : > { %v3882_v61 = vadd.f32 %v11440_v33, %v3881_v34  ;;  %v11445_v29 = vpop.eup %7656  ;;  %7668 = vpow2.f32 %v3814_v19  ;;  %vm3905_vm3 = vmor %vm3903_vm2, %vm3904_vm1  ;;  %v3910_v19 = vor.u32 1.1754944e-38, %v3909_v46 }
 0x976   : > { %v3900_v14 = vsub.f32 1.0, %v3899_v48  ;;  %v11450_v3 = vpop.eup %7658  ;;  %7670 = vpow2.f32 %v3818_v30 }
 0x977   : > { %v3883_v50 = vadd.f32 %v11445_v29, %v3882_v61  ;;  %v11453_v42 = vpop.eup %7660  ;;  %7672 = vpow2.f32 %v3822_v44 }
 0x978   : > { %v3901_v41 = vmul.f32 %v7653_v62, %v3900_v14  ;;  %v11456_v55 = vpop.eup %7662 }
 0x979   : > { %v3884_v28 = vadd.f32 %v11450_v3, %v3883_v50  ;;  %v11465_v61 = vpop.eup %7664 }
 0x97a   : > { %v3902_v48 = vadd.f32 %v7653_v62, %v3901_v41  ;;  %v11468_v41 = vpop.eup %7666 }
 0x97b   : > { %v3885_v34 = vadd.f32 %v11453_v42, %v3884_v28  ;;  %v11471_v43 = vpop.eup %7668 }
 0x97c   : > { %v3906_v15 = vsel %vm3905_vm3, %v7653_v62, %v3902_v48  ;;  %v11476_v28 = vpop.eup %7670 }
 0x97d   : > { %v3886_v14 = vadd.f32 %v11456_v55, %v3885_v34  ;;  %v11473_v50 = vsel %vm3908_vm4, %v3910_v19, %v3906_v15  ;;  %v11483_v34 = vpop.eup %7672 }
 0x97e   : > { %v3956_v62 = vmul.f32 %v11244_v23, %v11473_v50  ;;  %v3988_v48 = vmul.f32 %v11375_v21, %v11473_v50  ;;  %v3986_v46 = vmul.f32 %v11367_v57, %v11473_v50  ;;  %v3984_v32 = vmul.f32 %v11359_v18, %v11473_v50 }
 0x97f   : > { %v3887_v58 = vadd.f32 %v11465_v61, %v3886_v14  ;;  %v3954_v60 = vmul.f32 %v11231_v22, %v11473_v50  ;;  %v3982_v23 = vmul.f32 %v11351_v16, %v11473_v50  ;;  %v3980_v21 = vmul.f32 %v11343_v63, %v11473_v50 }
 0x980   : > { %3990 = vmatpush.msrb.mxu0 %v3956_v62  ;;  %4010 = vmatpush.msrb.mxu1 %v3988_v48  ;;  %v3978_v14 = vmul.f32 %v11332_v10, %v11473_v50  ;;  %v3952_v18 = vmul.f32 %v11226_v12, %v11473_v50  ;;  %v3976_v15 = vmul.f32 %v11321_v51, %v11473_v50 }
 0x981   : > { %v3888_v53 = vadd.f32 %v11468_v41, %v3887_v58  ;;  %v3974_v22 = vmul.f32 %v11310_v11, %v11473_v50  ;;  %v3972_v16 = vmul.f32 %v11299_v54, %v11473_v50  ;;  %v3970_v63 = vmul.f32 %v11284_v40, %v11473_v50 }
 0x982   : > { %3991 = vmatpush.msrb.mxu0 %v3954_v60  ;;  %4011 = vmatpush.msrb.mxu1 %v3986_v46  ;;  %v3950_v10 = vmul.f32 %v11217_v26, %v11473_v50  ;;  %v3948_v12 = vmul.f32 %v11204_v7, %v11473_v50  ;;  %v3946_v54 = vmul.f32 %v11197_v13, %v11473_v50  ;;  %v14431_v7 = vld [vmem:[#allocation18_spill] sm:$0xff]  ;;  %v14432_v13 = vld [vmem:[#allocation25_spill] sm:$0xff] }
 0x983   : > { %v3889_v59 = vadd.f32 %v11471_v43, %v3888_v53  ;;  %v3944_v40 = vmul.f32 %v11192_v36, %v11473_v50  ;;  %v3942_v26 = vmul.f32 %v11185_v4, %v11473_v50  ;;  %v14433_v36 = vld [vmem:[#allocation17_spill] sm:$0xff]  ;;  %v3968_v48 = vmul.f32 %v11276_v24, %v11473_v50 }
 0x984   : > { %3992 = vmatpush.msrb.mxu0 %v3952_v18  ;;  %4012 = vmatpush.msrb.mxu1 %v3984_v32  ;;  %v3936_v62 = vmul.f32 %v14433_v36, %v11473_v50  ;;  %v14434_v46 = vld [vmem:[#allocation13_spill] sm:$0xff] }
 0x985   : > { %v3890_v30 = vadd.f32 %v11476_v28, %v3889_v59  ;;  %v3940_v59 = vmul.f32 %v14431_v7, %v11473_v50  ;;  %v3934_v32 = vmul.f32 %v14434_v46, %v11473_v50  ;;  %v14436_v18 = vld [vmem:[#allocation45_spill] sm:$0xff]  ;;  %v14440_v7 = vld [vmem:[#allocation10_spill] sm:$0xff] }
 0x986   : > { %3993 = vmatpush.msrb.mxu0 %v3950_v10  ;;  %4013 = vmatpush.msrb.mxu1 %v3982_v23  ;;  %v14435_v23 = vld [vmem:[#allocation33_spill] sm:$0xff] }
 0x987   : > { %v3891_v44 = vadd.f32 %v11483_v34, %v3890_v30  ;;  %v3938_v30 = vmul.f32 %v14432_v13, %v11473_v50 }
 0x988   : > { %3994 = vmatpush.msrb.mxu0 %v3948_v12  ;;  %4014 = vmatpush.msrb.mxu1 %v3980_v21  ;;  %v3932_v21 = vmul.f32 %v14435_v23, %v11473_v50 }
 0x989   : > { %v3892_v57 = vrot.slane %v3891_v44, 4 }
 0x98a   : > { %3995 = vmatpush.msrb.mxu0 %v3946_v54  ;;  %4015 = vmatpush.msrb.mxu1 %v3978_v14  ;;  %v3964_v14 = vmul.f32 %v11266_v25, %v11473_v50  ;;  %v14437_v25 = vld [vmem:[#allocation40_spill] sm:$0xff] }
 0x98b   : > { %v3893_v58 = vadd.f32 %v3892_v57, %v3891_v44  ;;  %v3966_v44 = vmul.f32 %v11268_v27, %v11473_v50  ;;  %v11538_v27 = vpop.permute.xlu0 %989  ;;  %v3928_v10 = vmul.f32 %v14437_v25, %v11473_v50 }
 0x98c   : > { %3996 = vmatpush.msrb.mxu0 %v3944_v40  ;;  %4016 = vmatpush.msrb.mxu1 %v3976_v15  ;;  %v3930_v15 = vmul.f32 %v14436_v18, %v11473_v50  ;;  %v14439_v40 = vld [vmem:[#allocation9_spill] sm:$0xff] }
 0x98d   : > { %v3894_v19 = vrot.slane %v3893_v58, 2 }
 0x98e   : > { %3997 = vmatpush.msrb.mxu0 %v3942_v26  ;;  %4017 = vmatpush.msrb.mxu1 %v3974_v22  ;;  %v3962_v22 = vmul.f32 %v11261_v39, %v11473_v50  ;;  %v14438_v39 = vld [vmem:[#allocation46_spill] sm:$0xff] }
 0x98f   : > { %v3895_v51 = vadd.f32 %v3894_v19, %v3893_v58  ;;  %v1025_v58 = vpop.permute.xlu2 %1024  ;;  %v3960_v19 = vmul.f32 %v11256_v38, %v11473_v50  ;;  %v3912_v54 = vmul.f32 %v14438_v39, %v11473_v50 }
 0x990   : > { %3998 = vmatpush.msrb.mxu0 %v3940_v59  ;;  %4018 = vmatpush.msrb.mxu1 %v3972_v16  ;;  %v11549_v26 = vadd.f32 %v14439_v40, %v1025_v58  ;;  %v11552_v59 = vadd.f32 %v14440_v7, %v1025_v58 }
 0x991   : > { %v3896_v11 = vrot.slane %v3895_v51, 1 }
 0x992   : > { %3999 = vmatpush.msrb.mxu0 %v3938_v30  ;;  %4019 = vmatpush.msrb.mxu1 %v3970_v63 }
 0x993   : > { %v3897_v53 = vadd.f32 %v3896_v11, %v3895_v51  ;;  %v3958_v11 = vmul.f32 %v11251_v8, %v11473_v50 }
 0x994   : > { %4000 = vmatpush.msrb.mxu0 %v3936_v62  ;;  %4020 = vmatpush.msrb.mxu1 %v3968_v48  ;;  %v11572_v48 = vpop.trf.xlu0 }
 0x995   : > { %7674 = vrcp.f32 %v3897_v53  ;;  %v3924_v24 = vand.u32 2147483648, %v3897_v53  ;;  %v3922_v63 = vand.u32 2147483647, %v3897_v53  ;;  %vm3918_vm6 = vweird.f32 %v3897_v53 }
 0x996   : > { %4001 = vmatpush.msrb.mxu0 %v3934_v32  ;;  %4021 = vmatpush.msrb.mxu1 %v3966_v44  ;;  %v14443_v44 = vld [vmem:[#allocation7_spill] sm:$0xff] }
 0x997   : > { %v3925_v51 = vor.u32 1.1754944e-38, %v3924_v24  ;;  %vm3923_vm8 = vcmp.eq.f32.partialorder %v3922_v63, 8.507059e+37  ;;  %v14447_v24 = vld [vmem:[#allocation16_spill] sm:$0xff] }
 0x998   : > { %4002 = vmatpush.msrb.mxu0 %v3932_v21  ;;  %4022 = vmatpush.msrb.mxu1 %v3964_v14  ;;  %v14446_v14 = vld [vmem:[#allocation37_spill] sm:$0xff] }
 0x99a   : > { %4003 = vmatpush.msrb.mxu0 %v3930_v15  ;;  %4023 = vmatpush.msrb.mxu1 %v3962_v22  ;;  %v14448_v15 = vld [vmem:[#allocation29_spill] sm:$0xff] }
 0x99b   : > { %v7675_v4 = vpop.eup %7674 }
 0x99c   : > { %v3914_v60 = vmul.f32 %v7675_v4, %v3897_v53  ;;  %vm3919_vm5 = vweird.f32 %v7675_v4  ;;  %4004 = vmatpush.msrb.mxu0 %v3928_v10  ;;  %4024 = vmatpush.msrb.mxu1 %v3960_v19 }
 0x99d   : > { %vm3920_vm7 = vmor %vm3918_vm6, %vm3919_vm5 }
 0x99e   : > { %v3915_v57 = vsub.f32 1.0, %v3914_v60  ;;  %4005 = vmatpush.msrb.mxu0 %v3912_v54  ;;  %4025 = vmatpush.msrb.mxu1 %v3958_v11  ;;  %v1096_v60 = vadd.f32 %v14443_v44, %v11538_v27 }
 0x99f   : > { %4006 = vmatmul.f32.vlgmr.msrb.gmra.mxu0 %v11549_v26  ;;  %4026 = vmatmul.f32.vlgmr.msrb.gmra.mxu1 %v11552_v59 }
 0x9a0   : > { %v3916_v16 = vmul.f32 %v7675_v4, %v3915_v57 }
 0x9a2   : > { %v3917_v12 = vadd.f32 %v7675_v4, %v3916_v16  ;;  %v4070_v16 = vmul.f32 0.35355338, %v1096_v60 }
 0x9a4   : > { %v3921_v13 = vsel %vm3920_vm7, %v7675_v4, %v3917_v12 }
 0x9a5   : > { %v11554_v38 = vsel %vm3923_vm8, %v3925_v51, %v3921_v13 }
 0x9a6   : > { %v3957_v53 = vmul.f32 %v11398_v17, %v11554_v38  ;;  %v3989_v8 = vmul.f32 %v11483_v34, %v11554_v38  ;;  %v3987_v50 = vmul.f32 %v11476_v28, %v11554_v38  ;;  %v3985_v30 = vmul.f32 %v11471_v43, %v11554_v38 }
 0x9a7   : > { %v3955_v36 = vmul.f32 %v11392_v31, %v11554_v38  ;;  %v3983_v62 = vmul.f32 %v11468_v41, %v11554_v38  ;;  %v3981_v17 = vmul.f32 %v11465_v61, %v11554_v38  ;;  %v3979_v34 = vmul.f32 %v11456_v55, %v11554_v38 }
 0x9a8   : > { %4030 = vmatpush.msra.mxu0 %v3957_v53  ;;  %4050 = vmatpush.msra.mxu1 %v3989_v8  ;;  %v3977_v28 = vmul.f32 %v11453_v42, %v11554_v38  ;;  %v3953_v43 = vmul.f32 %v11387_v52, %v11554_v38  ;;  %v3975_v31 = vmul.f32 %v11450_v3, %v11554_v38 }
 0x9a9   : > { %v3973_v41 = vmul.f32 %v11445_v29, %v11554_v38  ;;  %v3971_v61 = vmul.f32 %v11440_v33, %v11554_v38  ;;  %v3951_v55 = vmul.f32 %v11384_v6, %v11554_v38  ;;  %v3969_v42 = vmul.f32 %v11433_v49, %v11554_v38  ;;  %v4089_v49 = vpop.trf.xlu0 }
 0x9aa   : > { %4031 = vmatpush.msra.mxu0 %v3955_v36  ;;  %4051 = vmatpush.msra.mxu1 %v3987_v50  ;;  %v3967_v52 = vmul.f32 %v11429_v45, %v11554_v38  ;;  %v3965_v3 = vmul.f32 %v11424_v47, %v11554_v38  ;;  %v3963_v29 = vmul.f32 %v11418_v37, %v11554_v38 }
 0x9ab   : > { %v3949_v33 = vmul.f32 %v11378_v20, %v11554_v38  ;;  %v3947_v6 = vmul.f32 %v11370_v5, %v11554_v38  ;;  %v3945_v45 = vmul.f32 %v11362_v2, %v11554_v38  ;;  %v3943_v37 = vmul.f32 %v11354_v56, %v11554_v38 }
 0x9ac   : > { %4032 = vmatpush.msra.mxu0 %v3953_v43  ;;  %4052 = vmatpush.msra.mxu1 %v3985_v30  ;;  %v3941_v20 = vmul.f32 %v11346_v35, %v11554_v38  ;;  %v3939_v5 = vmul.f32 %v11338_v1, %v11554_v38  ;;  %v3937_v2 = vmul.f32 %v11327_v0, %v11554_v38  ;;  %v14441_v35 = vld [vmem:[#allocation28_spill] sm:$0xff]  ;;  %v14442_v1 = vld [vmem:[#allocation35_spill] sm:$0xff] }
 0x9ad   : > { %v3935_v56 = vmul.f32 %v11316_v9, %v11554_v38  ;;  %v3933_v4 = vmul.f32 %v14441_v35, %v11554_v38  ;;  %v3931_v46 = vmul.f32 %v14442_v1, %v11554_v38  ;;  %v14444_v0 = vld [vmem:[#allocation8_spill] sm:$0xff]  ;;  %v3961_v57 = vmul.f32 %v14446_v14, %v11554_v38 }
 0x9ae   : > { %4033 = vmatpush.msra.mxu0 %v3951_v55  ;;  %4053 = vmatpush.msra.mxu1 %v3983_v62  ;;  %v1149_v23 = vadd.f32 %v14444_v0, %v11538_v27  ;;  %v14445_v9 = vld [vmem:[#allocation20_spill] sm:$0xff]  ;;  %v3927_v18 = vmul.f32 %v14447_v24, %v11554_v38  ;;  %v3959_v22 = vmul.f32 %v14448_v15, %v11554_v38 }
 0x9af   : > { %v3929_v21 = vmul.f32 %v14445_v9, %v11554_v38 }
 0x9b0   : > { %4034 = vmatpush.msra.mxu0 %v3949_v33  ;;  %4054 = vmatpush.msra.mxu1 %v3981_v17  ;;  %v4071_v63 = vmul.f32 0.35355338, %v1149_v23 }
 0x9b1   : > { %v4090_v47 = vpop.trf.xlu0 }
 0x9b2   : > { %4035 = vmatpush.msra.mxu0 %v3947_v6  ;;  %4055 = vmatpush.msra.mxu1 %v3979_v34 }
 0x9b4   : > { %4036 = vmatpush.msra.mxu0 %v3945_v45  ;;  %4056 = vmatpush.msra.mxu1 %v3977_v28 }
 0x9b6   : > { %4037 = vmatpush.msra.mxu0 %v3943_v37  ;;  %4057 = vmatpush.msra.mxu1 %v3975_v31 }
 0x9b8   : > { %4038 = vmatpush.msra.mxu0 %v3941_v20  ;;  %4058 = vmatpush.msra.mxu1 %v3973_v41 }
 0x9b9   : > { %v4091_v32 = vpop.trf.xlu0 }
 0x9ba   : > { %4039 = vmatpush.msra.mxu0 %v3939_v5  ;;  %4059 = vmatpush.msra.mxu1 %v3971_v61 }
 0x9bc   : > { %4040 = vmatpush.msra.mxu0 %v3937_v2  ;;  %4060 = vmatpush.msra.mxu1 %v3969_v42 }
 0x9be   : > { %4041 = vmatpush.msra.mxu0 %v3935_v56  ;;  %4061 = vmatpush.msra.mxu1 %v3967_v52 }
 0x9c0   : > { %4042 = vmatpush.msra.mxu0 %v3933_v4  ;;  %4062 = vmatpush.msra.mxu1 %v3965_v3 }
 0x9c1   : > { %v4092_v27 = vpop.trf.xlu0 }
 0x9c2   : > { %4043 = vmatpush.msra.mxu0 %v3931_v46  ;;  %4063 = vmatpush.msra.mxu1 %v3963_v29 }
 0x9c4   : > { %4044 = vmatpush.msra.mxu0 %v3929_v21  ;;  %4064 = vmatpush.msra.mxu1 %v3961_v57 }
 0x9c6   : > { %4045 = vmatpush.msra.mxu0 %v3927_v18  ;;  %4065 = vmatpush.msra.mxu1 %v3959_v22 }
 0x9c7   : > { %4046 = vmatmul.f32.vlgmr.msra.gmra.mxu0 %v11549_v26  ;;  %4066 = vmatmul.f32.vlgmr.msra.gmra.mxu1 %v11552_v59 }
 0x9c8   : > { %4312 = vmatpush.msrb.mxu0 %v4070_v16  ;;  %4425 = vmatpush.msrb.mxu1 %v4071_v63 }
 0x9c9   : > { %v4093_v58 = vpop.trf.xlu0 }
 0x9cf   : > { %7130 = vmatmul.msk.f32.vlgmr.msrb.gmra.mxu0 %vm1305_vm14, %v11572_v48  ;;  %7162 = vmatmul.msk.f32.vlgmr.msrb.gmra.mxu1 %vm1305_vm14, %v11572_v48 }
 0x9d1   : > { %v4094_v25 = vpop.trf.xlu0 }
 0x9d7   : > { %7131 = vmatmul.msk.f32.gmra.mxu0 %vm1305_vm14, %v4089_v49  ;;  %7163 = vmatmul.msk.f32.gmra.mxu1 %vm1305_vm14, %v4089_v49 }
 0x9d9   : > { %v4095_v10 = vpop.trf.xlu0 }
 0x9df   : > { %7132 = vmatmul.msk.f32.gmra.mxu0 %vm1305_vm14, %v4090_v47  ;;  %7164 = vmatmul.msk.f32.gmra.mxu1 %vm1305_vm14, %v4090_v47 }
 0x9e1   : > { %v4096_v19 = vpop.trf.xlu0 }
 0x9e7   : > { %7133 = vmatmul.msk.f32.gmra.mxu0 %vm1305_vm14, %v4091_v32  ;;  %7165 = vmatmul.msk.f32.gmra.mxu1 %vm1305_vm14, %v4091_v32 }
 0x9e9   : > { %v4097_v12 = vpop.trf.xlu0 }
 0x9ef   : > { %7134 = vmatmul.msk.f32.gmra.mxu0 %vm1305_vm14, %v4092_v27  ;;  %7166 = vmatmul.msk.f32.gmra.mxu1 %vm1305_vm14, %v4092_v27 }
 0x9f1   : > { %v4098_v51 = vpop.trf.xlu0 }
 0x9f7   : > { %7135 = vmatmul.msk.f32.gmra.mxu0 %vm1305_vm14, %v4093_v58  ;;  %7167 = vmatmul.msk.f32.gmra.mxu1 %vm1305_vm14, %v4093_v58 }
 0x9f9   : > { %v4099_v39 = vpop.trf.xlu0 }
 0x9ff   : > { %7136 = vmatmul.msk.f32.gmra.mxu0 %vm1305_vm14, %v4094_v25  ;;  %7168 = vmatmul.msk.f32.gmra.mxu1 %vm1305_vm14, %v4094_v25 }
 0xa01   : > { %v4100_v54 = vpop.trf.xlu0 }
 0xa07   : > { %7137 = vmatmul.msk.f32.gmra.mxu0 %vm1305_vm14, %v4095_v10  ;;  %7169 = vmatmul.msk.f32.gmra.mxu1 %vm1305_vm14, %v4095_v10 }
 0xa09   : > { %v4101_v11 = vpop.trf.xlu0 }
 0xa0f   : > { %7138 = vmatmul.msk.f32.gmra.mxu0 %vm1305_vm14, %v4096_v19  ;;  %7170 = vmatmul.msk.f32.gmra.mxu1 %vm1305_vm14, %v4096_v19 }
 0xa11   : > { %v4102_v40 = vpop.trf.xlu0 }
 0xa17   : > { %7139 = vmatmul.msk.f32.gmra.mxu0 %vm1305_vm14, %v4097_v12  ;;  %7171 = vmatmul.msk.f32.gmra.mxu1 %vm1305_vm14, %v4097_v12 }
 0xa19   : > { %v4103_v26 = vpop.trf.xlu0 }
 0xa1c   : > { %v11660_v13 = vpop.f32.mrf.mxu0  ;;  %v11662_v38 = vpop.f32.mrf.mxu1 }
 0xa1d   : > { %14449 = vst [vmem:[#allocation41_spill] sm:$0xff] %v11660_v13 }
 0xa1e   : > { %14450 = vst [vmem:[#allocation30_spill] sm:$0xff] %v11662_v38  ;;  %v7080_v38 = vld [vmem:[%s13986_s6 + $0x670] sm:$0xff] }
 0xa1f   : > { %7140 = vmatmul.msk.f32.gmra.mxu0 %vm1305_vm14, %v4098_v51  ;;  %7172 = vmatmul.msk.f32.gmra.mxu1 %vm1305_vm14, %v4098_v51 }
 0xa21   : > { %v4120_v7 = vpop.trf.xlu0 }
 0xa27   : > { %7141 = vmatmul.msk.f32.gmra.mxu0 %vm1305_vm14, %v4099_v39  ;;  %7173 = vmatmul.msk.f32.gmra.mxu1 %vm1305_vm14, %v4099_v39 }
 0xa29   : > { %v4121_v59 = vpop.trf.xlu0 }
 0xa2f   : > { %7142 = vmatmul.msk.f32.gmra.mxu0 %vm1305_vm14, %v4100_v54  ;;  %7174 = vmatmul.msk.f32.gmra.mxu1 %vm1305_vm14, %v4100_v54 }
 0xa31   : > { %v4122_v53 = vpop.trf.xlu0 }
 0xa37   : > { %7143 = vmatmul.msk.f32.gmra.mxu0 %vm1305_vm14, %v4101_v11  ;;  %7175 = vmatmul.msk.f32.gmra.mxu1 %vm1305_vm14, %v4101_v11 }
 0xa39   : > { %v4123_v30 = vpop.trf.xlu0 }
 0xa3f   : > { %7144 = vmatmul.msk.f32.gmra.mxu0 %vm1305_vm14, %v4102_v40  ;;  %7176 = vmatmul.msk.f32.gmra.mxu1 %vm1305_vm14, %v4102_v40 }
 0xa41   : > { %v4124_v34 = vpop.trf.xlu0 }
 0xa44   : > { %v11666_v8 = vpop.f32.mrf.mxu0  ;;  %v11668_v50 = vpop.f32.mrf.mxu1 }
 0xa45   : > { %14451 = vst [vmem:[#allocation31_spill] sm:$0xff] %v11666_v8  ;;  %v7078_v8 = vld [vmem:[%s13986_s6 + $0x660] sm:$0xff] }
 0xa46   : > { %14452 = vst [vmem:[#allocation32_spill] sm:$0xff] %v11668_v50 }
 0xa47   : > { %7145 = vmatmul.msk.f32.gmra.mxu0 %vm1305_vm14, %v4103_v26  ;;  %7177 = vmatmul.msk.f32.gmra.mxu1 %vm1305_vm14, %v4103_v26 }
 0xa49   : > { %v4125_v31 = vpop.trf.xlu0 }
 0xa4c   : > { %v11672_v36 = vpop.f32.mrf.mxu0  ;;  %v11674_v62 = vpop.f32.mrf.mxu1 }
 0xa4f   : > { %7146 = vmatmul.msk.f32.gmra.mxu0 %vm1305_vm14, %v4120_v7  ;;  %7178 = vmatmul.msk.f32.gmra.mxu1 %vm1305_vm14, %v4120_v7 }
 0xa51   : > { %v4126_v55 = vpop.trf.xlu0 }
 0xa54   : > { %v11678_v17 = vpop.f32.mrf.mxu0  ;;  %v11680_v48 = vpop.f32.mrf.mxu1 }
 0xa57   : > { %7147 = vmatmul.msk.f32.gmra.mxu0 %vm1305_vm14, %v4121_v59  ;;  %7179 = vmatmul.msk.f32.gmra.mxu1 %vm1305_vm14, %v4121_v59 }
 0xa59   : > { %v4127_v3 = vpop.trf.xlu0 }
 0xa5c   : > { %v11684_v28 = vpop.f32.mrf.mxu0  ;;  %v11686_v43 = vpop.f32.mrf.mxu1 }
 0xa5f   : > { %7148 = vmatmul.msk.f32.gmra.mxu0 %vm1305_vm14, %v4122_v53  ;;  %7180 = vmatmul.msk.f32.gmra.mxu1 %vm1305_vm14, %v4122_v53 }
 0xa61   : > { %v4128_v45 = vpop.trf.xlu0 }
 0xa64   : > { %v11690_v41 = vpop.f32.mrf.mxu0  ;;  %v11692_v61 = vpop.f32.mrf.mxu1 }
 0xa67   : > { %7149 = vmatmul.msk.f32.gmra.mxu0 %vm1305_vm14, %v4123_v30  ;;  %7181 = vmatmul.msk.f32.gmra.mxu1 %vm1305_vm14, %v4123_v30 }
 0xa69   : > { %v4129_v5 = vpop.trf.xlu0 }
 0xa6c   : > { %v11696_v42 = vpop.f32.mrf.mxu0  ;;  %v11698_v52 = vpop.f32.mrf.mxu1 }
 0xa6f   : > { %7150 = vmatmul.msk.f32.gmra.mxu0 %vm1305_vm14, %v4124_v34  ;;  %7182 = vmatmul.msk.f32.gmra.mxu1 %vm1305_vm14, %v4124_v34 }
 0xa71   : > { %v4130_v56 = vpop.trf.xlu0 }
 0xa74   : > { %v11702_v29 = vpop.f32.mrf.mxu0  ;;  %v11704_v33 = vpop.f32.mrf.mxu1 }
 0xa77   : > { %7151 = vmatmul.msk.f32.gmra.mxu0 %vm1305_vm14, %v4125_v31  ;;  %7183 = vmatmul.msk.f32.gmra.mxu1 %vm1305_vm14, %v4125_v31 }
 0xa79   : > { %v4131_v1 = vpop.trf.xlu0 }
 0xa7c   : > { %v11708_v6 = vpop.f32.mrf.mxu0  ;;  %v11710_v49 = vpop.f32.mrf.mxu1 }
 0xa7f   : > { %7152 = vmatmul.msk.f32.gmra.mxu0 %vm1305_vm14, %v4126_v55  ;;  %7184 = vmatmul.msk.f32.gmra.mxu1 %vm1305_vm14, %v4126_v55 }
 0xa81   : > { %v4132_v0 = vpop.trf.xlu0 }
 0xa84   : > { %v11714_v37 = vpop.f32.mrf.mxu0  ;;  %v11716_v20 = vpop.f32.mrf.mxu1 }
 0xa87   : > { %7153 = vmatmul.msk.f32.gmra.mxu0 %vm1305_vm14, %v4127_v3  ;;  %7185 = vmatmul.msk.f32.gmra.mxu1 %vm1305_vm14, %v4127_v3 }
 0xa89   : > { %v4133_v21 = vpop.trf.xlu0 }
 0xa8c   : > { %v11720_v47 = vpop.f32.mrf.mxu0  ;;  %v11722_v2 = vpop.f32.mrf.mxu1 }
 0xa8f   : > { %7154 = vmatmul.msk.f32.gmra.mxu0 %vm1305_vm14, %v4128_v45  ;;  %7186 = vmatmul.msk.f32.gmra.mxu1 %vm1305_vm14, %v4128_v45  ;;  %v7070_v45 = vld [vmem:[%s13986_s6 + $0x620] sm:$0xff] }
 0xa91   : > { %v4134_v24 = vpop.trf.xlu0 }
 0xa94   : > { %v11726_v35 = vpop.f32.mrf.mxu0  ;;  %v11728_v4 = vpop.f32.mrf.mxu1 }
 0xa97   : > { %7155 = vmatmul.msk.f32.gmra.mxu0 %vm1305_vm14, %v4129_v5  ;;  %7187 = vmatmul.msk.f32.gmra.mxu1 %vm1305_vm14, %v4129_v5  ;;  %v7072_v5 = vld [vmem:[%s13986_s6 + $0x630] sm:$0xff] }
 0xa98   : > { %v11832_v50 = vadd.f32 %v7072_v5, %v11690_v41  ;;  %v7084_v5 = vld [vmem:[%s13986_s6 + $0x690] sm:$0xff] }
 0xa99   : > { %v4135_v16 = vpop.trf.xlu0 }
 0xa9c   : > { %v11732_v46 = vpop.f32.mrf.mxu0  ;;  %v11734_v32 = vpop.f32.mrf.mxu1 }
 0xa9f   : > { %7156 = vmatmul.msk.f32.gmra.mxu0 %vm1305_vm14, %v4130_v56  ;;  %7188 = vmatmul.msk.f32.gmra.mxu1 %vm1305_vm14, %v4130_v56 }
 0xaa4   : > { %v11738_v44 = vpop.f32.mrf.mxu0  ;;  %v11740_v60 = vpop.f32.mrf.mxu1 }
 0xaa7   : > { %7157 = vmatmul.msk.f32.gmra.mxu0 %vm1305_vm14, %v4131_v1  ;;  %7189 = vmatmul.msk.f32.gmra.mxu1 %vm1305_vm14, %v4131_v1  ;;  %v7066_v1 = vld [vmem:[%s13986_s6 + $0x600] sm:$0xff] }
 0xaa8   : > { %v11841_v13 = vadd.f32 %v7066_v1, %v11672_v36 }
 0xaac   : > { %v11744_v23 = vpop.f32.mrf.mxu0  ;;  %v11746_v9 = vpop.f32.mrf.mxu1 }
 0xaaf   : > { %7158 = vmatmul.msk.f32.gmra.mxu0 %vm1305_vm14, %v4132_v0  ;;  %7190 = vmatmul.msk.f32.gmra.mxu1 %vm1305_vm14, %v4132_v0  ;;  %v7068_v0 = vld [vmem:[%s13986_s6 + $0x610] sm:$0xff] }
 0xab4   : > { %v11750_v14 = vpop.f32.mrf.mxu0  ;;  %v11752_v57 = vpop.f32.mrf.mxu1 }
 0xab7   : > { %7159 = vmatmul.msk.f32.gmra.mxu0 %vm1305_vm14, %v4133_v21  ;;  %7191 = vmatmul.msk.f32.gmra.mxu1 %vm1305_vm14, %v4133_v21  ;;  %v7074_v21 = vld [vmem:[%s13986_s6 + $0x640] sm:$0xff] }
 0xabc   : > { %v11756_v18 = vpop.f32.mrf.mxu0  ;;  %v11758_v15 = vpop.f32.mrf.mxu1 }
 0xabf   : > { %7160 = vmatmul.msk.f32.gmra.mxu0 %vm1305_vm14, %v4134_v24  ;;  %7192 = vmatmul.msk.f32.gmra.mxu1 %vm1305_vm14, %v4134_v24  ;;  %v7076_v24 = vld [vmem:[%s13986_s6 + $0x650] sm:$0xff] }
 0xac0   : > { %v11850_v41 = vadd.f32 %v7076_v24, %v11702_v29  ;;  %v11866_v29 = vadd.f32 %v7080_v38, %v11714_v37  ;;  %v11884_v38 = vadd.f32 %v7084_v5, %v11726_v35  ;;  %v7090_v37 = vld [vmem:[%s13986_s6 + $0x6c0] sm:$0xff] }
 0xac1   : > { %v7094_v35 = vld [vmem:[%s13986_s6 + $0x6e0] sm:$0xff] }
 0xac2   : > { %14457 = vst [vmem:[#allocation39_spill] sm:$0xff] %v11884_v38 }
 0xac4   : > { %v11762_v22 = vpop.f32.mrf.mxu0  ;;  %v11764_v63 = vpop.f32.mrf.mxu1 }
 0xac7   : > { %7161 = vmatmul.msk.f32.gmra.mxu0 %vm1305_vm14, %v4135_v16  ;;  %7193 = vmatmul.msk.f32.gmra.mxu1 %vm1305_vm14, %v4135_v16  ;;  %v11829_v16 = vadd.f32 %v7070_v45, %v11684_v28  ;;  %v11847_v28 = vadd.f32 %v7074_v21, %v11696_v42  ;;  %v7082_v45 = vld [vmem:[%s13986_s6 + $0x680] sm:$0xff]  ;;  %v11863_v42 = vadd.f32 %v7078_v8, %v11708_v6  ;;  %v7088_v21 = vld [vmem:[%s13986_s6 + $0x6b0] sm:$0xff] }
 0xac8   : > { %v11881_v6 = vadd.f32 %v7082_v45, %v11720_v47  ;;  %v11898_v47 = vadd.f32 %v7088_v21, %v11738_v44  ;;  %v7096_v45 = vld [vmem:[%s13986_s6 + $0x6f0] sm:$0xff]  ;;  %v7098_v44 = vld [vmem:[%s13986_s6 + $0x700] sm:$0xff] }
 0xac9   : > { %v4523_v36 = vmax.f32 %v11841_v13, %v11829_v16 }
 0xacc   : > { %v11768_v27 = vpop.f32.mrf.mxu0  ;;  %v11770_v58 = vpop.f32.mrf.mxu1 }
 0xad4   : > { %v11772_v25 = vpop.f32.mrf.mxu0  ;;  %v11774_v10 = vpop.f32.mrf.mxu1 }
 0xadc   : > { %v11776_v19 = vpop.f32.mrf.mxu0  ;;  %v11780_v51 = vpop.f32.mrf.mxu1 }
 0xae4   : > { %v11778_v12 = vpop.f32.mrf.mxu0  ;;  %v11784_v54 = vpop.f32.mrf.mxu1 }
 0xaec   : > { %v11782_v39 = vpop.f32.mrf.mxu0  ;;  %v11788_v40 = vpop.f32.mrf.mxu1 }
 0xaf4   : > { %v11786_v11 = vpop.f32.mrf.mxu0  ;;  %v11792_v7 = vpop.f32.mrf.mxu1 }
 0xafc   : > { %v11790_v26 = vpop.f32.mrf.mxu0  ;;  %v11798_v30 = vpop.f32.mrf.mxu1 }
 0xafd   : > { %14453 = vst [vmem:[#allocation42_spill] sm:$0xff] %v11798_v30 }
 0xb04   : > { %v11794_v59 = vpop.f32.mrf.mxu0  ;;  %v11802_v31 = vpop.f32.mrf.mxu1 }
 0xb05   : > { %14454 = vst [vmem:[#allocation43_spill] sm:$0xff] %v11802_v31  ;;  %v4525_v31 = vmax.f32 %v4523_v36, %v11847_v28 }
 0xb07   : > { %v4527_v30 = vmax.f32 %v4525_v31, %v11863_v42 }
 0xb09   : > { %v4529_v5 = vmax.f32 %v4527_v30, %v11881_v6 }
 0xb0c   : > { %v11796_v53 = vpop.f32.mrf.mxu0  ;;  %v11806_v3 = vpop.f32.mrf.mxu1 }
 0xb0d   : > { %14455 = vst [vmem:[#allocation38_spill] sm:$0xff] %v11806_v3  ;;  %v11844_v3 = vadd.f32 %v7068_v0, %v11678_v17  ;;  %v7086_v0 = vld [vmem:[%s13986_s6 + $0x6a0] sm:$0xff] }
 0xb0f   : > { %v4524_v17 = vmax.f32 %v11844_v3, %v11832_v50 }
 0xb11   : > { %v4526_v8 = vmax.f32 %v4524_v17, %v11850_v41  ;;  %v11895_v17 = vadd.f32 %v7086_v0, %v11732_v46  ;;  %v7100_v0 = vld [vmem:[%s13986_s6 + $0x710] sm:$0xff] }
 0xb13   : > { %v4528_v36 = vmax.f32 %v4526_v8, %v11866_v29  ;;  %v11909_v8 = vadd.f32 %v7090_v37, %v11744_v23  ;;  %v4531_v21 = vmax.f32 %v4529_v5, %v11895_v17  ;;  %v11926_v23 = vadd.f32 %v7096_v45, %v11762_v22  ;;  %v7108_v45 = vld [vmem:[%s13986_s6 + $0x750] sm:$0xff] }
 0xb14   : > { %v11800_v34 = vpop.f32.mrf.mxu0  ;;  %v11868_v1 = vpop.f32.mrf.mxu1 }
 0xb15   : > { %14456 = vst [vmem:[#allocation22_spill] sm:$0xff] %v11868_v1  ;;  %v7092_v1 = vld [vmem:[%s13986_s6 + $0x6d0] sm:$0xff]  ;;  %v4530_v31 = vmax.f32 %v4528_v36, %v11884_v38  ;;  %v11923_v36 = vadd.f32 %v7094_v35, %v11756_v18  ;;  %v4533_v38 = vmax.f32 %v4531_v21, %v11909_v8  ;;  %v11940_v18 = vadd.f32 %v7100_v0, %v11772_v25  ;;  %v7106_v35 = vld [vmem:[%s13986_s6 + $0x740] sm:$0xff] }
 0xb16   : > { %v11912_v46 = vadd.f32 %v7092_v1, %v11750_v14  ;;  %v7102_v14 = vld [vmem:[%s13986_s6 + $0x720] sm:$0xff]  ;;  %v7104_v1 = vld [vmem:[%s13986_s6 + $0x730] sm:$0xff] }
 0xb17   : > { %v4532_v30 = vmax.f32 %v4530_v31, %v11898_v47  ;;  %v11937_v31 = vadd.f32 %v7098_v44, %v11768_v27  ;;  %14459 = vst [vmem:[#allocation36_spill] sm:$0xff] %v11940_v18  ;;  %v4535_v21 = vmax.f32 %v4533_v38, %v11923_v36  ;;  %v11953_v27 = vadd.f32 %v7102_v14, %v11776_v19  ;;  %v7110_v44 = vld [vmem:[%s13986_s6 + $0x760] sm:$0xff]  ;;  %v7112_v0 = vld [vmem:[%s13986_s6 + $0x770] sm:$0xff] }
 0xb18   : > { %14458 = vst [vmem:[#allocation27_spill] sm:$0xff] %v11912_v46  ;;  %v11956_v25 = vadd.f32 %v7104_v1, %v11778_v12  ;;  %v11970_v19 = vadd.f32 %v7108_v45, %v11786_v11  ;;  %v7114_v12 = vld [vmem:[%s13986_s6 + $0x780] sm:$0xff]  ;;  %v7116_v14 = vld [vmem:[%s13986_s6 + $0x790] sm:$0xff] }
 0xb19   : > { %v4534_v5 = vmax.f32 %v4532_v30, %v11912_v46  ;;  %v4537_v46 = vmax.f32 %v4535_v21, %v11937_v31  ;;  %v7118_v11 = vld [vmem:[%s13986_s6 + $0x7a0] sm:$0xff] }
 0xb1a   : > { %14460 = vst [vmem:[#allocation34_spill] sm:$0xff] %v11970_v19 }
 0xb1b   : > { %v4536_v30 = vmax.f32 %v4534_v5, %v11926_v23  ;;  %v11967_v5 = vadd.f32 %v7106_v35, %v11782_v39  ;;  %v4539_v1 = vmax.f32 %v4537_v46, %v11953_v27  ;;  %v11984_v39 = vadd.f32 %v7112_v0, %v11794_v59  ;;  %v7120_v35 = vld [vmem:[%s13986_s6 + $0x7b0] sm:$0xff]  ;;  %v7122_v59 = vld [vmem:[%s13986_s6 + $0x7c0] sm:$0xff] }
 0xb1c   : > { %v11804_v55 = vpop.f32.mrf.mxu0  ;;  %v11942_v22 = vpop.f32.mrf.mxu1 }
 0xb1d   : > { %v4538_v38 = vmax.f32 %v4536_v30, %v11940_v18  ;;  %v11981_v30 = vadd.f32 %v7110_v44, %v11790_v26  ;;  %v4541_v18 = vmax.f32 %v4539_v1, %v11967_v5  ;;  %v11998_v26 = vadd.f32 %v7116_v14, %v11800_v34  ;;  %v7124_v44 = vld [vmem:[%s13986_s6 + $0x7d0] sm:$0xff] }
 0xb1f   : > { %v4540_v21 = vmax.f32 %v4538_v38, %v11956_v25  ;;  %v11995_v38 = vadd.f32 %v7114_v12, %v11796_v53  ;;  %14462 = vst [vmem:[#allocation26_spill] sm:$0xff] %v11998_v26  ;;  %v4543_v0 = vmax.f32 %v4541_v18, %v11981_v30  ;;  %v7126_v12 = vld [vmem:[%s13986_s6 + $0x7e0] sm:$0xff] }
 0xb21   : > { %v4542_v46 = vmax.f32 %v4540_v21, %v11970_v19  ;;  %14461 = vst [vmem:[#allocation14_spill] sm:$0xff] %v11995_v38  ;;  %v12009_v21 = vadd.f32 %v7118_v11, %v11804_v55  ;;  %v4545_v14 = vmax.f32 %v4543_v0, %v11995_v38  ;;  %v7128_v55 = vld [vmem:[%s13986_s6 + $0x7f0] sm:$0xff]  ;;  %v7071_v0 = vld [vmem:[%s13986_s6 + $0x628] sm:$0xff] }
 0xb23   : > { %v4544_v1 = vmax.f32 %v4542_v46, %v11984_v39 }
 0xb24   : > { %v11814_v56 = vpop.f32.mrf.mxu0  ;;  %v12014_v34 = vpop.f32.mrf.mxu1 }
 0xb25   : > { %v12012_v53 = vadd.f32 %v7120_v35, %v11814_v56  ;;  %v4546_v19 = vmax.f32 %v4544_v1, %v11998_v26  ;;  %v4547_v56 = vmax.f32 %v4545_v14, %v12009_v21  ;;  %v12053_v14 = vadd.f32 %v7071_v0, %v11686_v43  ;;  %v7079_v26 = vld [vmem:[%s13986_s6 + $0x668] sm:$0xff]  ;;  %v7081_v0 = vld [vmem:[%s13986_s6 + $0x678] sm:$0xff] }
 0xb27   : > { %v4548_v11 = vmax.f32 %v4546_v19, %v12012_v53  ;;  %v7067_v19 = vld [vmem:[%s13986_s6 + $0x608] sm:$0xff]  ;;  %14463 = vst [vmem:[#allocation44_spill] sm:$0xff] %v12053_v14 }
 0xb28   : > { %v12067_v38 = vadd.f32 %v7067_v19, %v11674_v62  ;;  %v7083_v62 = vld [vmem:[%s13986_s6 + $0x688] sm:$0xff]  ;;  %v12089_v19 = vadd.f32 %v7079_v26, %v11710_v49  ;;  %v7089_v26 = vld [vmem:[%s13986_s6 + $0x6b8] sm:$0xff] }
 0xb29   : > { %v12104_v49 = vadd.f32 %v7083_v62, %v11722_v2  ;;  %v7093_v2 = vld [vmem:[%s13986_s6 + $0x6d8] sm:$0xff] }
 0xb2c   : > { %v11876_v24 = vpop.f32.mrf.mxu0 }
 0xb2d   : > { %v12022_v18 = vadd.f32 %v7122_v59, %v11876_v24  ;;  %v7073_v24 = vld [vmem:[%s13986_s6 + $0x638] sm:$0xff] }
 0xb34   : > { %v4401_v37 = vpop.f32.mrf.mxu0 }
 0xb35   : > { %v12024_v46 = vadd.f32 %v7124_v44, %v4401_v37  ;;  %v4549_v37 = vmax.f32 %v4547_v56, %v12022_v18 }
 0xb37   : > { %v4550_v59 = vmax.f32 %v4548_v11, %v12024_v46 }
 0xb3c   : > { %v4404_v45 = vpop.f32.mrf.mxu0 }
 0xb3d   : > { %v12031_v35 = vadd.f32 %v7126_v12, %v4404_v45  ;;  %v7075_v45 = vld [vmem:[%s13986_s6 + $0x648] sm:$0xff]  ;;  %v7069_v12 = vld [vmem:[%s13986_s6 + $0x618] sm:$0xff] }
 0xb3e   : > { %v12070_v43 = vadd.f32 %v7075_v45, %v11698_v52  ;;  %v4560_v52 = vmax.f32 %v12067_v38, %v12053_v14  ;;  %v7085_v45 = vld [vmem:[%s13986_s6 + $0x698] sm:$0xff] }
 0xb3f   : > { %v4551_v56 = vmax.f32 %v4549_v37, %v12031_v35  ;;  %v12075_v37 = vpop.f32.mrf.mxu1 }
 0xb44   : > { %v4407_v1 = vpop.f32.mrf.mxu0 }
 0xb45   : > { %v12041_v44 = vadd.f32 %v7128_v55, %v4407_v1  ;;  %v7077_v55 = vld [vmem:[%s13986_s6 + $0x658] sm:$0xff]  ;;  %v12061_v1 = vadd.f32 %v7073_v24, %v11692_v61  ;;  %v12078_v61 = vadd.f32 %v7069_v12, %v11680_v48  ;;  %v7087_v12 = vld [vmem:[%s13986_s6 + $0x6a8] sm:$0xff] }
 0xb46   : > { %v12081_v24 = vadd.f32 %v7077_v55, %v11704_v33  ;;  %v12097_v33 = vadd.f32 %v7081_v0, %v11716_v20  ;;  %v4562_v55 = vmax.f32 %v4560_v52, %v12070_v43  ;;  %v7091_v20 = vld [vmem:[%s13986_s6 + $0x6c8] sm:$0xff]  ;;  %v12118_v52 = vadd.f32 %v7087_v12, %v11734_v32  ;;  %v7097_v32 = vld [vmem:[%s13986_s6 + $0x6f8] sm:$0xff] }
 0xb47   : > { %v4552_v11 = vmax.f32 %v4550_v59, %v12041_v44  ;;  %14464 = vst [vmem:[#allocation24_spill] sm:$0xff] %v12061_v1  ;;  %v4561_v48 = vmax.f32 %v12078_v61, %v12061_v1  ;;  %v12111_v1 = vadd.f32 %v7085_v45, %v11728_v4  ;;  %v7095_v4 = vld [vmem:[%s13986_s6 + $0x6e8] sm:$0xff] }
 0xb48   : > { %v4564_v0 = vmax.f32 %v4562_v55, %v12089_v19 }
 0xb49   : > { %v4553_v59 = vmax.f32 %v4551_v56, %v4552_v11  ;;  %v4563_v14 = vmax.f32 %v4561_v48, %v12081_v24  ;;  %v12132_v48 = vadd.f32 %v7091_v20, %v11746_v9  ;;  %v7101_v9 = vld [vmem:[%s13986_s6 + $0x718] sm:$0xff]  ;;  %v12151_v20 = vpop.f32.mrf.mxu1 }
 0xb4a   : > { %v4566_v45 = vmax.f32 %v4564_v0, %v12104_v49  ;;  %v12146_v0 = vadd.f32 %v7095_v4, %v11758_v15  ;;  %v7105_v4 = vld [vmem:[%s13986_s6 + $0x738] sm:$0xff] }
 0xb4b   : > { %v4554_v56 = vrot.slane %v4553_v59, 4 }
 0xb4d   : > { %v4555_v11 = vmax.f32 %v4553_v59, %v4554_v56  ;;  %v4565_v59 = vmax.f32 %v4563_v14, %v12097_v33  ;;  %v12125_v56 = vadd.f32 %v7089_v26, %v11740_v60  ;;  %v12139_v14 = vadd.f32 %v7093_v2, %v11752_v57  ;;  %v7099_v60 = vld [vmem:[%s13986_s6 + $0x708] sm:$0xff] }
 0xb4e   : > { %v4568_v26 = vmax.f32 %v4566_v45, %v12118_v52  ;;  %v12155_v57 = vadd.f32 %v7097_v32, %v11764_v63  ;;  %v7103_v2 = vld [vmem:[%s13986_s6 + $0x728] sm:$0xff]  ;;  %v12162_v15 = vadd.f32 %v7099_v60, %v11770_v58  ;;  %v12179_v58 = vadd.f32 %v7105_v4, %v11784_v54 }
 0xb4f   : > { %v4556_v62 = vrot.slane %v4555_v11, 2  ;;  %14465 = vst [vmem:[#allocation4_spill] sm:$0xff] %v12125_v56  ;;  %v4567_v55 = vmax.f32 %v4565_v59, %v12111_v1  ;;  %v12173_v32 = vadd.f32 %v7103_v2, %v11780_v51  ;;  %v7109_v51 = vld [vmem:[%s13986_s6 + $0x758] sm:$0xff]  ;;  %v7111_v4 = vld [vmem:[%s13986_s6 + $0x768] sm:$0xff] }
 0xb50   : > { %14466 = vst [vmem:[#allocation5_spill] sm:$0xff] %v12155_v57  ;;  %v4570_v59 = vmax.f32 %v4568_v26, %v12132_v48 }
 0xb51   : > { %v4557_v12 = vmax.f32 %v4555_v11, %v4556_v62  ;;  %v4569_v62 = vmax.f32 %v4567_v55, %v12125_v56  ;;  %14467 = vst [vmem:[#allocation6_spill] sm:$0xff] %v12162_v15  ;;  %v12169_v55 = vadd.f32 %v7101_v9, %v11774_v10 }
 0xb52   : > { %v4572_v63 = vmax.f32 %v4570_v59, %v12146_v0  ;;  %14469 = vst [vmem:[#allocation18_spill] sm:$0xff] %v12173_v32 }
 0xb53   : > { %v4558_v11 = vrot.slane %v4557_v12, 1  ;;  %v4571_v45 = vmax.f32 %v4569_v62, %v12139_v14  ;;  %14468 = vst [vmem:[#allocation3_spill] sm:$0xff] %v12169_v55  ;;  %v7107_v62 = vld [vmem:[%s13986_s6 + $0x748] sm:$0xff] }
 0xb54   : > { %v4574_v60 = vmax.f32 %v4572_v63, %v12162_v15  ;;  %v12198_v59 = vadd.f32 %v7107_v62, %v11788_v40  ;;  %v12211_v63 = vadd.f32 %v7109_v51, %v11792_v7  ;;  %v7121_v51 = vld [vmem:[%s13986_s6 + $0x7b8] sm:$0xff] }
 0xb55   : > { %v12175_v56 = vmax.f32 %v4557_v12, %v4558_v11  ;;  %v4573_v26 = vmax.f32 %v4571_v45, %v12155_v57  ;;  %v7113_v45 = vld [vmem:[%s13986_s6 + $0x778] sm:$0xff]  ;;  %v14471_v11 = vld [vmem:[#allocation43_spill] sm:$0xff] }
 0xb56   : > { %v4576_v12 = vmax.f32 %v4574_v60, %v12173_v32  ;;  %v14470_v60 = vld [vmem:[#allocation42_spill] sm:$0xff]  ;;  %v12237_v32 = vadd.f32 %v7113_v45, %v14471_v11  ;;  %v7125_v7 = vld [vmem:[%s13986_s6 + $0x7d8] sm:$0xff] }
 0xb57   : > { %v4575_v10 = vmax.f32 %v4573_v26, %v12169_v55  ;;  %v4597_v9 = vsub.f32 %v11841_v13, %v12175_v56  ;;  %v4599_v54 = vsub.f32 %v11844_v3, %v12175_v56  ;;  %v4601_v13 = vsub.f32 %v11829_v16, %v12175_v56  ;;  %v4517_v26 = vpop.f32.mrf.mxu1  ;;  %v7115_v16 = vld [vmem:[%s13986_s6 + $0x788] sm:$0xff]  ;;  %v14472_v11 = vld [vmem:[#allocation38_spill] sm:$0xff] }
 0xb58   : > { %v4603_v40 = vsub.f32 %v11832_v50, %v12175_v56  ;;  %v12234_v3 = vadd.f32 %v7111_v4, %v14470_v60  ;;  %v4578_v57 = vmax.f32 %v4576_v12, %v12198_v59  ;;  %v7119_v50 = vld [vmem:[%s13986_s6 + $0x7a8] sm:$0xff]  ;;  %v4605_v62 = vsub.f32 %v11847_v28, %v12175_v56 }
 0xb59   : > { %v4577_v2 = vmax.f32 %v4575_v10, %v12179_v58  ;;  %v7117_v10 = vld [vmem:[%s13986_s6 + $0x798] sm:$0xff]  ;;  %v4661_v55 = vmul.f32 1.442695, %v4597_v9  ;;  %v4665_v15 = vmul.f32 1.442695, %v4599_v54  ;;  %v12250_v45 = vadd.f32 %v7115_v16, %v14472_v11  ;;  %v14473_v9 = vld [vmem:[#allocation22_spill] sm:$0xff] }
 0xb5a   : > { %v4669_v4 = vmul.f32 1.442695, %v4601_v13  ;;  %v12253_v54 = vadd.f32 %v7117_v10, %v14473_v9  ;;  %v7123_v12 = vld [vmem:[%s13986_s6 + $0x7c8] sm:$0xff]  ;;  %v4607_v28 = vsub.f32 %v11850_v41, %v12175_v56  ;;  %v4580_v13 = vmax.f32 %v4578_v57, %v12234_v3 }
 0xb5b   : > { %v4579_v60 = vmax.f32 %v4577_v2, %v12211_v63  ;;  %7676 = vpow2.f32 %v4661_v55  ;;  %v4673_v2 = vmul.f32 1.442695, %v4603_v40  ;;  %v12266_v10 = vadd.f32 %v7119_v50, %v11942_v22  ;;  %v7127_v11 = vld [vmem:[%s13986_s6 + $0x7e8] sm:$0xff] }
 0xb5c   : > { %7678 = vpow2.f32 %v4665_v15  ;;  %v12269_v55 = vadd.f32 %v7121_v51, %v12014_v34  ;;  %v4609_v9 = vsub.f32 %v11863_v42, %v12175_v56  ;;  %v4677_v41 = vmul.f32 1.442695, %v4605_v62 }
 0xb5d   : > { %v4581_v16 = vmax.f32 %v4579_v60, %v12237_v32  ;;  %7680 = vpow2.f32 %v4669_v4  ;;  %v4582_v15 = vmax.f32 %v4580_v13, %v12250_v45  ;;  %v12279_v40 = vadd.f32 %v7123_v12, %v12075_v37 }
 0xb5e   : > { %v12282_v22 = vadd.f32 %v7125_v7, %v12151_v20  ;;  %v4611_v34 = vsub.f32 %v11866_v29, %v12175_v56  ;;  %7682 = vpow2.f32 %v4673_v2  ;;  %v4681_v50 = vmul.f32 1.442695, %v4607_v28  ;;  %v14477_v2 = vld [vmem:[#allocation39_spill] sm:$0xff] }
 0xb5f   : > { %v4583_v57 = vmax.f32 %v4581_v16, %v12253_v54  ;;  %v4584_v42 = vmax.f32 %v4582_v15, %v12266_v10  ;;  %v12290_v4 = vadd.f32 %v7127_v11, %v4517_v26  ;;  %v4520_v60 = vpop.f32.mrf.mxu1  ;;  %v4613_v37 = vsub.f32 %v11881_v6, %v12175_v56  ;;  %v7129_v26 = vld [vmem:[%s13986_s6 + $0x7f8] sm:$0xff] }
 0xb60   : > { %7684 = vpow2.f32 %v4677_v41  ;;  %v4685_v20 = vmul.f32 1.442695, %v4609_v9  ;;  %v4615_v16 = vsub.f32 %v14477_v2, %v12175_v56  ;;  %v4689_v6 = vmul.f32 1.442695, %v4611_v34 }
 0xb61   : > { %v12286_v51 = vpop.eup %7676  ;;  %v4585_v62 = vmax.f32 %v4583_v57, %v12269_v55  ;;  %v4586_v29 = vmax.f32 %v4584_v42, %v12279_v40  ;;  %7686 = vpow2.f32 %v4681_v50  ;;  %v12307_v11 = vadd.f32 %v7129_v26, %v4520_v60 }
 0xb62   : > { %14474 = vst [vmem:[#allocation25_spill] sm:$0xff] %v12286_v51  ;;  %v12292_v13 = vpop.eup %7678  ;;  %v4617_v57 = vsub.f32 %v11895_v17, %v12175_v56  ;;  %7688 = vpow2.f32 %v4685_v20  ;;  %v4693_v42 = vmul.f32 1.442695, %v4613_v37  ;;  %v4619_v34 = vsub.f32 %v11898_v47, %v12175_v56 }
 0xb63   : > { %14475 = vst [vmem:[#allocation17_spill] sm:$0xff] %v12292_v13  ;;  %v4587_v7 = vmax.f32 %v4585_v62, %v12282_v22  ;;  %v4789_v12 = vadd.f32 %v12292_v13, %v12286_v51  ;;  %v12303_v28 = vpop.eup %7680  ;;  %v4588_v9 = vmax.f32 %v4586_v29, %v12290_v4  ;;  %7690 = vpow2.f32 %v4689_v6 }
 0xb64   : > { %14476 = vst [vmem:[#allocation13_spill] sm:$0xff] %v12303_v28  ;;  %v12311_v15 = vpop.eup %7682  ;;  %v4697_v50 = vmul.f32 1.442695, %v4615_v16  ;;  %v4621_v17 = vsub.f32 %v11909_v8, %v12175_v56  ;;  %7692 = vpow2.f32 %v4693_v42  ;;  %v4701_v37 = vmul.f32 1.442695, %v4617_v57 }
 0xb65   : > { %v4790_v41 = vadd.f32 %v12303_v28, %v4789_v12  ;;  %v4589_v62 = vmax.f32 %v4587_v7, %v12307_v11  ;;  %v4705_v16 = vmul.f32 1.442695, %v4619_v34  ;;  %v4625_v8 = vsub.f32 %v11923_v36, %v12175_v56 }
 0xb66   : > { %v12317_v2 = vpop.eup %7684  ;;  %7694 = vpow2.f32 %v4697_v50  ;;  %v4709_v57 = vmul.f32 1.442695, %v4621_v17  ;;  %v4629_v36 = vsub.f32 %v11937_v31, %v12175_v56 }
 0xb67   : > { %v4791_v51 = vadd.f32 %v12311_v15, %v4790_v41  ;;  %v4590_v60 = vmax.f32 %v4588_v9, %v4589_v62  ;;  %v12322_v12 = vpop.eup %7686  ;;  %v14478_v41 = vld [vmem:[#allocation27_spill] sm:$0xff]  ;;  %7696 = vpow2.f32 %v4701_v37  ;;  %v4717_v17 = vmul.f32 1.442695, %v4625_v8 }
 0xb68   : > { %v12327_v26 = vpop.eup %7688  ;;  %v4623_v47 = vsub.f32 %v14478_v41, %v12175_v56  ;;  %v4627_v41 = vsub.f32 %v11926_v23, %v12175_v56  ;;  %7698 = vpow2.f32 %v4705_v16  ;;  %v4725_v31 = vmul.f32 1.442695, %v4629_v36 }
 0xb69   : > { %v4792_v29 = vadd.f32 %v12317_v2, %v4791_v51  ;;  %v4591_v20 = vrot.slane %v4590_v60, 4  ;;  %v12332_v9 = vpop.eup %7690  ;;  %7700 = vpow2.f32 %v4709_v57 }
 0xb6a   : > { %v4713_v34 = vmul.f32 1.442695, %v4623_v47  ;;  %v4721_v23 = vmul.f32 1.442695, %v4627_v41 }
 0xb6b   : > { %v4793_v7 = vadd.f32 %v12322_v12, %v4792_v29  ;;  %v4592_v6 = vmax.f32 %v4590_v60, %v4591_v20  ;;  %v12337_v29 = vpop.eup %7692 }
 0xb6c   : > { %v12342_v20 = vpop.eup %7694  ;;  %7702 = vpow2.f32 %v4713_v34 }
 0xb6d   : > { %v4794_v51 = vadd.f32 %v12327_v26, %v4793_v7  ;;  %v4593_v42 = vrot.slane %v4592_v6, 2  ;;  %v12347_v7 = vpop.eup %7696  ;;  %7704 = vpow2.f32 %v4717_v17 }
 0xb6e   : > { %7706 = vpow2.f32 %v4721_v23 }
 0xb6f   : > { %v4795_v62 = vadd.f32 %v12332_v9, %v4794_v51  ;;  %v4594_v50 = vmax.f32 %v4592_v6, %v4593_v42  ;;  %v14479_v51 = vld [vmem:[#allocation36_spill] sm:$0xff]  ;;  %v12352_v6 = vpop.eup %7698  ;;  %v4633_v42 = vsub.f32 %v11953_v27, %v12175_v56  ;;  %7708 = vpow2.f32 %v4725_v31 }
 0xb70   : > { %v4631_v13 = vsub.f32 %v14479_v51, %v12175_v56  ;;  %v12357_v57 = vpop.eup %7700  ;;  %v14480_v51 = vld [vmem:[#allocation34_spill] sm:$0xff]  ;;  %v14481_v27 = vsub.f32 %v11956_v25, %v12175_v56 }
 0xb71   : > { %v4796_v60 = vadd.f32 %v12337_v29, %v4795_v62  ;;  %v4595_v47 = vrot.slane %v4594_v50, 1  ;;  %v4639_v28 = vsub.f32 %v14480_v51, %v12175_v56 }
 0xb72   : > { %v4729_v62 = vmul.f32 1.442695, %v4631_v13  ;;  %v12362_v34 = vpop.eup %7702  ;;  %v4737_v36 = vmul.f32 1.442695, %v14481_v27 }
 0xb73   : > { %v4797_v37 = vadd.f32 %v12342_v20, %v4796_v60  ;;  %v12359_v60 = vmax.f32 %v4594_v50, %v4595_v47  ;;  %v14482_v47 = vsub.f32 %v11967_v5, %v12175_v56  ;;  %v14483_v5 = vld [vmem:[#allocation44_spill] sm:$0xff] }
 0xb74   : > { %7710 = vpow2.f32 %v4729_v62  ;;  %v4745_v62 = vmul.f32 1.442695, %v4639_v28 }
 0xb75   : > { %v4798_v16 = vadd.f32 %v12347_v7, %v4797_v37  ;;  %v4733_v37 = vmul.f32 1.442695, %v4633_v42  ;;  %v4598_v13 = vsub.f32 %v12067_v38, %v12359_v60  ;;  %v4600_v50 = vsub.f32 %v12078_v61, %v12359_v60 }
 0xb76   : > { %v4741_v42 = vmul.f32 1.442695, %v14482_v47  ;;  %v4641_v38 = vsub.f32 %v11981_v30, %v12175_v56  ;;  %v4643_v61 = vsub.f32 %v11984_v39, %v12175_v56  ;;  %v4602_v51 = vsub.f32 %v14483_v5, %v12359_v60 }
 0xb77   : > { %v4799_v8 = vadd.f32 %v12352_v6, %v4798_v16  ;;  %v12370_v16 = vpop.eup %7704  ;;  %7712 = vpow2.f32 %v4733_v37  ;;  %v4663_v47 = vmul.f32 1.442695, %v4598_v13  ;;  %v4667_v31 = vmul.f32 1.442695, %v4600_v50  ;;  %v14485_v37 = vld [vmem:[#allocation24_spill] sm:$0xff] }
 0xb78   : > { %7714 = vpow2.f32 %v4737_v36  ;;  %v4604_v39 = vsub.f32 %v14485_v37, %v12359_v60  ;;  %v4749_v5 = vmul.f32 1.442695, %v4641_v38  ;;  %v4671_v13 = vmul.f32 1.442695, %v4602_v51 }
 0xb79   : > { %v4800_v41 = vadd.f32 %v12357_v57, %v4799_v8  ;;  %v12384_v8 = vpop.eup %7706  ;;  %7716 = vpow2.f32 %v4741_v42  ;;  %v14487_v42 = vld [vmem:[#allocation26_spill] sm:$0xff]  ;;  %v4753_v37 = vmul.f32 1.442695, %v4643_v61  ;;  %v4608_v38 = vsub.f32 %v12081_v24, %v12359_v60 }
 0xb7a   : > { %v12393_v27 = vpop.eup %7708  ;;  %7718 = vpow2.f32 %v4663_v47  ;;  %v4675_v47 = vmul.f32 1.442695, %v4604_v39  ;;  %v4610_v51 = vsub.f32 %v12089_v19, %v12359_v60  ;;  %v14490_v19 = vsub.f32 %v12009_v21, %v12175_v56 }
 0xb7b   : > { %v4801_v17 = vadd.f32 %v12362_v34, %v4800_v41  ;;  %14484 = vst [vmem:[#allocation33_spill] sm:$0xff] %v12393_v27  ;;  %v12400_v28 = vpop.eup %7710  ;;  %7720 = vpow2.f32 %v4667_v31  ;;  %v4683_v39 = vmul.f32 1.442695, %v4608_v38 }
 0xb7c   : > { %7722 = vpow2.f32 %v4745_v62 }
 0xb7d   : > { %v4802_v25 = vadd.f32 %v12370_v16, %v4801_v17  ;;  %v4606_v17 = vsub.f32 %v12070_v43, %v12359_v60  ;;  %v12407_v50 = vpop.eup %7712  ;;  %7724 = vpow2.f32 %v4749_v5 }
 0xb7e   : > { %7726 = vpow2.f32 %v4671_v13  ;;  %v4614_v13 = vsub.f32 %v12104_v49, %v12359_v60 }
 0xb7f   : > { %v4803_v41 = vadd.f32 %v12384_v8, %v4802_v25  ;;  %v14486_v25 = vld [vmem:[#allocation14_spill] sm:$0xff]  ;;  %v4679_v62 = vmul.f32 1.442695, %v4606_v17  ;;  %7728 = vpow2.f32 %v4753_v37 }
 0xb80   : > { %v4645_v23 = vsub.f32 %v14486_v25, %v12175_v56  ;;  %v12414_v25 = vpop.eup %7714  ;;  %7730 = vpow2.f32 %v4675_v47 }
 0xb81   : > { %v4804_v30 = vadd.f32 %v12393_v27, %v4803_v41  ;;  %v4647_v41 = vsub.f32 %v14487_v42, %v12175_v56  ;;  %v12416_v43 = vpop.eup %7716 }
 0xb82   : > { %v12421_v61 = vpop.eup %7718 }
 0xb83   : > { %v4805_v36 = vadd.f32 %v12400_v28, %v4804_v30  ;;  %v4757_v30 = vmul.f32 1.442695, %v4645_v23  ;;  %14488 = vst [vmem:[#allocation45_spill] sm:$0xff] %v12421_v61  ;;  %v12423_v42 = vpop.eup %7720  ;;  %v4612_v23 = vsub.f32 %v12097_v33, %v12359_v60  ;;  %v14491_v33 = vsub.f32 %v12012_v53, %v12175_v56 }
 0xb84   : > { %14489 = vst [vmem:[#allocation40_spill] sm:$0xff] %v12423_v42  ;;  %v12428_v5 = vpop.eup %7722  ;;  %v4826_v47 = vadd.f32 %v12423_v42, %v12421_v61 }
 0xb85   : > { %v4806_v27 = vadd.f32 %v12407_v50, %v4805_v36  ;;  %v4761_v36 = vmul.f32 1.442695, %v4647_v41  ;;  %7732 = vpow2.f32 %v4757_v30  ;;  %v4687_v41 = vmul.f32 1.442695, %v4610_v51  ;;  %v12436_v37 = vpop.eup %7724 }
 0xb86   : > { %7734 = vpow2.f32 %v4679_v62  ;;  %v4769_v38 = vmul.f32 1.442695, %v14491_v33  ;;  %v12443_v30 = vpop.eup %7726  ;;  %v4691_v49 = vmul.f32 1.442695, %v4612_v23  ;;  %v14493_v62 = vsub.f32 %v12022_v18, %v12175_v56 }
 0xb87   : > { %v4807_v31 = vadd.f32 %v12414_v25, %v4806_v27  ;;  %v4765_v27 = vmul.f32 1.442695, %v14490_v19  ;;  %7736 = vpow2.f32 %v4761_v36  ;;  %14492 = vst [vmem:[#allocation46_spill] sm:$0xff] %v12443_v30  ;;  %v12448_v51 = vpop.eup %7728  ;;  %v4827_v36 = vadd.f32 %v12443_v30, %v4826_v47 }
 0xb88   : > { %7738 = vpow2.f32 %v4683_v39  ;;  %v4773_v53 = vmul.f32 1.442695, %v14493_v62  ;;  %v14495_v23 = vsub.f32 %v12024_v46, %v12175_v56 }
 0xb89   : > { %v4808_v24 = vadd.f32 %v12416_v43, %v4807_v31  ;;  %v4616_v31 = vsub.f32 %v12111_v1, %v12359_v60  ;;  %7740 = vpow2.f32 %v4765_v27  ;;  %v4695_v1 = vmul.f32 1.442695, %v4614_v13 }
 0xb8a   : > { %7742 = vpow2.f32 %v4687_v41  ;;  %v4777_v27 = vmul.f32 1.442695, %v14495_v23  ;;  %v14498_v13 = vsub.f32 %v12031_v35, %v12175_v56 }
 0xb8b   : > { %v4809_v17 = vadd.f32 %v12428_v5, %v4808_v24  ;;  %v12454_v24 = vpop.eup %7730  ;;  %7744 = vpow2.f32 %v4769_v38 }
 0xb8c   : > { %14494 = vst [vmem:[#allocation9_spill] sm:$0xff] %v12454_v24  ;;  %v12459_v39 = vpop.eup %7732  ;;  %v4828_v18 = vadd.f32 %v12454_v24, %v4827_v36  ;;  %7746 = vpow2.f32 %v4691_v49  ;;  %v4781_v38 = vmul.f32 1.442695, %v14498_v13 }
 0xb8d   : > { %v4810_v21 = vadd.f32 %v12436_v37, %v4809_v17  ;;  %v4618_v17 = vsub.f32 %v12118_v52, %v12359_v60  ;;  %v12465_v33 = vpop.eup %7734  ;;  %v4699_v52 = vmul.f32 1.442695, %v4616_v31  ;;  %7748 = vpow2.f32 %v4773_v53 }
 0xb8e   : > { %14496 = vst [vmem:[#allocation10_spill] sm:$0xff] %v12465_v33  ;;  %v12470_v41 = vpop.eup %7736  ;;  %v4829_v46 = vadd.f32 %v12465_v33, %v4828_v18  ;;  %7750 = vpow2.f32 %v4695_v1  ;;  %v14500_v31 = vsub.f32 %v12041_v44, %v12175_v56  ;;  %v4626_v56 = vsub.f32 %v12146_v0, %v12359_v60 }
 0xb8f   : > { %v4811_v19 = vadd.f32 %v12448_v51, %v4810_v21  ;;  %v14497_v21 = vld [vmem:[#allocation4_spill] sm:$0xff]  ;;  %v12476_v23 = vpop.eup %7738  ;;  %7752 = vpow2.f32 %v4777_v27 }
 0xb90   : > { %v4620_v62 = vsub.f32 %v14497_v21, %v12359_v60  ;;  %14499 = vst [vmem:[#allocation28_spill] sm:$0xff] %v12476_v23  ;;  %v4703_v21 = vmul.f32 1.442695, %v4618_v17  ;;  %v12481_v49 = vpop.eup %7740  ;;  %v4785_v53 = vmul.f32 1.442695, %v14500_v31  ;;  %v4830_v35 = vadd.f32 %v12476_v23, %v4829_v46 }
 0xb91   : > { %v4812_v47 = vadd.f32 %v12459_v39, %v4811_v19  ;;  %v4622_v19 = vsub.f32 %v12132_v48, %v12359_v60  ;;  %v12487_v13 = vpop.eup %7742  ;;  %7754 = vpow2.f32 %v4699_v52  ;;  %v4719_v61 = vmul.f32 1.442695, %v4626_v56 }
 0xb92   : > { %14501 = vst [vmem:[#allocation35_spill] sm:$0xff] %v12487_v13  ;;  %v4707_v48 = vmul.f32 1.442695, %v4620_v62  ;;  %v12492_v1 = vpop.eup %7744  ;;  %7756 = vpow2.f32 %v4781_v38  ;;  %v4831_v17 = vadd.f32 %v12487_v13, %v4830_v35  ;;  %v14503_v38 = vld [vmem:[#allocation5_spill] sm:$0xff] }
 0xb93   : > { %v4813_v36 = vadd.f32 %v12470_v41, %v4812_v47  ;;  %v4624_v47 = vsub.f32 %v12139_v14, %v12359_v60  ;;  %v12495_v27 = vpop.eup %7746  ;;  %7758 = vpow2.f32 %v4703_v21  ;;  %v4711_v46 = vmul.f32 1.442695, %v4622_v19 }
 0xb94   : > { %14502 = vst [vmem:[#allocation7_spill] sm:$0xff] %v12495_v27  ;;  %7760 = vpow2.f32 %v4785_v53  ;;  %v4832_v14 = vadd.f32 %v12495_v27, %v4831_v17  ;;  %v4628_v31 = vsub.f32 %v14503_v38, %v12359_v60  ;;  %v14504_v53 = vld [vmem:[#allocation6_spill] sm:$0xff] }
 0xb95   : > { %v4814_v18 = vadd.f32 %v12481_v49, %v4813_v36  ;;  %v12500_v36 = vpop.eup %7748  ;;  %7762 = vpow2.f32 %v4707_v48  ;;  %v4715_v35 = vmul.f32 1.442695, %v4624_v47  ;;  %v4630_v17 = vsub.f32 %v14504_v53, %v12359_v60  ;;  %v14505_v48 = vld [vmem:[#allocation3_spill] sm:$0xff] }
 0xb96   : > { %v12503_v62 = vpop.eup %7750  ;;  %7764 = vpow2.f32 %v4711_v46  ;;  %v4723_v30 = vmul.f32 1.442695, %v4628_v31  ;;  %v14506_v46 = vld [vmem:[#allocation18_spill] sm:$0xff] }
 0xb97   : > { %v4815_v44 = vadd.f32 %v12492_v1, %v4814_v18  ;;  %v12508_v18 = vpop.eup %7752  ;;  %v4833_v0 = vadd.f32 %v12503_v62, %v4832_v14  ;;  %v4632_v14 = vsub.f32 %v14505_v48, %v12359_v60  ;;  %7766 = vpow2.f32 %v4715_v35 }
 0xb98   : > { %v12511_v21 = vpop.eup %7754  ;;  %7768 = vpow2.f32 %v4719_v61  ;;  %v4727_v33 = vmul.f32 1.442695, %v4630_v17 }
 0xb99   : > { %v4816_v52 = vadd.f32 %v12500_v36, %v4815_v44  ;;  %v12516_v42 = vpop.eup %7756  ;;  %v4834_v44 = vadd.f32 %v12511_v21, %v4833_v0  ;;  %v4634_v0 = vsub.f32 %v14506_v46, %v12359_v60  ;;  %7770 = vpow2.f32 %v4723_v30 }
 0xb9a   : > { %v12519_v38 = vpop.eup %7758  ;;  %v4731_v31 = vmul.f32 1.442695, %v4632_v14  ;;  %7772 = vpow2.f32 %v4727_v33  ;;  %v14507_v30 = vsub.f32 %v12179_v58, %v12359_v60  ;;  %v4642_v33 = vsub.f32 %v12234_v3, %v12359_v60 }
 0xb9b   : > { %v4817_v19 = vadd.f32 %v12508_v18, %v4816_v52  ;;  %v12524_v24 = vpop.eup %7760  ;;  %v4835_v52 = vadd.f32 %v12519_v38, %v4834_v44  ;;  %v4735_v27 = vmul.f32 1.442695, %v4634_v0 }
 0xb9c   : > { %v12527_v53 = vpop.eup %7762  ;;  %7774 = vpow2.f32 %v4731_v31  ;;  %v4739_v14 = vmul.f32 1.442695, %v14507_v30 }
 0xb9d   : > { %v4818_v47 = vadd.f32 %v12516_v42, %v4817_v19  ;;  %v4836_v19 = vadd.f32 %v12527_v53, %v4835_v52  ;;  %v12533_v23 = vpop.eup %7764  ;;  %7776 = vpow2.f32 %v4735_v27  ;;  %v4751_v27 = vmul.f32 1.442695, %v4642_v33 }
 0xb9e   : > { %v12536_v13 = vpop.eup %7766  ;;  %7778 = vpow2.f32 %v4739_v14 }
 0xb9f   : > { %v4819_v56 = vadd.f32 %v12524_v24, %v4818_v47  ;;  %v4837_v35 = vadd.f32 %v12533_v23, %v4836_v19  ;;  %v4640_v47 = vsub.f32 %v12211_v63, %v12359_v60  ;;  %v12541_v17 = vpop.eup %7768  ;;  %v14508_v63 = vsub.f32 %v12198_v59, %v12359_v60 }
 0xba0   : > { %v12547_v19 = vpop.eup %7770  ;;  %v4646_v59 = vsub.f32 %v12250_v45, %v12359_v60  ;;  %v4650_v45 = vsub.f32 %v12266_v10, %v12359_v60 }
 0xba1   : > { %v4820_v48 = vrot.slane %v4819_v56, 4  ;;  %v4838_v61 = vadd.f32 %v12536_v13, %v4837_v35  ;;  %v4743_v0 = vmul.f32 1.442695, %v14508_v63  ;;  %v12555_v35 = vpop.eup %7772 }
 0xba2   : > { %14509 = vst [vmem:[#allocation8_spill] sm:$0xff] %v12555_v35  ;;  %v4759_v33 = vmul.f32 1.442695, %v4646_v59  ;;  %v4767_v10 = vmul.f32 1.442695, %v4650_v45 }
 0xba3   : > { %v4821_v44 = vadd.f32 %v4820_v48, %v4819_v56  ;;  %v4839_v46 = vadd.f32 %v12541_v17, %v4838_v61  ;;  %v4747_v48 = vmul.f32 1.442695, %v4640_v47  ;;  %v4644_v61 = vsub.f32 %v12237_v32, %v12359_v60 }
 0xba4   : > { %7780 = vpow2.f32 %v4743_v0  ;;  %v4648_v32 = vsub.f32 %v12253_v54, %v12359_v60 }
 0xba5   : > { %v4822_v52 = vrot.slane %v4821_v44, 2  ;;  %v4840_v31 = vadd.f32 %v12547_v19, %v4839_v46  ;;  %7782 = vpow2.f32 %v4747_v48  ;;  %v4755_v14 = vmul.f32 1.442695, %v4644_v61 }
 0xba6   : > { %v4652_v48 = vsub.f32 %v12269_v55, %v12359_v60  ;;  %v4656_v55 = vsub.f32 %v12282_v22, %v12359_v60 }
 0xba7   : > { %v4823_v56 = vadd.f32 %v4822_v52, %v4821_v44  ;;  %v4841_v44 = vadd.f32 %v12555_v35, %v4840_v31  ;;  %v12560_v52 = vpop.eup %7774  ;;  %v4763_v31 = vmul.f32 1.442695, %v4648_v32 }
 0xba8   : > { %14510 = vst [vmem:[#allocation20_spill] sm:$0xff] %v12560_v52  ;;  %v12567_v30 = vpop.eup %7776  ;;  %v4771_v32 = vmul.f32 1.442695, %v4652_v48 }
 0xba9   : > { %v4824_v58 = vrot.slane %v4823_v56, 1  ;;  %v4842_v47 = vadd.f32 %v12560_v52, %v4841_v44  ;;  %v4654_v44 = vsub.f32 %v12279_v40, %v12359_v60  ;;  %v4658_v40 = vsub.f32 %v12290_v4, %v12359_v60 }
 0xbaa   : > { %v4779_v52 = vmul.f32 1.442695, %v4656_v55 }
 0xbab   : > { %v12562_v3 = vadd.f32 %v4824_v58, %v4823_v56  ;;  %v4843_v46 = vadd.f32 %v12567_v30, %v4842_v47  ;;  %v12573_v56 = vpop.eup %7778  ;;  %v4775_v45 = vmul.f32 1.442695, %v4654_v44 }
 0xbac   : > { %v12578_v0 = vpop.eup %7780 }
 0xbad   : > { %7784 = vrcp.f32 %v12562_v3  ;;  %v4844_v63 = vadd.f32 %v12573_v56, %v4843_v46  ;;  %v12582_v54 = vpop.eup %7782  ;;  %v4874_v44 = vand.u32 2147483648, %v12562_v3  ;;  %vm4868_vm9 = vweird.f32 %v12562_v3 }
 0xbae   : > { %7786 = vpow2.f32 %v4751_v27  ;;  %v4872_v55 = vand.u32 2147483647, %v12562_v3 }
 0xbaf   : > { %7788 = vpow2.f32 %v4755_v14  ;;  %v4845_v58 = vadd.f32 %v12578_v0, %v4844_v63 }
 0xbb0   : > { %7790 = vpow2.f32 %v4759_v33  ;;  %vm4873_vm11 = vcmp.eq.f32.partialorder %v4872_v55, 8.507059e+37 }
 0xbb1   : > { %v4846_v27 = vadd.f32 %v12582_v54, %v4845_v58  ;;  %7792 = vpow2.f32 %v4763_v31  ;;  %v4783_v31 = vmul.f32 1.442695, %v4658_v40 }
 0xbb2   : > { %7794 = vpow2.f32 %v4767_v10  ;;  %v14511_v10 = vsub.f32 %v12307_v11, %v12359_v60 }
 0xbb3   : > { %v7785_v61 = vpop.eup %7784  ;;  %7796 = vpow2.f32 %v4771_v32 }
 0xbb4   : > { %v4864_v59 = vmul.f32 %v7785_v61, %v12562_v3  ;;  %v12589_v47 = vpop.eup %7786  ;;  %7798 = vpow2.f32 %v4775_v45  ;;  %vm4869_vm14 = vweird.f32 %v7785_v61  ;;  %v4787_v32 = vmul.f32 1.442695, %v14511_v10 }
 0xbb5   : > { %v4847_v46 = vadd.f32 %v12589_v47, %v4846_v27  ;;  %v12594_v63 = vpop.eup %7788  ;;  %7800 = vpow2.f32 %v4779_v52  ;;  %vm4870_vm10 = vmor %vm4868_vm9, %vm4869_vm14  ;;  %v4875_v52 = vor.u32 1.1754944e-38, %v4874_v44 }
 0xbb6   : > { %v4865_v14 = vsub.f32 1.0, %v4864_v59  ;;  %v12599_v35 = vpop.eup %7790  ;;  %7802 = vpow2.f32 %v4783_v31 }
 0xbb7   : > { %v4848_v58 = vadd.f32 %v12594_v63, %v4847_v46  ;;  %v12602_v48 = vpop.eup %7792  ;;  %7804 = vpow2.f32 %v4787_v32 }
 0xbb8   : > { %v4866_v33 = vmul.f32 %v7785_v61, %v4865_v14  ;;  %v12605_v4 = vpop.eup %7794 }
 0xbb9   : > { %v4849_v22 = vadd.f32 %v12599_v35, %v4848_v58  ;;  %v12614_v46 = vpop.eup %7796 }
 0xbba   : > { %v4867_v59 = vadd.f32 %v7785_v61, %v4866_v33  ;;  %v12617_v33 = vpop.eup %7798 }
 0xbbb   : > { %v4850_v27 = vadd.f32 %v12602_v48, %v4849_v22  ;;  %v12620_v60 = vpop.eup %7800 }
 0xbbc   : > { %v4871_v40 = vsel %vm4870_vm10, %v7785_v61, %v4867_v59  ;;  %v12625_v22 = vpop.eup %7802 }
 0xbbd   : > { %v4851_v14 = vadd.f32 %v12605_v4, %v4850_v27  ;;  %v12622_v58 = vsel %vm4873_vm11, %v4875_v52, %v4871_v40  ;;  %v12632_v27 = vpop.eup %7804 }
 0xbbe   : > { %v4921_v61 = vmul.f32 %v12384_v8, %v12622_v58  ;;  %v4953_v59 = vmul.f32 %v12524_v24, %v12622_v58  ;;  %v4951_v44 = vmul.f32 %v12516_v42, %v12622_v58  ;;  %v4949_v10 = vmul.f32 %v12508_v18, %v12622_v58 }
 0xbbf   : > { %v4852_v45 = vadd.f32 %v12614_v46, %v4851_v14  ;;  %v4919_v55 = vmul.f32 %v12370_v16, %v12622_v58  ;;  %v4947_v8 = vmul.f32 %v12500_v36, %v12622_v58  ;;  %v4945_v24 = vmul.f32 %v12492_v1, %v12622_v58 }
 0xbc0   : > { %4955 = vmatpush.msra.mxu2 %v4921_v61  ;;  %4975 = vmatpush.msra.mxu3 %v4953_v59  ;;  %v4943_v14 = vmul.f32 %v12481_v49, %v12622_v58  ;;  %v4917_v18 = vmul.f32 %v12362_v34, %v12622_v58  ;;  %v4941_v40 = vmul.f32 %v12470_v41, %v12622_v58 }
 0xbc1   : > { %v4853_v11 = vadd.f32 %v12617_v33, %v4852_v45  ;;  %v4939_v16 = vmul.f32 %v12459_v39, %v12622_v58  ;;  %v4937_v36 = vmul.f32 %v12448_v51, %v12622_v58  ;;  %v4935_v1 = vmul.f32 %v12436_v37, %v12622_v58 }
 0xbc2   : > { %4956 = vmatpush.msra.mxu2 %v4919_v55  ;;  %4976 = vmatpush.msra.mxu3 %v4951_v44  ;;  %v4915_v49 = vmul.f32 %v12357_v57, %v12622_v58  ;;  %v4913_v34 = vmul.f32 %v12352_v6, %v12622_v58  ;;  %v4911_v51 = vmul.f32 %v12347_v7, %v12622_v58  ;;  %v14512_v44 = vld [vmem:[#allocation13_spill] sm:$0xff]  ;;  %v1030_v55 = vpop.permute.xlu1 %1029 }
 0xbc3   : > { %v4854_v3 = vadd.f32 %v12620_v60, %v4853_v11  ;;  %v4909_v37 = vmul.f32 %v12342_v20, %v12622_v58  ;;  %v4907_v57 = vmul.f32 %v12337_v29, %v12622_v58  ;;  %v4905_v6 = vmul.f32 %v12332_v9, %v12622_v58 }
 0xbc4   : > { %4957 = vmatpush.msra.mxu2 %v4917_v18  ;;  %4977 = vmatpush.msra.mxu3 %v4949_v10  ;;  %v4903_v7 = vmul.f32 %v12327_v26, %v12622_v58  ;;  %v4901_v20 = vmul.f32 %v12322_v12, %v12622_v58  ;;  %v4931_v9 = vmul.f32 %v12416_v43, %v12622_v58  ;;  %v14515_v18 = vld [vmem:[#allocation33_spill] sm:$0xff] }
 0xbc5   : > { %v4855_v31 = vadd.f32 %v12625_v22, %v4854_v3  ;;  %v4933_v3 = vmul.f32 %v12428_v5, %v12622_v58  ;;  %v4897_v26 = vmul.f32 %v12311_v15, %v12622_v58  ;;  %v4929_v12 = vmul.f32 %v12414_v25, %v12622_v58  ;;  %v14513_v15 = vld [vmem:[#allocation17_spill] sm:$0xff] }
 0xbc6   : > { %4958 = vmatpush.msra.mxu2 %v4915_v49  ;;  %4978 = vmatpush.msra.mxu3 %v4947_v8  ;;  %v4895_v10 = vmul.f32 %v14512_v44, %v12622_v58  ;;  %v4893_v8 = vmul.f32 %v14513_v15, %v12622_v58  ;;  %v4925_v25 = vmul.f32 %v12400_v28, %v12622_v58  ;;  %v14531_v15 = vld [vmem:[#allocation48_spill] sm:$0xff] }
 0xbc7   : > { %v4856_v32 = vadd.f32 %v12632_v27, %v4855_v31  ;;  %v4899_v31 = vmul.f32 %v12317_v2, %v12622_v58  ;;  %v4927_v2 = vmul.f32 %v12407_v50, %v12622_v58  ;;  %v14514_v50 = vld [vmem:[#allocation25_spill] sm:$0xff] }
 0xbc8   : > { %4959 = vmatpush.msra.mxu2 %v4913_v34  ;;  %4979 = vmatpush.msra.mxu3 %v4945_v24 }
 0xbc9   : > { %v4857_v42 = vrot.slane %v4856_v32, 4 }
 0xbca   : > { %4960 = vmatpush.msra.mxu2 %v4911_v51  ;;  %4980 = vmatpush.msra.mxu3 %v4943_v14 }
 0xbcb   : > { %v4858_v45 = vadd.f32 %v4857_v42, %v4856_v32  ;;  %v4877_v42 = vmul.f32 %v14514_v50, %v12622_v58  ;;  %v5035_v50 = vld [vmem:[%s13987_s7] sm:$0xff] }
 0xbcc   : > { %4961 = vmatpush.msra.mxu2 %v4909_v37  ;;  %4981 = vmatpush.msra.mxu3 %v4941_v40  ;;  %v4923_v40 = vmul.f32 %v14515_v18, %v12622_v58  ;;  %v14520_v37 = vld [vmem:[#allocation28_spill] sm:$0xff] }
 0xbcd   : > { %v4859_v52 = vrot.slane %v4858_v45, 2  ;;  %v5037_v18 = vld [vmem:[%s13987_s7 + $0x10] sm:$0xff] }
 0xbce   : > { %4962 = vmatpush.msra.mxu2 %v4907_v57  ;;  %4982 = vmatpush.msra.mxu3 %v4939_v16  ;;  %v14516_v16 = vld [vmem:[#allocation11_spill] sm:$0xff]  ;;  %v14522_v57 = vld [vmem:[#allocation9_spill] sm:$0xff] }
 0xbcf   : > { %v4860_v41 = vadd.f32 %v4859_v52, %v4858_v45 }
 0xbd0   : > { %4963 = vmatpush.msra.mxu2 %v4905_v6  ;;  %4983 = vmatpush.msra.mxu3 %v4937_v36  ;;  %v12696_v36 = vadd.f32 %v14516_v16, %v1030_v55 }
 0xbd1   : > { %v4861_v39 = vrot.slane %v4860_v41, 1 }
 0xbd2   : > { %4964 = vmatpush.msra.mxu2 %v4903_v7  ;;  %4984 = vmatpush.msra.mxu3 %v4935_v1  ;;  %v14517_v1 = vld [vmem:[#allocation12_spill] sm:$0xff]  ;;  %v14523_v7 = vld [vmem:[#allocation46_spill] sm:$0xff] }
 0xbd3   : > { %v4862_v11 = vadd.f32 %v4861_v39, %v4860_v41  ;;  %v12699_v45 = vadd.f32 %v14517_v1, %v1030_v55  ;;  %v14530_v55 = vld [vmem:[#allocation47_spill] sm:$0xff] }
 0xbd4   : > { %4965 = vmatpush.msra.mxu2 %v4901_v20  ;;  %4985 = vmatpush.msra.mxu3 %v4933_v3  ;;  %v14524_v3 = vld [vmem:[#allocation40_spill] sm:$0xff] }
 0xbd5   : > { %7806 = vrcp.f32 %v4862_v11  ;;  %v4889_v5 = vand.u32 2147483648, %v4862_v11  ;;  %v4887_v32 = vand.u32 2147483647, %v4862_v11  ;;  %vm4883_vm15 = vweird.f32 %v4862_v11 }
 0xbd6   : > { %4966 = vmatpush.msra.mxu2 %v4899_v31  ;;  %4986 = vmatpush.msra.mxu3 %v4931_v9  ;;  %v14525_v31 = vld [vmem:[#allocation20_spill] sm:$0xff] }
 0xbd7   : > { %v4890_v14 = vor.u32 1.1754944e-38, %v4889_v5  ;;  %vm4888_vm1 = vcmp.eq.f32.partialorder %v4887_v32, 8.507059e+37 }
 0xbd8   : > { %4967 = vmatpush.msra.mxu2 %v4897_v26  ;;  %4987 = vmatpush.msra.mxu3 %v4929_v12  ;;  %v14527_v12 = vld [vmem:[#allocation8_spill] sm:$0xff] }
 0xbda   : > { %4968 = vmatpush.msra.mxu2 %v4895_v10  ;;  %4988 = vmatpush.msra.mxu3 %v4927_v2  ;;  %v14528_v2 = vld [vmem:[#allocation41_spill] sm:$0xff] }
 0xbdb   : > { %v7807_v29 = vpop.eup %7806 }
 0xbdc   : > { %v4879_v61 = vmul.f32 %v7807_v29, %v4862_v11  ;;  %vm4884_vm12 = vweird.f32 %v7807_v29  ;;  %4969 = vmatpush.msra.mxu2 %v4893_v8  ;;  %4989 = vmatpush.msra.mxu3 %v4925_v25  ;;  %v14521_v11 = vld [vmem:[#allocation10_spill] sm:$0xff]  ;;  %v3063_v8 = vadd.f32 %v14531_v15, %v14530_v55  ;;  %v14532_v25 = vld [vmem:[#allocation23_spill] sm:$0xff] }
 0xbdd   : > { %vm4885_vm0 = vmor %vm4883_vm15, %vm4884_vm12  ;;  %v5138_v55 = vld [vmem:[%s13989_s9 + $0x28] sm:$0xff] }
 0xbde   : > { %v4880_v59 = vsub.f32 1.0, %v4879_v61  ;;  %4970 = vmatpush.msra.mxu2 %v4877_v42  ;;  %4990 = vmatpush.msra.mxu3 %v4923_v40  ;;  %v14526_v61 = vld [vmem:[#allocation45_spill] sm:$0xff]  ;;  %v5036_v42 = vld [vmem:[%s13987_s7 + $0x8] sm:$0xff] }
 0xbdf   : > { %4971 = vmatmul.f32.vlgmr.msra.gmra.mxu2 %v12696_v36  ;;  %4991 = vmatmul.f32.vlgmr.msra.gmra.mxu3 %v12699_v45  ;;  %v5038_v40 = vld [vmem:[%s13987_s7 + $0x18] sm:$0xff] }
 0xbe0   : > { %v4881_v43 = vmul.f32 %v7807_v29, %v4880_v59 }
 0xbe2   : > { %v4882_v24 = vadd.f32 %v7807_v29, %v4881_v43  ;;  %v14529_v43 = vld [vmem:[#allocation30_spill] sm:$0xff] }
 0xbe3   : > { %v4028_v32 = vadd.f32 %v14529_v43, %v14528_v2  ;;  %v5140_v2 = vld [vmem:[%s13989_s9 + $0x38] sm:$0xff]  ;;  %v5169_v43 = vld [vmem:[%s13989_s9 + $0x120] sm:$0xff] }
 0xbe4   : > { %v4886_v49 = vsel %vm4885_vm0, %v7807_v29, %v4882_v24  ;;  %v14533_v24 = vld [vmem:[#allocation21_spill] sm:$0xff] }
 0xbe5   : > { %v12701_v28 = vsel %vm4888_vm1, %v4890_v14, %v4886_v49  ;;  %v2098_v14 = vadd.f32 %v14533_v24, %v14532_v25  ;;  %v5161_v49 = vld [vmem:[%s13989_s9 + $0xe0] sm:$0xff]  ;;  %v5167_v25 = vld [vmem:[%s13989_s9 + $0x110] sm:$0xff]  ;;  %v5136_v24 = vld [vmem:[%s13989_s9 + $0x18] sm:$0xff] }
 0xbe6   : > { %v4922_v52 = vmul.f32 %v12547_v19, %v12701_v28  ;;  %v4954_v58 = vmul.f32 %v12632_v27, %v12701_v28  ;;  %v4952_v34 = vmul.f32 %v12625_v22, %v12701_v28  ;;  %v4950_v41 = vmul.f32 %v12620_v60, %v12701_v28 }
 0xbe7   : > { %v4920_v51 = vmul.f32 %v12541_v17, %v12701_v28  ;;  %v4948_v39 = vmul.f32 %v12617_v33, %v12701_v28  ;;  %v4946_v19 = vmul.f32 %v12614_v46, %v12701_v28  ;;  %v4944_v27 = vmul.f32 %v12605_v4, %v12701_v28 }
 0xbe8   : > { %4995 = vmatpush.msrb.mxu2 %v4922_v52  ;;  %5015 = vmatpush.msrb.mxu3 %v4954_v58  ;;  %v4942_v22 = vmul.f32 %v12602_v48, %v12701_v28  ;;  %v4918_v60 = vmul.f32 %v12536_v13, %v12701_v28  ;;  %v4940_v17 = vmul.f32 %v12599_v35, %v12701_v28  ;;  %v14535_v52 = vld [vmem:[#allocation32_spill] sm:$0xff] }
 0xbe9   : > { %v4938_v33 = vmul.f32 %v12594_v63, %v12701_v28  ;;  %v4936_v46 = vmul.f32 %v12589_v47, %v12701_v28  ;;  %v4916_v4 = vmul.f32 %v12533_v23, %v12701_v28  ;;  %v4934_v48 = vmul.f32 %v12582_v54, %v12701_v28  ;;  %v14519_v54 = vld [vmem:[#allocation35_spill] sm:$0xff] }
 0xbea   : > { %4996 = vmatpush.msrb.mxu2 %v4920_v51  ;;  %5016 = vmatpush.msrb.mxu3 %v4952_v34  ;;  %v4932_v13 = vmul.f32 %v12578_v0, %v12701_v28  ;;  %v4930_v35 = vmul.f32 %v12573_v56, %v12701_v28  ;;  %v4928_v63 = vmul.f32 %v12567_v30, %v12701_v28  ;;  %v14518_v56 = vld [vmem:[#allocation7_spill] sm:$0xff]  ;;  %v5159_v34 = vld [vmem:[%s13989_s9 + $0xd0] sm:$0xff] }
 0xbeb   : > { %v4914_v47 = vmul.f32 %v12527_v53, %v12701_v28  ;;  %v4912_v23 = vmul.f32 %v12519_v38, %v12701_v28  ;;  %v4910_v0 = vmul.f32 %v12511_v21, %v12701_v28  ;;  %v4908_v30 = vmul.f32 %v12503_v62, %v12701_v28  ;;  %v14536_v51 = vld [vmem:[#allocation19_spill] sm:$0xff] }
 0xbec   : > { %4997 = vmatpush.msrb.mxu2 %v4918_v60  ;;  %5017 = vmatpush.msrb.mxu3 %v4950_v41  ;;  %v4906_v53 = vmul.f32 %v14518_v56, %v12701_v28  ;;  %v4904_v38 = vmul.f32 %v14519_v54, %v12701_v28  ;;  %v4902_v21 = vmul.f32 %v14520_v37, %v12701_v28  ;;  %v5157_v41 = vld [vmem:[%s13989_s9 + $0xc0] sm:$0xff]  ;;  %v5191_v54 = vld [vmem:[%s13989_s9 + $0x1d0] sm:$0xff] }
 0xbed   : > { %v4900_v62 = vmul.f32 %v14521_v11, %v12701_v28  ;;  %v4898_v6 = vmul.f32 %v14522_v57, %v12701_v28  ;;  %v4896_v20 = vmul.f32 %v14523_v7, %v12701_v28  ;;  %v4894_v29 = vmul.f32 %v14524_v3, %v12701_v28  ;;  %v5153_v60 = vld [vmem:[%s13989_s9 + $0xa0] sm:$0xff]  ;;  %v5187_v11 = vld [vmem:[%s13989_s9 + $0x1b0] sm:$0xff] }
 0xbee   : > { %4998 = vmatpush.msrb.mxu2 %v4916_v4  ;;  %5018 = vmatpush.msrb.mxu3 %v4948_v39  ;;  %v4926_v9 = vmul.f32 %v14525_v31, %v12701_v28  ;;  %v4892_v26 = vmul.f32 %v14526_v61, %v12701_v28  ;;  %v4924_v59 = vmul.f32 %v14527_v12, %v12701_v28  ;;  %v14534_v28 = vld [vmem:[#allocation31_spill] sm:$0xff]  ;;  %v5145_v4 = vld [vmem:[%s13989_s9 + $0x60] sm:$0xff]  ;;  %v5183_v7 = vld [vmem:[%s13989_s9 + $0x190] sm:$0xff] }
 0xbef   : > { %v4068_v58 = vadd.f32 %v14535_v52, %v14534_v28  ;;  %v14537_v39 = vld [vmem:[#allocation15_spill] sm:$0xff]  ;;  %v5193_v56 = vld [vmem:[%s13989_s9 + $0x1e0] sm:$0xff]  ;;  %v5179_v31 = vld [vmem:[%s13989_s9 + $0x170] sm:$0xff] }
 0xbf0   : > { %4999 = vmatpush.msrb.mxu2 %v4914_v47  ;;  %5019 = vmatpush.msrb.mxu3 %v4946_v19  ;;  %v2138_v19 = vadd.f32 %v14537_v39, %v14536_v51  ;;  %v5135_v47 = vld [vmem:[%s13989_s9 + $0x10] sm:$0xff]  ;;  %v5189_v37 = vld [vmem:[%s13989_s9 + $0x1c0] sm:$0xff]  ;;  %v5186_v28 = vld [vmem:[%s13989_s9 + $0x1a8] sm:$0xff] }
 0xbf1   : > { %v5185_v57 = vld [vmem:[%s13989_s9 + $0x1a0] sm:$0xff]  ;;  %v5175_v12 = vld [vmem:[%s13989_s9 + $0x150] sm:$0xff]  ;;  %v5182_v51 = vld [vmem:[%s13989_s9 + $0x188] sm:$0xff] }
 0xbf2   : > { %5000 = vmatpush.msrb.mxu2 %v4912_v23  ;;  %5020 = vmatpush.msrb.mxu3 %v4944_v27  ;;  %v14538_v27 = vld [vmem:[#allocation49_spill] sm:$0xff]  ;;  %v5133_v23 = vld [vmem:[%s13989_s9] sm:$0xff] }
 0xbf3   : > { %v5181_v3 = vld [vmem:[%s13989_s9 + $0x180] sm:$0xff]  ;;  %v5180_v39 = vld [vmem:[%s13989_s9 + $0x178] sm:$0xff] }
 0xbf4   : > { %5001 = vmatpush.msrb.mxu2 %v4910_v0  ;;  %5021 = vmatpush.msrb.mxu3 %v4942_v22  ;;  %v5155_v22 = vld [vmem:[%s13989_s9 + $0xb0] sm:$0xff]  ;;  %v5177_v61 = vld [vmem:[%s13989_s9 + $0x160] sm:$0xff] }
 0xbf5   : > { %v5195_v0 = vld [vmem:[%s13989_s9 + $0x1f0] sm:$0xff] }
 0xbf6   : > { %5002 = vmatpush.msrb.mxu2 %v4908_v30  ;;  %5022 = vmatpush.msrb.mxu3 %v4940_v17  ;;  %v5151_v17 = vld [vmem:[%s13989_s9 + $0x90] sm:$0xff]  ;;  %v5164_v30 = vld [vmem:[%s13989_s9 + $0xf8] sm:$0xff] }
 0xbf8   : > { %5003 = vmatpush.msrb.mxu2 %v4906_v53  ;;  %5023 = vmatpush.msrb.mxu3 %v4938_v33  ;;  %v5149_v33 = vld [vmem:[%s13989_s9 + $0x80] sm:$0xff]  ;;  %v5162_v53 = vld [vmem:[%s13989_s9 + $0xe8] sm:$0xff] }
 0xbfa   : > { %5004 = vmatpush.msrb.mxu2 %v4904_v38  ;;  %5024 = vmatpush.msrb.mxu3 %v4936_v46  ;;  %v5147_v46 = vld [vmem:[%s13989_s9 + $0x70] sm:$0xff]  ;;  %v5160_v38 = vld [vmem:[%s13989_s9 + $0xd8] sm:$0xff] }
 0xbfc   : > { %5005 = vmatpush.msrb.mxu2 %v4902_v21  ;;  %5025 = vmatpush.msrb.mxu3 %v4934_v48  ;;  %v5143_v48 = vld [vmem:[%s13989_s9 + $0x50] sm:$0xff]  ;;  %v5158_v21 = vld [vmem:[%s13989_s9 + $0xc8] sm:$0xff] }
 0xbfe   : > { %5006 = vmatpush.msrb.mxu2 %v4900_v62  ;;  %5026 = vmatpush.msrb.mxu3 %v4932_v13  ;;  %v5141_v13 = vld [vmem:[%s13989_s9 + $0x40] sm:$0xff]  ;;  %v5156_v62 = vld [vmem:[%s13989_s9 + $0xb8] sm:$0xff] }
 0xc00   : > { %5007 = vmatpush.msrb.mxu2 %v4898_v6  ;;  %5027 = vmatpush.msrb.mxu3 %v4930_v35  ;;  %v5139_v35 = vld [vmem:[%s13989_s9 + $0x30] sm:$0xff]  ;;  %v5154_v6 = vld [vmem:[%s13989_s9 + $0xa8] sm:$0xff] }
 0xc02   : > { %5008 = vmatpush.msrb.mxu2 %v4896_v20  ;;  %5028 = vmatpush.msrb.mxu3 %v4928_v63  ;;  %v5137_v63 = vld [vmem:[%s13989_s9 + $0x20] sm:$0xff]  ;;  %v5152_v20 = vld [vmem:[%s13989_s9 + $0x98] sm:$0xff] }
 0xc04   : > { %5009 = vmatpush.msrb.mxu2 %v4894_v29  ;;  %5029 = vmatpush.msrb.mxu3 %v4926_v9  ;;  %v5150_v29 = vld [vmem:[%s13989_s9 + $0x88] sm:$0xff]  ;;  %v5148_v9 = vld [vmem:[%s13989_s9 + $0x78] sm:$0xff] }
 0xc06   : > { %5010 = vmatpush.msrb.mxu2 %v4892_v26  ;;  %5030 = vmatpush.msrb.mxu3 %v4924_v59  ;;  %v5146_v26 = vld [vmem:[%s13989_s9 + $0x68] sm:$0xff]  ;;  %v5144_v59 = vld [vmem:[%s13989_s9 + $0x58] sm:$0xff] }
 0xc07   : > { %5011 = vmatmul.f32.vlgmr.msrb.gmra.mxu2 %v12696_v36  ;;  %5031 = vmatmul.f32.vlgmr.msrb.gmra.mxu3 %v12699_v45  ;;  %v5163_v45 = vld [vmem:[%s13989_s9 + $0xf0] sm:$0xff] }
 0xc62   : > { %v4972_v5 = vpop.f32.mrf.mxu2  ;;  %v4992_v44 = vpop.f32.mrf.mxu3 }
 0xc63   : > { %v4993_v10 = vadd.f32 %v4992_v44, %v4972_v5  ;;  %v5173_v5 = vld [vmem:[%s13989_s9 + $0x140] sm:$0xff]  ;;  %v5142_v44 = vld [vmem:[%s13989_s9 + $0x48] sm:$0xff] }
 0xc65   : > { %5087 = vmatpush.msra.mxu2 %v4993_v10  ;;  %v5171_v10 = vld [vmem:[%s13989_s9 + $0x130] sm:$0xff] }
 0xc67   : > { %5088 = vmatpush.msra.mxu2 %v4028_v32  ;;  %v5046_v32 = vpop.permute.xlu1 %5045 }
 0xc69   : > { %5089 = vmatpush.msra.mxu2 %v3063_v8 }
 0xc6b   : > { %5090 = vmatpush.msra.mxu2 %v2098_v14  ;;  %v5165_v14 = vld [vmem:[%s13989_s9 + $0x100] sm:$0xff] }
 0xc6c   : > { %7194 = vmatmul.msk.f32.vlgmr.msra.gmra.mxu2 %vm1032_vm13, %v5035_v50 }
 0xc6d   : > { %5197 = vmatpush.msrb.mxu2 %v5163_v45  ;;  %v5190_v45 = vld [vmem:[%s13989_s9 + $0x1c8] sm:$0xff] }
 0xc6f   : > { %5198 = vmatpush.msrb.mxu2 %v5161_v49  ;;  %v5188_v49 = vld [vmem:[%s13989_s9 + $0x1b8] sm:$0xff] }
 0xc71   : > { %5199 = vmatpush.msrb.mxu2 %v5159_v34 }
 0xc73   : > { %5200 = vmatpush.msrb.mxu2 %v5157_v41  ;;  %v5184_v41 = vld [vmem:[%s13989_s9 + $0x198] sm:$0xff] }
 0xc74   : > { %7195 = vmatmul.msk.f32.gmra.mxu2 %vm1032_vm13, %v5036_v42 }
 0xc75   : > { %5201 = vmatpush.msrb.mxu2 %v5155_v22 }
 0xc77   : > { %5202 = vmatpush.msrb.mxu2 %v5153_v60 }
 0xc79   : > { %5203 = vmatpush.msrb.mxu2 %v5151_v17  ;;  %v5176_v17 = vld [vmem:[%s13989_s9 + $0x158] sm:$0xff] }
 0xc7b   : > { %5204 = vmatpush.msrb.mxu2 %v5149_v33  ;;  %v5174_v33 = vld [vmem:[%s13989_s9 + $0x148] sm:$0xff] }
 0xc7c   : > { %7196 = vmatmul.msk.f32.gmra.mxu2 %vm1032_vm13, %v5037_v18 }
 0xc7d   : > { %5205 = vmatpush.msrb.mxu2 %v5147_v46  ;;  %v5172_v46 = vld [vmem:[%s13989_s9 + $0x138] sm:$0xff] }
 0xc7f   : > { %5206 = vmatpush.msrb.mxu2 %v5145_v4  ;;  %v5170_v4 = vld [vmem:[%s13989_s9 + $0x128] sm:$0xff] }
 0xc81   : > { %5207 = vmatpush.msrb.mxu2 %v5143_v48  ;;  %v5168_v48 = vld [vmem:[%s13989_s9 + $0x118] sm:$0xff] }
 0xc83   : > { %5208 = vmatpush.msrb.mxu2 %v5141_v13 }
 0xc84   : > { %7197 = vmatmul.msk.f32.gmra.mxu2 %vm1032_vm13, %v5038_v40 }
 0xc85   : > { %5209 = vmatpush.msrb.mxu2 %v5139_v35 }
 0xc87   : > { %5210 = vmatpush.msrb.mxu2 %v5137_v63  ;;  %v5166_v63 = vld [vmem:[%s13989_s9 + $0x108] sm:$0xff] }
 0xc89   : > { %5211 = vmatpush.msrb.mxu2 %v5135_v47 }
 0xc8a   : > { %v5012_v16 = vpop.f32.mrf.mxu2  ;;  %v5032_v36 = vpop.f32.mrf.mxu3 }
 0xc8b   : > { %v5033_v1 = vadd.f32 %v5032_v36, %v5012_v16  ;;  %5212 = vmatpush.msrb.mxu2 %v5133_v23 }
 0xc8d   : > { %5116 = vmatpush.msra.mxu3 %v5033_v1  ;;  %5255 = vmatpush.msra.mxu2 %v5164_v30  ;;  %v5192_v1 = vld [vmem:[%s13989_s9 + $0x1d8] sm:$0xff] }
 0xc8f   : > { %5117 = vmatpush.msra.mxu3 %v4068_v58  ;;  %5256 = vmatpush.msra.mxu2 %v5162_v53 }
 0xc91   : > { %5118 = vmatpush.msra.mxu3 %v14538_v27  ;;  %5257 = vmatpush.msra.mxu2 %v5160_v38  ;;  %v5061_v27 = vpop.permute.xlu2 %5060 }
 0xc93   : > { %5119 = vmatpush.msra.mxu3 %v2138_v19  ;;  %5258 = vmatpush.msra.mxu2 %v5158_v21  ;;  %v5178_v19 = vld [vmem:[%s13989_s9 + $0x168] sm:$0xff] }
 0xc94   : > { %7198 = vmatmul.msk.f32.vlgmr.msra.gmra.mxu3 %vm1032_vm13, %v5035_v50  ;;  %v5134_v50 = vld [vmem:[%s13989_s9 + $0x8] sm:$0xff] }
 0xc95   : > { %5226 = vmatpush.msrb.mxu3 %v5195_v0  ;;  %5259 = vmatpush.msra.mxu2 %v5156_v62 }
 0xc97   : > { %5227 = vmatpush.msrb.mxu3 %v5193_v56  ;;  %5260 = vmatpush.msra.mxu2 %v5154_v6 }
 0xc99   : > { %5228 = vmatpush.msrb.mxu3 %v5191_v54  ;;  %5261 = vmatpush.msra.mxu2 %v5152_v20 }
 0xc9b   : > { %5229 = vmatpush.msrb.mxu3 %v5189_v37  ;;  %5262 = vmatpush.msra.mxu2 %v5150_v29 }
 0xc9c   : > { %7199 = vmatmul.msk.f32.gmra.mxu3 %vm1032_vm13, %v5036_v42  ;;  %v5196_v42 = vld [vmem:[%s13989_s9 + $0x1f8] sm:$0xff] }
 0xc9d   : > { %5230 = vmatpush.msrb.mxu3 %v5187_v11  ;;  %5263 = vmatpush.msra.mxu2 %v5148_v9  ;;  %v7848_v9 = vld [vmem:[%s7972_s0] sm:$0xff] }
 0xc9f   : > { %5231 = vmatpush.msrb.mxu3 %v5185_v57  ;;  %5264 = vmatpush.msra.mxu2 %v5146_v26  ;;  %v7849_v26 = vld [vmem:[%s7972_s0 + $0x8] sm:$0xff] }
 0xca1   : > { %5232 = vmatpush.msrb.mxu3 %v5183_v7  ;;  %5265 = vmatpush.msra.mxu2 %v5144_v59 }
 0xca3   : > { %5233 = vmatpush.msrb.mxu3 %v5181_v3  ;;  %5266 = vmatpush.msra.mxu2 %v5142_v44 }
 0xca4   : > { %7200 = vmatmul.msk.f32.gmra.mxu3 %vm1032_vm13, %v5037_v18  ;;  %v5194_v18 = vld [vmem:[%s13989_s9 + $0x1e8] sm:$0xff] }
 0xca5   : > { %5234 = vmatpush.msrb.mxu3 %v5179_v31  ;;  %5267 = vmatpush.msra.mxu2 %v5140_v2 }
 0xca7   : > { %5235 = vmatpush.msrb.mxu3 %v5177_v61  ;;  %5268 = vmatpush.msra.mxu2 %v5138_v55  ;;  %v7851_v55 = vld [vmem:[%s7972_s0 + $0x18] sm:$0xff] }
 0xca9   : > { %5236 = vmatpush.msrb.mxu3 %v5175_v12  ;;  %5269 = vmatpush.msra.mxu2 %v5136_v24 }
 0xcab   : > { %5237 = vmatpush.msrb.mxu3 %v5173_v5  ;;  %5270 = vmatpush.msra.mxu2 %v5134_v50 }
 0xcac   : > { %7201 = vmatmul.msk.f32.gmra.mxu3 %vm1032_vm13, %v5038_v40  ;;  %v5051_v40 = vpop.permute.xlu1 %5050 }
 0xcad   : > { %5238 = vmatpush.msrb.mxu3 %v5171_v10 }
 0xcaf   : > { %5239 = vmatpush.msrb.mxu3 %v5169_v43  ;;  %v7850_v43 = vld [vmem:[%s7972_s0 + $0x10] sm:$0xff] }
 0xcb1   : > { %5240 = vmatpush.msrb.mxu3 %v5167_v25 }
 0xcb3   : > { %5241 = vmatpush.msrb.mxu3 %v5165_v14 }
 0xcb4   : > { %v5056_v52 = vpop.permute.xlu1 %5055 }
 0xcb5   : > { %5284 = vmatpush.msra.mxu3 %v5196_v42  ;;  %v7852_v42 = vld [vmem:[%s7972_s0 + $0x20] sm:$0xff] }
 0xcb7   : > { %5285 = vmatpush.msra.mxu3 %v5194_v18 }
 0xcb9   : > { %5286 = vmatpush.msra.mxu3 %v5192_v1  ;;  %v5325_v1 = vld [vmem:[%s13991_s11] sm:$0xff] }
 0xcbb   : > { %5287 = vmatpush.msra.mxu3 %v5190_v45  ;;  %v5321_v45 = vld [vmem:[%s13990_s10] sm:$0xff] }
 0xcbd   : > { %5288 = vmatpush.msra.mxu3 %v5188_v49  ;;  %v5326_v49 = vld [vmem:[%s13991_s11 + $0x8] sm:$0xff] }
 0xcbf   : > { %5289 = vmatpush.msra.mxu3 %v5186_v28  ;;  %v5322_v28 = vld [vmem:[%s13990_s10 + $0x8] sm:$0xff] }
 0xcc1   : > { %5290 = vmatpush.msra.mxu3 %v5184_v41 }
 0xcc3   : > { %5291 = vmatpush.msra.mxu3 %v5182_v51  ;;  %v7854_v51 = vld [vmem:[%s7972_s0 + $0x38] sm:$0xff] }
 0xcc5   : > { %5292 = vmatpush.msra.mxu3 %v5180_v39 }
 0xcc7   : > { %5293 = vmatpush.msra.mxu3 %v5178_v19  ;;  %v7855_v19 = vld [vmem:[%s7972_s0 + $0x30] sm:$0xff] }
 0xcc9   : > { %5294 = vmatpush.msra.mxu3 %v5176_v17 }
 0xccb   : > { %5295 = vmatpush.msra.mxu3 %v5174_v33  ;;  %v14547_v33 = vld [vmem:[#allocation2_spill] sm:$0xff] }
 0xccd   : > { %5296 = vmatpush.msra.mxu3 %v5172_v46 }
 0xccf   : > { %5297 = vmatpush.msra.mxu3 %v5170_v4 }
 0xcd1   : > { %5298 = vmatpush.msra.mxu3 %v5168_v48 }
 0xcd3   : > { %5299 = vmatpush.msra.mxu3 %v5166_v63 }
 0xcef   : > { %v5092_v15 = vpop.f32.mrf.mxu2 }
 0xcf0   : > { %v5093_v8 = vadd.f32 %v5092_v15, %v5046_v32 }
 0xcf2   : > { %5213 = vmatmul.f32.vlgmr.msrb.gmra.mxu2 %v5093_v8 }
 0xcf7   : > { %v5095_v16 = vpop.f32.mrf.mxu2 }
 0xcf8   : > { %v5096_v36 = vadd.f32 %v5095_v16, %v5051_v40 }
 0xcfa   : > { %5216 = vmatmul.f32.gmra.mxu2 %v5096_v36 }
 0xcff   : > { %v5098_v58 = vpop.f32.mrf.mxu2 }
 0xd00   : > { %v5099_v34 = vadd.f32 %v5098_v58, %v5056_v52 }
 0xd02   : > { %5219 = vmatmul.f32.gmra.mxu2 %v5099_v34 }
 0xd07   : > { %v5101_v22 = vpop.f32.mrf.mxu2 }
 0xd08   : > { %v5102_v60 = vadd.f32 %v5101_v22, %v5061_v27 }
 0xd0a   : > { %5222 = vmatmul.f32.gmra.mxu2 %v5102_v60 }
 0xd12   : > { %5271 = vmatmul.f32.vlgmr.msra.gmra.mxu2 %v5093_v8 }
 0xd17   : > { %v5121_v13 = vpop.f32.mrf.mxu3 }
 0xd18   : > { %v5122_v35 = vadd.f32 %v5121_v13, %v5046_v32 }
 0xd1a   : > { %5242 = vmatmul.f32.vlgmr.msrb.gmra.mxu3 %v5122_v35  ;;  %5274 = vmatmul.f32.gmra.mxu2 %v5096_v36 }
 0xd1f   : > { %v5124_v47 = vpop.f32.mrf.mxu3 }
 0xd20   : > { %v5125_v23 = vadd.f32 %v5124_v47, %v5051_v40  ;;  %v7853_v40 = vld [vmem:[%s7972_s0 + $0x28] sm:$0xff] }
 0xd22   : > { %5245 = vmatmul.f32.gmra.mxu3 %v5125_v23  ;;  %5277 = vmatmul.f32.gmra.mxu2 %v5099_v34 }
 0xd27   : > { %v5127_v0 = vpop.f32.mrf.mxu3 }
 0xd28   : > { %v5128_v30 = vadd.f32 %v5127_v0, %v5056_v52  ;;  %v5323_v52 = vld [vmem:[%s13990_s10 + $0x10] sm:$0xff] }
 0xd2a   : > { %5248 = vmatmul.f32.gmra.mxu3 %v5128_v30  ;;  %5280 = vmatmul.f32.gmra.mxu2 %v5102_v60  ;;  %v5327_v60 = vld [vmem:[%s13991_s11 + $0x10] sm:$0xff] }
 0xd2f   : > { %v5130_v56 = vpop.f32.mrf.mxu3 }
 0xd30   : > { %v5131_v53 = vadd.f32 %v5130_v56, %v5061_v27 }
 0xd32   : > { %5251 = vmatmul.f32.gmra.mxu3 %v5131_v53 }
 0xd3a   : > { %5300 = vmatmul.f32.vlgmr.msra.gmra.mxu3 %v5122_v35 }
 0xd42   : > { %5303 = vmatmul.f32.gmra.mxu3 %v5125_v23 }
 0xd4a   : > { %5306 = vmatmul.f32.gmra.mxu3 %v5128_v30 }
 0xd52   : > { %5309 = vmatmul.f32.gmra.mxu3 %v5131_v53 }
 0xd75   : > { %v5214_v54 = vpop.f32.mrf.mxu2 }
 0xd7d   : > { %v5217_v38 = vpop.f32.mrf.mxu2 }
 0xd85   : > { %v5220_v21 = vpop.f32.mrf.mxu2 }
 0xd8d   : > { %v5223_v57 = vpop.f32.mrf.mxu2 }
 0xd95   : > { %v5272_v20 = vpop.f32.mrf.mxu2 }
 0xd9d   : > { %v5243_v37 = vpop.f32.mrf.mxu3  ;;  %v5275_v5 = vpop.f32.mrf.mxu2 }
 0xd9e   : > { %v5244_v3 = vadd.f32 %v5243_v37, %v5214_v54 }
 0xda0   : > { %v12995_v61 = vadd.f32 %v7848_v9, %v5244_v3  ;;  %v5676_v9 = vld [vmem:[%s13994_s14 + $0x18] sm:$0xff] }
 0xda2   : > { %14539 = vst [vmem:[#allocation37_spill] sm:$0xff] %v12995_v61 }
 0xda5   : > { %v5246_v11 = vpop.f32.mrf.mxu3  ;;  %v5278_v24 = vpop.f32.mrf.mxu2 }
 0xda6   : > { %v5247_v44 = vadd.f32 %v5246_v11, %v5217_v38 }
 0xda8   : > { %v13003_v32 = vadd.f32 %v7850_v43, %v5247_v44 }
 0xdaa   : > { %14541 = vst [vmem:[#allocation29_spill] sm:$0xff] %v13003_v32 }
 0xdad   : > { %v5249_v62 = vpop.f32.mrf.mxu3  ;;  %v5281_v34 = vpop.f32.mrf.mxu2 }
 0xdae   : > { %v5250_v25 = vadd.f32 %v5249_v62, %v5220_v21 }
 0xdb0   : > { %v13011_v18 = vadd.f32 %v7852_v42, %v5250_v25  ;;  %v5515_v25 = vld [vmem:[%s13112_s26 + $0xf0] sm:$0xff]  ;;  %v5513_v42 = vld [vmem:[%s13112_s26 + $0xe0] sm:$0xff] }
 0xdb1   : > { %5549 = vmatpush.msra.mxu0 %v5515_v25  ;;  %v5532_v25 = vld [vmem:[%s13112_s26 + $0x178] sm:$0xff] }
 0xdb2   : > { %14543 = vst [vmem:[#allocation43_spill] sm:$0xff] %v13011_v18 }
 0xdb3   : > { %5550 = vmatpush.msra.mxu0 %v5513_v42  ;;  %v5498_v42 = vld [vmem:[%s13112_s26 + $0x68] sm:$0xff] }
 0xdb5   : > { %v5252_v6 = vpop.f32.mrf.mxu3 }
 0xdb6   : > { %v5253_v7 = vadd.f32 %v5252_v6, %v5223_v57 }
 0xdb8   : > { %v13037_v27 = vadd.f32 %v7855_v19, %v5253_v7  ;;  %v5324_v7 = vld [vmem:[%s13990_s10 + $0x18] sm:$0xff] }
 0xdb9   : > { %v5512_v19 = vld [vmem:[%s13112_s26 + $0xd8] sm:$0xff] }
 0xdba   : > { %14546 = vst [vmem:[#allocation39_spill] sm:$0xff] %v13037_v27 }
 0xdbd   : > { %v5301_v29 = vpop.f32.mrf.mxu3 }
 0xdbe   : > { %v5302_v31 = vadd.f32 %v5301_v29, %v5272_v20  ;;  %v5680_v20 = vld [vmem:[%s13994_s14 + $0x38] sm:$0xff]  ;;  %v5678_v29 = vld [vmem:[%s13994_s14 + $0x28] sm:$0xff] }
 0xdc0   : > { %v12998_v12 = vadd.f32 %v7849_v26, %v5302_v31 }
 0xdc2   : > { %14540 = vst [vmem:[#allocation16_spill] sm:$0xff] %v12998_v12  ;;  %v5329_v59 = vadd.f32 %v12998_v12, %v12995_v61 }
 0xdc4   : > { %5330 = vadd.xlane.f32.xlu1 %v5329_v59 }
 0xdc5   : > { %v5304_v10 = vpop.f32.mrf.mxu3 }
 0xdc6   : > { %v5305_v2 = vadd.f32 %v5304_v10, %v5275_v5  ;;  %v5674_v10 = vld [vmem:[%s13994_s14 + $0x8] sm:$0xff] }
 0xdc8   : > { %v13006_v15 = vadd.f32 %v7851_v55, %v5305_v2 }
 0xdca   : > { %14542 = vst [vmem:[#allocation42_spill] sm:$0xff] %v13006_v15  ;;  %v5332_v8 = vadd.f32 %v13006_v15, %v13003_v32 }
 0xdcc   : > { %5333 = vadd.xlane.f32.xlu2 %v5332_v8  ;;  %v6519_v8 = vld [vmem:[%s13996_s16] sm:$0xff] }
 0xdcd   : > { %v5307_v14 = vpop.f32.mrf.mxu3 }
 0xdce   : > { %v5308_v50 = vadd.f32 %v5307_v14, %v5278_v24  ;;  %v5547_v24 = vld [vmem:[%s13112_s26 + $0x1f0] sm:$0xff]  ;;  %v5516_v14 = vld [vmem:[%s13112_s26 + $0xf8] sm:$0xff] }
 0xdcf   : > { %5578 = vmatpush.msra.mxu1 %v5547_v24  ;;  %5607 = vmatpush.msrb.mxu2 %v5516_v14  ;;  %v5497_v24 = vld [vmem:[%s13112_s26 + $0x60] sm:$0xff]  ;;  %v5675_v14 = vld [vmem:[%s13994_s14 + $0x10] sm:$0xff] }
 0xdd0   : > { %v13014_v16 = vadd.f32 %v7853_v40, %v5308_v50  ;;  %v5548_v50 = vld [vmem:[%s13112_s26 + $0x1f8] sm:$0xff]  ;;  %v5545_v40 = vld [vmem:[%s13112_s26 + $0x1e0] sm:$0xff] }
 0xdd1   : > { %5636 = vmatpush.msrb.mxu3 %v5548_v50  ;;  %5579 = vmatpush.msra.mxu1 %v5545_v40  ;;  %v5529_v50 = vld [vmem:[%s13112_s26 + $0x160] sm:$0xff]  ;;  %v5530_v40 = vld [vmem:[%s13112_s26 + $0x168] sm:$0xff] }
 0xdd2   : > { %14544 = vst [vmem:[#allocation38_spill] sm:$0xff] %v13014_v16  ;;  %v5335_v36 = vadd.f32 %v13014_v16, %v13011_v18 }
 0xdd4   : > { %5336 = vadd.xlane.f32.xlu0 %v5335_v36  ;;  %v5514_v36 = vld [vmem:[%s13112_s26 + $0xe8] sm:$0xff] }
 0xdd5   : > { %v5310_v58 = vpop.f32.mrf.mxu3  ;;  %5608 = vmatpush.msrb.mxu2 %v5514_v36  ;;  %v5495_v36 = vld [vmem:[%s13112_s26 + $0x50] sm:$0xff] }
 0xdd6   : > { %v5311_v41 = vadd.f32 %v5310_v58, %v5281_v34  ;;  %v5679_v58 = vld [vmem:[%s13994_s14 + $0x30] sm:$0xff] }
 0xdd7   : > { %5609 = vmatpush.msrb.mxu2 %v5512_v19 }
 0xdd8   : > { %v13034_v39 = vadd.f32 %v7854_v51, %v5311_v41  ;;  %v5511_v41 = vld [vmem:[%s13112_s26 + $0xd0] sm:$0xff] }
 0xdd9   : > { %v5543_v51 = vld [vmem:[%s13112_s26 + $0x1d0] sm:$0xff]  ;;  %5551 = vmatpush.msra.mxu0 %v5511_v41  ;;  %v5493_v41 = vld [vmem:[%s13112_s26 + $0x40] sm:$0xff] }
 0xdda   : > { %14545 = vst [vmem:[#allocation22_spill] sm:$0xff] %v13034_v39  ;;  %v5338_v22 = vadd.f32 %v13034_v39, %v13037_v27  ;;  %5580 = vmatpush.msra.mxu1 %v5543_v51  ;;  %v5525_v51 = vld [vmem:[%s13112_s26 + $0x140] sm:$0xff] }
 0xddd   : > { %5459 = vperm.xlu1 %7269, %v5325_v1   ;;  %v5546_v1 = vld [vmem:[%s13112_s26 + $0x1e8] sm:$0xff] }
 0xdde   : > { %5637 = vmatpush.msrb.mxu3 %v5546_v1  ;;  %v5527_v1 = vld [vmem:[%s13112_s26 + $0x150] sm:$0xff] }
 0xde4   : > { %5431 = vperm.xlu2 %7267, %v5321_v45   ;;  %v6521_v45 = vld [vmem:[%s13996_s16 + $0x10] sm:$0xff] }
 0xde5   : > { %5464 = vperm.xlu1 %7269, %v5326_v49  }
 0xdec   : > { %5436 = vperm.xlu2 %7267, %v5322_v28  }
 0xdf4   : > { %5441 = vperm.xlu2 %7267, %v5323_v52   ;;  %v5328_v52 = vld [vmem:[%s13991_s11 + $0x18] sm:$0xff] }
 0xe0f   : > { %5339 = vadd.xlane.f32.xlu1 %v5338_v22  ;;  %v5544_v22 = vld [vmem:[%s13112_s26 + $0x1d8] sm:$0xff] }
 0xe10   : > { %5638 = vmatpush.msrb.mxu3 %v5544_v22  ;;  %v5494_v22 = vld [vmem:[%s13112_s26 + $0x48] sm:$0xff] }
 0xe28   : > { %5469 = vperm.xlu1 %7269, %v5327_v60   ;;  %v5509_v60 = vld [vmem:[%s13112_s26 + $0xc0] sm:$0xff] }
 0xe29   : > { %5552 = vmatpush.msra.mxu0 %v5509_v60  ;;  %v5526_v60 = vld [vmem:[%s13112_s26 + $0x148] sm:$0xff] }
 0xe37   : > { %v5331_v17 = vpop.xlane.xlu1 %5330 }
 0xe38   : > { %v5341_v46 = vmul.f32 %v5331_v17, %v14547_v33  ;;  %v5541_v17 = vld [vmem:[%s13112_s26 + $0x1c0] sm:$0xff] }
 0xe39   : > { %5581 = vmatpush.msra.mxu1 %v5541_v17 }
 0xe3a   : > { %v13046_v4 = vsub.f32 %v12995_v61, %v5341_v46  ;;  %v13049_v48 = vsub.f32 %v12998_v12, %v5341_v46  ;;  %v5510_v46 = vld [vmem:[%s13112_s26 + $0xc8] sm:$0xff] }
 0xe3b   : > { %5610 = vmatpush.msrb.mxu2 %v5510_v46  ;;  %v5491_v46 = vld [vmem:[%s13112_s26 + $0x30] sm:$0xff] }
 0xe3c   : > { %v5353_v13 = vmul.f32 %v13046_v4, %v13046_v4  ;;  %v5354_v35 = vmul.f32 %v13049_v48, %v13049_v48 }
 0xe3e   : > { %v5361_v63 = vadd.f32 %v5354_v35, %v5353_v13  ;;  %v5542_v13 = vld [vmem:[%s13112_s26 + $0x1c8] sm:$0xff]  ;;  %v5507_v35 = vld [vmem:[%s13112_s26 + $0xb0] sm:$0xff] }
 0xe3f   : > { %v5334_v47 = vpop.xlane.xlu2 %5333  ;;  %5639 = vmatpush.msrb.mxu3 %v5542_v13  ;;  %5553 = vmatpush.msra.mxu0 %v5507_v35  ;;  %v5523_v13 = vld [vmem:[%s13112_s26 + $0x130] sm:$0xff]  ;;  %v5492_v35 = vld [vmem:[%s13112_s26 + $0x38] sm:$0xff] }
 0xe40   : > { %5362 = vadd.xlane.f32.xlu2 %v5361_v63  ;;  %v5342_v23 = vmul.f32 %v5334_v47, %v14547_v33  ;;  %v5539_v63 = vld [vmem:[%s13112_s26 + $0x1b0] sm:$0xff]  ;;  %v5508_v47 = vld [vmem:[%s13112_s26 + $0xb8] sm:$0xff] }
 0xe41   : > { %5582 = vmatpush.msra.mxu1 %v5539_v63  ;;  %5611 = vmatpush.msrb.mxu2 %v5508_v47  ;;  %v5524_v63 = vld [vmem:[%s13112_s26 + $0x138] sm:$0xff] }
 0xe42   : > { %v13057_v30 = vsub.f32 %v13003_v32, %v5342_v23  ;;  %v13060_v56 = vsub.f32 %v13006_v15, %v5342_v23  ;;  %v5540_v23 = vld [vmem:[%s13112_s26 + $0x1b8] sm:$0xff] }
 0xe43   : > { %5640 = vmatpush.msrb.mxu3 %v5540_v23  ;;  %v5673_v23 = vld [vmem:[%s13994_s14] sm:$0xff] }
 0xe44   : > { %v5355_v37 = vmul.f32 %v13057_v30, %v13057_v30  ;;  %v5356_v21 = vmul.f32 %v13060_v56, %v13060_v56 }
 0xe46   : > { %v5364_v6 = vadd.f32 %v5356_v21, %v5355_v37  ;;  %v5677_v37 = vld [vmem:[%s13994_s14 + $0x20] sm:$0xff]  ;;  %v5506_v21 = vld [vmem:[%s13112_s26 + $0xa8] sm:$0xff] }
 0xe47   : > { %v5337_v0 = vpop.xlane.xlu0 %5336  ;;  %v13128_v49 = vpop.permute.xlu2 %5431  ;;  %5612 = vmatpush.msrb.mxu2 %v5506_v21 }
 0xe48   : > { %v5343_v53 = vmul.f32 %v5337_v0, %v14547_v33  ;;  %v5505_v0 = vld [vmem:[%s13112_s26 + $0xa0] sm:$0xff] }
 0xe49   : > { %5554 = vmatpush.msra.mxu0 %v5505_v0  ;;  %v5489_v0 = vld [vmem:[%s13112_s26 + $0x20] sm:$0xff] }
 0xe4a   : > { %v13064_v54 = vsub.f32 %v13011_v18, %v5343_v53  ;;  %v13067_v38 = vsub.f32 %v13014_v16, %v5343_v53  ;;  %v5537_v53 = vld [vmem:[%s13112_s26 + $0x1a0] sm:$0xff] }
 0xe4b   : > { %5583 = vmatpush.msra.mxu1 %v5537_v53  ;;  %v5521_v53 = vld [vmem:[%s13112_s26 + $0x120] sm:$0xff] }
 0xe4c   : > { %v5357_v11 = vmul.f32 %v13064_v54, %v13064_v54  ;;  %v5358_v62 = vmul.f32 %v13067_v38, %v13067_v38 }
 0xe4e   : > { %v5367_v57 = vadd.f32 %v5358_v62, %v5357_v11  ;;  %v5538_v11 = vld [vmem:[%s13112_s26 + $0x1a8] sm:$0xff]  ;;  %v5503_v62 = vld [vmem:[%s13112_s26 + $0x90] sm:$0xff] }
 0xe4f   : > { %v13083_v3 = vpop.permute.xlu1 %5459  ;;  %v13130_v28 = vpop.permute.xlu2 %5436  ;;  %5641 = vmatpush.msrb.mxu3 %v5538_v11  ;;  %5555 = vmatpush.msra.mxu0 %v5503_v62  ;;  %v5522_v62 = vld [vmem:[%s13112_s26 + $0x128] sm:$0xff] }
 0xe50   : > { %5368 = vadd.xlane.f32.xlu2 %v5367_v57 }
 0xe52   : > { %5365 = vadd.xlane.f32.xlu1 %v5364_v6  ;;  %v5535_v6 = vld [vmem:[%s13112_s26 + $0x190] sm:$0xff] }
 0xe53   : > { %5584 = vmatpush.msra.mxu1 %v5535_v6 }
 0xe57   : > { %v13088_v31 = vpop.permute.xlu1 %5464  ;;  %v13138_v34 = vpop.permute.xlu2 %5441 }
 0xe68   : > { %5446 = vperm.xlu2 %7267, %v5324_v7   ;;  %v5504_v7 = vld [vmem:[%s13112_s26 + $0x98] sm:$0xff] }
 0xe69   : > { %5613 = vmatpush.msrb.mxu2 %v5504_v7  ;;  %v5519_v7 = vld [vmem:[%s13112_s26 + $0x110] sm:$0xff] }
 0xe70   : > { %5718 = vperm.xlu2 %7267, %v5680_v20  }
 0xe78   : > { %5708 = vperm.xlu2 %7267, %v5678_v29   ;;  %v5536_v29 = vld [vmem:[%s13112_s26 + $0x198] sm:$0xff] }
 0xe79   : > { %5642 = vmatpush.msrb.mxu3 %v5536_v29 }
 0xe80   : > { %5698 = vperm.xlu2 %7267, %v5676_v9   ;;  %v5501_v9 = vld [vmem:[%s13112_s26 + $0x80] sm:$0xff] }
 0xe81   : > { %5556 = vmatpush.msra.mxu0 %v5501_v9 }
 0xe82   : > { %v5340_v26 = vpop.xlane.xlu1 %5339 }
 0xe83   : > { %v5344_v59 = vmul.f32 %v5340_v26, %v14547_v33  ;;  %v5533_v26 = vld [vmem:[%s13112_s26 + $0x180] sm:$0xff] }
 0xe84   : > { %5585 = vmatpush.msra.mxu1 %v5533_v26  ;;  %v5520_v26 = vld [vmem:[%s13112_s26 + $0x118] sm:$0xff] }
 0xe85   : > { %v13095_v5 = vsub.f32 %v13037_v27, %v5344_v59  ;;  %v13098_v44 = vsub.f32 %v13034_v39, %v5344_v59  ;;  %v5502_v59 = vld [vmem:[%s13112_s26 + $0x88] sm:$0xff] }
 0xe86   : > { %5614 = vmatpush.msrb.mxu2 %v5502_v59  ;;  %v5485_v59 = vld [vmem:[%s13112_s26] sm:$0xff] }
 0xe87   : > { %v5359_v2 = vmul.f32 %v13095_v5, %v13095_v5  ;;  %v5360_v43 = vmul.f32 %v13098_v44, %v13098_v44 }
 0xe88   : > { %5688 = vperm.xlu2 %7267, %v5674_v10  }
 0xe89   : > { %v5370_v55 = vadd.f32 %v5360_v43, %v5359_v2  ;;  %v5534_v2 = vld [vmem:[%s13112_s26 + $0x188] sm:$0xff]  ;;  %v5499_v43 = vld [vmem:[%s13112_s26 + $0x70] sm:$0xff] }
 0xe8a   : > { %5643 = vmatpush.msrb.mxu3 %v5534_v2  ;;  %5557 = vmatpush.msra.mxu0 %v5499_v43 }
 0xe8b   : > { %5371 = vadd.xlane.f32.xlu1 %v5370_v55  ;;  %v5531_v55 = vld [vmem:[%s13112_s26 + $0x170] sm:$0xff] }
 0xe8c   : > { %5586 = vmatpush.msra.mxu1 %v5531_v55  ;;  %5644 = vmatpush.msrb.mxu3 %v5532_v25  ;;  %v5517_v55 = vld [vmem:[%s13112_s26 + $0x100] sm:$0xff] }
 0xe8d   : > { %5558 = vmatpush.msra.mxu0 %v5497_v24  ;;  %v5518_v24 = vld [vmem:[%s13112_s26 + $0x108] sm:$0xff] }
 0xe8e   : > { %5587 = vmatpush.msra.mxu1 %v5529_v50  ;;  %5645 = vmatpush.msrb.mxu3 %v5530_v40 }
 0xe8f   : > { %5559 = vmatpush.msra.mxu0 %v5495_v36 }
 0xe90   : > { %6525 = vperm.xlu2 %7267, %v6519_v8   ;;  %v5500_v8 = vld [vmem:[%s13112_s26 + $0x78] sm:$0xff]  ;;  %5588 = vmatpush.msra.mxu1 %v5527_v1 }
 0xe91   : > { %5615 = vmatpush.msrb.mxu2 %v5500_v8  ;;  %5560 = vmatpush.msra.mxu0 %v5493_v41  ;;  %v5486_v8 = vld [vmem:[%s13112_s26 + $0x8] sm:$0xff] }
 0xe92   : > { %5589 = vmatpush.msra.mxu1 %v5525_v51 }
 0xe93   : > { %5616 = vmatpush.msrb.mxu2 %v5498_v42  ;;  %5561 = vmatpush.msra.mxu0 %v5491_v46  ;;  %v6520_v42 = vld [vmem:[%s13996_s16 + $0x8] sm:$0xff] }
 0xe94   : > { %5590 = vmatpush.msra.mxu1 %v5523_v13 }
 0xe95   : > { %5562 = vmatpush.msra.mxu0 %v5489_v0 }
 0xe96   : > { %5591 = vmatpush.msra.mxu1 %v5521_v53 }
 0xe98   : > { %6535 = vperm.xlu2 %7267, %v6521_v45   ;;  %v5496_v45 = vld [vmem:[%s13112_s26 + $0x58] sm:$0xff]  ;;  %5592 = vmatpush.msra.mxu1 %v5519_v7 }
 0xe99   : > { %5617 = vmatpush.msrb.mxu2 %v5496_v45 }
 0xe9a   : > { %5593 = vmatpush.msra.mxu1 %v5517_v55 }
 0xe9b   : > { %5618 = vmatpush.msrb.mxu2 %v5494_v22 }
 0xe9d   : > { %5619 = vmatpush.msrb.mxu2 %v5492_v35 }
 0xea4   : > { %5474 = vperm.xlu1 %7269, %v5328_v52   ;;  %v5528_v52 = vld [vmem:[%s13112_s26 + $0x158] sm:$0xff] }
 0xea5   : > { %5646 = vmatpush.msrb.mxu3 %v5528_v52 }
 0xea7   : > { %5647 = vmatpush.msrb.mxu3 %v5526_v60 }
 0xea9   : > { %5648 = vmatpush.msrb.mxu3 %v5524_v63 }
 0xeab   : > { %5649 = vmatpush.msrb.mxu3 %v5522_v62 }
 0xeac   : > { %5713 = vperm.xlu1 %7269, %v5679_v58   ;;  %v13186_v58 = vpop.permute.xlu1 %5469 }
 0xead   : > { %5650 = vmatpush.msrb.mxu3 %v5520_v26 }
 0xeaf   : > { %5651 = vmatpush.msrb.mxu3 %v5518_v24 }
 0xeb3   : > { %v5363_v57 = vpop.xlane.xlu2 %5362 }
 0xeb4   : > { %v5373_v20 = vmul.f32 %v5363_v57, %v14547_v33  ;;  %5703 = vperm.xlu1 %7269, %v5677_v37   ;;  %v5490_v37 = vld [vmem:[%s13112_s26 + $0x28] sm:$0xff]  ;;  %v5487_v57 = vld [vmem:[%s13112_s26 + $0x10] sm:$0xff] }
 0xeb5   : > { %5620 = vmatpush.msrb.mxu2 %v5490_v37  ;;  %5563 = vmatpush.msra.mxu0 %v5487_v57 }
 0xeb6   : > { %v13167_v10 = vadd.f32 1e-05, %v5373_v20  ;;  %v5488_v20 = vld [vmem:[%s13112_s26 + $0x18] sm:$0xff] }
 0xeb7   : > { %5621 = vmatpush.msrb.mxu2 %v5488_v20  ;;  %5564 = vmatpush.msra.mxu0 %v5485_v59 }
 0xeb8   : > { %7808 = vrsqrt.f32 %v13167_v10  ;;  %vm5387_vm3 = vweird.f32 %v13167_v10 }
 0xeb9   : > { %5622 = vmatpush.msrb.mxu2 %v5486_v8 }
 0xebc   : > { %5693 = vperm.xlu1 %7269, %v5675_v14  }
 0xebe   : > { %v7809_v19 = vpop.eup %7808 }
 0xebf   : > { %v5382_v17 = vmul.f32 %v7809_v19, %v13167_v10  ;;  %vm5388_vm2 = vweird.f32 %v7809_v19 }
 0xec0   : > { %vm5389_vm4 = vmor %vm5387_vm3, %vm5388_vm2 }
 0xec1   : > { %v5383_v47 = vmul.f32 %v7809_v19, %v5382_v17 }
 0xec3   : > { %v5384_v21 = vmul.f32 0.5, %v5383_v47  ;;  %v5369_v11 = vpop.xlane.xlu2 %5368 }
 0xec4   : > { %v5375_v6 = vmul.f32 %v5369_v11, %v14547_v33  ;;  %5683 = vperm.xlu1 %7269, %v5673_v23  }
 0xec5   : > { %v5385_v29 = vsub.f32 1.5, %v5384_v21  ;;  %v5366_v9 = vpop.xlane.xlu1 %5365 }
 0xec6   : > { %v5379_v2 = vadd.f32 1e-05, %v5375_v6  ;;  %v5374_v43 = vmul.f32 %v5366_v9, %v14547_v33 }
 0xec7   : > { %v5386_v25 = vmul.f32 %v7809_v19, %v5385_v29 }
 0xec8   : > { %7810 = vrsqrt.f32 %v5379_v2  ;;  %v5378_v14 = vadd.f32 1e-05, %v5374_v43  ;;  %vm5407_vm14 = vweird.f32 %v5379_v2 }
 0xec9   : > { %v5390_v50 = vsel %vm5389_vm4, %v7809_v19, %v5386_v25 }
 0xeca   : > { %v5421_v40 = vmul.f32 %v5390_v50, %v13046_v4  ;;  %v5422_v10 = vmul.f32 %v5390_v50, %v13049_v48  ;;  %7812 = vrsqrt.f32 %v5378_v14  ;;  %v6522_v48 = vld [vmem:[%s13996_s16 + $0x18] sm:$0xff]  ;;  %vm5397_vm7 = vweird.f32 %v5378_v14 }
 0xecb   : > { %v5447_v43 = vpop.permute.xlu2 %5446 }
 0xecc   : > { %v5449_v36 = vmul.f32 %v13128_v49, %v5421_v40  ;;  %v5450_v1 = vmul.f32 %v13128_v49, %v5422_v10  ;;  %6530 = vperm.xlu1 %7269, %v6520_v42  }
 0xece   : > { %v7811_v45 = vpop.eup %7810  ;;  %v5477_v52 = vadd.f32 %v13083_v3, %v5449_v36  ;;  %v5478_v41 = vadd.f32 %v13083_v3, %v5450_v1 }
 0xecf   : > { %v5402_v51 = vmul.f32 %v7811_v45, %v5379_v2  ;;  %vm5408_vm6 = vweird.f32 %v7811_v45 }
 0xed0   : > { %v7813_v19 = vpop.eup %7812  ;;  %5565 = vmatmul.f32.vlgmr.msra.gmra.mxu0 %v5477_v52  ;;  %5594 = vmatmul.f32.vlgmr.msra.gmra.mxu1 %v5478_v41  ;;  %vm5409_vm9 = vmor %vm5407_vm14, %vm5408_vm6 }
 0xed1   : > { %v5403_v22 = vmul.f32 %v7811_v45, %v5402_v51  ;;  %v5392_v4 = vmul.f32 %v7813_v19, %v5378_v14  ;;  %5623 = vmatmul.f32.vlgmr.msrb.gmra.mxu2 %v5477_v52  ;;  %5652 = vmatmul.f32.vlgmr.msrb.gmra.mxu3 %v5478_v41  ;;  %vm5398_vm5 = vweird.f32 %v7813_v19 }
 0xed2   : > { %vm5399_vm8 = vmor %vm5397_vm7, %vm5398_vm5 }
 0xed3   : > { %v5404_v60 = vmul.f32 0.5, %v5403_v22  ;;  %v5393_v49 = vmul.f32 %v7813_v19, %v5392_v4 }
 0xed4   : > { %6540 = vperm.xlu1 %7269, %v6522_v48  }
 0xed5   : > { %v5405_v17 = vsub.f32 1.5, %v5404_v60  ;;  %v5394_v46 = vmul.f32 0.5, %v5393_v49 }
 0xed7   : > { %v5395_v13 = vsub.f32 1.5, %v5394_v46  ;;  %v5406_v3 = vmul.f32 %v7811_v45, %v5405_v17  ;;  %v5665_v46 = vld [vmem:[%s13993_s13] sm:$0xff] }
 0xed9   : > { %v5396_v35 = vmul.f32 %v7813_v19, %v5395_v13  ;;  %v5410_v0 = vsel %vm5409_vm9, %v7811_v45, %v5406_v3 }
 0xeda   : > { %v5425_v62 = vmul.f32 %v5410_v0, %v13064_v54  ;;  %v5426_v57 = vmul.f32 %v5410_v0, %v13067_v38  ;;  %v5668_v0 = vld [vmem:[%s13993_s13 + $0x18] sm:$0xff] }
 0xedb   : > { %v5400_v63 = vsel %vm5399_vm8, %v7813_v19, %v5396_v35 }
 0xedc   : > { %v5423_v47 = vmul.f32 %v5400_v63, %v13057_v30  ;;  %v5424_v23 = vmul.f32 %v5400_v63, %v13060_v56  ;;  %v5453_v30 = vmul.f32 %v13138_v34, %v5425_v62  ;;  %v5454_v56 = vmul.f32 %v13138_v34, %v5426_v57  ;;  %v13285_v57 = vpop.permute.xlu2 %5718 }
 0xede   : > { %v5451_v53 = vmul.f32 %v13130_v28, %v5423_v47  ;;  %v5452_v37 = vmul.f32 %v13130_v28, %v5424_v23  ;;  %v5481_v6 = vadd.f32 %v13186_v58, %v5453_v30  ;;  %v5482_v28 = vadd.f32 %v13186_v58, %v5454_v56  ;;  %v5666_v47 = vld [vmem:[%s13993_s13 + $0x8] sm:$0xff]  ;;  %v5667_v23 = vld [vmem:[%s13993_s13 + $0x10] sm:$0xff] }
 0xee0   : > { %v5479_v21 = vadd.f32 %v13088_v31, %v5451_v53  ;;  %v5480_v11 = vadd.f32 %v13088_v31, %v5452_v37  ;;  %v5669_v53 = vld [vmem:[%s13993_s13 + $0x20] sm:$0xff]  ;;  %v5670_v37 = vld [vmem:[%s13993_s13 + $0x28] sm:$0xff] }
 0xee2   : > { %5568 = vmatmul.f32.gmra.mxu0 %v5479_v21  ;;  %5597 = vmatmul.f32.gmra.mxu1 %v5480_v11 }
 0xee3   : > { %5626 = vmatmul.f32.gmra.mxu2 %v5479_v21  ;;  %5655 = vmatmul.f32.gmra.mxu3 %v5480_v11  ;;  %v5671_v21 = vld [vmem:[%s13993_s13 + $0x30] sm:$0xff]  ;;  %v5672_v11 = vld [vmem:[%s13993_s13 + $0x38] sm:$0xff] }
 0xee4   : > { %v13289_v56 = vpop.permute.xlu2 %5708 }
 0xeea   : > { %5571 = vmatmul.f32.gmra.mxu0 %v5481_v6  ;;  %5600 = vmatmul.f32.gmra.mxu1 %v5482_v28 }
 0xeeb   : > { %5629 = vmatmul.f32.gmra.mxu2 %v5481_v6  ;;  %5658 = vmatmul.f32.gmra.mxu3 %v5482_v28 }
 0xeec   : > { %v5699_v28 = vpop.permute.xlu2 %5698 }
 0xefe   : > { %v5372_v31 = vpop.xlane.xlu1 %5371 }
 0xeff   : > { %v5376_v54 = vmul.f32 %v5372_v31, %v14547_v33 }
 0xf01   : > { %v5380_v38 = vadd.f32 1e-05, %v5376_v54 }
 0xf03   : > { %7814 = vrsqrt.f32 %v5380_v38  ;;  %vm5417_vm11 = vweird.f32 %v5380_v38 }
 0xf09   : > { %v7815_v7 = vpop.eup %7814 }
 0xf0a   : > { %v5412_v20 = vmul.f32 %v7815_v7, %v5380_v38  ;;  %vm5418_vm10 = vweird.f32 %v7815_v7 }
 0xf0b   : > { %vm5419_vm12 = vmor %vm5417_vm11, %vm5418_vm10 }
 0xf0c   : > { %v5413_v29 = vmul.f32 %v7815_v7, %v5412_v20 }
 0xf0e   : > { %v5414_v9 = vmul.f32 0.5, %v5413_v29 }
 0xf10   : > { %v5415_v26 = vsub.f32 1.5, %v5414_v9 }
 0xf12   : > { %v5416_v34 = vmul.f32 %v7815_v7, %v5415_v26  ;;  %v5689_v26 = vpop.permute.xlu2 %5688 }
 0xf14   : > { %v5420_v59 = vsel %vm5419_vm12, %v7815_v7, %v5416_v34 }
 0xf15   : > { %v5427_v58 = vmul.f32 %v5420_v59, %v13095_v5  ;;  %v5428_v2 = vmul.f32 %v5420_v59, %v13098_v44 }
 0xf16   : > { %v5475_v33 = vpop.permute.xlu1 %5474 }
 0xf17   : > { %v5455_v55 = vmul.f32 %v5447_v43, %v5427_v58  ;;  %v5456_v8 = vmul.f32 %v5447_v43, %v5428_v2 }
 0xf19   : > { %v5483_v25 = vadd.f32 %v5475_v33, %v5455_v55  ;;  %v5484_v24 = vadd.f32 %v5475_v33, %v5456_v8 }
 0xf1b   : > { %5574 = vmatmul.f32.gmra.mxu0 %v5483_v25  ;;  %5603 = vmatmul.f32.gmra.mxu1 %v5484_v24 }
 0xf1c   : > { %5632 = vmatmul.f32.gmra.mxu2 %v5483_v25  ;;  %5661 = vmatmul.f32.gmra.mxu3 %v5484_v24 }
 0xf1e   : > { %v13283_v62 = vpop.permute.xlu1 %5713 }
 0xf26   : > { %v13287_v30 = vpop.permute.xlu1 %5703 }
 0xf2e   : > { %v5694_v6 = vpop.permute.xlu1 %5693 }
 0xf36   : > { %v5684_v31 = vpop.permute.xlu1 %5683 }
 0xf4d   : > { %v5566_v14 = vpop.f32.mrf.mxu0  ;;  %v5595_v50 = vpop.f32.mrf.mxu1 }
 0xf4e   : > { %v5596_v60 = vadd.f32 %v5595_v50, %v5566_v14 }
 0xf54   : > { %v5624_v42 = vpop.f32.mrf.mxu2  ;;  %v5653_v40 = vpop.f32.mrf.mxu3 }
 0xf55   : > { %v5654_v63 = vadd.f32 %v5653_v40, %v5624_v42 }
 0xf5f   : > { %v5569_v10 = vpop.f32.mrf.mxu0  ;;  %v5598_v36 = vpop.f32.mrf.mxu1 }
 0xf60   : > { %v5599_v48 = vadd.f32 %v5598_v36, %v5569_v10 }
 0xf66   : > { %v5627_v1 = vpop.f32.mrf.mxu2  ;;  %v5656_v5 = vpop.f32.mrf.mxu3 }
 0xf67   : > { %v5572_v45 = vpop.f32.mrf.mxu0  ;;  %v5601_v44 = vpop.f32.mrf.mxu1  ;;  %v5657_v35 = vadd.f32 %v5656_v5, %v5627_v1 }
 0xf68   : > { %v5602_v4 = vadd.f32 %v5601_v44, %v5572_v45 }
 0xf6e   : > { %v5630_v52 = vpop.f32.mrf.mxu2  ;;  %v5659_v41 = vpop.f32.mrf.mxu3 }
 0xf6f   : > { %v5660_v3 = vadd.f32 %v5659_v41, %v5630_v52 }
 0xf98   : > { %v5575_v51 = vpop.f32.mrf.mxu0  ;;  %v5604_v19 = vpop.f32.mrf.mxu1 }
 0xf99   : > { %v5605_v22 = vadd.f32 %v5604_v19, %v5575_v51 }
 0xf9b   : > { %5757 = vmatpush.msrb.mxu0 %v5605_v22 }
 0xf9d   : > { %5758 = vmatpush.msrb.mxu0 %v5602_v4 }
 0xf9f   : > { %v5633_v49 = vpop.f32.mrf.mxu2  ;;  %v5662_v17 = vpop.f32.mrf.mxu3  ;;  %5759 = vmatpush.msrb.mxu0 %v5599_v48 }
 0xfa0   : > { %v5663_v13 = vadd.f32 %v5662_v17, %v5633_v49 }
 0xfa1   : > { %5760 = vmatpush.msrb.mxu0 %v5596_v60 }
 0xfa2   : > { %5798 = vmatpush.msrb.mxu1 %v5663_v13  ;;  %7202 = vmatmul.msk.f32.vlgmr.msrb.gmra.mxu0 %vm1032_vm13, %v5665_v46 }
 0xfa4   : > { %5799 = vmatpush.msrb.mxu1 %v5660_v3 }
 0xfa6   : > { %5800 = vmatpush.msrb.mxu1 %v5657_v35 }
 0xfa8   : > { %5801 = vmatpush.msrb.mxu1 %v5654_v63 }
 0xfa9   : > { %7210 = vmatmul.msk.f32.vlgmr.msrb.gmra.mxu1 %vm1032_vm13, %v5665_v46 }
 0xfaa   : > { %7203 = vmatmul.msk.f32.gmra.mxu0 %vm1032_vm13, %v5666_v47 }
 0xfb1   : > { %7211 = vmatmul.msk.f32.gmra.mxu1 %vm1032_vm13, %v5666_v47 }
 0xfb2   : > { %7204 = vmatmul.msk.f32.gmra.mxu0 %vm1032_vm13, %v5667_v23 }
 0xfb9   : > { %7212 = vmatmul.msk.f32.gmra.mxu1 %vm1032_vm13, %v5667_v23 }
 0xfba   : > { %7205 = vmatmul.msk.f32.gmra.mxu0 %vm1032_vm13, %v5668_v0 }
 0xfc1   : > { %7213 = vmatmul.msk.f32.gmra.mxu1 %vm1032_vm13, %v5668_v0 }
 0xfc2   : > { %7206 = vmatmul.msk.f32.gmra.mxu0 %vm1032_vm13, %v5669_v53 }
 0xfc9   : > { %7214 = vmatmul.msk.f32.gmra.mxu1 %vm1032_vm13, %v5669_v53 }
 0xfca   : > { %7207 = vmatmul.msk.f32.gmra.mxu0 %vm1032_vm13, %v5670_v37 }
 0xfd1   : > { %7215 = vmatmul.msk.f32.gmra.mxu1 %vm1032_vm13, %v5670_v37 }
 0xfd2   : > { %7208 = vmatmul.msk.f32.gmra.mxu0 %vm1032_vm13, %v5671_v21 }
 0xfd9   : > { %7216 = vmatmul.msk.f32.gmra.mxu1 %vm1032_vm13, %v5671_v21 }
 0xfda   : > { %7209 = vmatmul.msk.f32.gmra.mxu0 %vm1032_vm13, %v5672_v11 }
 0xfe1   : > { %7217 = vmatmul.msk.f32.gmra.mxu1 %vm1032_vm13, %v5672_v11 }
0x101f   : > { %v5762_v54 = vpop.f32.mrf.mxu0 }
0x1020   : > { %v13291_v38 = vadd.f32 %v5762_v54, %v5684_v31 }
0x1022   : > { %14548 = vst [vmem:[#allocation27_spill] sm:$0xff] %v13291_v38  ;;  %v5843_v7 = vmul.f32 0.70710677, %v13291_v38 }
0x1024   : > { %v13294_v20 = vclamps-f32 %v5843_v7, 4.0 }
0x1026   : > { %v13298_v29 = vmul.f32 %v13294_v20, %v13294_v20  ;;  %v5803_v9 = vpop.f32.mrf.mxu1 }
0x1027   : > { %v13300_v34 = vadd.f32 %v5803_v9, %v5684_v31  ;;  %v5765_v59 = vpop.f32.mrf.mxu0 }
0x1028   : > { %v5907_v58 = vmul.f32 -2.7261424e-10, %v13298_v29  ;;  %v13303_v2 = vadd.f32 %v5765_v59, %v5689_v26 }
0x1029   : > { %14549 = vst [vmem:[#allocation36_spill] sm:$0xff] %v13300_v34  ;;  %v5844_v43 = vmul.f32 0.70710677, %v13300_v34 }
0x102a   : > { %v5923_v55 = vadd.f32 2.7706815e-08, %v5907_v58  ;;  %v5845_v8 = vmul.f32 0.70710677, %v13303_v2 }
0x102b   : > { %v13309_v25 = vclamps-f32 %v5844_v43, 4.0 }
0x102c   : > { %v13307_v33 = vclamps-f32 %v5845_v8, 4.0  ;;  %v5939_v24 = vmul.f32 %v5923_v55, %v13298_v29 }
0x102d   : > { %14550 = vst [vmem:[#allocation34_spill] sm:$0xff] %v13309_v25  ;;  %v13321_v36 = vmul.f32 %v13309_v25, %v13309_v25 }
0x102e   : > { %v13314_v14 = vmul.f32 %v13307_v33, %v13307_v33  ;;  %v5806_v50 = vpop.f32.mrf.mxu1  ;;  %v5955_v1 = vadd.f32 -2.101024e-06, %v5939_v24 }
0x102f   : > { %v5768_v42 = vpop.f32.mrf.mxu0  ;;  %v13323_v5 = vadd.f32 %v5806_v50, %v5689_v26  ;;  %v5908_v52 = vmul.f32 -2.7261424e-10, %v13321_v36 }
0x1030   : > { %v5909_v40 = vmul.f32 -2.7261424e-10, %v13314_v14  ;;  %v13317_v10 = vadd.f32 %v5768_v42, %v5694_v6  ;;  %v5971_v51 = vmul.f32 %v5955_v1, %v13298_v29 }
0x1031   : > { %14551 = vst [vmem:[#allocation44_spill] sm:$0xff] %v13323_v5  ;;  %v5846_v22 = vmul.f32 0.70710677, %v13323_v5  ;;  %v5924_v49 = vadd.f32 2.7706815e-08, %v5908_v52 }
0x1032   : > { %v5847_v45 = vmul.f32 0.70710677, %v13317_v10  ;;  %v5925_v44 = vadd.f32 2.7706815e-08, %v5909_v40  ;;  %v5987_v13 = vadd.f32 -5.6925062e-05, %v5971_v51 }
0x1033   : > { %v13341_v35 = vclamps-f32 %v5846_v22, 4.0  ;;  %v5940_v53 = vmul.f32 %v5924_v49, %v13321_v36 }
0x1034   : > { %v13327_v41 = vclamps-f32 %v5847_v45, 4.0  ;;  %v5941_v60 = vmul.f32 %v5925_v44, %v13314_v14  ;;  %v6003_v31 = vmul.f32 %v5987_v13, %v13298_v29 }
0x1035   : > { %14553 = vst [vmem:[#allocation14_spill] sm:$0xff] %v13341_v35  ;;  %v13354_v54 = vmul.f32 %v13341_v35, %v13341_v35  ;;  %v5956_v58 = vadd.f32 -2.101024e-06, %v5940_v53 }
0x1036   : > { %v5809_v19 = vpop.f32.mrf.mxu1  ;;  %v13333_v4 = vmul.f32 %v13327_v41, %v13327_v41  ;;  %v5957_v23 = vadd.f32 -2.101024e-06, %v5941_v60  ;;  %v6019_v50 = vadd.f32 -0.00073499064, %v6003_v31 }
0x1037   : > { %v13335_v48 = vadd.f32 %v5809_v19, %v5694_v6  ;;  %v5771_v46 = vpop.f32.mrf.mxu0  ;;  %v5910_v42 = vmul.f32 -2.7261424e-10, %v13354_v54  ;;  %v5972_v44 = vmul.f32 %v5956_v58, %v13321_v36 }
0x1038   : > { %v5911_v17 = vmul.f32 -2.7261424e-10, %v13333_v4  ;;  %v13339_v3 = vadd.f32 %v5771_v46, %v5699_v28  ;;  %v5973_v9 = vmul.f32 %v5957_v23, %v13314_v14  ;;  %v6035_v49 = vmul.f32 %v6019_v50, %v13298_v29 }
0x1039   : > { %14552 = vst [vmem:[#allocation24_spill] sm:$0xff] %v13335_v48  ;;  %v5848_v47 = vmul.f32 0.70710677, %v13335_v48  ;;  %v5988_v23 = vadd.f32 -5.6925062e-05, %v5972_v44 }
0x103a   : > { %v5927_v63 = vadd.f32 2.7706815e-08, %v5911_v17  ;;  %v5849_v0 = vmul.f32 0.70710677, %v13339_v3  ;;  %v5989_v40 = vadd.f32 -5.6925062e-05, %v5973_v9 }
0x103b   : > { %v13347_v21 = vclamps-f32 %v5848_v47, 4.0  ;;  %v5926_v17 = vadd.f32 2.7706815e-08, %v5910_v42  ;;  %v6051_v9 = vadd.f32 -0.0029546001, %v6035_v49  ;;  %v6004_v42 = vmul.f32 %v5988_v23, %v13321_v36 }
0x103c   : > { %v5943_v37 = vmul.f32 %v5927_v63, %v13333_v4  ;;  %v13349_v11 = vclamps-f32 %v5849_v0, 4.0  ;;  %v6005_v46 = vmul.f32 %v5989_v40, %v13314_v14 }
0x103d   : > { %14554 = vst [vmem:[#allocation26_spill] sm:$0xff] %v13347_v21  ;;  %v13365_v43 = vmul.f32 %v13347_v21, %v13347_v21  ;;  %v5942_v58 = vmul.f32 %v5926_v17, %v13354_v54  ;;  %v13413_v17 = vmul.f32 0.5, %v13317_v10 }
0x103e   : > { %v5812_v6 = vpop.f32.mrf.mxu1  ;;  %v5959_v7 = vadd.f32 -2.101024e-06, %v5943_v37  ;;  %v13359_v26 = vmul.f32 %v13349_v11, %v13349_v11 }
0x103f   : > { %v13361_v59 = vadd.f32 %v5812_v6, %v5699_v28  ;;  %v5774_v24 = vpop.f32.mrf.mxu0  ;;  %v5912_v52 = vmul.f32 -2.7261424e-10, %v13365_v43  ;;  %v5958_v49 = vadd.f32 -2.101024e-06, %v5942_v58 }
0x1040   : > { %v5975_v55 = vmul.f32 %v5959_v7, %v13333_v4  ;;  %v5913_v8 = vmul.f32 -2.7261424e-10, %v13359_v26  ;;  %v13372_v28 = vadd.f32 %v5774_v24, %v13287_v30 }
0x1041   : > { %14555 = vst [vmem:[#allocation4_spill] sm:$0xff] %v13361_v59  ;;  %v5850_v45 = vmul.f32 0.70710677, %v13361_v59  ;;  %v5928_v0 = vadd.f32 2.7706815e-08, %v5912_v52 }
0x1042   : > { %v5929_v1 = vadd.f32 2.7706815e-08, %v5913_v8  ;;  %v5991_v51 = vadd.f32 -5.6925062e-05, %v5975_v55  ;;  %v5851_v47 = vmul.f32 0.70710677, %v13372_v28 }
0x1043   : > { %v13377_v22 = vclamps-f32 %v5850_v45, 4.0  ;;  %v6021_v8 = vadd.f32 -0.00073499064, %v6005_v46  ;;  %v5944_v44 = vmul.f32 %v5928_v0, %v13365_v43 }
0x1044   : > { %v5945_v19 = vmul.f32 %v5929_v1, %v13359_v26  ;;  %v6007_v37 = vmul.f32 %v5991_v51, %v13333_v4  ;;  %v13392_v7 = vclamps-f32 %v5851_v47, 4.0 }
0x1045   : > { %14556 = vst [vmem:[#allocation5_spill] sm:$0xff] %v13377_v22  ;;  %v13383_v63 = vmul.f32 %v13377_v22, %v13377_v22 }
0x1046   : > { %v5815_v60 = vpop.f32.mrf.mxu1  ;;  %v5961_v13 = vadd.f32 -2.101024e-06, %v5945_v19  ;;  %v13397_v50 = vmul.f32 %v13392_v7, %v13392_v7  ;;  %v6023_v45 = vadd.f32 -0.00073499064, %v6007_v37  ;;  %v6067_v19 = vmul.f32 %v6051_v9, %v13298_v29 }
0x1047   : > { %v13387_v53 = vadd.f32 %v5815_v60, %v13287_v30  ;;  %v5914_v31 = vmul.f32 -2.7261424e-10, %v13383_v63  ;;  %v5777_v55 = vpop.f32.mrf.mxu0  ;;  %v13410_v60 = vmul.f32 0.5, %v13303_v2  ;;  %v13421_v37 = vadd.f32 -0.00073499064, %v6004_v42 }
0x1048   : > { %v5977_v6 = vmul.f32 %v5961_v13, %v13359_v26  ;;  %v13402_v1 = vadd.f32 %v5777_v55, %v13289_v56  ;;  %v5915_v52 = vmul.f32 -2.7261424e-10, %v13397_v50  ;;  %v6037_v13 = vmul.f32 %v6021_v8, %v13314_v14 }
0x1049   : > { %14557 = vst [vmem:[#allocation6_spill] sm:$0xff] %v13387_v53  ;;  %v5852_v30 = vmul.f32 0.70710677, %v13387_v53  ;;  %v5930_v40 = vadd.f32 2.7706815e-08, %v5914_v31  ;;  %v6039_v10 = vmul.f32 %v6023_v45, %v13333_v4 }
0x104a   : > { %v5993_v24 = vadd.f32 -5.6925062e-05, %v5977_v6  ;;  %14558 = vst [vmem:[#allocation3_spill] sm:$0xff] %v13410_v60  ;;  %v5931_v23 = vadd.f32 2.7706815e-08, %v5915_v52 }
0x104b   : > { %v13406_v51 = vclamps-f32 %v5852_v30, 4.0  ;;  %14559 = vst [vmem:[#allocation18_spill] sm:$0xff] %v13421_v37  ;;  %v5946_v6 = vmul.f32 %v5930_v40, %v13383_v63  ;;  %v5853_v2 = vmul.f32 0.70710677, %v13402_v1  ;;  %v5960_v9 = vadd.f32 -2.101024e-06, %v5944_v44 }
0x104c   : > { %v6009_v47 = vmul.f32 %v5993_v24, %v13359_v26  ;;  %v5947_v58 = vmul.f32 %v5931_v23, %v13397_v50  ;;  %v6083_v8 = vadd.f32 -0.016096033, %v6067_v19  ;;  %v13432_v24 = vmul.f32 0.5, %v13339_v3 }
0x104d   : > { %v13419_v0 = vmul.f32 %v13406_v51, %v13406_v51  ;;  %v13434_v30 = vclamps-f32 %v5853_v2, 4.0  ;;  %v6053_v52 = vadd.f32 -0.0029546001, %v6037_v13  ;;  %v5962_v45 = vadd.f32 -2.101024e-06, %v5946_v6 }
0x104e   : > { %v5818_v46 = vpop.f32.mrf.mxu1  ;;  %v5963_v39 = vadd.f32 -2.101024e-06, %v5947_v58  ;;  %v6055_v3 = vadd.f32 -0.0029546001, %v6039_v10  ;;  %v5976_v2 = vmul.f32 %v5960_v9, %v13365_v43  ;;  %v13448_v13 = vmul.f32 %v13294_v20, %v6083_v8 }
0x104f   : > { %v13426_v31 = vadd.f32 %v5818_v46, %v13289_v56  ;;  %v5916_v55 = vmul.f32 -2.7261424e-10, %v13419_v0  ;;  %v5780_v40 = vpop.f32.mrf.mxu0  ;;  %v5974_v56 = vmul.f32 %v5958_v49, %v13354_v54  ;;  %v6025_v46 = vadd.f32 -0.00073499064, %v6009_v47 }
0x1050   : > { %v13440_v23 = vmul.f32 %v13434_v30, %v13434_v30  ;;  %v5979_v16 = vmul.f32 %v5963_v39, %v13397_v50  ;;  %v5781_v15 = vadd.f32 %v5780_v40, %v13283_v62  ;;  %14560 = vst [vmem:[#allocation13_spill] sm:$0xff] %v13448_v13  ;;  %v6069_v58 = vmul.f32 %v6053_v52, %v13314_v14 }
0x1051   : > { %v5854_v42 = vmul.f32 0.70710677, %v13426_v31  ;;  %v5932_v44 = vadd.f32 2.7706815e-08, %v5916_v55  ;;  %v5990_v10 = vadd.f32 -5.6925062e-05, %v5974_v56  ;;  %v6041_v9 = vmul.f32 %v6025_v46, %v13359_v26 }
0x1052   : > { %v5917_v47 = vmul.f32 -2.7261424e-10, %v13440_v23  ;;  %v5995_v55 = vadd.f32 -5.6925062e-05, %v5979_v16  ;;  %v5992_v12 = vadd.f32 -5.6925062e-05, %v5976_v2 }
0x1053   : > { %v13442_v19 = vclamps-f32 %v5854_v42, 4.0  ;;  %v5948_v49 = vmul.f32 %v5932_v44, %v13419_v0  ;;  %v5978_v42 = vmul.f32 %v5962_v45, %v13383_v63  ;;  %v6071_v44 = vmul.f32 %v6055_v3, %v13333_v4 }
0x1054   : > { %v5933_v20 = vadd.f32 2.7706815e-08, %v5917_v47  ;;  %v6011_v27 = vmul.f32 %v5995_v55, %v13397_v50  ;;  %v5855_v18 = vmul.f32 0.70710677, %v5781_v15  ;;  %v6085_v46 = vadd.f32 -0.016096033, %v6069_v58 }
0x1055   : > { %v13454_v6 = vmul.f32 %v13442_v19, %v13442_v19  ;;  %v5964_v40 = vadd.f32 -2.101024e-06, %v5948_v49  ;;  %v13466_v45 = vmul.f32 %v5990_v10, %v13354_v54  ;;  %v6057_v49 = vadd.f32 -0.0029546001, %v6041_v9 }
0x1056   : > { %v5821_v39 = vpop.f32.mrf.mxu1  ;;  %v5949_v52 = vmul.f32 %v5933_v20, %v13440_v23  ;;  %v13468_v47 = vclamps-f32 %v5855_v18, 4.0  ;;  %v5994_v61 = vadd.f32 -5.6925062e-05, %v5978_v42  ;;  %v13471_v3 = vmul.f32 0.5, %v13372_v28 }
0x1057   : > { %v5918_v8 = vmul.f32 -2.7261424e-10, %v13454_v6  ;;  %v5980_v32 = vmul.f32 %v5964_v40, %v13419_v0  ;;  %v5822_v16 = vadd.f32 %v5821_v39, %v13283_v62  ;;  %14561 = vst [vmem:[#allocation17_spill] sm:$0xff] %v13466_v45  ;;  %v5783_v40 = vpop.f32.mrf.mxu0  ;;  %v6087_v34 = vadd.f32 -0.016096033, %v6071_v44 }
0x1058   : > { %v5965_v2 = vadd.f32 -2.101024e-06, %v5949_v52  ;;  %v6008_v20 = vmul.f32 %v5992_v12, %v13365_v43  ;;  %v13477_v62 = vmul.f32 %v13468_v47, %v13468_v47  ;;  %v6027_v10 = vadd.f32 -0.00073499064, %v6011_v27 }
0x1059   : > { %v5934_v56 = vadd.f32 2.7706815e-08, %v5918_v8  ;;  %v5856_v58 = vmul.f32 0.70710677, %v5822_v16  ;;  %v5996_v9 = vadd.f32 -5.6925062e-05, %v5980_v32  ;;  %v13481_v28 = vmul.f32 %v13307_v33, %v6085_v46 }
0x105a   : > { %v5981_v18 = vmul.f32 %v5965_v2, %v13440_v23  ;;  %v6073_v42 = vmul.f32 %v6057_v49, %v13359_v26  ;;  %v5919_v8 = vmul.f32 -2.7261424e-10, %v13477_v62  ;;  %v5784_v44 = vadd.f32 %v5783_v40, %v13285_v57 }
0x105b   : > { %v5950_v55 = vmul.f32 %v5934_v56, %v13454_v6  ;;  %14562 = vst [vmem:[#allocation25_spill] sm:$0xff] %v13481_v28  ;;  %v6010_v12 = vmul.f32 %v5994_v61, %v13383_v63  ;;  %v13488_v25 = vclamps-f32 %v5856_v58, 4.0  ;;  %v13491_v32 = vmul.f32 %v13327_v41, %v6087_v34 }
0x105c   : > { %v5997_v52 = vadd.f32 -5.6925062e-05, %v5981_v18  ;;  %v6024_v27 = vadd.f32 -0.00073499064, %v6008_v20  ;;  %v13494_v33 = vmul.f32 0.5, %v13402_v1  ;;  %v6043_v49 = vmul.f32 %v6027_v10, %v13397_v50 }
0x105d   : > { %v5966_v39 = vadd.f32 -2.101024e-06, %v5950_v55  ;;  %v5935_v46 = vadd.f32 2.7706815e-08, %v5919_v8  ;;  %v6012_v2 = vmul.f32 %v5996_v9, %v13419_v0  ;;  %v13499_v55 = vmul.f32 0.5, %v13426_v31 }
0x105e   : > { %v13503_v61 = vmul.f32 %v13488_v25, %v13488_v25  ;;  %v6089_v40 = vadd.f32 -0.016096033, %v6073_v42  ;;  %v5857_v41 = vmul.f32 0.70710677, %v5784_v44  ;;  %v6107_v20 = vmul.f32 -1.45660715e-05, %v13397_v50 }
0x105f   : > { %v5982_v56 = vmul.f32 %v5966_v39, %v13454_v6  ;;  %v5951_v34 = vmul.f32 %v5935_v46, %v13477_v62  ;;  %v6026_v1 = vadd.f32 -0.00073499064, %v6010_v12  ;;  %v6013_v58 = vmul.f32 %v5997_v52, %v13440_v23 }
0x1060   : > { %v5920_v10 = vmul.f32 -2.7261424e-10, %v13503_v61  ;;  %v13509_v9 = vmul.f32 0.5, %v5781_v15  ;;  %v13511_v39 = vclamps-f32 %v5857_v41, 4.0  ;;  %v6123_v8 = vadd.f32 -0.00021337405, %v6107_v20 }
0x1061   : > { %v5998_v18 = vadd.f32 -5.6925062e-05, %v5982_v56  ;;  %v5967_v31 = vadd.f32 -2.101024e-06, %v5951_v34  ;;  %v13514_v5 = vmul.f32 %v6024_v27, %v13365_v43  ;;  %v6059_v42 = vadd.f32 -0.0029546001, %v6043_v49 }
0x1062   : > { %v6028_v46 = vadd.f32 -0.00073499064, %v6012_v2  ;;  %v5936_v35 = vadd.f32 2.7706815e-08, %v5920_v10  ;;  %v13517_v59 = vmul.f32 %v13349_v11, %v6089_v40  ;;  %v13520_v52 = vmul.f32 0.5, %v5822_v16 }
0x1063   : > { %14563 = vst [vmem:[#allocation33_spill] sm:$0xff] %v13514_v5  ;;  %v5983_v12 = vmul.f32 %v5967_v31, %v13477_v62  ;;  %v13524_v15 = vmul.f32 %v13511_v39, %v13511_v39  ;;  %v6029_v56 = vadd.f32 -0.00073499064, %v6013_v58  ;;  %v6014_v34 = vmul.f32 %v5998_v18, %v13454_v6 }
0x1064   : > { %v5952_v27 = vmul.f32 %v5936_v35, %v13503_v61  ;;  %v6139_v49 = vmul.f32 %v6123_v8, %v13397_v50  ;;  %v13530_v2 = vmul.f32 %v6026_v1, %v13383_v63  ;;  %v6075_v41 = vmul.f32 %v6059_v42, %v13397_v50 }
0x1065   : > { %v5999_v11 = vadd.f32 -5.6925062e-05, %v5983_v12  ;;  %v5921_v40 = vmul.f32 -2.7261424e-10, %v13524_v15  ;;  %v6113_v16 = vmul.f32 -1.45660715e-05, %v13524_v15  ;;  %v6044_v20 = vmul.f32 %v6028_v46, %v13419_v0 }
0x1066   : > { %14564 = vst [vmem:[#allocation11_spill] sm:$0xff] %v13530_v2  ;;  %v5968_v10 = vadd.f32 -2.101024e-06, %v5952_v27  ;;  %v13536_v58 = vmul.f32 0.5, %v5784_v44  ;;  %v6109_v8 = vmul.f32 -1.45660715e-05, %v13440_v23  ;;  %v6045_v1 = vmul.f32 %v6029_v56, %v13440_v23 }
0x1067   : > { %v6015_v18 = vmul.f32 %v5999_v11, %v13477_v62  ;;  %v5937_v35 = vadd.f32 2.7706815e-08, %v5921_v40  ;;  %v6129_v31 = vadd.f32 -0.00021337405, %v6113_v16  ;;  %v6030_v12 = vadd.f32 -0.00073499064, %v6014_v34  ;;  %v5824_v11 = vpop.f32.mrf.mxu1 }
0x1068   : > { %v5984_v48 = vmul.f32 %v5968_v10, %v13503_v61  ;;  %v6155_v22 = vadd.f32 -0.001682827, %v6139_v49  ;;  %v6125_v27 = vadd.f32 -0.00021337405, %v6109_v8  ;;  %v6091_v44 = vadd.f32 -0.016096033, %v6075_v41 }
0x1069   : > { %v6031_v21 = vadd.f32 -0.00073499064, %v6015_v18  ;;  %v5953_v42 = vmul.f32 %v5937_v35, %v13524_v15  ;;  %v6145_v46 = vmul.f32 %v6129_v31, %v13524_v15  ;;  %v6060_v2 = vadd.f32 -0.0029546001, %v6044_v20 }
0x106a   : > { %v6000_v37 = vadd.f32 -5.6925062e-05, %v5984_v48  ;;  %v6171_v40 = vmul.f32 %v6155_v22, %v13397_v50  ;;  %v13547_v34 = vadd.f32 %v5824_v11, %v13285_v57  ;;  %v6061_v49 = vadd.f32 -0.0029546001, %v6045_v1 }
0x106b   : > { %v6047_v16 = vmul.f32 %v6031_v21, %v13477_v62  ;;  %v5969_v38 = vadd.f32 -2.101024e-06, %v5953_v42  ;;  %v6161_v56 = vadd.f32 -0.001682827, %v6145_v46  ;;  %v6141_v18 = vmul.f32 %v6125_v27, %v13440_v23 }
0x106c   : > { %v6016_v10 = vmul.f32 %v6000_v37, %v13503_v61  ;;  %v6187_v35 = vadd.f32 -0.0073733293, %v6171_v40  ;;  %v6046_v41 = vmul.f32 %v6030_v12, %v13454_v6  ;;  %v5858_v21 = vmul.f32 0.70710677, %v13547_v34 }
0x106d   : > { %v6063_v20 = vadd.f32 -0.0029546001, %v6047_v16  ;;  %v5985_v48 = vmul.f32 %v5969_v38, %v13524_v15  ;;  %v6177_v22 = vmul.f32 %v6161_v56, %v13524_v15  ;;  %v6111_v8 = vmul.f32 -1.45660715e-05, %v13477_v62 }
0x106e   : > { %v6032_v31 = vadd.f32 -0.00073499064, %v6016_v10  ;;  %v6203_v57 = vmul.f32 %v6187_v35, %v13397_v50  ;;  %v6076_v1 = vmul.f32 %v6060_v2, %v13419_v0  ;;  %v6157_v46 = vadd.f32 -0.001682827, %v6141_v18 }
0x106f   : > { %v6001_v37 = vadd.f32 -5.6925062e-05, %v5985_v48  ;;  %v6193_v42 = vadd.f32 -0.0073733293, %v6177_v22  ;;  %v6077_v27 = vmul.f32 %v6061_v49, %v13440_v23  ;;  %v13559_v12 = vclamps-f32 %v5858_v21, 4.0 }
0x1070   : > { %v6127_v11 = vadd.f32 -0.00021337405, %v6111_v8  ;;  %v13561_v38 = vadd.f32 -0.014264739, %v6203_v57  ;;  %v6062_v40 = vadd.f32 -0.0029546001, %v6046_v41  ;;  %v6173_v10 = vmul.f32 %v6157_v46, %v13440_v23 }
0x1071   : > { %v6017_v16 = vmul.f32 %v6001_v37, %v13524_v15  ;;  %v6209_v56 = vmul.f32 %v6193_v42, %v13524_v15  ;;  %v6079_v50 = vmul.f32 %v6063_v20, %v13477_v62  ;;  %v6048_v2 = vmul.f32 %v6032_v31, %v13503_v61 }
0x1072   : > { %v13570_v18 = vmul.f32 %v13559_v12, %v13559_v12  ;;  %v6143_v49 = vmul.f32 %v6127_v11, %v13477_v62  ;;  %v6189_v41 = vadd.f32 -0.0073733293, %v6173_v10  ;;  %7816 = vrcp.f32 %v13561_v38 }
0x1073   : > { %v6033_v35 = vadd.f32 -0.00073499064, %v6017_v16  ;;  %v13573_v48 = vadd.f32 -0.014264739, %v6209_v56  ;;  %v13577_v22 = vmul.f32 %v13392_v7, %v6091_v44  ;;  %v13581_v8 = vadd.f32 -0.016096033, %v6076_v1 }
0x1074   : > { %v5922_v21 = vmul.f32 -2.7261424e-10, %v13570_v18  ;;  %v6114_v20 = vmul.f32 -1.45660715e-05, %v13570_v18  ;;  %v6159_v31 = vadd.f32 -0.001682827, %v6143_v49  ;;  %v6205_v10 = vmul.f32 %v6189_v41, %v13440_v23 }
0x1075   : > { %v6049_v57 = vmul.f32 %v6033_v35, %v13524_v15  ;;  %7818 = vrcp.f32 %v13573_v48  ;;  %v13586_v37 = vmul.f32 -1.45660715e-05, %v13359_v26  ;;  %v6093_v42 = vadd.f32 -0.016096033, %v6077_v27 }
0x1076   : > { %v6095_v46 = vadd.f32 -0.016096033, %v6079_v50  ;;  %v5938_v11 = vadd.f32 2.7706815e-08, %v5922_v21  ;;  %v6175_v7 = vmul.f32 %v6159_v31, %v13477_v62  ;;  %v6064_v44 = vadd.f32 -0.0029546001, %v6048_v2 }
0x1077   : > { %v6065_v16 = vadd.f32 -0.0029546001, %v6049_v57  ;;  %v6130_v56 = vadd.f32 -0.00021337405, %v6114_v20  ;;  %v13591_v1 = vmul.f32 %v6062_v40, %v13454_v6  ;;  %v6462_v49 = vand.u32 2147483647, %v13573_v48 }
0x1078   : > { %v5954_v35 = vmul.f32 %v5938_v11, %v13570_v18  ;;  %v6191_v5 = vadd.f32 -0.0073733293, %v6175_v7  ;;  %v13595_v13 = vpop.eup %7816  ;;  %v6464_v50 = vand.u32 2147483648, %v13573_v48  ;;  %v13600_v21 = vadd.f32 -0.014264739, %v6205_v10 }
0x1079   : > { %v6081_v27 = vmul.f32 %v6065_v16, %v13524_v15  ;;  %v6146_v2 = vmul.f32 %v6130_v56, %v13570_v18  ;;  %v13603_v23 = vmul.f32 %v13434_v30, %v6093_v42  ;;  %v13606_v40 = vmul.f32 %v13468_v47, %v6095_v46 }
0x107a   : > { %v5970_v41 = vadd.f32 -2.101024e-06, %v5954_v35  ;;  %v6207_v20 = vmul.f32 %v6191_v5, %v13477_v62  ;;  %v13610_v57 = vmul.f32 %v6064_v44, %v13503_v61  ;;  %vm6458_vm13 = vweird.f32 %v13573_v48 }
0x107b   : > { %v7819_v31 = vpop.eup %7818  ;;  %v6162_v15 = vadd.f32 -0.001682827, %v6146_v2  ;;  %7820 = vrcp.f32 %v13600_v21  ;;  %v6364_v47 = vmul.f32 %v13595_v13, %v13561_v38  ;;  %v6097_v46 = vadd.f32 -0.016096033, %v6081_v27 }
0x107c   : > { %v6454_v11 = vmul.f32 %v7819_v31, %v13573_v48  ;;  %v5986_v30 = vmul.f32 %v5970_v41, %v13570_v18  ;;  %v13616_v42 = vadd.f32 -0.014264739, %v6207_v20  ;;  %vm13620_vm15 = vcmp.eq.f32.partialorder %v6462_v49, 8.507059e+37 }
0x107d   : > { %v6465_v62 = vor.u32 1.1754944e-38, %v6464_v50  ;;  %v6178_v7 = vmul.f32 %v6162_v15, %v13570_v18  ;;  %vm6369_vm0 = vweird.f32 %v13595_v13  ;;  %vm6459_vm1 = vweird.f32 %v7819_v31 }
0x107e   : > { %v6455_v44 = vsub.f32 1.0, %v6454_v11  ;;  %v6002_v16 = vadd.f32 -5.6925062e-05, %v5986_v30  ;;  %7822 = vrcp.f32 %v13616_v42  ;;  %v6434_v10 = vand.u32 2147483648, %v13616_v42  ;;  %vm6460_vm4 = vmor %vm6458_vm13, %vm6459_vm1 }
0x107f   : > { %v6194_v56 = vadd.f32 -0.0073733293, %v6178_v7  ;;  %v6404_v35 = vand.u32 2147483648, %v13600_v21  ;;  %vm6368_vm2 = vweird.f32 %v13561_v38  ;;  %v6402_v50 = vand.u32 2147483647, %v13600_v21 }
0x1080   : > { %v6456_v49 = vmul.f32 %v7819_v31, %v6455_v44  ;;  %v6018_v27 = vmul.f32 %v6002_v16, %v13570_v18  ;;  %v6365_v2 = vsub.f32 1.0, %v6364_v47  ;;  %v6241_v20 = vmul.f32 %v13511_v39, %v6097_v46  ;;  %vm6370_vm10 = vmor %vm6368_vm2, %vm6369_vm0 }
0x1081   : > { %v7821_v41 = vpop.eup %7820  ;;  %v6210_v15 = vmul.f32 %v6194_v56, %v13570_v18  ;;  %v6432_v11 = vand.u32 2147483647, %v13616_v42  ;;  %vm6398_vm3 = vweird.f32 %v13600_v21  ;;  %v6372_v44 = vand.u32 2147483647, %v13561_v38 }
0x1082   : > { %v6457_v30 = vadd.f32 %v7819_v31, %v6456_v49  ;;  %v6034_v7 = vadd.f32 -0.00073499064, %v6018_v27  ;;  %v6394_v53 = vmul.f32 %v7821_v41, %v13600_v21  ;;  %v6435_v16 = vor.u32 1.1754944e-38, %v6434_v10 }
0x1083   : > { %v13641_v47 = vadd.f32 -0.014264739, %v6210_v15  ;;  %v6405_v39 = vor.u32 1.1754944e-38, %v6404_v35  ;;  %v6366_v46 = vmul.f32 %v13595_v13, %v6365_v2  ;;  %vm6428_vm5 = vweird.f32 %v13616_v42 }
0x1084   : > { %v7823_v56 = vpop.eup %7822  ;;  %v6461_v45 = vsel %vm6460_vm4, %v7819_v31, %v6457_v30  ;;  %v6050_v60 = vmul.f32 %v6034_v7, %v13570_v18  ;;  %v6395_v49 = vsub.f32 1.0, %v6394_v53  ;;  %vm6399_vm6 = vweird.f32 %v7821_v41 }
0x1085   : > { %vm13646_vm7 = vcmp.eq.f32.partialorder %v6402_v50, 8.507059e+37  ;;  %v6466_v48 = vsel %vm13620_vm15, %v6465_v62, %v6461_v45  ;;  %7824 = vrcp.f32 %v13641_v47  ;;  %v6374_v10 = vand.u32 2147483648, %v13561_v38  ;;  %vm6400_vm12 = vmor %vm6398_vm3, %vm6399_vm6 }
0x1086   : > { %v6121_v35 = vadd.f32 -0.00021337405, %v13586_v37  ;;  %v6467_v31 = vmul.f32 %v6466_v48, %v6241_v20  ;;  %v6066_v2 = vadd.f32 -0.0029546001, %v6050_v60  ;;  %v6424_v15 = vmul.f32 %v7823_v56, %v13616_v42 }
0x1087   : > { %vm13656_vm8 = vcmp.eq.f32.partialorder %v6432_v11, 8.507059e+37  ;;  %vm13660_vm14 = vcmp.eq.f32.partialorder %v6372_v44, 8.507059e+37  ;;  %v6477_v45 = vand.u32 2147483647, %v13641_v47  ;;  %v6479_v5 = vand.u32 2147483648, %v13641_v47 }
0x1088   : > { %v6396_v62 = vmul.f32 %v7821_v41, %v6395_v49  ;;  %v6367_v30 = vadd.f32 %v13595_v13, %v6366_v46  ;;  %v6497_v37 = vadd.f32 1.0, %v6467_v31  ;;  %v6082_v60 = vmul.f32 %v6066_v2, %v13570_v18 }
0x1089   : > { %v6425_v20 = vsub.f32 1.0, %v6424_v15  ;;  %vm6429_vm9 = vweird.f32 %v7823_v56  ;;  %v6375_v44 = vor.u32 1.1754944e-38, %v6374_v10  ;;  %v6137_v48 = vmul.f32 %v6121_v35, %v13359_v26 }
0x108a   : > { %v6397_v11 = vadd.f32 %v7821_v41, %v6396_v62  ;;  %v6371_v7 = vsel %vm6370_vm10, %v13595_v13, %v6367_v30  ;;  %v6513_v49 = vmul.f32 %v6497_v37, %v13536_v58  ;;  %v6098_v28 = vadd.f32 -0.016096033, %v6082_v60  ;;  %vm6430_vm15 = vmor %vm6428_vm5, %vm6429_vm9 }
0x108b   : > { %vm6473_vm11 = vweird.f32 %v13641_v47  ;;  %v6426_v46 = vmul.f32 %v7823_v56, %v6425_v20  ;;  %v6112_v18 = vmul.f32 -1.45660715e-05, %v13503_v61  ;;  %v7825_v38 = vpop.eup %7824  ;;  %v6376_v13 = vsel %vm13660_vm14, %v6375_v44, %v6371_v7 }
0x108c   : > { %v6401_v31 = vsel %vm6400_vm12, %v7821_v41, %v6397_v11  ;;  %v6153_v10 = vadd.f32 -0.001682827, %v6137_v48  ;;  %v6103_v35 = vmul.f32 -1.45660715e-05, %v13333_v4  ;;  %v6469_v58 = vmul.f32 %v7825_v38, %v13641_v47  ;;  %6564 = vmatpush.msra.mxu2 %v6513_v49 }
0x108d   : > { %vm13684_vm13 = vcmp.eq.f32.partialorder %v6477_v45, 8.507059e+37  ;;  %v6480_v15 = vor.u32 1.1754944e-38, %v6479_v5  ;;  %v6427_v21 = vadd.f32 %v7823_v56, %v6426_v46  ;;  %v6406_v41 = vsel %vm13646_vm7, %v6405_v39, %v6401_v31 }
0x108e   : > { %v6377_v50 = vmul.f32 %v6376_v13, %v13577_v22  ;;  %v6169_v62 = vmul.f32 %v6153_v10, %v13359_v26  ;;  %v6128_v30 = vadd.f32 -0.00021337405, %v6112_v18  ;;  %v6470_v37 = vsub.f32 1.0, %v6469_v58 }
0x108f   : > { %v6431_v45 = vsel %vm6430_vm15, %v7823_v56, %v6427_v21  ;;  %v6407_v60 = vmul.f32 %v6406_v41, %v13603_v23  ;;  %v6119_v20 = vadd.f32 -0.00021337405, %v6103_v35  ;;  %v6242_v5 = vmul.f32 %v13559_v12, %v6098_v28 }
0x1090   : > { %v6436_v11 = vsel %vm13656_vm8, %v6435_v16, %v6431_v45  ;;  %v6185_v42 = vadd.f32 -0.0073733293, %v6169_v62  ;;  %v6144_v7 = vmul.f32 %v6128_v30, %v13503_v61  ;;  %v6471_v27 = vmul.f32 %v7825_v38, %v6470_v37 }
0x1091   : > { %vm6474_vm0 = vweird.f32 %v7825_v38  ;;  %v6437_v22 = vmul.f32 %v6436_v11, %v13606_v40  ;;  %v6135_v39 = vmul.f32 %v6119_v20, %v13333_v4  ;;  %v6491_v44 = vadd.f32 1.0, %v6377_v50 }
0x1092   : > { %v6201_v56 = vmul.f32 %v6185_v42, %v13359_v26  ;;  %v6160_v48 = vadd.f32 -0.001682827, %v6144_v7  ;;  %v6110_v23 = vmul.f32 -1.45660715e-05, %v13454_v6  ;;  %v6472_v49 = vadd.f32 %v7825_v38, %v6471_v27  ;;  %vm6475_vm1 = vmor %vm6473_vm11, %vm6474_vm0 }
0x1093   : > { %v6495_v28 = vadd.f32 1.0, %v6437_v22  ;;  %v6493_v12 = vadd.f32 1.0, %v6407_v60  ;;  %v6151_v53 = vadd.f32 -0.001682827, %v6135_v39  ;;  %v6101_v18 = vmul.f32 -1.45660715e-05, %v13314_v14 }
0x1094   : > { %v13706_v16 = vadd.f32 -0.014264739, %v6201_v56  ;;  %v6176_v46 = vmul.f32 %v6160_v48, %v13503_v61  ;;  %v6126_v40 = vadd.f32 -0.00021337405, %v6110_v23  ;;  %v6476_v31 = vsel %vm6475_vm1, %v7825_v38, %v6472_v49 }
0x1095   : > { %v6511_v26 = vmul.f32 %v6495_v28, %v13509_v9  ;;  %v6167_v13 = vmul.f32 %v6151_v53, %v13333_v4  ;;  %v6099_v10 = vmul.f32 -1.45660715e-05, %v13298_v29  ;;  %v6094_v35 = vadd.f32 -0.016096033, %v13591_v1 }
0x1096   : > { %v5842_v58 = vmul.f32 0.5, %v13547_v34  ;;  %v6481_v47 = vsel %vm13684_vm13, %v6480_v15, %v6476_v31  ;;  %7826 = vrcp.f32 %v13706_v16  ;;  %v6509_v41 = vmul.f32 %v6493_v12, %v13494_v33 }
0x1097   : > { %v6482_v21 = vmul.f32 %v6481_v47, %v6242_v5  ;;  %6565 = vmatpush.msra.mxu2 %v6511_v26  ;;  %v6192_v38 = vadd.f32 -0.0073733293, %v6176_v46  ;;  %v6183_v50 = vadd.f32 -0.0073733293, %v6167_v13  ;;  %v6096_v9 = vadd.f32 -0.016096033, %v13610_v57 }
0x1098   : > { %v6142_v62 = vmul.f32 %v6126_v40, %v13454_v6  ;;  %v6117_v30 = vadd.f32 -0.00021337405, %v6101_v18  ;;  %v6115_v37 = vadd.f32 -0.00021337405, %v6099_v10  ;;  %v6507_v34 = vmul.f32 %v6491_v44, %v13471_v3 }
0x1099   : > { %v6498_v1 = vadd.f32 1.0, %v6482_v21  ;;  %6566 = vmatpush.msra.mxu2 %v6509_v41  ;;  %v6208_v2 = vmul.f32 %v6192_v38, %v13503_v61  ;;  %v6199_v15 = vmul.f32 %v6183_v50, %v13333_v4  ;;  %v6342_v45 = vand.u32 2147483647, %v13706_v16 }
0x109a   : > { %v6158_v60 = vadd.f32 -0.001682827, %v6142_v62  ;;  %v6133_v33 = vmul.f32 %v6117_v30, %v13314_v14  ;;  %v6108_v20 = vmul.f32 -1.45660715e-05, %v13419_v0  ;;  %v6131_v42 = vmul.f32 %v6115_v37, %v13298_v29 }
0x109b   : > { %v6514_v57 = vmul.f32 %v6498_v1, %v5842_v58  ;;  %6567 = vmatpush.msra.mxu2 %v6507_v34  ;;  %v13727_v5 = vadd.f32 -0.014264739, %v6208_v2  ;;  %v13729_v11 = vadd.f32 -0.014264739, %v6199_v15  ;;  %v13734_v61 = vmul.f32 %v13406_v51, %v13581_v8 }
0x109c   : > { %v7827_v3 = vpop.eup %7826  ;;  %v6174_v4 = vmul.f32 %v6158_v60, %v13454_v6  ;;  %v6149_v7 = vadd.f32 -0.001682827, %v6133_v33  ;;  %v6124_v27 = vadd.f32 -0.00021337405, %v6108_v20  ;;  %v13738_v22 = vmul.f32 %v13442_v19, %v6094_v35 }
0x109d   : > { %v13741_v39 = vmul.f32 %v13488_v25, %v6096_v9  ;;  %6593 = vmatpush.msra.mxu3 %v6514_v57  ;;  %v6334_v44 = vmul.f32 %v7827_v3, %v13706_v16  ;;  %7828 = vrcp.f32 %v13727_v5  ;;  %vm6338_vm2 = vweird.f32 %v13706_v16 }
0x109e   : > { %v6344_v51 = vand.u32 2147483648, %v13706_v16  ;;  %7830 = vrcp.f32 %v13729_v11  ;;  %v6104_v8 = vmul.f32 -1.45660715e-05, %v13365_v43  ;;  %vm13749_vm3 = vcmp.eq.f32.partialorder %v6342_v45, 8.507059e+37 }
0x109f   : > { %v6335_v56 = vsub.f32 1.0, %v6334_v44  ;;  %v6190_v25 = vadd.f32 -0.0073733293, %v6174_v4  ;;  %v6147_v48 = vadd.f32 -0.001682827, %v6131_v42  ;;  %vm6339_vm4 = vweird.f32 %v7827_v3 }
0x10a0   : > { %v6447_v23 = vand.u32 2147483647, %v13727_v5  ;;  %v6165_v49 = vmul.f32 %v6149_v7, %v13314_v14  ;;  %v6140_v28 = vmul.f32 %v6124_v27, %v13419_v0  ;;  %v6449_v53 = vand.u32 2147483648, %v13727_v5  ;;  %vm6340_vm7 = vmor %vm6338_vm2, %vm6339_vm4 }
0x10a1   : > { %v6336_v12 = vmul.f32 %v7827_v3, %v6335_v56  ;;  %v6312_v46 = vand.u32 2147483647, %v13729_v11  ;;  %v6206_v40 = vmul.f32 %v6190_v25, %v13454_v6  ;;  %v6345_v18 = vor.u32 1.1754944e-38, %v6344_v51 }
0x10a2   : > { %v6314_v31 = vand.u32 2147483648, %v13729_v11  ;;  %v6181_v26 = vadd.f32 -0.0073733293, %v6165_v49  ;;  %v6156_v13 = vadd.f32 -0.001682827, %v6140_v28  ;;  %vm6443_vm5 = vweird.f32 %v13727_v5 }
0x10a3   : > { %v7829_v10 = vpop.eup %7828  ;;  %v6337_v35 = vadd.f32 %v7827_v3, %v6336_v12  ;;  %vm6308_vm6 = vweird.f32 %v13729_v11  ;;  %v13762_v58 = vadd.f32 -0.014264739, %v6206_v40  ;;  %vm13768_vm8 = vcmp.eq.f32.partialorder %v6447_v23, 8.507059e+37 }
0x10a4   : > { %v7831_v47 = vpop.eup %7830  ;;  %v6439_v6 = vmul.f32 %v7829_v10, %v13727_v5  ;;  %v6197_v41 = vmul.f32 %v6181_v26, %v13314_v14  ;;  %v6172_v38 = vmul.f32 %v6156_v13, %v13419_v0  ;;  %v6163_v50 = vmul.f32 %v6147_v48, %v13298_v29 }
0x10a5   : > { %v6341_v9 = vsel %vm6340_vm7, %v7827_v3, %v6337_v35  ;;  %v6450_v62 = vor.u32 1.1754944e-38, %v6449_v53  ;;  %v6304_v30 = vmul.f32 %v7831_v47, %v13729_v11  ;;  %7832 = vrcp.f32 %v13762_v58 }
0x10a6   : > { %v6346_v16 = vsel %vm13749_vm3, %v6345_v18, %v6341_v9  ;;  %v6440_v37 = vsub.f32 1.0, %v6439_v6  ;;  %vm13779_vm14 = vcmp.eq.f32.partialorder %v6312_v46, 8.507059e+37  ;;  %v6315_v34 = vor.u32 1.1754944e-38, %v6314_v31 }
0x10a7   : > { %v6347_v14 = vmul.f32 %v6346_v16, %v13517_v59  ;;  %vm6444_vm9 = vweird.f32 %v7829_v10  ;;  %v6305_v2 = vsub.f32 1.0, %v6304_v30  ;;  %v13784_v15 = vadd.f32 -0.014264739, %v6197_v41 }
0x10a8   : > { %v6441_v45 = vmul.f32 %v7829_v10, %v6440_v37  ;;  %vm6309_vm10 = vweird.f32 %v7831_v47  ;;  %v6188_v60 = vadd.f32 -0.0073733293, %v6172_v38  ;;  %v6179_v33 = vadd.f32 -0.0073733293, %v6163_v50  ;;  %vm6445_vm11 = vmor %vm6443_vm5, %vm6444_vm9 }
0x10a9   : > { %v6489_v20 = vadd.f32 1.0, %v6347_v14  ;;  %v6306_v57 = vmul.f32 %v7831_v47, %v6305_v2  ;;  %v6417_v42 = vand.u32 2147483647, %v13762_v58  ;;  %7834 = vrcp.f32 %v13784_v15  ;;  %vm6310_vm12 = vmor %vm6308_vm6, %vm6309_vm10  ;;  %v14595_v14 = vld [vmem:[#allocation11_spill] sm:$0xff] }
0x10aa   : > { %v6442_v3 = vadd.f32 %v7829_v10, %v6441_v45  ;;  %v6106_v4 = vmul.f32 -1.45660715e-05, %v13383_v63  ;;  %v6120_v7 = vadd.f32 -0.00021337405, %v6104_v8  ;;  %v6102_v59 = vmul.f32 -1.45660715e-05, %v13354_v54 }
0x10ab   : > { %v7833_v27 = vpop.eup %7832  ;;  %v6505_v44 = vmul.f32 %v6489_v20, %v13432_v24  ;;  %v6307_v51 = vadd.f32 %v7831_v47, %v6306_v57  ;;  %v6204_v56 = vmul.f32 %v6188_v60, %v13419_v0  ;;  %v6195_v19 = vmul.f32 %v6179_v33, %v13298_v29 }
0x10ac   : > { %v6446_v25 = vsel %vm6445_vm11, %v7829_v10, %v6442_v3  ;;  %v6409_v8 = vmul.f32 %v7833_v27, %v13762_v58  ;;  %vm6413_vm13 = vweird.f32 %v13762_v58  ;;  %v6419_v24 = vand.u32 2147483648, %v13762_v58 }
0x10ad   : > { %6568 = vmatpush.msra.mxu2 %v6505_v44  ;;  %v6451_v5 = vsel %vm13768_vm8, %v6450_v62, %v6446_v25  ;;  %v6311_v48 = vsel %vm6310_vm12, %v7831_v47, %v6307_v51  ;;  %vm13804_vm15 = vcmp.eq.f32.partialorder %v6417_v42, 8.507059e+37  ;;  %v13808_v29 = vadd.f32 -0.014264739, %v6204_v56  ;;  %v14587_v44 = vld [vmem:[#allocation25_spill] sm:$0xff] }
0x10ae   : > { %v6452_v11 = vmul.f32 %v6451_v5, %v13741_v39  ;;  %v6316_v23 = vsel %vm13779_vm14, %v6315_v34, %v6311_v48  ;;  %v6410_v49 = vsub.f32 1.0, %v6409_v8  ;;  %v13813_v28 = vadd.f32 -0.014264739, %v6195_v19 }
0x10af   : > { %v7835_v12 = vpop.eup %7834  ;;  %v6317_v53 = vmul.f32 %v6316_v23, %v13491_v32  ;;  %v6282_v46 = vand.u32 2147483647, %v13784_v15  ;;  %v6284_v40 = vand.u32 2147483648, %v13784_v15  ;;  %7836 = vrcp.f32 %v13808_v29 }
0x10b0   : > { %v6496_v18 = vadd.f32 1.0, %v6452_v11  ;;  %v6411_v31 = vmul.f32 %v7833_v27, %v6410_v49  ;;  %vm6414_vm0 = vweird.f32 %v7833_v27  ;;  %v6274_v39 = vmul.f32 %v7835_v12, %v13784_v15 }
0x10b1   : > { %v6487_v26 = vadd.f32 1.0, %v6317_v53  ;;  %v6420_v13 = vor.u32 1.1754944e-38, %v6419_v24  ;;  %vm6278_vm1 = vweird.f32 %v13784_v15  ;;  %7838 = vrcp.f32 %v13813_v28  ;;  %vm6415_vm2 = vmor %vm6413_vm13, %vm6414_vm0  ;;  %v14588_v53 = vld [vmem:[#allocation3_spill] sm:$0xff] }
0x10b2   : > { %v6512_v10 = vmul.f32 %v6496_v18, %v13520_v52  ;;  %v6412_v32 = vadd.f32 %v7833_v27, %v6411_v31  ;;  %v6275_v35 = vsub.f32 1.0, %v6274_v39  ;;  %v6387_v47 = vand.u32 2147483647, %v13808_v29 }
0x10b3   : > { %v6503_v6 = vmul.f32 %v6487_v26, %v13413_v17  ;;  %vm6279_vm3 = vweird.f32 %v7835_v12  ;;  %vm13827_vm4 = vcmp.eq.f32.partialorder %v6282_v46, 8.507059e+37  ;;  %v6285_v41 = vor.u32 1.1754944e-38, %v6284_v40 }
0x10b4   : > { %6594 = vmatpush.msra.mxu3 %v6512_v10  ;;  %v6416_v38 = vsel %vm6415_vm2, %v7833_v27, %v6412_v32  ;;  %v6276_v50 = vmul.f32 %v7835_v12, %v6275_v35  ;;  %vm6383_vm5 = vweird.f32 %v13808_v29  ;;  %v6122_v52 = vadd.f32 -0.00021337405, %v6106_v4  ;;  %vm6280_vm8 = vmor %vm6278_vm1, %vm6279_vm3 }
0x10b5   : > { %v6136_v9 = vmul.f32 %v6120_v7, %v13365_v43  ;;  %v7837_v62 = vpop.eup %7836  ;;  %6569 = vmatpush.msra.mxu2 %v6503_v6  ;;  %v6421_v17 = vsel %vm13804_vm15, %v6420_v13, %v6416_v38  ;;  %v6389_v58 = vand.u32 2147483648, %v13808_v29  ;;  %v6252_v30 = vand.u32 2147483647, %v13813_v28  ;;  %v14590_v38 = vld [vmem:[#allocation6_spill] sm:$0xff] }
0x10b6   : > { %v6118_v16 = vadd.f32 -0.00021337405, %v6102_v59  ;;  %v6422_v37 = vmul.f32 %v6421_v17, %v13738_v22  ;;  %v6277_v1 = vadd.f32 %v7835_v12, %v6276_v50  ;;  %v6379_v34 = vmul.f32 %v7837_v62, %v13808_v29  ;;  %v14592_v17 = vld [vmem:[#allocation33_spill] sm:$0xff] }
0x10b7   : > { %vm13839_vm6 = vcmp.eq.f32.partialorder %v6387_v47, 8.507059e+37  ;;  %vm6248_vm7 = vweird.f32 %v13813_v28  ;;  %v6254_v2 = vand.u32 2147483648, %v13813_v28  ;;  %v7839_v45 = vpop.eup %7838  ;;  %v6138_v60 = vmul.f32 %v6122_v52, %v13383_v63 }
0x10b8   : > { %v6152_v33 = vadd.f32 -0.001682827, %v6136_v9  ;;  %v6134_v22 = vmul.f32 %v6118_v16, %v13354_v54  ;;  %v6100_v20 = vmul.f32 -1.45660715e-05, %v13321_v36  ;;  %v6494_v57 = vadd.f32 1.0, %v6422_v37  ;;  %v14591_v9 = vld [vmem:[#allocation13_spill] sm:$0xff] }
0x10b9   : > { %v6281_v42 = vsel %vm6280_vm8, %v7835_v12, %v6277_v1  ;;  %v6380_v3 = vsub.f32 1.0, %v6379_v34  ;;  %v6244_v4 = vmul.f32 %v7839_v45, %v13813_v28  ;;  %vm6384_vm14 = vweird.f32 %v7837_v62  ;;  %v14594_v1 = vld [vmem:[#allocation18_spill] sm:$0xff] }
0x10ba   : > { %v6286_v7 = vsel %vm13827_vm4, %v6285_v41, %v6281_v42  ;;  %v6154_v59 = vadd.f32 -0.001682827, %v6138_v60  ;;  %v6168_v15 = vmul.f32 %v6152_v33, %v13365_v43  ;;  %v6510_v27 = vmul.f32 %v6494_v57, %v13499_v55  ;;  %vm6385_vm10 = vmor %vm6383_vm5, %vm6384_vm14  ;;  %v14589_v41 = vld [vmem:[#allocation17_spill] sm:$0xff] }
0x10bb   : > { %v6287_v51 = vmul.f32 %v6286_v7, %v14587_v44  ;;  %v6381_v56 = vmul.f32 %v7837_v62, %v6380_v3  ;;  %v6245_v19 = vsub.f32 1.0, %v6244_v4  ;;  %vm6249_vm9 = vweird.f32 %v7839_v45 }
0x10bc   : > { %v6170_v25 = vmul.f32 %v6154_v59, %v13383_v63  ;;  %v6184_v8 = vadd.f32 -0.0073733293, %v6168_v15  ;;  %v6150_v24 = vadd.f32 -0.001682827, %v6134_v22  ;;  %6595 = vmatpush.msra.mxu3 %v6510_v27  ;;  %v6116_v11 = vadd.f32 -0.00021337405, %v6100_v20  ;;  %vm6250_vm11 = vmor %vm6248_vm7, %vm6249_vm9 }
0x10bd   : > { %v6485_v5 = vadd.f32 1.0, %v6287_v51  ;;  %v6382_v48 = vadd.f32 %v7837_v62, %v6381_v56  ;;  %v6246_v0 = vmul.f32 %v7839_v45, %v6245_v19  ;;  %v6390_v23 = vor.u32 1.1754944e-38, %v6389_v58  ;;  %v13892_v20 = vld [vmem:[%s13995_s15] sm:$0xff] }
0x10be   : > { %v6186_v55 = vadd.f32 -0.0073733293, %v6170_v25  ;;  %v6200_v49 = vmul.f32 %v6184_v8, %v13365_v43  ;;  %v6166_v12 = vmul.f32 %v6150_v24, %v13354_v54  ;;  %v6132_v31 = vmul.f32 %v6116_v11, %v13321_v36 }
0x10bf   : > { %v6501_v46 = vmul.f32 %v6485_v5, %v14588_v53  ;;  %v6386_v40 = vsel %vm6385_vm10, %v7837_v62, %v6382_v48  ;;  %v6247_v18 = vadd.f32 %v7839_v45, %v6246_v0  ;;  %v6255_v29 = vor.u32 1.1754944e-38, %v6254_v2 }
0x10c0   : > { %v6391_v39 = vsel %vm13839_vm6, %v6390_v23, %v6386_v40  ;;  %v6202_v26 = vmul.f32 %v6186_v55, %v13383_v63  ;;  %v13871_v13 = vadd.f32 -0.014264739, %v6200_v49  ;;  %vm6253_vm12 = vcmp.eq.f32.partialorder %v6252_v30, 8.507059e+37  ;;  %v13915_v49 = vld [vmem:[%s13995_s15 + $0x8] sm:$0xff] }
0x10c1   : > { %6570 = vmatpush.msra.mxu2 %v6501_v46  ;;  %v6392_v10 = vmul.f32 %v6391_v39, %v13734_v61  ;;  %v6251_v32 = vsel %vm6250_vm11, %v7839_v45, %v6247_v18  ;;  %v6182_v35 = vadd.f32 -0.0073733293, %v6166_v12  ;;  %v6148_v21 = vadd.f32 -0.001682827, %v6132_v31  ;;  %v14593_v61 = vld [vmem:[#allocation27_spill] sm:$0xff]  ;;  %v14596_v46 = vld [vmem:[#allocation26_spill] sm:$0xff] }
0x10c2   : > { %v6256_v47 = vsel %vm6253_vm12, %v6255_v29, %v6251_v32  ;;  %v13874_v6 = vadd.f32 -0.014264739, %v6202_v26  ;;  %7840 = vrcp.f32 %v13871_v13  ;;  %v6022_v28 = vadd.f32 -0.00073499064, %v14589_v41  ;;  %v14597_v26 = vld [vmem:[#allocation5_spill] sm:$0xff] }
0x10c3   : > { %v5836_v50 = vmul.f32 0.5, %v14590_v38  ;;  %v6492_v52 = vadd.f32 1.0, %v6392_v10  ;;  %v6257_v62 = vmul.f32 %v6256_v47, %v14591_v9  ;;  %v6056_v58 = vadd.f32 -0.0029546001, %v14592_v17 }
0x10c4   : > { %7842 = vrcp.f32 %v13874_v6  ;;  %v5827_v30 = vmul.f32 0.5, %v14593_v61  ;;  %v6036_v34 = vmul.f32 %v14594_v1, %v13321_v36  ;;  %v6058_v2 = vadd.f32 -0.0029546001, %v14595_v14  ;;  %v14600_v14 = vld [vmem:[#allocation14_spill] sm:$0xff] }
0x10c5   : > { %v6508_v16 = vmul.f32 %v6492_v52, %v5836_v50  ;;  %v6483_v37 = vadd.f32 1.0, %v6257_v62  ;;  %v6198_v45 = vmul.f32 %v6182_v35, %v13354_v54  ;;  %v6164_v60 = vmul.f32 %v6148_v21, %v13321_v36  ;;  %v14598_v62 = vld [vmem:[#allocation24_spill] sm:$0xff] }
0x10c6   : > { %v6038_v33 = vmul.f32 %v6022_v28, %v13354_v54  ;;  %vm6543_vm13 = vcmask 523264   ;;  %v6072_v42 = vmul.f32 %v6056_v58, %v13365_v43  ;;  %v6052_v15 = vadd.f32 -0.0029546001, %v6036_v34  ;;  %v14599_v58 = vld [vmem:[#allocation4_spill] sm:$0xff] }
0x10c7   : > { %6596 = vmatpush.msra.mxu3 %v6508_v16  ;;  %v6499_v22 = vmul.f32 %v6483_v37, %v5827_v30  ;;  %v13895_v3 = vadd.f32 -0.014264739, %v6198_v45  ;;  %v6180_v4 = vadd.f32 -0.0073733293, %v6164_v60  ;;  %v6074_v27 = vmul.f32 %v6058_v2, %v13383_v63 }
0x10c8   : > { %v7841_v57 = vpop.eup %7840  ;;  %v6054_v44 = vadd.f32 -0.0029546001, %v6038_v33  ;;  %v6088_v19 = vadd.f32 -0.016096033, %v6072_v42  ;;  %v6327_v25 = vand.u32 2147483647, %v13871_v13  ;;  %vm6323_vm0 = vweird.f32 %v13871_v13 }
0x10c9   : > { %6571 = vmatpush.msra.mxu2 %v6499_v22  ;;  %v6319_v7 = vmul.f32 %v7841_v57, %v13871_v13  ;;  %7844 = vrcp.f32 %v13895_v3  ;;  %v6196_v43 = vmul.f32 %v6180_v4, %v13321_v36  ;;  %v6329_v8 = vand.u32 2147483648, %v13871_v13 }
0x10ca   : > { %v7843_v59 = vpop.eup %7842  ;;  %7234 = vmatmul.msk.f32.vlgmr.msra.gmra.mxu2 %vm6543_vm13, %v13892_v20  ;;  %vm6324_vm15 = vweird.f32 %v7841_v57  ;;  %v6090_v48 = vadd.f32 -0.016096033, %v6074_v27  ;;  %v6357_v0 = vand.u32 2147483647, %v13874_v6  ;;  %v6359_v11 = vand.u32 2147483648, %v13874_v6  ;;  %v14601_v27 = vld [vmem:[#allocation44_spill] sm:$0xff] }
0x10cb   : > { %v6349_v51 = vmul.f32 %v7843_v59, %v13874_v6  ;;  %v6320_v56 = vsub.f32 1.0, %v6319_v7  ;;  %v13906_v63 = vadd.f32 -0.014264739, %v6196_v43  ;;  %vm6354_vm1 = vweird.f32 %v7843_v59  ;;  %vm6325_vm3 = vmor %vm6323_vm0, %vm6324_vm15  ;;  %v14602_v43 = vld [vmem:[#allocation34_spill] sm:$0xff] }
0x10cc   : > { %v6070_v53 = vmul.f32 %v6054_v44, %v13354_v54  ;;  %v6232_v40 = vmul.f32 %v14596_v46, %v6088_v19  ;;  %vm6353_vm2 = vweird.f32 %v13874_v6  ;;  %v6330_v18 = vor.u32 1.1754944e-38, %v6329_v8  ;;  %v14605_v46 = vld [vmem:[#allocation37_spill] sm:$0xff] }
0x10cd   : > { %v6350_v24 = vsub.f32 1.0, %v6349_v51  ;;  %v6321_v5 = vmul.f32 %v7841_v57, %v6320_v56  ;;  %7846 = vrcp.f32 %v13906_v63  ;;  %vm6328_vm4 = vcmp.eq.f32.partialorder %v6327_v25, 8.507059e+37  ;;  %vm6355_vm5 = vmor %vm6353_vm2, %vm6354_vm1 }
0x10ce   : > { %v6234_v13 = vmul.f32 %v14597_v26, %v6090_v48  ;;  %v6360_v10 = vor.u32 1.1754944e-38, %v6359_v11  ;;  %vm6358_vm6 = vcmp.eq.f32.partialorder %v6357_v0, 8.507059e+37  ;;  %v6068_v6 = vmul.f32 %v6052_v15, %v13321_v36  ;;  %v6517_v36 = vld [vmem:[%s13995_s15 + $0x10] sm:$0xff] }
0x10cf   : > { %v6351_v23 = vmul.f32 %v7843_v59, %v6350_v24  ;;  %v6322_v55 = vadd.f32 %v7841_v57, %v6321_v5  ;;  %v7845_v12 = vpop.eup %7844  ;;  %v6086_v21 = vadd.f32 -0.016096033, %v6070_v53  ;;  %v6299_v28 = vand.u32 2147483648, %v13895_v3  ;;  %v6518_v5 = vld [vmem:[%s13995_s15 + $0x18] sm:$0xff] }
0x10d0   : > { %v6289_v29 = vmul.f32 %v7845_v12, %v13895_v3  ;;  %vm6294_vm7 = vweird.f32 %v7845_v12  ;;  %v6297_v9 = vand.u32 2147483647, %v13895_v3  ;;  %v5832_v17 = vmul.f32 0.5, %v14598_v62  ;;  %v14610_v62 = vld [vmem:[#allocation42_spill] sm:$0xff] }
0x10d1   : > { %v6352_v31 = vadd.f32 %v7843_v59, %v6351_v23  ;;  %v6326_v39 = vsel %vm6325_vm3, %v7841_v57, %v6322_v55  ;;  %v5834_v61 = vmul.f32 0.5, %v14599_v58  ;;  %vm6293_vm8 = vweird.f32 %v13895_v3  ;;  %v6526_v55 = vpop.permute.xlu2 %6525 }
0x10d2   : > { %v6331_v32 = vsel %vm6328_vm4, %v6330_v18, %v6326_v39  ;;  %7235 = vmatmul.msk.f32.gmra.mxu2 %vm6543_vm13, %v13915_v49  ;;  %v6290_v47 = vsub.f32 1.0, %v6289_v29  ;;  %v6084_v34 = vadd.f32 -0.016096033, %v6068_v6  ;;  %v6230_v2 = vmul.f32 %v14600_v14, %v6086_v21  ;;  %vm6295_vm14 = vmor %vm6293_vm8, %vm6294_vm7  ;;  %v14608_v6 = vld [vmem:[#allocation39_spill] sm:$0xff] }
0x10d3   : > { %v6356_v54 = vsel %vm6355_vm5, %v7843_v59, %v6352_v31  ;;  %v6332_v35 = vmul.f32 %v6331_v32, %v6232_v40  ;;  %v7847_v38 = vpop.eup %7846  ;;  %v6300_v45 = vor.u32 1.1754944e-38, %v6299_v28  ;;  %vm6298_vm9 = vcmp.eq.f32.partialorder %v6297_v9, 8.507059e+37  ;;  %v14606_v31 = vld [vmem:[#allocation29_spill] sm:$0xff] }
0x10d4   : > { %v6361_v41 = vsel %vm6358_vm6, %v6360_v10, %v6356_v54  ;;  %v6291_v52 = vmul.f32 %v7845_v12, %v6290_v47  ;;  %v6259_v30 = vmul.f32 %v7847_v38, %v13906_v63  ;;  %v6269_v57 = vand.u32 2147483648, %v13906_v63  ;;  %v14607_v10 = vld [vmem:[#allocation43_spill] sm:$0xff] }
0x10d5   : > { %v6362_v50 = vmul.f32 %v6361_v41, %v6234_v13  ;;  %v6488_v37 = vadd.f32 1.0, %v6332_v35  ;;  %vm6264_vm10 = vweird.f32 %v7847_v38  ;;  %v6267_v3 = vand.u32 2147483647, %v13906_v63 }
0x10d6   : > { %v6292_v1 = vadd.f32 %v7845_v12, %v6291_v52  ;;  %v6260_v60 = vsub.f32 1.0, %v6259_v30  ;;  %vm6263_vm11 = vweird.f32 %v13906_v63  ;;  %v5830_v44 = vmul.f32 0.5, %v14601_v27  ;;  %v14603_v63 = vld [vmem:[#allocation36_spill] sm:$0xff]  ;;  %v14611_v30 = vld [vmem:[#allocation38_spill] sm:$0xff] }
0x10d7   : > { %v6490_v16 = vadd.f32 1.0, %v6362_v50  ;;  %v6504_v7 = vmul.f32 %v6488_v37, %v5832_v17  ;;  %vm6265_vm12 = vmor %vm6263_vm11, %vm6264_vm10  ;;  %v6270_v56 = vor.u32 1.1754944e-38, %v6269_v57  ;;  %v6228_v19 = vmul.f32 %v14602_v43, %v6084_v34 }
0x10d8   : > { %v6296_v22 = vsel %vm6295_vm14, %v7845_v12, %v6292_v1  ;;  %v6261_v4 = vmul.f32 %v7847_v38, %v6260_v60  ;;  %vm6268_vm15 = vcmp.eq.f32.partialorder %v6267_v3, 8.507059e+37  ;;  %v5828_v0 = vmul.f32 0.5, %v14603_v63 }
0x10d9   : > { %v6506_v33 = vmul.f32 %v6490_v16, %v5834_v61  ;;  %v6301_v42 = vsel %vm6298_vm9, %v6300_v45, %v6296_v22  ;;  %v6536_v29 = vpop.permute.xlu2 %6535 }
0x10da   : > { %7236 = vmatmul.msk.f32.gmra.mxu2 %vm6543_vm13, %v6517_v36  ;;  %v6302_v59 = vmul.f32 %v6301_v42, %v6230_v2  ;;  %v6262_v15 = vadd.f32 %v7847_v38, %v6261_v4 }
0x10db   : > { %6597 = vmatpush.msra.mxu3 %v6506_v33 }
0x10dc   : > { %v6486_v51 = vadd.f32 1.0, %v6302_v59  ;;  %v6266_v25 = vsel %vm6265_vm12, %v7847_v38, %v6262_v15  ;;  %v14609_v38 = vld [vmem:[#allocation16_spill] sm:$0xff] }
0x10dd   : > { %6598 = vmatpush.msra.mxu3 %v6504_v7  ;;  %v6271_v24 = vsel %vm6268_vm15, %v6270_v56, %v6266_v25 }
0x10de   : > { %v6502_v8 = vmul.f32 %v6486_v51, %v5830_v44  ;;  %v6272_v48 = vmul.f32 %v6271_v24, %v6228_v19 }
0x10e0   : > { %6599 = vmatpush.msra.mxu3 %v6502_v8  ;;  %v6484_v11 = vadd.f32 1.0, %v6272_v48 }
0x10e2   : > { %7237 = vmatmul.msk.f32.gmra.mxu2 %vm6543_vm13, %v6518_v5  ;;  %v6500_v23 = vmul.f32 %v6484_v11, %v5828_v0 }
0x10e4   : > { %6600 = vmatpush.msra.mxu3 %v6500_v23 }
0x10e5   : > { %7238 = vmatmul.msk.f32.vlgmr.msra.gmra.mxu3 %vm6543_vm13, %v13892_v20 }
0x10ed   : > { %7239 = vmatmul.msk.f32.gmra.mxu3 %vm6543_vm13, %v13915_v49  ;;  %v6531_v49 = vpop.permute.xlu1 %6530 }
0x10f5   : > { %7240 = vmatmul.msk.f32.gmra.mxu3 %vm6543_vm13, %v6517_v36  ;;  %v6541_v54 = vpop.permute.xlu1 %6540  ;;  %v14612_v36 = vld [vmem:[#allocation22_spill] sm:$0xff] }
0x10fd   : > { %7241 = vmatmul.msk.f32.gmra.mxu3 %vm6543_vm13, %v6518_v5 }
0x114d   : > { %v6573_v12 = vpop.f32.mrf.mxu2 }
0x114e   : > { %v6574_v53 = vadd.f32 %v6573_v12, %v6526_v55 }
0x1150   : > { %v6614_v20 = vadd.f32 %v6574_v53, %v14605_v46 }
0x1152   : > { %6622 = vst [vmem:[%s13959_s21] sm:$0xff] %v6614_v20 }
0x1155   : > { %v6576_v40 = vpop.f32.mrf.mxu2 }
0x1156   : > { %v6577_v18 = vadd.f32 %v6576_v40, %v6531_v49 }
0x1158   : > { %v6616_v39 = vadd.f32 %v6577_v18, %v14606_v31 }
0x115a   : > { %6624 = vst [vmem:[%s13959_s21 + $0x10] sm:$0xff] %v6616_v39 }
0x115d   : > { %v6579_v26 = vpop.f32.mrf.mxu2 }
0x115e   : > { %v6580_v13 = vadd.f32 %v6579_v26, %v6536_v29 }
0x1160   : > { %v6618_v32 = vadd.f32 %v6580_v13, %v14607_v10 }
0x1162   : > { %6626 = vst [vmem:[%s13959_s21 + $0x20] sm:$0xff] %v6618_v32 }
0x1165   : > { %v6582_v35 = vpop.f32.mrf.mxu2 }
0x1166   : > { %v6583_v47 = vadd.f32 %v6582_v35, %v6541_v54 }
0x1168   : > { %v6620_v21 = vadd.f32 %v6583_v47, %v14608_v6  ;;  %v6602_v41 = vpop.f32.mrf.mxu3 }
0x1169   : > { %v6603_v28 = vadd.f32 %v6602_v41, %v6526_v55 }
0x116a   : > { %6628 = vst [vmem:[%s13959_s21 + $0x30] sm:$0xff] %v6620_v21 }
0x116b   : > { %v6615_v50 = vadd.f32 %v6603_v28, %v14609_v38 }
0x116d   : > { %6623 = vst [vmem:[%s13959_s21 + $0x8] sm:$0xff] %v6615_v50 }
0x1170   : > { %v6605_v52 = vpop.f32.mrf.mxu3 }
0x1171   : > { %v6606_v9 = vadd.f32 %v6605_v52, %v6531_v49 }
0x1173   : > { %v6617_v17 = vadd.f32 %v6606_v9, %v14610_v62 }
0x1175   : > { %6625 = vst [vmem:[%s13959_s21 + $0x18] sm:$0xff] %v6617_v17 }
0x1178   : > { %v6608_v58 = vpop.f32.mrf.mxu3 }
0x1179   : > { %v6609_v61 = vadd.f32 %v6608_v58, %v6536_v29 }
0x117b   : > { %v6619_v16 = vadd.f32 %v6609_v61, %v14611_v30 }
0x117d   : > { %6627 = vst [vmem:[%s13959_s21 + $0x28] sm:$0xff] %v6619_v16 }
0x1180   : > { %v6611_v37 = vpop.f32.mrf.mxu3 }
0x1181   : > { %v6612_v1 = vadd.f32 %v6611_v37, %v6541_v54 }
0x1183   : > { %v6621_v34 = vadd.f32 %v6612_v1, %v14612_v36 }
0x1185   : > { %6629 = vst [vmem:[%s13959_s21 + $0x38] sm:$0xff] %v6621_v34 }
0x1186 PF: > { %s27_s24 = sadd.s32 1, %s7862_s24  }
0x1187   : > { %p24_p4 = scmp.ge.s32.totalorder %s27_s24, 4  }
0x1189   :  { %26 = sbr.rel (!%p24_p4) target bundleno = 3 (0x3), region = 127 }

</bundles_post_ra>
